<compile_context>
chip_gen: v7x
topology: tpu7x:2x2x1
jax: 0.10.0
libtpu: 0.0.40
codegen_flags: <defaults>
</compile_context>

<pallas_src>
from functools import partial

import jax
import jax.numpy as jnp
from jax import lax
from jax.experimental import pallas as pl
from jax.experimental.pallas import tpu as pltpu


def residual_block_kernel(x_ref, w1_ref, b1_ref, w2_ref, b2_ref, o_ref,
                          xp_ref, *, H, W, C):
    # x_ref : (1, H*W, C) f32   input slab (channels on lanes)
    # w*_ref: (9, C, C)   bf16  conv weights; tap index = ky*3 + kx, rows = cin
    # b*_ref: (1, C)      f32   biases
    # o_ref : (1, H*W, C) f32   output slab
    # xp_ref: (H+2, W+2, C) bf16  shared zero-padded operand scratch

    # ---- zero ONLY the 1-pixel border, once per grid step ------------------
    zero_row = jnp.zeros((1, W + 2, C), dtype=xp_ref.dtype)
    zero_col = jnp.zeros((H, 1, C), dtype=xp_ref.dtype)
    xp_ref[0:1, :, :] = zero_row
    xp_ref[H + 1:H + 2, :, :] = zero_row
    xp_ref[1:H + 1, 0:1, :] = zero_col
    xp_ref[1:H + 1, W + 1:W + 2, :] = zero_col

    def conv3x3(w_ref, b_ref):
        # 3x3 "same" conv of whatever padded operand currently sits in xp_ref.
        # Per-tap accumulating dots: no im2col matrix is ever materialized.
        acc = None
        for ky in range(3):
            for kx in range(3):
                patch = xp_ref[ky:ky + H, kx:kx + W, :].reshape(H * W, C)
                part = jnp.dot(patch, w_ref[3 * ky + kx],
                               preferred_element_type=jnp.float32)
                acc = part if acc is None else acc + part
        return acc + b_ref[...]                           # (H*W, C) f32

    # ---- conv1: pad x into scratch, conv, bias + ReLU -----------------------
    xp_ref[1:H + 1, 1:W + 1, :] = (
        x_ref[0].reshape(H, W, C).astype(xp_ref.dtype))
    mid = jnp.maximum(conv3x3(w1_ref, b1_ref), 0.0)

    # ---- conv2: re-pad relu(conv1) into the SAME scratch (border still 0) ---
    xp_ref[1:H + 1, 1:W + 1, :] = mid.reshape(H, W, C).astype(xp_ref.dtype)
    out = conv3x3(w2_ref, b2_ref)

    # ---- residual: re-read x from the VMEM-resident input block ------------
    o_ref[0] = (out + x_ref[0]).astype(o_ref.dtype)


def residual_block_nhwc(x_nhwc, w1, b1, w2, b2):
    """NHWC fast path (use end-to-end when stacking residual blocks).

    x_nhwc: (N, H, W, C); w*: (3, 3, Cin, Cout) [HWIO]; b*: (C,).
    """
    N, H, W, C = x_nhwc.shape
    x_rows = x_nhwc.reshape(N, H * W, C)                  # free contiguous view
    # NOTE: tap ordering (ky outer, kx inner, cin as matmul rows) must match
    # the kernel's `w_ref[3*ky + kx]` / patch ordering.
    w1_t = w1.reshape(9, C, C).astype(jnp.bfloat16)
    w2_t = w2.reshape(9, C, C).astype(jnp.bfloat16)
    b1_r = b1.reshape(1, C).astype(jnp.float32)
    b2_r = b2.reshape(1, C).astype(jnp.float32)

    kernel = partial(residual_block_kernel, H=H, W=W, C=C)
    out = pl.pallas_call(
        kernel,
        out_shape=jax.ShapeDtypeStruct((N, H * W, C), x_nhwc.dtype),
        grid_spec=pltpu.PrefetchScalarGridSpec(
            num_scalar_prefetch=0,
            grid=(N,),
            in_specs=[
                pl.BlockSpec((1, H * W, C), lambda n: (n, 0, 0)),
                pl.BlockSpec((9, C, C), lambda n: (0, 0, 0)),
                pl.BlockSpec((1, C), lambda n: (0, 0)),
                pl.BlockSpec((9, C, C), lambda n: (0, 0, 0)),
                pl.BlockSpec((1, C), lambda n: (0, 0)),
            ],
            out_specs=pl.BlockSpec((1, H * W, C), lambda n: (n, 0, 0)),
            scratch_shapes=[
                pltpu.VMEM((H + 2, W + 2, C), jnp.bfloat16),   # shared pad buf
            ],
        ),
        compiler_params=pltpu.CompilerParams(
            dimension_semantics=("parallel",)),
    )(x_rows, w1_t, b1_r, w2_t, b2_r)
    return out.reshape(N, H, W, C)


def residual_block(x_nchw, w1, b1, w2, b2):
    """NCHW adapter matching the PyTorch module interface."""
    x_nhwc = jnp.transpose(x_nchw, (0, 2, 3, 1))
    out = residual_block_nhwc(x_nhwc, w1, b1, w2, b2)
    return jnp.transpose(out, (0, 3, 1, 2))


def _reference(x_nchw, w1, b1, w2, b2):
    """Pure-JAX f32 reference (lax conv), NCHW in/out."""
    def conv(x, w, b):
        w_oihw = jnp.transpose(w, (3, 2, 0, 1))
        y = lax.conv_general_dilated(
            x, w_oihw, window_strides=(1, 1), padding=((1, 1), (1, 1)),
            dimension_numbers=("NCHW", "OIHW", "NCHW"),
            precision=lax.Precision.HIGHEST)
        return y + b.reshape(1, -1, 1, 1)

    mid = jnp.maximum(conv(x_nchw, w1, b1), 0.0)
    return conv(mid, w2, b2) + x_nchw


if __name__ == "__main__":
    N, C, H, W = 2, 64, 16, 16     # nf=64 (module default), small spatial
    key = jax.random.PRNGKey(0)
    k_x, k_w1, k_b1, k_w2, k_b2 = jax.random.split(key, 5)

    # Round test data to bf16-representable values so the bf16 MXU path is
    # lossless on the leaves; remaining diff vs the f32 reference is only the
    # bf16 rounding of the intermediate activation (<~5e-3 at nf=64).
    def bf16r(a):
        return a.astype(jnp.bfloat16).astype(jnp.float32)

    x = bf16r(jax.random.normal(k_x, (N, C, H, W), dtype=jnp.float32))
    scale = 1.0 / (3.0 * jnp.sqrt(float(C)))
    w1 = bf16r(jax.random.normal(k_w1, (3, 3, C, C), dtype=jnp.float32) * scale)
    b1 = bf16r(jax.random.normal(k_b1, (C,), dtype=jnp.float32) * 0.01)
    w2 = bf16r(jax.random.normal(k_w2, (3, 3, C, C), dtype=jnp.float32) * scale)
    b2 = bf16r(jax.random.normal(k_b2, (C,), dtype=jnp.float32) * 0.01)

    out = jax.block_until_ready(residual_block(x, w1, b1, w2, b2))
    ref = jax.block_until_ready(_reference(x, w1, b1, w2, b2))

    assert out.shape == (N, C, H, W)
    assert jnp.allclose(out, ref, atol=1e-2, rtol=1e-2), (
        "mismatch vs reference, max abs err = "
        f"{float(jnp.max(jnp.abs(out - ref)))}")

    print("KERNEL_OK")
</pallas_src>

<mosaic_0001>
module attributes {stable_mosaic.version = 11 : i64} {
  func.func @residual_block_kernel(%arg0: i32, %arg1: memref<1x256x64xf32, #tpu.memory_space<vmem>>, %arg2: memref<9x64x64xbf16, #tpu.memory_space<vmem>>, %arg3: memref<1x64xf32, #tpu.memory_space<vmem>>, %arg4: memref<9x64x64xbf16, #tpu.memory_space<vmem>>, %arg5: memref<1x64xf32, #tpu.memory_space<vmem>>, %arg6: memref<1x256x64xf32, #tpu.memory_space<vmem>>, %arg7: memref<18x18x64xbf16, #tpu.memory_space<vmem>>) attributes {dimension_semantics = [#tpu.dimension_semantics<parallel>], iteration_bounds = array<i64: 2>, scalar_prefetch = 0 : i64, scratch_operands = 1 : i64, tpu.core_type = #tpu.core_type<tc>, window_params = [{transform_indices = @transform_0, window_bounds = array<i64: 1, 256, 64>}, {pipeline_mode = #tpu.pipeline_mode<synchronous>, transform_indices = @transform_1, window_bounds = array<i64: 9, 64, 64>}, {pipeline_mode = #tpu.pipeline_mode<synchronous>, transform_indices = @transform_2, window_bounds = array<i64: 1, 64>}, {pipeline_mode = #tpu.pipeline_mode<synchronous>, transform_indices = @transform_3, window_bounds = array<i64: 9, 64, 64>}, {pipeline_mode = #tpu.pipeline_mode<synchronous>, transform_indices = @transform_4, window_bounds = array<i64: 1, 64>}, {transform_indices = @transform_5, window_bounds = array<i64: 1, 256, 64>}]} {
    %cst = arith.constant 0.000000e+00 : bf16
    %0 = vector.broadcast %cst : bf16 to vector<1x18x64xbf16>
    %cst_0 = arith.constant 0.000000e+00 : bf16
    %1 = vector.broadcast %cst_0 : bf16 to vector<16x1x64xbf16>
    %c0 = arith.constant 0 : index
    %c0_1 = arith.constant 0 : index
    %c0_2 = arith.constant 0 : index
    %2 = vector.load %arg7[%c0, %c0_1, %c0_2] : memref<18x18x64xbf16, #tpu.memory_space<vmem>>, vector<1x18x64xbf16>
    tpu.vector_store %arg7[%c0, %c0_1, %c0_2], %0 {strides = array<i32>} : memref<18x18x64xbf16, #tpu.memory_space<vmem>>, vector<1x18x64xbf16>,
    %c17 = arith.constant 17 : index
    %c0_3 = arith.constant 0 : index
    %c0_4 = arith.constant 0 : index
    %3 = vector.load %arg7[%c17, %c0_3, %c0_4] : memref<18x18x64xbf16, #tpu.memory_space<vmem>>, vector<1x18x64xbf16>
    tpu.vector_store %arg7[%c17, %c0_3, %c0_4], %0 {strides = array<i32>} : memref<18x18x64xbf16, #tpu.memory_space<vmem>>, vector<1x18x64xbf16>,
    %c1 = arith.constant 1 : index
    %c0_5 = arith.constant 0 : index
    %c0_6 = arith.constant 0 : index
    %4 = vector.load %arg7[%c1, %c0_5, %c0_6] : memref<18x18x64xbf16, #tpu.memory_space<vmem>>, vector<16x1x64xbf16>
    tpu.vector_store %arg7[%c1, %c0_5, %c0_6], %1 {strides = array<i32>} : memref<18x18x64xbf16, #tpu.memory_space<vmem>>, vector<16x1x64xbf16>,
    %c1_7 = arith.constant 1 : index
    %c17_8 = arith.constant 17 : index
    %c0_9 = arith.constant 0 : index
    %5 = vector.load %arg7[%c1_7, %c17_8, %c0_9] : memref<18x18x64xbf16, #tpu.memory_space<vmem>>, vector<16x1x64xbf16>
    tpu.vector_store %arg7[%c1_7, %c17_8, %c0_9], %1 {strides = array<i32>} : memref<18x18x64xbf16, #tpu.memory_space<vmem>>, vector<16x1x64xbf16>,
    %c0_10 = arith.constant 0 : index
    %c0_11 = arith.constant 0 : index
    %c0_12 = arith.constant 0 : index
    %6 = vector.load %arg1[%c0_10, %c0_11, %c0_12] : memref<1x256x64xf32, #tpu.memory_space<vmem>>, vector<1x256x64xf32>
    %7 = vector.shape_cast %6 : vector<1x256x64xf32> to vector<256x64xf32>
    %8 = vector.shape_cast %7 : vector<256x64xf32> to vector<16x16x64xf32>
    %9 = arith.truncf %8 : vector<16x16x64xf32> to vector<16x16x64xbf16>
    %c1_13 = arith.constant 1 : index
    %c1_14 = arith.constant 1 : index
    %c0_15 = arith.constant 0 : index
    %10 = vector.load %arg7[%c1_13, %c1_14, %c0_15] : memref<18x18x64xbf16, #tpu.memory_space<vmem>>, vector<16x16x64xbf16>
    tpu.vector_store %arg7[%c1_13, %c1_14, %c0_15], %9 {strides = array<i32>} : memref<18x18x64xbf16, #tpu.memory_space<vmem>>, vector<16x16x64xbf16>,
    %c0_16 = arith.constant 0 : index
    %c0_17 = arith.constant 0 : index
    %c0_18 = arith.constant 0 : index
    %11 = vector.load %arg7[%c0_16, %c0_17, %c0_18] : memref<18x18x64xbf16, #tpu.memory_space<vmem>>, vector<16x16x64xbf16>
    %12 = vector.shape_cast %11 : vector<16x16x64xbf16> to vector<256x64xbf16>
    %c0_19 = arith.constant 0 : index
    %c0_20 = arith.constant 0 : index
    %c0_21 = arith.constant 0 : index
    %13 = vector.load %arg2[%c0_19, %c0_20, %c0_21] : memref<9x64x64xbf16, #tpu.memory_space<vmem>>, vector<1x64x64xbf16>
    %14 = vector.shape_cast %13 : vector<1x64x64xbf16> to vector<64x64xbf16>
    %cst_22 = arith.constant dense<0.000000e+00> : vector<256x64xf32>
    %15 = tpu.matmul %12, %14, %cst_22 {dimension_numbers = #tpu.dot_dimension_numbers<[1], [0], [0], [1], [0, 0, 1, 1], [], []>} : vector<256x64xbf16>, vector<64x64xbf16>, vector<256x64xf32> -> vector<256x64xf32>
    %c0_23 = arith.constant 0 : index
    %c1_24 = arith.constant 1 : index
    %c0_25 = arith.constant 0 : index
    %16 = vector.load %arg7[%c0_23, %c1_24, %c0_25] : memref<18x18x64xbf16, #tpu.memory_space<vmem>>, vector<16x16x64xbf16>
    %17 = vector.shape_cast %16 : vector<16x16x64xbf16> to vector<256x64xbf16>
    %c1_26 = arith.constant 1 : index
    %c0_27 = arith.constant 0 : index
    %c0_28 = arith.constant 0 : index
    %18 = vector.load %arg2[%c1_26, %c0_27, %c0_28] : memref<9x64x64xbf16, #tpu.memory_space<vmem>>, vector<1x64x64xbf16>
    %19 = vector.shape_cast %18 : vector<1x64x64xbf16> to vector<64x64xbf16>
    %cst_29 = arith.constant dense<0.000000e+00> : vector<256x64xf32>
    %20 = tpu.matmul %17, %19, %cst_29 {dimension_numbers = #tpu.dot_dimension_numbers<[1], [0], [0], [1], [0, 0, 1, 1], [], []>} : vector<256x64xbf16>, vector<64x64xbf16>, vector<256x64xf32> -> vector<256x64xf32>
    %21 = arith.addf %15, %20 : vector<256x64xf32>
    %c0_30 = arith.constant 0 : index
    %c2 = arith.constant 2 : index
    %c0_31 = arith.constant 0 : index
    %22 = vector.load %arg7[%c0_30, %c2, %c0_31] : memref<18x18x64xbf16, #tpu.memory_space<vmem>>, vector<16x16x64xbf16>
    %23 = vector.shape_cast %22 : vector<16x16x64xbf16> to vector<256x64xbf16>
    %c2_32 = arith.constant 2 : index
    %c0_33 = arith.constant 0 : index
    %c0_34 = arith.constant 0 : index
    %24 = vector.load %arg2[%c2_32, %c0_33, %c0_34] : memref<9x64x64xbf16, #tpu.memory_space<vmem>>, vector<1x64x64xbf16>
    %25 = vector.shape_cast %24 : vector<1x64x64xbf16> to vector<64x64xbf16>
    %cst_35 = arith.constant dense<0.000000e+00> : vector<256x64xf32>
    %26 = tpu.matmul %23, %25, %cst_35 {dimension_numbers = #tpu.dot_dimension_numbers<[1], [0], [0], [1], [0, 0, 1, 1], [], []>} : vector<256x64xbf16>, vector<64x64xbf16>, vector<256x64xf32> -> vector<256x64xf32>
    %27 = arith.addf %21, %26 : vector<256x64xf32>
    %c1_36 = arith.constant 1 : index
    %c0_37 = arith.constant 0 : index
    %c0_38 = arith.constant 0 : index
    %28 = vector.load %arg7[%c1_36, %c0_37, %c0_38] : memref<18x18x64xbf16, #tpu.memory_space<vmem>>, vector<16x16x64xbf16>
    %29 = vector.shape_cast %28 : vector<16x16x64xbf16> to vector<256x64xbf16>
    %c3 = arith.constant 3 : index
    %c0_39 = arith.constant 0 : index
    %c0_40 = arith.constant 0 : index
    %30 = vector.load %arg2[%c3, %c0_39, %c0_40] : memref<9x64x64xbf16, #tpu.memory_space<vmem>>, vector<1x64x64xbf16>
    %31 = vector.shape_cast %30 : vector<1x64x64xbf16> to vector<64x64xbf16>
    %cst_41 = arith.constant dense<0.000000e+00> : vector<256x64xf32>
    %32 = tpu.matmul %29, %31, %cst_41 {dimension_numbers = #tpu.dot_dimension_numbers<[1], [0], [0], [1], [0, 0, 1, 1], [], []>} : vector<256x64xbf16>, vector<64x64xbf16>, vector<256x64xf32> -> vector<256x64xf32>
    %33 = arith.addf %27, %32 : vector<256x64xf32>
    %c1_42 = arith.constant 1 : index
    %c1_43 = arith.constant 1 : index
    %c0_44 = arith.constant 0 : index
    %34 = vector.load %arg7[%c1_42, %c1_43, %c0_44] : memref<18x18x64xbf16, #tpu.memory_space<vmem>>, vector<16x16x64xbf16>
    %35 = vector.shape_cast %34 : vector<16x16x64xbf16> to vector<256x64xbf16>
    %c4 = arith.constant 4 : index
    %c0_45 = arith.constant 0 : index
    %c0_46 = arith.constant 0 : index
    %36 = vector.load %arg2[%c4, %c0_45, %c0_46] : memref<9x64x64xbf16, #tpu.memory_space<vmem>>, vector<1x64x64xbf16>
    %37 = vector.shape_cast %36 : vector<1x64x64xbf16> to vector<64x64xbf16>
    %cst_47 = arith.constant dense<0.000000e+00> : vector<256x64xf32>
    %38 = tpu.matmul %35, %37, %cst_47 {dimension_numbers = #tpu.dot_dimension_numbers<[1], [0], [0], [1], [0, 0, 1, 1], [], []>} : vector<256x64xbf16>, vector<64x64xbf16>, vector<256x64xf32> -> vector<256x64xf32>
    %39 = arith.addf %33, %38 : vector<256x64xf32>
    %c1_48 = arith.constant 1 : index
    %c2_49 = arith.constant 2 : index
    %c0_50 = arith.constant 0 : index
    %40 = vector.load %arg7[%c1_48, %c2_49, %c0_50] : memref<18x18x64xbf16, #tpu.memory_space<vmem>>, vector<16x16x64xbf16>
    %41 = vector.shape_cast %40 : vector<16x16x64xbf16> to vector<256x64xbf16>
    %c5 = arith.constant 5 : index
    %c0_51 = arith.constant 0 : index
    %c0_52 = arith.constant 0 : index
    %42 = vector.load %arg2[%c5, %c0_51, %c0_52] : memref<9x64x64xbf16, #tpu.memory_space<vmem>>, vector<1x64x64xbf16>
    %43 = vector.shape_cast %42 : vector<1x64x64xbf16> to vector<64x64xbf16>
    %cst_53 = arith.constant dense<0.000000e+00> : vector<256x64xf32>
    %44 = tpu.matmul %41, %43, %cst_53 {dimension_numbers = #tpu.dot_dimension_numbers<[1], [0], [0], [1], [0, 0, 1, 1], [], []>} : vector<256x64xbf16>, vector<64x64xbf16>, vector<256x64xf32> -> vector<256x64xf32>
    %45 = arith.addf %39, %44 : vector<256x64xf32>
    %c2_54 = arith.constant 2 : index
    %c0_55 = arith.constant 0 : index
    %c0_56 = arith.constant 0 : index
    %46 = vector.load %arg7[%c2_54, %c0_55, %c0_56] : memref<18x18x64xbf16, #tpu.memory_space<vmem>>, vector<16x16x64xbf16>
    %47 = vector.shape_cast %46 : vector<16x16x64xbf16> to vector<256x64xbf16>
    %c6 = arith.constant 6 : index
    %c0_57 = arith.constant 0 : index
    %c0_58 = arith.constant 0 : index
    %48 = vector.load %arg2[%c6, %c0_57, %c0_58] : memref<9x64x64xbf16, #tpu.memory_space<vmem>>, vector<1x64x64xbf16>
    %49 = vector.shape_cast %48 : vector<1x64x64xbf16> to vector<64x64xbf16>
    %cst_59 = arith.constant dense<0.000000e+00> : vector<256x64xf32>
    %50 = tpu.matmul %47, %49, %cst_59 {dimension_numbers = #tpu.dot_dimension_numbers<[1], [0], [0], [1], [0, 0, 1, 1], [], []>} : vector<256x64xbf16>, vector<64x64xbf16>, vector<256x64xf32> -> vector<256x64xf32>
    %51 = arith.addf %45, %50 : vector<256x64xf32>
    %c2_60 = arith.constant 2 : index
    %c1_61 = arith.constant 1 : index
    %c0_62 = arith.constant 0 : index
    %52 = vector.load %arg7[%c2_60, %c1_61, %c0_62] : memref<18x18x64xbf16, #tpu.memory_space<vmem>>, vector<16x16x64xbf16>
    %53 = vector.shape_cast %52 : vector<16x16x64xbf16> to vector<256x64xbf16>
    %c7 = arith.constant 7 : index
    %c0_63 = arith.constant 0 : index
    %c0_64 = arith.constant 0 : index
    %54 = vector.load %arg2[%c7, %c0_63, %c0_64] : memref<9x64x64xbf16, #tpu.memory_space<vmem>>, vector<1x64x64xbf16>
    %55 = vector.shape_cast %54 : vector<1x64x64xbf16> to vector<64x64xbf16>
    %cst_65 = arith.constant dense<0.000000e+00> : vector<256x64xf32>
    %56 = tpu.matmul %53, %55, %cst_65 {dimension_numbers = #tpu.dot_dimension_numbers<[1], [0], [0], [1], [0, 0, 1, 1], [], []>} : vector<256x64xbf16>, vector<64x64xbf16>, vector<256x64xf32> -> vector<256x64xf32>
    %57 = arith.addf %51, %56 : vector<256x64xf32>
    %c2_66 = arith.constant 2 : index
    %c2_67 = arith.constant 2 : index
    %c0_68 = arith.constant 0 : index
    %58 = vector.load %arg7[%c2_66, %c2_67, %c0_68] : memref<18x18x64xbf16, #tpu.memory_space<vmem>>, vector<16x16x64xbf16>
    %59 = vector.shape_cast %58 : vector<16x16x64xbf16> to vector<256x64xbf16>
    %c8 = arith.constant 8 : index
    %c0_69 = arith.constant 0 : index
    %c0_70 = arith.constant 0 : index
    %60 = vector.load %arg2[%c8, %c0_69, %c0_70] : memref<9x64x64xbf16, #tpu.memory_space<vmem>>, vector<1x64x64xbf16>
    %61 = vector.shape_cast %60 : vector<1x64x64xbf16> to vector<64x64xbf16>
    %cst_71 = arith.constant dense<0.000000e+00> : vector<256x64xf32>
    %62 = tpu.matmul %59, %61, %cst_71 {dimension_numbers = #tpu.dot_dimension_numbers<[1], [0], [0], [1], [0, 0, 1, 1], [], []>} : vector<256x64xbf16>, vector<64x64xbf16>, vector<256x64xf32> -> vector<256x64xf32>
    %63 = arith.addf %57, %62 : vector<256x64xf32>
    %c0_72 = arith.constant 0 : index
    %c0_73 = arith.constant 0 : index
    %64 = vector.load %arg3[%c0_72, %c0_73] : memref<1x64xf32, #tpu.memory_space<vmem>>, vector<1x64xf32>
    %65 = vector.broadcast %64 : vector<1x64xf32> to vector<256x64xf32>
    %66 = arith.addf %63, %65 : vector<256x64xf32>
    %cst_74 = arith.constant 0.000000e+00 : f32
    %67 = vector.broadcast %cst_74 : f32 to vector<256x64xf32>
    %68 = arith.maximumf %66, %67 : vector<256x64xf32>
    %69 = vector.shape_cast %68 : vector<256x64xf32> to vector<16x16x64xf32>
    %70 = arith.truncf %69 : vector<16x16x64xf32> to vector<16x16x64xbf16>
    %c1_75 = arith.constant 1 : index
    %c1_76 = arith.constant 1 : index
    %c0_77 = arith.constant 0 : index
    %71 = vector.load %arg7[%c1_75, %c1_76, %c0_77] : memref<18x18x64xbf16, #tpu.memory_space<vmem>>, vector<16x16x64xbf16>
    tpu.vector_store %arg7[%c1_75, %c1_76, %c0_77], %70 {strides = array<i32>} : memref<18x18x64xbf16, #tpu.memory_space<vmem>>, vector<16x16x64xbf16>,
    %c0_78 = arith.constant 0 : index
    %c0_79 = arith.constant 0 : index
    %c0_80 = arith.constant 0 : index
    %72 = vector.load %arg7[%c0_78, %c0_79, %c0_80] : memref<18x18x64xbf16, #tpu.memory_space<vmem>>, vector<16x16x64xbf16>
    %73 = vector.shape_cast %72 : vector<16x16x64xbf16> to vector<256x64xbf16>
    %c0_81 = arith.constant 0 : index
    %c0_82 = arith.constant 0 : index
    %c0_83 = arith.constant 0 : index
    %74 = vector.load %arg4[%c0_81, %c0_82, %c0_83] : memref<9x64x64xbf16, #tpu.memory_space<vmem>>, vector<1x64x64xbf16>
    %75 = vector.shape_cast %74 : vector<1x64x64xbf16> to vector<64x64xbf16>
    %cst_84 = arith.constant dense<0.000000e+00> : vector<256x64xf32>
    %76 = tpu.matmul %73, %75, %cst_84 {dimension_numbers = #tpu.dot_dimension_numbers<[1], [0], [0], [1], [0, 0, 1, 1], [], []>} : vector<256x64xbf16>, vector<64x64xbf16>, vector<256x64xf32> -> vector<256x64xf32>
    %c0_85 = arith.constant 0 : index
    %c1_86 = arith.constant 1 : index
    %c0_87 = arith.constant 0 : index
    %77 = vector.load %arg7[%c0_85, %c1_86, %c0_87] : memref<18x18x64xbf16, #tpu.memory_space<vmem>>, vector<16x16x64xbf16>
    %78 = vector.shape_cast %77 : vector<16x16x64xbf16> to vector<256x64xbf16>
    %c1_88 = arith.constant 1 : index
    %c0_89 = arith.constant 0 : index
    %c0_90 = arith.constant 0 : index
    %79 = vector.load %arg4[%c1_88, %c0_89, %c0_90] : memref<9x64x64xbf16, #tpu.memory_space<vmem>>, vector<1x64x64xbf16>
    %80 = vector.shape_cast %79 : vector<1x64x64xbf16> to vector<64x64xbf16>
    %cst_91 = arith.constant dense<0.000000e+00> : vector<256x64xf32>
    %81 = tpu.matmul %78, %80, %cst_91 {dimension_numbers = #tpu.dot_dimension_numbers<[1], [0], [0], [1], [0, 0, 1, 1], [], []>} : vector<256x64xbf16>, vector<64x64xbf16>, vector<256x64xf32> -> vector<256x64xf32>
    %82 = arith.addf %76, %81 : vector<256x64xf32>
    %c0_92 = arith.constant 0 : index
    %c2_93 = arith.constant 2 : index
    %c0_94 = arith.constant 0 : index
    %83 = vector.load %arg7[%c0_92, %c2_93, %c0_94] : memref<18x18x64xbf16, #tpu.memory_space<vmem>>, vector<16x16x64xbf16>
    %84 = vector.shape_cast %83 : vector<16x16x64xbf16> to vector<256x64xbf16>
    %c2_95 = arith.constant 2 : index
    %c0_96 = arith.constant 0 : index
    %c0_97 = arith.constant 0 : index
    %85 = vector.load %arg4[%c2_95, %c0_96, %c0_97] : memref<9x64x64xbf16, #tpu.memory_space<vmem>>, vector<1x64x64xbf16>
    %86 = vector.shape_cast %85 : vector<1x64x64xbf16> to vector<64x64xbf16>
    %cst_98 = arith.constant dense<0.000000e+00> : vector<256x64xf32>
    %87 = tpu.matmul %84, %86, %cst_98 {dimension_numbers = #tpu.dot_dimension_numbers<[1], [0], [0], [1], [0, 0, 1, 1], [], []>} : vector<256x64xbf16>, vector<64x64xbf16>, vector<256x64xf32> -> vector<256x64xf32>
    %88 = arith.addf %82, %87 : vector<256x64xf32>
    %c1_99 = arith.constant 1 : index
    %c0_100 = arith.constant 0 : index
    %c0_101 = arith.constant 0 : index
    %89 = vector.load %arg7[%c1_99, %c0_100, %c0_101] : memref<18x18x64xbf16, #tpu.memory_space<vmem>>, vector<16x16x64xbf16>
    %90 = vector.shape_cast %89 : vector<16x16x64xbf16> to vector<256x64xbf16>
    %c3_102 = arith.constant 3 : index
    %c0_103 = arith.constant 0 : index
    %c0_104 = arith.constant 0 : index
    %91 = vector.load %arg4[%c3_102, %c0_103, %c0_104] : memref<9x64x64xbf16, #tpu.memory_space<vmem>>, vector<1x64x64xbf16>
    %92 = vector.shape_cast %91 : vector<1x64x64xbf16> to vector<64x64xbf16>
    %cst_105 = arith.constant dense<0.000000e+00> : vector<256x64xf32>
    %93 = tpu.matmul %90, %92, %cst_105 {dimension_numbers = #tpu.dot_dimension_numbers<[1], [0], [0], [1], [0, 0, 1, 1], [], []>} : vector<256x64xbf16>, vector<64x64xbf16>, vector<256x64xf32> -> vector<256x64xf32>
    %94 = arith.addf %88, %93 : vector<256x64xf32>
    %c1_106 = arith.constant 1 : index
    %c1_107 = arith.constant 1 : index
    %c0_108 = arith.constant 0 : index
    %95 = vector.load %arg7[%c1_106, %c1_107, %c0_108] : memref<18x18x64xbf16, #tpu.memory_space<vmem>>, vector<16x16x64xbf16>
    %96 = vector.shape_cast %95 : vector<16x16x64xbf16> to vector<256x64xbf16>
    %c4_109 = arith.constant 4 : index
    %c0_110 = arith.constant 0 : index
    %c0_111 = arith.constant 0 : index
    %97 = vector.load %arg4[%c4_109, %c0_110, %c0_111] : memref<9x64x64xbf16, #tpu.memory_space<vmem>>, vector<1x64x64xbf16>
    %98 = vector.shape_cast %97 : vector<1x64x64xbf16> to vector<64x64xbf16>
    %cst_112 = arith.constant dense<0.000000e+00> : vector<256x64xf32>
    %99 = tpu.matmul %96, %98, %cst_112 {dimension_numbers = #tpu.dot_dimension_numbers<[1], [0], [0], [1], [0, 0, 1, 1], [], []>} : vector<256x64xbf16>, vector<64x64xbf16>, vector<256x64xf32> -> vector<256x64xf32>
    %100 = arith.addf %94, %99 : vector<256x64xf32>
    %c1_113 = arith.constant 1 : index
    %c2_114 = arith.constant 2 : index
    %c0_115 = arith.constant 0 : index
    %101 = vector.load %arg7[%c1_113, %c2_114, %c0_115] : memref<18x18x64xbf16, #tpu.memory_space<vmem>>, vector<16x16x64xbf16>
    %102 = vector.shape_cast %101 : vector<16x16x64xbf16> to vector<256x64xbf16>
    %c5_116 = arith.constant 5 : index
    %c0_117 = arith.constant 0 : index
    %c0_118 = arith.constant 0 : index
    %103 = vector.load %arg4[%c5_116, %c0_117, %c0_118] : memref<9x64x64xbf16, #tpu.memory_space<vmem>>, vector<1x64x64xbf16>
    %104 = vector.shape_cast %103 : vector<1x64x64xbf16> to vector<64x64xbf16>
    %cst_119 = arith.constant dense<0.000000e+00> : vector<256x64xf32>
    %105 = tpu.matmul %102, %104, %cst_119 {dimension_numbers = #tpu.dot_dimension_numbers<[1], [0], [0], [1], [0, 0, 1, 1], [], []>} : vector<256x64xbf16>, vector<64x64xbf16>, vector<256x64xf32> -> vector<256x64xf32>
    %106 = arith.addf %100, %105 : vector<256x64xf32>
    %c2_120 = arith.constant 2 : index
    %c0_121 = arith.constant 0 : index
    %c0_122 = arith.constant 0 : index
    %107 = vector.load %arg7[%c2_120, %c0_121, %c0_122] : memref<18x18x64xbf16, #tpu.memory_space<vmem>>, vector<16x16x64xbf16>
    %108 = vector.shape_cast %107 : vector<16x16x64xbf16> to vector<256x64xbf16>
    %c6_123 = arith.constant 6 : index
    %c0_124 = arith.constant 0 : index
    %c0_125 = arith.constant 0 : index
    %109 = vector.load %arg4[%c6_123, %c0_124, %c0_125] : memref<9x64x64xbf16, #tpu.memory_space<vmem>>, vector<1x64x64xbf16>
    %110 = vector.shape_cast %109 : vector<1x64x64xbf16> to vector<64x64xbf16>
    %cst_126 = arith.constant dense<0.000000e+00> : vector<256x64xf32>
    %111 = tpu.matmul %108, %110, %cst_126 {dimension_numbers = #tpu.dot_dimension_numbers<[1], [0], [0], [1], [0, 0, 1, 1], [], []>} : vector<256x64xbf16>, vector<64x64xbf16>, vector<256x64xf32> -> vector<256x64xf32>
    %112 = arith.addf %106, %111 : vector<256x64xf32>
    %c2_127 = arith.constant 2 : index
    %c1_128 = arith.constant 1 : index
    %c0_129 = arith.constant 0 : index
    %113 = vector.load %arg7[%c2_127, %c1_128, %c0_129] : memref<18x18x64xbf16, #tpu.memory_space<vmem>>, vector<16x16x64xbf16>
    %114 = vector.shape_cast %113 : vector<16x16x64xbf16> to vector<256x64xbf16>
    %c7_130 = arith.constant 7 : index
    %c0_131 = arith.constant 0 : index
    %c0_132 = arith.constant 0 : index
    %115 = vector.load %arg4[%c7_130, %c0_131, %c0_132] : memref<9x64x64xbf16, #tpu.memory_space<vmem>>, vector<1x64x64xbf16>
    %116 = vector.shape_cast %115 : vector<1x64x64xbf16> to vector<64x64xbf16>
    %cst_133 = arith.constant dense<0.000000e+00> : vector<256x64xf32>
    %117 = tpu.matmul %114, %116, %cst_133 {dimension_numbers = #tpu.dot_dimension_numbers<[1], [0], [0], [1], [0, 0, 1, 1], [], []>} : vector<256x64xbf16>, vector<64x64xbf16>, vector<256x64xf32> -> vector<256x64xf32>
    %118 = arith.addf %112, %117 : vector<256x64xf32>
    %c2_134 = arith.constant 2 : index
    %c2_135 = arith.constant 2 : index
    %c0_136 = arith.constant 0 : index
    %119 = vector.load %arg7[%c2_134, %c2_135, %c0_136] : memref<18x18x64xbf16, #tpu.memory_space<vmem>>, vector<16x16x64xbf16>
    %120 = vector.shape_cast %119 : vector<16x16x64xbf16> to vector<256x64xbf16>
    %c8_137 = arith.constant 8 : index
    %c0_138 = arith.constant 0 : index
    %c0_139 = arith.constant 0 : index
    %121 = vector.load %arg4[%c8_137, %c0_138, %c0_139] : memref<9x64x64xbf16, #tpu.memory_space<vmem>>, vector<1x64x64xbf16>
    %122 = vector.shape_cast %121 : vector<1x64x64xbf16> to vector<64x64xbf16>
    %cst_140 = arith.constant dense<0.000000e+00> : vector<256x64xf32>
    %123 = tpu.matmul %120, %122, %cst_140 {dimension_numbers = #tpu.dot_dimension_numbers<[1], [0], [0], [1], [0, 0, 1, 1], [], []>} : vector<256x64xbf16>, vector<64x64xbf16>, vector<256x64xf32> -> vector<256x64xf32>
    %124 = arith.addf %118, %123 : vector<256x64xf32>
    %c0_141 = arith.constant 0 : index
    %c0_142 = arith.constant 0 : index
    %125 = vector.load %arg5[%c0_141, %c0_142] : memref<1x64xf32, #tpu.memory_space<vmem>>, vector<1x64xf32>
    %126 = vector.broadcast %125 : vector<1x64xf32> to vector<256x64xf32>
    %127 = arith.addf %124, %126 : vector<256x64xf32>
    %c0_143 = arith.constant 0 : index
    %c0_144 = arith.constant 0 : index
    %c0_145 = arith.constant 0 : index
    %128 = vector.load %arg1[%c0_143, %c0_144, %c0_145] : memref<1x256x64xf32, #tpu.memory_space<vmem>>, vector<1x256x64xf32>
    %129 = vector.shape_cast %128 : vector<1x256x64xf32> to vector<256x64xf32>
    %130 = arith.addf %127, %129 : vector<256x64xf32>
    %c0_146 = arith.constant 0 : index
    %c0_147 = arith.constant 0 : index
    %c0_148 = arith.constant 0 : index
    %131 = vector.load %arg6[%c0_146, %c0_147, %c0_148] : memref<1x256x64xf32, #tpu.memory_space<vmem>>, vector<1x256x64xf32>
    %132 = vector.shape_cast %131 : vector<1x256x64xf32> to vector<256x64xf32>
    %133 = vector.shape_cast %130 : vector<256x64xf32> to vector<1x256x64xf32>
    tpu.vector_store %arg6[%c0_146, %c0_147, %c0_148], %133 {strides = array<i32>} : memref<1x256x64xf32, #tpu.memory_space<vmem>>, vector<1x256x64xf32>,
    return
  }
  func.func @transform_0(%arg0: i32) -> (i32, i32, i32) {
    %c0_i32 = arith.constant 0 : i32
    %c0_i32_0 = arith.constant 0 : i32
    %c0_i32_1 = arith.constant 0 : i32
    return %arg0, %c0_i32, %c0_i32_0 : i32, i32, i32
  }
  func.func @transform_1(%arg0: i32) -> (i32, i32, i32) {
    %c0_i32 = arith.constant 0 : i32
    %c0_i32_0 = arith.constant 0 : i32
    %c0_i32_1 = arith.constant 0 : i32
    %c0_i32_2 = arith.constant 0 : i32
    return %c0_i32, %c0_i32_0, %c0_i32_1 : i32, i32, i32
  }
  func.func @transform_2(%arg0: i32) -> (i32, i32) {
    %c0_i32 = arith.constant 0 : i32
    %c0_i32_0 = arith.constant 0 : i32
    %c0_i32_1 = arith.constant 0 : i32
    return %c0_i32, %c0_i32_0 : i32, i32
  }
  func.func @transform_3(%arg0: i32) -> (i32, i32, i32) {
    %c0_i32 = arith.constant 0 : i32
    %c0_i32_0 = arith.constant 0 : i32
    %c0_i32_1 = arith.constant 0 : i32
    %c0_i32_2 = arith.constant 0 : i32
    return %c0_i32, %c0_i32_0, %c0_i32_1 : i32, i32, i32
  }
  func.func @transform_4(%arg0: i32) -> (i32, i32) {
    %c0_i32 = arith.constant 0 : i32
    %c0_i32_0 = arith.constant 0 : i32
    %c0_i32_1 = arith.constant 0 : i32
    return %c0_i32, %c0_i32_0 : i32, i32
  }
  func.func @transform_5(%arg0: i32) -> (i32, i32, i32) {
    %c0_i32 = arith.constant 0 : i32
    %c0_i32_0 = arith.constant 0 : i32
    %c0_i32_1 = arith.constant 0 : i32
    return %arg0, %c0_i32, %c0_i32_0 : i32, i32, i32
  }
}

</mosaic_0001>

<bundles_post_ra>
// kernel: tpu_custom_call.1
= control target key start
LH: loop header
LB: loop body
LE: loop exit
PB: predicated region body
PF: predicated region fallthrough
CT: control target
= control target key end

     0   :  { %s14162_s18 = smov 0   ;;  %s17764_s0 = inlined_call_operand.vmem [shape: f32[2,256,64], index: 0, kind: input, shape index: {}]   ;;  %s17765_s1 = inlined_call_operand.vmem [shape: bf16[9,64,64], index: 1, kind: input, shape index: {}]   ;;  %s17766_s2 = inlined_call_operand.vmem [shape: f32[1,64], index: 2, kind: input, shape index: {}]   ;;  %s17767_s3 = inlined_call_operand.vmem [shape: bf16[9,64,64], index: 3, kind: input, shape index: {}]   ;;  %s17768_s4 = inlined_call_operand.vmem [shape: f32[1,64], index: 4, kind: input, shape index: {}]   ;;  %s17769_s5 = inlined_call_operand.vmem [shape: f32[2,256,64], index: 5, kind: output, shape index: {}]  }
   0x1 LB: > { %s11299_s19 = sadd.s32 4294967295, %s14129_s18   ;;  %p11303_p0 = scmp.ge.s32.totalorder %s14129_s18, 1  ;;  %s14129_s18 = sphi %s14162_s18, %s15_s18  }
   0x2   : > { %p187_p1 = scmp.lt.s32.totalorder %s14129_s18, 3 }
   0x4   : > { %p188_p2 = pnand %p11303_p0, %p187_p1 }
   0x6   : > { %191 = sbr.rel (%p188_p2) target bundleno = 1724 (0x6bc), region = 40 }
   0xd   : > { %v13915_v0 = vld [vmem:[%s17765_s1 + $0x20] sm:$0xff]   ;;  %vm226_vm0 = vcmask 519168   ;;  %v13916_v1 = vld [vmem:[%s17765_s1 + $0x28] sm:$0xff]   ;;  %v14131_v2 = vmov 0   ;;  %vm229_vm1 = vcmask 516096   ;;  %v13917_v3 = vld [vmem:[%s17765_s1 + $0x30] sm:$0xff]  }
   0xe   : > { %12674 = vmatprep.subr.bf16.mxu0 %v13915_v0  ;;  %227 = vst.msk [vmem:[#allocation2] sm:$0xf] %vm226_vm0, %v14131_v2  ;;  %228 = vst.msk [vmem:[#allocation2 + $0x4] sm:$0xf] %vm226_vm0, %v14131_v2  ;;  %vm237_vm2 = vsmask.f32 256 }
   0xf   : > { %232 = vst.msk [vmem:[#allocation2 + $0xcc] sm:$0xf] %vm226_vm0, %v14131_v2  ;;  %233 = vst.msk [vmem:[#allocation2 + $0xd0] sm:$0xf] %vm226_vm0, %v14131_v2  ;;  %12675 = vmatpush3.bf16.msra.mxu0 %v13915_v0  ;;  %vm287_vm3 = vsmask.f32 7938 }
  0x10   : > { %230 = vst.msk [vmem:[#allocation2 + $0x8] sm:$0x1] %vm229_vm1, %v14131_v2  ;;  %234 = vst.msk [vmem:[#allocation2 + $0xd4] sm:$0x1] %vm229_vm1, %v14131_v2  ;;  %12676 = vmatprep.subr.bf16.mxu0 %v13916_v1  ;;  %v17858_v4 = vmov 0  ;;  %p215_p3 = scmp.lt.s32.totalorder %s11299_s19, 1 }
  0x11   : > { %vm14184_vm4 = vmand %vm229_vm1, %vm237_vm2  ;;  %vm957_vm5 = vsmask.f32 3328  ;;  %vm958_vm7 = vsmask.f32 7440  ;;  %v239_v6 = vld [vmem:[#allocation2 + $0xc] sm:$0x1] }
  0x12   : > { %v17859_v4 = vsel %vm14184_vm4, 4294967295, %v17858_v4  ;;  %vm14189_vm6 = vmand %vm229_vm1, %vm287_vm3  ;;  %v240_v7 = vsel %vm14184_vm4, 0, %v239_v6  ;;  %v289_v8 = vld [vmem:[#allocation2 + $0x14] sm:$0x1]  ;;  %v242_v9 = vld [vmem:[#allocation2 + $0x18] sm:$0x1] }
  0x13   : > { %17860 = vst [vmem:[#allocation3_spill] sm:$0xff] %v17859_v4  ;;  %12677 = vmatpush3.bf16.msra.mxu0 %v13916_v1  ;;  %v13918_v10 = vld [vmem:[%s17765_s1 + $0x38] sm:$0xff]   ;;  %s18071_s19 = smov (!%p215_p3, %s11299_s19), 1  ;;  %241 = vst [vmem:[#allocation2 + $0xc] sm:$0x1] %v240_v7  ;;  %v290_v11 = vsel %vm14189_vm6, 0, %v289_v8 }
  0x14   : > { %12678 = vmatprep.subr.bf16.mxu0 %v13917_v3  ;;  %v243_v12 = vsel %vm14184_vm4, 0, %v242_v9  ;;  %v292_v13 = vld [vmem:[#allocation2 + $0x20] sm:$0x1]  ;;  %291 = vst [vmem:[#allocation2 + $0x14] sm:$0x1] %v290_v11  ;;  %vm1425_vm8 = vcmask 523264   ;;  %vm14235_vm10 = vmor %vm957_vm5, %vm958_vm7 }
  0x15   : > { %v901_v14 = vld [vmem:[#allocation2] sm:$0xf]  ;;  %v902_v15 = vld [vmem:[#allocation2 + $0x4] sm:$0xf]  ;;  %244 = vst [vmem:[#allocation2 + $0x18] sm:$0x1] %v243_v12  ;;  %vm14248_vm11 = vmand %vm226_vm0, %vm287_vm3 }
  0x16   : > { %v293_v16 = vsel %vm14189_vm6, 0, %v292_v13  ;;  %v961_v18 = vshrl.u32 %v901_v14, 16  ;;  %v964_v19 = vshll.u32 %v901_v14, 16  ;;  %v970_v20 = vshll.u32 %v902_v15, 16  ;;  %v14213_v22 = vld [vmem:[%s17765_s1] sm:$0xff]   ;;  %s12248_s30 = sshll.u32 %s18071_s19, 8 }
  0x17   : > { %v941_v17 = vld [vmem:[#allocation2 + $0x8] sm:$0x1]  ;;  %v974_v21 = vshrl.u32 %v902_v15, 16  ;;  %294 = vst [vmem:[#allocation2 + $0x20] sm:$0x1] %v293_v16  ;;  %12679 = vmatpush3.bf16.msra.mxu0 %v13917_v3  ;;  %s14221_s8 = scalar_lea.vmem %s17764_s0, %s12248_s30  ;;  %v17865_v63 = vmov 0  ;;  %s17634_s29 = scalar_lea.vmem %s17769_s5, %s12248_s30 }
  0x18   : > { %v980_v23 = vshll.u32 %v941_v17, 16  ;;  %vm465_vm9 = vsmask.f32 4368  ;;  %v245_v24 = vld [vmem:[#allocation2 + $0x24] sm:$0x1]  ;;  %12680 = vmatprep.subr.bf16.mxu0 %v13918_v10  ;;  %v963_v25 = vrot.slane %v961_v18, 4 }
  0x19   : > { %v966_v26 = vrot.slane %v964_v19, 5  ;;  %v972_v27 = vrot.slane %v970_v20, 5  ;;  %v976_v28 = vrot.slane %v974_v21, 4  ;;  %v295_v29 = vld [vmem:[#allocation2 + $0x2c] sm:$0x1]  ;;  %v337_v31 = vld [vmem:[%s14221_s8] sm:$0xff]  ;;  %vm14254_vm12 = vmor %vm237_vm2, %vm465_vm9 }
  0x1a   : > { %v982_v30 = vrot.slane %v980_v23, 5  ;;  %v338_v32 = vld [vmem:[%s14221_s8 + $0x8] sm:$0xff]  ;;  %v339_v33 = vld [vmem:[%s14221_s8 + $0x10] sm:$0xff]  ;;  %v246_v34 = vsel %vm14184_vm4, 0, %v245_v24  ;;  %v296_v35 = vsel %vm14189_vm6, 0, %v295_v29  ;;  %v12250_v38 = vpack.c.bf16 %v337_v31, %v337_v31  ;;  %v340_v40 = vld [vmem:[%s14221_s8 + $0x18] sm:$0xff] }
  0x1b   : > { %v967_v36 = vor.u32 %v966_v26, %v963_v25  ;;  %v977_v37 = vor.u32 %v976_v28, %v972_v27  ;;  %v12251_v39 = vpack.c.bf16 %v338_v32, %v338_v32  ;;  %247 = vst [vmem:[#allocation2 + $0x24] sm:$0x1] %v246_v34  ;;  %297 = vst [vmem:[#allocation2 + $0x2c] sm:$0x1] %v296_v35  ;;  %v341_v41 = vld [vmem:[%s14221_s8 + $0x20] sm:$0xff]  ;;  %v342_v42 = vld [vmem:[%s14221_s8 + $0x28] sm:$0xff]  ;;  %12681 = vmatpush3.bf16.msra.mxu0 %v13918_v10 }
  0x1c   : > { %v12252_v44 = vpack.c.bf16 %v339_v33, %v339_v33  ;;  %v12253_v45 = vpack.c.bf16 %v340_v40, %v340_v40  ;;  %v12254_v46 = vpack.c.bf16 %v341_v41, %v341_v41  ;;  %v14239_v47 = vpack.c.bf16 %v342_v42, %v342_v42  ;;  %12714 = vmatprep.subr.bf16.mxu0 %v14213_v22  ;;  %v789_v54 = vld [vmem:[#allocation2 + $0xc] sm:$0xf]  ;;  %v793_v60 = vld [vmem:[#allocation2 + $0x14] sm:$0x1]  ;;  %v796_v62 = vld [vmem:[#allocation2 + $0x18] sm:$0xf] }
  0x1d   : > { %v968_v48 = vrot.slane %v967_v36, 4  ;;  %v978_v49 = vrot.slane %v977_v37, 4  ;;  %v468_v50 = vshrl.u32 %v12250_v38, 16  ;;  %v471_v51 = vshll.u32 %v12250_v38, 16  ;;  %v248_v16 = vld [vmem:[#allocation2 + $0x30] sm:$0x1] }
  0x1e   : > { %v476_v52 = vshrl.u32 %v12251_v39, 16  ;;  %v479_v53 = vshll.u32 %v12251_v39, 16  ;;  %v485_v55 = vshrl.u32 %v12252_v44, 16  ;;  %v488_v56 = vshll.u32 %v12252_v44, 16  ;;  %v800_v15 = vld [vmem:[#allocation2 + $0x20] sm:$0x1] }
  0x1f   : > { %v973_v57 = vsel %vm14235_vm10, %v968_v48, %v972_v27  ;;  %v983_v58 = vsel %vm14235_vm10, %v978_v49, %v982_v30  ;;  %v470_v59 = vrot.slane %v468_v50, 7  ;;  %v493_v61 = vshrl.u32 %v12253_v45, 16  ;;  %v298_v21 = vld [vmem:[#allocation2 + $0x38] sm:$0x1]  ;;  %v343_v23 = vld [vmem:[%s14221_s8 + $0x30] sm:$0xff]  ;;  %v345_v30 = vld [vmem:[%s14221_s8 + $0x40] sm:$0xff] }
  0x20   : > { %v17866_v63 = vsel %vm14248_vm11, 4294967295, %v17865_v63  ;;  %v11348_v0 = vcombine.low %v973_v57, %v983_v58  ;;  %v478_v1 = vrot.slane %v476_v52, 7  ;;  %v487_v2 = vrot.slane %v485_v55, 7  ;;  %v344_v24 = vld [vmem:[%s14221_s8 + $0x38] sm:$0xff]  ;;  %v346_v31 = vld [vmem:[%s14221_s8 + $0x48] sm:$0xff] }
  0x21   : > { %17867 = vst [vmem:[#allocation4_spill] sm:$0xff] %v17866_v63  ;;  %v496_v3 = vshll.u32 %v12253_v45, 16  ;;  %v17868_v6 = vmov 0  ;;  %v473_v7 = vor.u32 %v471_v51, %v470_v59  ;;  %v474_v8 = vrot.slane %v470_v59, 4  ;;  %v251_v29 = vld [vmem:[#allocation2 + $0x3c] sm:$0x1] }
  0x22   : > { %v17869_v6 = vsel %vm14254_vm12, 4294967295, %v17868_v6  ;;  %v495_v9 = vrot.slane %v493_v61, 7  ;;  %v502_v10 = vshrl.u32 %v12254_v46, 16  ;;  %12682 = vmatprep.mubr.msk.bf16.mxu0 %vm1425_vm8, %v11348_v0  ;;  %v481_v11 = vor.u32 %v479_v53, %v478_v1  ;;  %v803_v36 = vld [vmem:[#allocation2 + $0x24] sm:$0xf]  ;;  %v348_v61 = vld [vmem:[%s14221_s8 + $0x58] sm:$0xff] }
  0x23   : > { %17870 = vst [vmem:[#allocation5_spill] sm:$0xff] %v17869_v6  ;;  %v483_v12 = vrot.slane %v478_v1, 4  ;;  %v490_v13 = vor.u32 %v488_v56, %v487_v2  ;;  %v491_v14 = vrot.slane %v487_v2, 4  ;;  %v790_v17 = vsel %vm14248_vm11, %v473_v7, %v789_v54  ;;  %v301_v37 = vld [vmem:[#allocation2 + $0x44] sm:$0x1]  ;;  %v347_v56 = vld [vmem:[%s14221_s8 + $0x50] sm:$0xff] }
  0x24   : > { %v498_v18 = vor.u32 %v496_v3, %v495_v9  ;;  %v500_v19 = vrot.slane %v495_v9, 4  ;;  %v504_v20 = vrot.slane %v502_v10, 7  ;;  %v482_v25 = vsel %vm14254_vm12, %v474_v8, %v481_v11  ;;  %791 = vst [vmem:[#allocation2 + $0xc] sm:$0xf] %v790_v17  ;;  %v349_v7 = vld [vmem:[%s14221_s8 + $0x60] sm:$0xff]  ;;  %v13938_v5 = vld [vmem:[%s17765_s1 + $0x88] sm:$0xff]  }
  0x25   : > { %v794_v26 = vsel %vm14184_vm4, %v483_v12, %v793_v60  ;;  %v797_v27 = vsel %vm14248_vm11, %v490_v13, %v796_v62  ;;  %v505_v28 = vshll.u32 %v12254_v46, 16  ;;  %792 = vst.msk [vmem:[#allocation2 + $0x10] sm:$0xf] %vm226_vm0, %v482_v25  ;;  %v510_v35 = vshrl.u32 %v14239_v47, 16 }
  0x26   : > { %795 = vst [vmem:[#allocation2 + $0x14] sm:$0x1] %v794_v26  ;;  %v499_v32 = vsel %vm14254_vm12, %v491_v14, %v498_v18  ;;  %798 = vst [vmem:[#allocation2 + $0x18] sm:$0xf] %v797_v27  ;;  %v801_v33 = vsel %vm14184_vm4, %v500_v19, %v800_v15  ;;  %v508_v34 = vrot.slane %v504_v20, 4  ;;  %v513_v39 = vshll.u32 %v14239_v47, 16 }
  0x27   : > { %799 = vst.msk [vmem:[#allocation2 + $0x1c] sm:$0xf] %vm226_vm0, %v499_v32  ;;  %802 = vst [vmem:[#allocation2 + $0x20] sm:$0x1] %v801_v33  ;;  %v507_v38 = vor.u32 %v505_v28, %v504_v20  ;;  %v249_v40 = vsel %vm14184_vm4, 0, %v248_v16  ;;  %v299_v41 = vsel %vm14189_vm6, 0, %v298_v21  ;;  %v12256_v44 = vpack.c.bf16 %v343_v23, %v343_v23 }
  0x28   : > { %v512_v42 = vrot.slane %v510_v35, 7  ;;  %250 = vst [vmem:[#allocation2 + $0x30] sm:$0x1] %v249_v40  ;;  %300 = vst [vmem:[#allocation2 + $0x38] sm:$0x1] %v299_v41  ;;  %v14283_v45 = vpack.c.bf16 %v344_v24, %v344_v24  ;;  %v252_v46 = vsel %vm14184_vm4, 0, %v251_v29  ;;  %v14291_v50 = vpack.c.bf16 %v345_v30, %v345_v30 }
  0x29   : > { %v804_v48 = vsel %vm14248_vm11, %v507_v38, %v803_v36  ;;  %v807_v47 = vld [vmem:[#allocation2 + $0x2c] sm:$0x1]  ;;  %253 = vst [vmem:[#allocation2 + $0x3c] sm:$0x1] %v252_v46  ;;  %v302_v49 = vsel %vm14189_vm6, 0, %v301_v37  ;;  %v14293_v51 = vpack.c.bf16 %v346_v31, %v346_v31  ;;  %v519_v54 = vshrl.u32 %v12256_v44, 16 }
  0x2a   : > { %v515_v52 = vor.u32 %v513_v39, %v512_v42  ;;  %v517_v53 = vrot.slane %v512_v42, 4  ;;  %805 = vst [vmem:[#allocation2 + $0x24] sm:$0xf] %v804_v48  ;;  %v522_v55 = vshll.u32 %v12256_v44, 16  ;;  %303 = vst [vmem:[#allocation2 + $0x44] sm:$0x1] %v302_v49  ;;  %v14310_v12 = vpack.c.bf16 %v347_v56, %v347_v56 }
  0x2b   : > { %v527_v57 = vshrl.u32 %v14283_v45, 16  ;;  %v530_v58 = vshll.u32 %v14283_v45, 16  ;;  %v536_v59 = vshrl.u32 %v14291_v50, 16  ;;  %v539_v60 = vshll.u32 %v14291_v50, 16  ;;  %v903_v62 = vld [vmem:[#allocation2 + $0xc] sm:$0xf] }
  0x2c   : > { %v516_v0 = vsel %vm14254_vm12, %v508_v34, %v515_v52  ;;  %v808_v1 = vsel %vm14184_vm4, %v517_v53, %v807_v47  ;;  %v14305_v2 = vrot.slane %v519_v54, 7  ;;  %v544_v3 = vshrl.u32 %v14293_v51, 16  ;;  %v904_v8 = vld [vmem:[#allocation2 + $0x10] sm:$0xf]  ;;  %v350_v35 = vld [vmem:[%s14221_s8 + $0x68] sm:$0xff] }
  0x2d   : > { %v942_v9 = vld [vmem:[#allocation2 + $0x14] sm:$0x1]  ;;  %v985_v10 = vshrl.u32 %v903_v62, 16  ;;  %v988_v11 = vshll.u32 %v903_v62, 16  ;;  %806 = vst.msk [vmem:[#allocation2 + $0x28] sm:$0xf] %vm226_vm0, %v516_v0  ;;  %v14312_v17 = vpack.c.bf16 %v348_v61, %v348_v61  ;;  %v14315_v24 = vpack.c.bf16 %v349_v7, %v349_v7 }
  0x2e   : > { %809 = vst [vmem:[#allocation2 + $0x2c] sm:$0x1] %v808_v1  ;;  %v994_v13 = vshll.u32 %v904_v8, 16  ;;  %v998_v14 = vshrl.u32 %v904_v8, 16  ;;  %v1004_v15 = vshll.u32 %v942_v9, 16  ;;  %v524_v23 = vor.u32 %v522_v55, %v14305_v2 }
  0x2f   : > { %v905_v16 = vld [vmem:[#allocation2 + $0x18] sm:$0xf]  ;;  %v987_v18 = vrot.slane %v985_v10, 4  ;;  %v990_v19 = vrot.slane %v988_v11, 5  ;;  %v906_v20 = vld [vmem:[#allocation2 + $0x1c] sm:$0xf]  ;;  %v14320_v53 = vpack.c.bf16 %v350_v35, %v350_v35 }
  0x30   : > { %v943_v21 = vld [vmem:[#allocation2 + $0x20] sm:$0x1]  ;;  %v996_v25 = vrot.slane %v994_v13, 5  ;;  %v1000_v26 = vrot.slane %v998_v14, 4  ;;  %v1006_v27 = vrot.slane %v1004_v15, 5  ;;  %v1009_v28 = vshrl.u32 %v905_v16, 16 }
  0x31   : > { %v810_v29 = vld [vmem:[#allocation2 + $0x30] sm:$0xf]  ;;  %v991_v30 = vor.u32 %v990_v19, %v987_v18  ;;  %v1012_v31 = vshll.u32 %v905_v16, 16  ;;  %v1018_v32 = vshll.u32 %v906_v20, 16  ;;  %v1022_v33 = vshrl.u32 %v906_v20, 16  ;;  %v13920_v13 = vld [vmem:[%s17765_s1 + $0x8] sm:$0xff]  }
  0x32   : > { %v907_v34 = vld [vmem:[#allocation2 + $0x24] sm:$0xf]  ;;  %v1001_v36 = vor.u32 %v1000_v26, %v996_v25  ;;  %v1011_v37 = vrot.slane %v1009_v28, 4  ;;  %v1028_v38 = vshll.u32 %v943_v21, 16  ;;  %v811_v52 = vsel %vm14248_vm11, %v524_v23, %v810_v29  ;;  %v817_v29 = vld [vmem:[#allocation2 + $0x3c] sm:$0xf] }
  0x33   : > { %v1033_v39 = vshrl.u32 %v907_v34, 16  ;;  %v992_v40 = vrot.slane %v991_v30, 4  ;;  %v1014_v41 = vrot.slane %v1012_v31, 5  ;;  %v1020_v42 = vrot.slane %v1018_v32, 5  ;;  %812 = vst [vmem:[#allocation2 + $0x30] sm:$0xf] %v811_v52 }
  0x34   : > { %v1024_v44 = vrot.slane %v1022_v33, 4  ;;  %v1002_v46 = vrot.slane %v1001_v36, 4  ;;  %v1030_v48 = vrot.slane %v1028_v38, 5  ;;  %v908_v47 = vld [vmem:[#allocation2 + $0x28] sm:$0xf]  ;;  %v1036_v0 = vshll.u32 %v907_v34, 16 }
  0x35   : > { %v944_v49 = vld [vmem:[#allocation2 + $0x2c] sm:$0x1]  ;;  %v997_v54 = vsel %vm14235_vm10, %v992_v40, %v996_v25  ;;  %v1015_v55 = vor.u32 %v1014_v41, %v1011_v37  ;;  %v1035_v61 = vrot.slane %v1033_v39, 4  ;;  %v1042_v1 = vshll.u32 %v908_v47, 16  ;;  %v814_v25 = vld [vmem:[#allocation2 + $0x38] sm:$0x1] }
  0x36   : > { %v1025_v56 = vor.u32 %v1024_v44, %v1020_v42  ;;  %v1007_v62 = vsel %vm14235_vm10, %v1002_v46, %v1006_v27  ;;  %v1046_v7 = vshrl.u32 %v908_v47, 16  ;;  %v1052_v11 = vshll.u32 %v944_v49, 16  ;;  %v254_v33 = vld [vmem:[#allocation2 + $0x48] sm:$0x1]  ;;  %v821_v38 = vld [vmem:[#allocation2 + $0x44] sm:$0x1] }
  0x37   : > { %v11349_v8 = vcombine.low %v997_v54, %v1007_v62  ;;  %v1016_v9 = vrot.slane %v1015_v55, 4  ;;  %v1038_v14 = vrot.slane %v1036_v0, 5  ;;  %v1044_v15 = vrot.slane %v1042_v1, 5  ;;  %v304_v39 = vld [vmem:[#allocation2 + $0x50] sm:$0x1]  ;;  %v13922_v52 = vld [vmem:[%s17765_s1 + $0x18] sm:$0xff]  }
  0x38   : > { %v1026_v10 = vrot.slane %v1025_v56, 4  ;;  %v1048_v16 = vrot.slane %v1046_v7, 4  ;;  %v525_v18 = vrot.slane %v14305_v2, 4  ;;  %v1054_v21 = vrot.slane %v1052_v11, 5  ;;  %v307_v49 = vld [vmem:[#allocation2 + $0x5c] sm:$0x1] }
  0x39   : > { %12683 = vmatmul.mubr.msk.bf16.vlgmr.msra.gmra.mrb[0].mxu0 %vm1425_vm8, %v11349_v8  ;;  %v1021_v19 = vsel %vm14235_vm10, %v1016_v9, %v1020_v42  ;;  %v529_v23 = vrot.slane %v527_v57, 7  ;;  %v1039_v27 = vor.u32 %v1038_v14, %v1035_v61  ;;  %v538_v2 = vrot.slane %v536_v59, 7  ;;  %v257_v42 = vld [vmem:[#allocation2 + $0x54] sm:$0x1]  ;;  %v260_v62 = vld [vmem:[#allocation2 + $0x60] sm:$0x1] }
  0x3a   : > { %v1031_v20 = vsel %vm14235_vm10, %v1026_v10, %v1030_v48  ;;  %12715 = vmatpush3.bf16.msra.mxu0 %v14213_v22  ;;  %v1049_v28 = vor.u32 %v1048_v16, %v1044_v15  ;;  %v546_v32 = vrot.slane %v544_v3, 7  ;;  %v547_v57 = vshll.u32 %v14293_v51, 16  ;;  %v13921_v22 = vld [vmem:[%s17765_s1 + $0x10] sm:$0xff]   ;;  %v13923_v9 = vld [vmem:[%s17765_s1 + $0x40] sm:$0xff]  }
  0x3b   : > { %v11350_v26 = vcombine.low %v1021_v19, %v1031_v20  ;;  %v532_v30 = vor.u32 %v530_v58, %v529_v23  ;;  %v534_v31 = vrot.slane %v529_v23, 4  ;;  %12716 = vmatprep.subr.bf16.mxu0 %v13920_v13  ;;  %v1040_v34 = vrot.slane %v1039_v27, 4  ;;  %v909_v35 = vld [vmem:[#allocation2 + $0x30] sm:$0xf] }
  0x3c   : > { %v1050_v59 = vrot.slane %v1049_v28, 4  ;;  %v541_v45 = vor.u32 %v539_v60, %v538_v2  ;;  %v542_v58 = vrot.slane %v538_v2, 4  ;;  %v1057_v3 = vshrl.u32 %v909_v35, 16 }
  0x3d   : > { %12686 = vmatprep.mubr.msk.bf16.mxu0 %vm1425_vm8, %v11350_v26  ;;  %v533_v36 = vsel %vm14254_vm12, %v525_v18, %v532_v30  ;;  %v815_v51 = vsel %vm14184_vm4, %v534_v31, %v814_v25  ;;  %v1060_v37 = vshll.u32 %v909_v35, 16  ;;  %v1045_v40 = vsel %vm14235_vm10, %v1040_v34, %v1044_v15  ;;  %v310_v15 = vld [vmem:[#allocation2 + $0x68] sm:$0x1] }
  0x3e   : > { %v1055_v41 = vsel %vm14235_vm10, %v1050_v59, %v1054_v21  ;;  %813 = vst.msk [vmem:[#allocation2 + $0x34] sm:$0xf] %vm226_vm0, %v533_v36  ;;  %816 = vst [vmem:[#allocation2 + $0x38] sm:$0x1] %v815_v51  ;;  %v549_v50 = vor.u32 %v547_v57, %v546_v32  ;;  %v551_v60 = vrot.slane %v546_v32, 4  ;;  %12717 = vmatpush3.bf16.msra.mxu0 %v13920_v13  ;;  %v1059_v46 = vrot.slane %v1057_v3, 4 }
  0x3f   : > { %v11351_v44 = vcombine.low %v1045_v40, %v1055_v41  ;;  %v1062_v48 = vrot.slane %v1060_v37, 5  ;;  %v818_v47 = vsel %vm14248_vm11, %v541_v45, %v817_v29  ;;  %12718 = vmatprep.subr.bf16.mxu0 %v13921_v22  ;;  %v255_v56 = vsel %vm14184_vm4, 0, %v254_v33  ;;  %v351_v40 = vld [vmem:[%s14221_s8 + $0x70] sm:$0xff]  ;;  %v263_v41 = vld [vmem:[#allocation2 + $0x6c] sm:$0x1] }
  0x40   : > { %v550_v54 = vsel %vm14254_vm12, %v542_v58, %v549_v50  ;;  %819 = vst [vmem:[#allocation2 + $0x3c] sm:$0xf] %v818_v47  ;;  %v822_v55 = vsel %vm14184_vm4, %v551_v60, %v821_v38  ;;  %v305_v61 = vsel %vm14189_vm6, 0, %v304_v39  ;;  %256 = vst [vmem:[#allocation2 + $0x48] sm:$0x1] %v255_v56  ;;  %v553_v1 = vshrl.u32 %v14310_v12, 16 }
  0x41   : > { %12687 = vmatmul.mubr.msk.bf16.gmra.mrb[4].mxu0 %vm1425_vm8, %v11351_v44  ;;  %v1063_v0 = vor.u32 %v1062_v48, %v1059_v46  ;;  %820 = vst.msk [vmem:[#allocation2 + $0x40] sm:$0xf] %vm226_vm0, %v550_v54  ;;  %823 = vst [vmem:[#allocation2 + $0x44] sm:$0x1] %v822_v55  ;;  %v556_v7 = vshll.u32 %v14310_v12, 16  ;;  %v561_v8 = vshrl.u32 %v14312_v17, 16 }
  0x42   : > { %306 = vst [vmem:[#allocation2 + $0x50] sm:$0x1] %v305_v61  ;;  %v564_v10 = vshll.u32 %v14312_v17, 16  ;;  %v258_v11 = vsel %vm14184_vm4, 0, %v257_v42  ;;  %v308_v13 = vsel %vm14189_vm6, 0, %v307_v49  ;;  %v570_v14 = vshrl.u32 %v14315_v24, 16  ;;  %12719 = vmatpush3.bf16.msra.mxu0 %v13921_v22 }
  0x43   : > { %v14387_v16 = vrot.slane %v1063_v0, 4  ;;  %v555_v12 = vrot.slane %v553_v1, 7  ;;  %v563_v18 = vrot.slane %v561_v8, 7  ;;  %259 = vst [vmem:[#allocation2 + $0x54] sm:$0x1] %v258_v11  ;;  %v573_v19 = vshll.u32 %v14315_v24, 16  ;;  %12720 = vmatprep.subr.bf16.mxu0 %v13922_v52 }
  0x44   : > { %309 = vst [vmem:[#allocation2 + $0x5c] sm:$0x1] %v308_v13  ;;  %v572_v17 = vrot.slane %v570_v14, 7  ;;  %v578_v20 = vshrl.u32 %v14320_v53, 16  ;;  %v581_v21 = vshll.u32 %v14320_v53, 16  ;;  %v261_v23 = vsel %vm14184_vm4, 0, %v260_v62 }
  0x45   : > { %v910_v25 = vld [vmem:[#allocation2 + $0x34] sm:$0xf]  ;;  %v945_v26 = vld [vmem:[#allocation2 + $0x38] sm:$0x1]  ;;  %v558_v27 = vor.u32 %v556_v7, %v555_v12  ;;  %v559_v28 = vrot.slane %v555_v12, 4  ;;  %v566_v2 = vor.u32 %v564_v10, %v563_v18  ;;  %v568_v29 = vrot.slane %v563_v18, 4 }
  0x46   : > { %262 = vst [vmem:[#allocation2 + $0x60] sm:$0x1] %v261_v23  ;;  %v1066_v30 = vshll.u32 %v910_v25, 16  ;;  %v1070_v31 = vshrl.u32 %v910_v25, 16  ;;  %v1076_v32 = vshll.u32 %v945_v26, 16  ;;  %v575_v24 = vor.u32 %v573_v19, %v572_v17  ;;  %12721 = vmatpush3.bf16.msra.mxu0 %v13922_v52  ;;  %v352_v56 = vld [vmem:[%s14221_s8 + $0x78] sm:$0xff] }
  0x47   : > { %v911_v57 = vld [vmem:[#allocation2 + $0x3c] sm:$0xf]  ;;  %v567_v33 = vsel %vm14254_vm12, %v559_v28, %v566_v2  ;;  %v576_v53 = vrot.slane %v572_v17, 4  ;;  %v580_v22 = vrot.slane %v578_v20, 7  ;;  %v311_v34 = vsel %vm14189_vm6, 0, %v310_v15  ;;  %12754 = vmatprep.subr.bf16.mxu0 %v13923_v9  ;;  %v353_v23 = vld [vmem:[%s14221_s8 + $0x80] sm:$0xff] }
  0x48   : > { %v1068_v59 = vrot.slane %v1066_v30, 5  ;;  %v1072_v35 = vrot.slane %v1070_v31, 4  ;;  %v1078_v45 = vrot.slane %v1076_v32, 5  ;;  %v912_v58 = vld [vmem:[#allocation2 + $0x40] sm:$0xf]  ;;  %v1081_v36 = vshrl.u32 %v911_v57, 16 }
  0x49   : > { %827 = vst.msk [vmem:[#allocation2 + $0x4c] sm:$0xf] %vm226_vm0, %v567_v33  ;;  %312 = vst [vmem:[#allocation2 + $0x68] sm:$0x1] %v311_v34  ;;  %v946_v51 = vld [vmem:[#allocation2 + $0x44] sm:$0x1]  ;;  %v583_v39 = vor.u32 %v581_v21, %v580_v22  ;;  %v12264_v14 = vpack.c.bf16 %v351_v40, %v351_v40  ;;  %v12265_v15 = vpack.c.bf16 %v352_v56, %v352_v56 }
  0x4a   : > { %v1084_v3 = vshll.u32 %v911_v57, 16  ;;  %v1090_v37 = vshll.u32 %v912_v58, 16  ;;  %v1094_v38 = vshrl.u32 %v912_v58, 16  ;;  %v1069_v50 = vsel %vm14235_vm10, %v14387_v16, %v1068_v59  ;;  %v824_v46 = vld [vmem:[#allocation2 + $0x48] sm:$0xf] }
  0x4b   : > { %v1073_v60 = vor.u32 %v1072_v35, %v1068_v59  ;;  %v1083_v42 = vrot.slane %v1081_v36, 4  ;;  %v1100_v44 = vshll.u32 %v946_v51, 16  ;;  %v828_v48 = vld [vmem:[#allocation2 + $0x50] sm:$0x1]  ;;  %v825_v54 = vsel %vm14248_vm11, %v558_v27, %v824_v46  ;;  %v831_v55 = vld [vmem:[#allocation2 + $0x54] sm:$0xf] }
  0x4c   : > { %v1086_v47 = vrot.slane %v1084_v3, 5  ;;  %v1092_v49 = vrot.slane %v1090_v37, 5  ;;  %v1096_v52 = vrot.slane %v1094_v38, 4  ;;  %826 = vst [vmem:[#allocation2 + $0x48] sm:$0xf] %v825_v54  ;;  %v829_v0 = vsel %vm14184_vm4, %v568_v29, %v828_v48  ;;  %v354_v25 = vld [vmem:[%s14221_s8 + $0x88] sm:$0xff] }
  0x4d   : > { %v1074_v61 = vrot.slane %v1073_v60, 4  ;;  %v1102_v62 = vrot.slane %v1100_v44, 5  ;;  %v584_v1 = vsel %vm14254_vm12, %v576_v53, %v583_v39  ;;  %v835_v7 = vld [vmem:[#allocation2 + $0x5c] sm:$0x1]  ;;  %830 = vst [vmem:[#allocation2 + $0x50] sm:$0x1] %v829_v0  ;;  %v832_v11 = vsel %vm14248_vm11, %v575_v24, %v831_v55 }
  0x4e   : > { %v1087_v8 = vor.u32 %v1086_v47, %v1083_v42  ;;  %v1097_v9 = vor.u32 %v1096_v52, %v1092_v49  ;;  %v585_v10 = vrot.slane %v580_v22, 4  ;;  %834 = vst.msk [vmem:[#allocation2 + $0x58] sm:$0xf] %vm226_vm0, %v584_v1  ;;  %833 = vst [vmem:[#allocation2 + $0x54] sm:$0xf] %v832_v11  ;;  %v264_v16 = vsel %vm14184_vm4, 0, %v263_v41 }
  0x4f   : > { %v1079_v13 = vsel %vm14235_vm10, %v1074_v61, %v1078_v45  ;;  %v313_v12 = vld [vmem:[#allocation2 + $0x74] sm:$0x1]  ;;  %265 = vst [vmem:[#allocation2 + $0x6c] sm:$0x1] %v264_v16  ;;  %v587_v28 = vshrl.u32 %v12264_v14, 16  ;;  %v590_v2 = vshll.u32 %v12264_v14, 16  ;;  %v14428_v35 = vpack.c.bf16 %v353_v23, %v353_v23 }
  0x50   : > { %v11352_v18 = vcombine.low %v1069_v50, %v1079_v13  ;;  %v1088_v19 = vrot.slane %v1087_v8, 4  ;;  %v1098_v17 = vrot.slane %v1097_v9, 4  ;;  %v914_v20 = vld [vmem:[#allocation2 + $0x4c] sm:$0xf]  ;;  %v836_v21 = vsel %vm14184_vm4, %v585_v10, %v835_v7  ;;  %v838_v42 = vld [vmem:[#allocation2 + $0x60] sm:$0xf] }
  0x51   : > { %v1114_v26 = vshll.u32 %v914_v20, 16  ;;  %v1118_v27 = vshrl.u32 %v914_v20, 16  ;;  %837 = vst [vmem:[#allocation2 + $0x5c] sm:$0x1] %v836_v21  ;;  %v595_v31 = vshrl.u32 %v12265_v15, 16  ;;  %v598_v32 = vshll.u32 %v12265_v15, 16 }
  0x52   : > { %12690 = vmatprep.mubr.msk.bf16.mxu0 %vm1425_vm8, %v11352_v18  ;;  %v1093_v29 = vsel %vm14235_vm10, %v1088_v19, %v1092_v49  ;;  %v1103_v30 = vsel %vm14235_vm10, %v1098_v17, %v1102_v62  ;;  %v589_v53 = vrot.slane %v587_v28, 7  ;;  %v314_v59 = vsel %vm14189_vm6, 0, %v313_v12  ;;  %v842_v49 = vld [vmem:[#allocation2 + $0x68] sm:$0x1]  ;;  %v355_v13 = vld [vmem:[%s14221_s8 + $0x90] sm:$0xff] }
  0x53   : > { %v11353_v24 = vcombine.low %v1093_v29, %v1103_v30  ;;  %v1116_v57 = vrot.slane %v1114_v26, 5  ;;  %v1120_v33 = vrot.slane %v1118_v27, 4  ;;  %v913_v22 = vld [vmem:[#allocation2 + $0x48] sm:$0xf]  ;;  %v597_v34 = vrot.slane %v595_v31, 7  ;;  %v356_v29 = vld [vmem:[%s14221_s8 + $0x98] sm:$0xff] }
  0x54   : > { %v14430_v45 = vpack.c.bf16 %v354_v25, %v354_v25  ;;  %v947_v58 = vld [vmem:[#allocation2 + $0x50] sm:$0x1]  ;;  %v1105_v36 = vshrl.u32 %v913_v22, 16  ;;  %v1108_v51 = vshll.u32 %v913_v22, 16  ;;  %v592_v38 = vor.u32 %v590_v2, %v589_v53  ;;  %315 = vst [vmem:[#allocation2 + $0x74] sm:$0x1] %v314_v59 }
  0x55   : > { %12691 = vmatmul.mubr.msk.bf16.gmra.mrb[8].mxu0 %vm1425_vm8, %v11353_v24  ;;  %v1121_v3 = vor.u32 %v1120_v33, %v1116_v57  ;;  %v916_v37 = vld [vmem:[#allocation2 + $0x58] sm:$0xf]  ;;  %v1124_v39 = vshll.u32 %v947_v58, 16  ;;  %v915_v40 = vld [vmem:[#allocation2 + $0x54] sm:$0xf]  ;;  %v593_v60 = vrot.slane %v589_v53, 4  ;;  %v600_v7 = vor.u32 %v598_v32, %v597_v34 }
  0x56   : > { %v1138_v41 = vshll.u32 %v916_v37, 16  ;;  %v1142_v50 = vshrl.u32 %v916_v37, 16  ;;  %v1107_v44 = vrot.slane %v1105_v36, 4  ;;  %v1110_v46 = vrot.slane %v1108_v51, 5  ;;  %v266_v21 = vld [vmem:[#allocation2 + $0x78] sm:$0x1] }
  0x57   : > { %v1122_v48 = vrot.slane %v1121_v3, 4  ;;  %v1129_v47 = vshrl.u32 %v915_v40, 16  ;;  %v1126_v52 = vrot.slane %v1124_v39, 5  ;;  %v1132_v55 = vshll.u32 %v915_v40, 16  ;;  %v316_v23 = vld [vmem:[#allocation2 + $0x80] sm:$0x1] }
  0x58   : > { %v948_v54 = vld [vmem:[#allocation2 + $0x5c] sm:$0x1]  ;;  %v1140_v56 = vrot.slane %v1138_v41, 5  ;;  %v1144_v61 = vrot.slane %v1142_v50, 4  ;;  %v1111_v62 = vor.u32 %v1110_v46, %v1107_v44  ;;  %v602_v11 = vrot.slane %v597_v34, 4 }
  0x59   : > { %v1131_v0 = vrot.slane %v1129_v47, 4  ;;  %v1148_v1 = vshll.u32 %v948_v54, 16  ;;  %v1127_v8 = vsel %vm14235_vm10, %v1122_v48, %v1126_v52  ;;  %v1134_v9 = vrot.slane %v1132_v55, 5  ;;  %v845_v2 = vld [vmem:[#allocation2 + $0x6c] sm:$0xf] }
  0x5a   : > { %v1145_v10 = vor.u32 %v1144_v61, %v1140_v56  ;;  %v1112_v14 = vrot.slane %v1111_v62, 4  ;;  %v601_v16 = vsel %vm14254_vm12, %v593_v60, %v600_v7  ;;  %v839_v12 = vsel %vm14248_vm11, %v592_v38, %v838_v42  ;;  %v269_v53 = vld [vmem:[#allocation2 + $0x84] sm:$0x1]  ;;  %v319_v52 = vld [vmem:[#allocation2 + $0x8c] sm:$0x1] }
  0x5b   : > { %v1150_v15 = vrot.slane %v1148_v1, 5  ;;  %v1135_v18 = vor.u32 %v1134_v9, %v1131_v0  ;;  %840 = vst [vmem:[#allocation2 + $0x60] sm:$0xf] %v839_v12  ;;  %841 = vst.msk [vmem:[#allocation2 + $0x64] sm:$0xf] %vm226_vm0, %v601_v16  ;;  %v843_v17 = vsel %vm14184_vm4, %v602_v11, %v842_v49  ;;  %v604_v20 = vshrl.u32 %v14428_v35, 16 }
  0x5c   : > { %v1146_v19 = vrot.slane %v1145_v10, 4  ;;  %v1117_v25 = vsel %vm14235_vm10, %v1112_v14, %v1116_v57  ;;  %844 = vst [vmem:[#allocation2 + $0x68] sm:$0x1] %v843_v17  ;;  %v607_v26 = vshll.u32 %v14428_v35, 16  ;;  %v612_v27 = vshrl.u32 %v14430_v45, 16  ;;  %v357_v60 = vld [vmem:[%s14221_s8 + $0xa0] sm:$0xff] }
  0x5d   : > { %v615_v28 = vshll.u32 %v14430_v45, 16  ;;  %v11354_v30 = vcombine.low %v1117_v25, %v1127_v8  ;;  %v1136_v31 = vrot.slane %v1135_v18, 4  ;;  %v606_v24 = vrot.slane %v604_v20, 7  ;;  %v849_v33 = vld [vmem:[#allocation2 + $0x74] sm:$0x1]  ;;  %v358_v9 = vld [vmem:[%s14221_s8 + $0xa8] sm:$0xff] }
  0x5e   : > { %v1151_v32 = vsel %vm14235_vm10, %v1146_v19, %v1150_v15  ;;  %v614_v22 = vrot.slane %v612_v27, 7  ;;  %v267_v57 = vsel %vm14184_vm4, 0, %v266_v21  ;;  %v317_v34 = vsel %vm14189_vm6, 0, %v316_v23  ;;  %v272_v10 = vld [vmem:[#allocation2 + $0x90] sm:$0x1] }
  0x5f   : > { %v12268_v59 = vpack.c.bf16 %v355_v13, %v355_v13  ;;  %12694 = vmatprep.mubr.msk.bf16.mxu0 %vm1425_vm8, %v11354_v30  ;;  %v1141_v35 = vsel %vm14235_vm10, %v1136_v31, %v1140_v56  ;;  %v609_v45 = vor.u32 %v607_v26, %v606_v24  ;;  %v610_v58 = vrot.slane %v606_v24, 4  ;;  %268 = vst [vmem:[#allocation2 + $0x78] sm:$0x1] %v267_v57  ;;  %v359_v16 = vld [vmem:[%s14221_s8 + $0xb0] sm:$0xff] }
  0x60   : > { %318 = vst [vmem:[#allocation2 + $0x80] sm:$0x1] %v317_v34  ;;  %v12269_v36 = vpack.c.bf16 %v356_v29, %v356_v29  ;;  %v11355_v51 = vcombine.low %v1141_v35, %v1151_v32  ;;  %v617_v3 = vor.u32 %v615_v28, %v614_v22  ;;  %v619_v37 = vrot.slane %v614_v22, 4  ;;  %v360_v28 = vld [vmem:[%s14221_s8 + $0xb8] sm:$0xff] }
  0x61   : > { %v621_v38 = vshrl.u32 %v12268_v59, 16  ;;  %v846_v39 = vsel %vm14248_vm11, %v609_v45, %v845_v2  ;;  %v624_v40 = vshll.u32 %v12268_v59, 16  ;;  %v270_v49 = vsel %vm14184_vm4, 0, %v269_v53 }
  0x62   : > { %v629_v41 = vshrl.u32 %v12269_v36, 16  ;;  %v632_v50 = vshll.u32 %v12269_v36, 16  ;;  %12695 = vmatmul.mubr.msk.bf16.gmra.mrb[12].mxu0 %vm1425_vm8, %v11355_v51  ;;  %v14463_v42 = vld [vmem:[#allocation2 + $0x60] sm:$0xf]  ;;  %v14465_v44 = vld [vmem:[#allocation2 + $0x64] sm:$0xf]  ;;  %v618_v46 = vsel %vm14254_vm12, %v610_v58, %v617_v3  ;;  %v850_v48 = vsel %vm14184_vm4, %v619_v37, %v849_v33 }
  0x63   : > { %847 = vst [vmem:[#allocation2 + $0x6c] sm:$0xf] %v846_v39  ;;  %v623_v47 = vrot.slane %v621_v38, 7  ;;  %v949_v54 = vld [vmem:[#allocation2 + $0x68] sm:$0x1]  ;;  %v1153_v55 = vshrl.u32 %v14463_v42, 16  ;;  %v12270_v21 = vpack.c.bf16 %v357_v60, %v357_v60  ;;  %v12271_v30 = vpack.c.bf16 %v358_v9, %v358_v9 }
  0x64   : > { %v1156_v56 = vshll.u32 %v14463_v42, 16  ;;  %v1162_v61 = vshll.u32 %v14465_v44, 16  ;;  %v1166_v62 = vshrl.u32 %v14465_v44, 16  ;;  %848 = vst.msk [vmem:[#allocation2 + $0x70] sm:$0xf] %vm226_vm0, %v618_v46  ;;  %v1172_v0 = vshll.u32 %v949_v54, 16 }
  0x65   : > { %851 = vst [vmem:[#allocation2 + $0x74] sm:$0x1] %v850_v48  ;;  %271 = vst [vmem:[#allocation2 + $0x84] sm:$0x1] %v270_v49  ;;  %v626_v1 = vor.u32 %v624_v40, %v623_v47  ;;  %v627_v7 = vrot.slane %v623_v47, 4  ;;  %v631_v8 = vrot.slane %v629_v41, 7  ;;  %v14498_v45 = vpack.c.bf16 %v359_v16, %v359_v16 }
  0x66   : > { %v1155_v11 = vrot.slane %v1153_v55, 4  ;;  %v1158_v13 = vrot.slane %v1156_v56, 5  ;;  %v1164_v14 = vrot.slane %v1162_v61, 5  ;;  %v1168_v15 = vrot.slane %v1166_v62, 4  ;;  %v852_v17 = vld [vmem:[#allocation2 + $0x78] sm:$0xf] }
  0x67   : > { %v1174_v12 = vrot.slane %v1172_v0, 5  ;;  %v634_v18 = vor.u32 %v632_v50, %v631_v8  ;;  %v636_v19 = vrot.slane %v631_v8, 4  ;;  %v856_v20 = vld [vmem:[#allocation2 + $0x80] sm:$0x1]  ;;  %v853_v26 = vsel %vm14248_vm11, %v626_v1, %v852_v17  ;;  %v322_v38 = vld [vmem:[#allocation2 + $0x98] sm:$0x1] }
  0x68   : > { %v1159_v23 = vor.u32 %v1158_v13, %v1155_v11  ;;  %v1169_v25 = vor.u32 %v1168_v15, %v1164_v14  ;;  %v320_v27 = vsel %vm14189_vm6, 0, %v319_v52  ;;  %854 = vst [vmem:[#allocation2 + $0x78] sm:$0xf] %v853_v26  ;;  %v638_v31 = vshrl.u32 %v12270_v21, 16  ;;  %v361_v60 = vld [vmem:[%s14221_s8 + $0xc0] sm:$0xff]  ;;  %v362_v46 = vld [vmem:[%s14221_s8 + $0xc8] sm:$0xff] }
  0x69   : > { %v635_v2 = vsel %vm14254_vm12, %v627_v7, %v634_v18  ;;  %v857_v29 = vsel %vm14184_vm4, %v636_v19, %v856_v20  ;;  %321 = vst [vmem:[#allocation2 + $0x8c] sm:$0x1] %v320_v27  ;;  %v641_v53 = vshll.u32 %v12270_v21, 16  ;;  %v273_v22 = vsel %vm14184_vm4, 0, %v272_v10  ;;  %v275_v26 = vld [vmem:[#allocation2 + $0x9c] sm:$0x1] }
  0x6a   : > { %v1160_v32 = vrot.slane %v1159_v23, 4  ;;  %v1170_v24 = vrot.slane %v1169_v25, 4  ;;  %v14489_v33 = vld [vmem:[#allocation2 + $0x6c] sm:$0xf]  ;;  %855 = vst.msk [vmem:[#allocation2 + $0x7c] sm:$0xf] %vm226_vm0, %v635_v2  ;;  %v14500_v58 = vpack.c.bf16 %v360_v28, %v360_v28  ;;  %v14520_v15 = vpack.c.bf16 %v362_v46, %v362_v46 }
  0x6b   : > { %858 = vst [vmem:[#allocation2 + $0x80] sm:$0x1] %v857_v29  ;;  %v14494_v57 = vld [vmem:[#allocation2 + $0x70] sm:$0xf]  ;;  %v1177_v59 = vshrl.u32 %v14489_v33, 16  ;;  %v1180_v35 = vshll.u32 %v14489_v33, 16 }
  0x6c   : > { %v950_v34 = vld [vmem:[#allocation2 + $0x74] sm:$0x1]  ;;  %274 = vst [vmem:[#allocation2 + $0x90] sm:$0x1] %v273_v22  ;;  %v1165_v36 = vsel %vm14235_vm10, %v1160_v32, %v1164_v14  ;;  %v1175_v51 = vsel %vm14235_vm10, %v1170_v24, %v1174_v12  ;;  %v1186_v3 = vshll.u32 %v14494_v57, 16  ;;  %v1190_v37 = vshrl.u32 %v14494_v57, 16 }
  0x6d   : > { %v11356_v39 = vcombine.low %v1165_v36, %v1175_v51  ;;  %v1179_v40 = vrot.slane %v1177_v59, 4  ;;  %v1182_v41 = vrot.slane %v1180_v35, 5  ;;  %v1196_v50 = vshll.u32 %v950_v34, 16  ;;  %v859_v17 = vld [vmem:[#allocation2 + $0x84] sm:$0xf] }
  0x6e   : > { %v1188_v48 = vrot.slane %v1186_v3, 5  ;;  %v1192_v47 = vrot.slane %v1190_v37, 4  ;;  %v640_v49 = vrot.slane %v638_v31, 7  ;;  %v646_v52 = vshrl.u32 %v12271_v30, 16  ;;  %v325_v22 = vld [vmem:[#allocation2 + $0xa4] sm:$0x1] }
  0x6f   : > { %12698 = vmatprep.mubr.msk.bf16.mxu0 %vm1425_vm8, %v11356_v39  ;;  %v1183_v54 = vor.u32 %v1182_v41, %v1179_v40  ;;  %v1198_v55 = vrot.slane %v1196_v50, 5  ;;  %v649_v56 = vshll.u32 %v12271_v30, 16  ;;  %v323_v61 = vsel %vm14189_vm6, 0, %v322_v38  ;;  %v14513_v0 = vld [vmem:[#allocation2 + $0x78] sm:$0xf] }
  0x70   : > { %v1193_v62 = vor.u32 %v1192_v47, %v1188_v48  ;;  %v643_v1 = vor.u32 %v641_v53, %v640_v49  ;;  %v644_v7 = vrot.slane %v640_v49, 4  ;;  %v648_v8 = vrot.slane %v646_v52, 7  ;;  %324 = vst [vmem:[#allocation2 + $0x98] sm:$0x1] %v323_v61  ;;  %v863_v30 = vld [vmem:[#allocation2 + $0x8c] sm:$0x1] }
  0x71   : > { %v1184_v9 = vrot.slane %v1183_v54, 4  ;;  %v14515_v10 = vld [vmem:[#allocation2 + $0x7c] sm:$0xf]  ;;  %v1201_v13 = vshrl.u32 %v14513_v0, 16  ;;  %v14518_v14 = vpack.c.bf16 %v361_v60, %v361_v60  ;;  %v1204_v12 = vshll.u32 %v14513_v0, 16 }
  0x72   : > { %v951_v11 = vld [vmem:[#allocation2 + $0x80] sm:$0x1]  ;;  %v1194_v16 = vrot.slane %v1193_v62, 4  ;;  %v1210_v18 = vshll.u32 %v14515_v10, 16  ;;  %v1214_v19 = vshrl.u32 %v14515_v10, 16  ;;  %v651_v25 = vor.u32 %v649_v56, %v648_v8 }
  0x73   : > { %v1189_v20 = vsel %vm14235_vm10, %v1184_v9, %v1188_v48  ;;  %v1203_v21 = vrot.slane %v1201_v13, 4  ;;  %v1220_v23 = vshll.u32 %v951_v11, 16  ;;  %v1206_v28 = vrot.slane %v1204_v12, 5  ;;  %v866_v39 = vld [vmem:[#allocation2 + $0x90] sm:$0xf]  ;;  %v364_v12 = vld [vmem:[%s14221_s8 + $0xd8] sm:$0xff] }
  0x74   : > { %v1199_v27 = vsel %vm14235_vm10, %v1194_v16, %v1198_v55  ;;  %v1212_v2 = vrot.slane %v1210_v18, 5  ;;  %v1216_v29 = vrot.slane %v1214_v19, 4  ;;  %v652_v24 = vsel %vm14254_vm12, %v644_v7, %v651_v25  ;;  %v278_v40 = vld [vmem:[#allocation2 + $0xa8] sm:$0x1]  ;;  %v363_v16 = vld [vmem:[%s14221_s8 + $0xd0] sm:$0xff] }
  0x75   : > { %v11357_v31 = vcombine.low %v1189_v20, %v1199_v27  ;;  %v1222_v32 = vrot.slane %v1220_v23, 5  ;;  %v653_v53 = vrot.slane %v648_v8, 4  ;;  %v1207_v34 = vor.u32 %v1206_v28, %v1203_v21  ;;  %862 = vst.msk [vmem:[#allocation2 + $0x88] sm:$0xf] %vm226_vm0, %v652_v24  ;;  %v328_v8 = vld [vmem:[#allocation2 + $0xb0] sm:$0x1] }
  0x76   : > { %v1217_v59 = vor.u32 %v1216_v29, %v1212_v2  ;;  %v860_v35 = vsel %vm14248_vm11, %v643_v1, %v859_v17  ;;  %v655_v36 = vshrl.u32 %v14498_v45, 16  ;;  %v658_v3 = vshll.u32 %v14498_v45, 16 }
  0x77   : > { %12699 = vmatmul.mubr.msk.bf16.gmra.mrb[16].mxu0 %vm1425_vm8, %v11357_v31  ;;  %861 = vst [vmem:[#allocation2 + $0x84] sm:$0xf] %v860_v35  ;;  %v864_v51 = vsel %vm14184_vm4, %v653_v53, %v863_v30  ;;  %v663_v37 = vshrl.u32 %v14500_v58, 16  ;;  %v666_v38 = vshll.u32 %v14500_v58, 16  ;;  %v1208_v41 = vrot.slane %v1207_v34, 4  ;;  %v365_v35 = vld [vmem:[%s14221_s8 + $0xe0] sm:$0xff] }
  0x78   : > { %v1218_v50 = vrot.slane %v1217_v59, 4  ;;  %865 = vst [vmem:[#allocation2 + $0x8c] sm:$0x1] %v864_v51  ;;  %v657_v60 = vrot.slane %v655_v36, 7  ;;  %v870_v46 = vld [vmem:[#allocation2 + $0x98] sm:$0x1]  ;;  %v12276_v30 = vpack.c.bf16 %v363_v16, %v363_v16  ;;  %v14577_v31 = vpack.c.bf16 %v364_v12, %v364_v12 }
  0x79   : > { %v276_v48 = vsel %vm14184_vm4, 0, %v275_v26  ;;  %v665_v47 = vrot.slane %v663_v37, 7  ;;  %v326_v49 = vsel %vm14189_vm6, 0, %v325_v22  ;;  %v672_v45 = vshrl.u32 %v14518_v14, 16 }
  0x7a   : > { %277 = vst [vmem:[#allocation2 + $0x9c] sm:$0x1] %v276_v48  ;;  %v675_v58 = vshll.u32 %v14518_v14, 16  ;;  %v1213_v52 = vsel %vm14235_vm10, %v1208_v41, %v1212_v2  ;;  %v1223_v54 = vsel %vm14235_vm10, %v1218_v50, %v1222_v32  ;;  %v660_v55 = vor.u32 %v658_v3, %v657_v60  ;;  %327 = vst [vmem:[#allocation2 + $0xa4] sm:$0x1] %v326_v49 }
  0x7b   : > { %v661_v56 = vrot.slane %v657_v60, 4  ;;  %v11358_v61 = vcombine.low %v1213_v52, %v1223_v54  ;;  %v668_v62 = vor.u32 %v666_v38, %v665_v47  ;;  %v670_v1 = vrot.slane %v665_v47, 4  ;;  %v281_v32 = vld [vmem:[#allocation2 + $0xb4] sm:$0x1] }
  0x7c   : > { %v674_v7 = vrot.slane %v672_v45, 7  ;;  %v867_v9 = vsel %vm14248_vm11, %v660_v55, %v866_v39  ;;  %v680_v11 = vshrl.u32 %v14520_v15, 16  ;;  %v683_v13 = vshll.u32 %v14520_v15, 16  ;;  %v14560_v18 = vld [vmem:[#allocation2 + $0x88] sm:$0xf] }
  0x7d   : > { %v279_v14 = vsel %vm14184_vm4, 0, %v278_v40  ;;  %12702 = vmatprep.mubr.msk.bf16.mxu0 %vm1425_vm8, %v11358_v61  ;;  %v669_v19 = vsel %vm14254_vm12, %v661_v56, %v668_v62  ;;  %868 = vst [vmem:[#allocation2 + $0x90] sm:$0xf] %v867_v9  ;;  %v871_v17 = vsel %vm14184_vm4, %v670_v1, %v870_v46  ;;  %v1234_v23 = vshll.u32 %v14560_v18, 16  ;;  %v366_v39 = vld [vmem:[%s14221_s8 + $0xe8] sm:$0xff] }
  0x7e   : > { %v677_v20 = vor.u32 %v675_v58, %v674_v7  ;;  %v678_v21 = vrot.slane %v674_v7, 4  ;;  %280 = vst [vmem:[#allocation2 + $0xa8] sm:$0x1] %v279_v14  ;;  %v14566_v15 = vld [vmem:[#allocation2 + $0x84] sm:$0xf]  ;;  %v1238_v25 = vshrl.u32 %v14560_v18, 16  ;;  %v14600_v7 = vpack.c.bf16 %v365_v35, %v365_v35 }
  0x7f   : > { %869 = vst.msk [vmem:[#allocation2 + $0x94] sm:$0xf] %vm226_vm0, %v669_v19  ;;  %872 = vst [vmem:[#allocation2 + $0x98] sm:$0x1] %v871_v17  ;;  %v682_v26 = vrot.slane %v680_v11, 7  ;;  %v329_v27 = vsel %vm14189_vm6, 0, %v328_v8  ;;  %v14602_v8 = vpack.c.bf16 %v366_v39, %v366_v39 }
  0x80   : > { %v14573_v28 = vld [vmem:[#allocation2 + $0x8c] sm:$0x1]  ;;  %v1225_v2 = vshrl.u32 %v14566_v15, 16  ;;  %v1228_v29 = vshll.u32 %v14566_v15, 16  ;;  %330 = vst [vmem:[#allocation2 + $0xb0] sm:$0x1] %v329_v27 }
  0x81   : > { %v1236_v24 = vrot.slane %v1234_v23, 5  ;;  %v1240_v53 = vrot.slane %v1238_v25, 4  ;;  %v1244_v22 = vshll.u32 %v14573_v28, 16  ;;  %v685_v34 = vor.u32 %v683_v13, %v682_v26  ;;  %v873_v59 = vld [vmem:[#allocation2 + $0x9c] sm:$0xf] }
  0x82   : > { %v1227_v36 = vrot.slane %v1225_v2, 4  ;;  %v1230_v51 = vrot.slane %v1228_v29, 5  ;;  %v687_v3 = vrot.slane %v682_v26, 4  ;;  %v874_v37 = vsel %vm14248_vm11, %v677_v20, %v873_v59  ;;  %v877_v38 = vld [vmem:[#allocation2 + $0xa4] sm:$0x1] }
  0x83   : > { %v1241_v40 = vor.u32 %v1240_v53, %v1236_v24  ;;  %v1246_v41 = vrot.slane %v1244_v22, 5  ;;  %v686_v50 = vsel %vm14254_vm12, %v678_v21, %v685_v34  ;;  %875 = vst [vmem:[#allocation2 + $0x9c] sm:$0xf] %v874_v37  ;;  %v689_v60 = vshrl.u32 %v12276_v30, 16 }
  0x84   : > { %v1231_v46 = vor.u32 %v1230_v51, %v1227_v36  ;;  %876 = vst.msk [vmem:[#allocation2 + $0xa0] sm:$0xf] %vm226_vm0, %v686_v50  ;;  %v878_v48 = vsel %vm14184_vm4, %v687_v3, %v877_v38  ;;  %v692_v47 = vshll.u32 %v12276_v30, 16  ;;  %v697_v49 = vshrl.u32 %v14577_v31, 16  ;;  %v14590_v58 = vld [vmem:[#allocation2 + $0x90] sm:$0xf] }
  0x85   : > { %v1242_v45 = vrot.slane %v1241_v40, 4  ;;  %879 = vst [vmem:[#allocation2 + $0xa4] sm:$0x1] %v878_v48  ;;  %v691_v52 = vrot.slane %v689_v60, 7  ;;  %v700_v54 = vshll.u32 %v14577_v31, 16  ;;  %v282_v55 = vsel %vm14184_vm4, 0, %v281_v32 }
  0x86   : > { %v1232_v56 = vrot.slane %v1231_v46, 4  ;;  %v14595_v61 = vld [vmem:[#allocation2 + $0x94] sm:$0xf]  ;;  %v14597_v62 = vld [vmem:[#allocation2 + $0x98] sm:$0x1]  ;;  %v1249_v1 = vshrl.u32 %v14590_v58, 16 }
  0x87   : > { %283 = vst [vmem:[#allocation2 + $0xb4] sm:$0x1] %v282_v55  ;;  %v1247_v9 = vsel %vm14235_vm10, %v1242_v45, %v1246_v41  ;;  %v1252_v11 = vshll.u32 %v14590_v58, 16  ;;  %v1258_v13 = vshll.u32 %v14595_v61, 16  ;;  %v1262_v14 = vshrl.u32 %v14595_v61, 16 }
  0x88   : > { %v880_v16 = vld [vmem:[#allocation2 + $0xa8] sm:$0xf]  ;;  %v1237_v12 = vsel %vm14235_vm10, %v1232_v56, %v1236_v24  ;;  %v1251_v19 = vrot.slane %v1249_v1, 4  ;;  %v1268_v17 = vshll.u32 %v14597_v62, 16  ;;  %v694_v20 = vor.u32 %v692_v47, %v691_v52  ;;  %v884_v32 = vld [vmem:[#allocation2 + $0xb0] sm:$0x1] }
  0x89   : > { %v11359_v21 = vcombine.low %v1237_v12, %v1247_v9  ;;  %v1254_v23 = vrot.slane %v1252_v11, 5  ;;  %v1260_v25 = vrot.slane %v1258_v13, 5  ;;  %v1264_v26 = vrot.slane %v1262_v14, 4  ;;  %v331_v50 = vld [vmem:[#allocation2 + $0xbc] sm:$0x1] }
  0x8a   : > { %v1270_v27 = vrot.slane %v1268_v17, 5  ;;  %v14612_v2 = vld [vmem:[#allocation2 + $0x9c] sm:$0xf]  ;;  %v695_v29 = vrot.slane %v691_v52, 4  ;;  %v699_v30 = vrot.slane %v697_v49, 7  ;;  %v881_v31 = vsel %vm14248_vm11, %v694_v20, %v880_v16 }
  0x8b   : > { %12703 = vmatmul.mubr.msk.bf16.gmra.mrb[20].mxu0 %vm1425_vm8, %v11359_v21  ;;  %v1255_v24 = vor.u32 %v1254_v23, %v1251_v19  ;;  %v1265_v53 = vor.u32 %v1264_v26, %v1260_v25  ;;  %v14617_v22 = vld [vmem:[#allocation2 + $0xa0] sm:$0xf]  ;;  %v1273_v34 = vshrl.u32 %v14612_v2, 16  ;;  %v1276_v59 = vshll.u32 %v14612_v2, 16  ;;  %882 = vst [vmem:[#allocation2 + $0xa8] sm:$0xf] %v881_v31 }
  0x8c   : > { %v14621_v35 = vld [vmem:[#allocation2 + $0xa4] sm:$0x1]  ;;  %v1282_v36 = vshll.u32 %v14617_v22, 16  ;;  %v1286_v51 = vshrl.u32 %v14617_v22, 16  ;;  %v702_v3 = vor.u32 %v700_v54, %v699_v30  ;;  %v704_v37 = vrot.slane %v699_v30, 4 }
  0x8d   : > { %v1256_v38 = vrot.slane %v1255_v24, 4  ;;  %v1266_v39 = vrot.slane %v1265_v53, 4  ;;  %v1275_v40 = vrot.slane %v1273_v34, 4  ;;  %v1278_v41 = vrot.slane %v1276_v59, 5 }
  0x8e   : > { %v1284_v60 = vrot.slane %v1282_v36, 5  ;;  %v1288_v46 = vrot.slane %v1286_v51, 4  ;;  %v1292_v48 = vshll.u32 %v14621_v35, 16  ;;  %v703_v47 = vsel %vm14254_vm12, %v695_v29, %v702_v3 }
  0x8f   : > { %v1261_v49 = vsel %vm14235_vm10, %v1256_v38, %v1260_v25  ;;  %v1271_v45 = vsel %vm14235_vm10, %v1266_v39, %v1270_v27  ;;  %v1279_v52 = vor.u32 %v1278_v41, %v1275_v40  ;;  %883 = vst.msk [vmem:[#allocation2 + $0xac] sm:$0xf] %vm226_vm0, %v703_v47  ;;  %v885_v54 = vsel %vm14184_vm4, %v704_v37, %v884_v32  ;;  %v887_v27 = vld [vmem:[#allocation2 + $0xb4] sm:$0xf] }
  0x90   : > { %v11360_v55 = vcombine.low %v1261_v49, %v1271_v45  ;;  %v1289_v56 = vor.u32 %v1288_v46, %v1284_v60  ;;  %v1294_v1 = vrot.slane %v1292_v48, 5  ;;  %886 = vst [vmem:[#allocation2 + $0xb0] sm:$0x1] %v885_v54  ;;  %v332_v9 = vsel %vm14189_vm6, 0, %v331_v50 }
  0x91   : > { %v1280_v11 = vrot.slane %v1279_v52, 4  ;;  %333 = vst [vmem:[#allocation2 + $0xbc] sm:$0x1] %v332_v9  ;;  %v706_v13 = vshrl.u32 %v14600_v7, 16  ;;  %v709_v14 = vshll.u32 %v14600_v7, 16  ;;  %v714_v16 = vshrl.u32 %v14602_v8, 16 }
  0x92   : > { %12706 = vmatprep.mubr.msk.bf16.mxu0 %vm1425_vm8, %v11360_v55  ;;  %v1290_v12 = vrot.slane %v1289_v56, 4  ;;  %v14641_v19 = vld [vmem:[#allocation2 + $0xa8] sm:$0xf]  ;;  %v717_v17 = vshll.u32 %v14602_v8, 16  ;;  %vm1996_vm13 = vcmask 1042432   ;;  %vm1997_vm14 = vcmask 1046532  }
  0x93   : > { %v1285_v20 = vsel %vm14235_vm10, %v1280_v11, %v1284_v60  ;;  %v1297_v21 = vshrl.u32 %v14641_v19, 16  ;;  %v1300_v23 = vshll.u32 %v14641_v19, 16  ;;  %v708_v25 = vrot.slane %v706_v13, 7  ;;  %vm14767_vm15 = vmor %vm1996_vm13, %vm1997_vm14 }
  0x94   : > { %v1295_v7 = vsel %vm14235_vm10, %v1290_v12, %v1294_v1  ;;  %v716_v26 = vrot.slane %v714_v16, 7 }
  0x95   : > { %v11361_v29 = vcombine.low %v1285_v20, %v1295_v7  ;;  %v1299_v30 = vrot.slane %v1297_v21, 4  ;;  %v1302_v31 = vrot.slane %v1300_v23, 5  ;;  %v711_v32 = vor.u32 %v709_v14, %v708_v25 }
  0x96   : > { %v14650_v24 = vld [vmem:[#allocation2 + $0xac] sm:$0xf]  ;;  %v712_v8 = vrot.slane %v708_v25, 4  ;;  %v719_v53 = vor.u32 %v717_v17, %v716_v26  ;;  %v721_v34 = vrot.slane %v716_v26, 4 }
  0x97   : > { %12707 = vmatmul.mubr.msk.bf16.gmra.mrb[24].mxu0 %vm1425_vm8, %v11361_v29  ;;  %v14653_v59 = vld [vmem:[#allocation2 + $0xb0] sm:$0x1]  ;;  %v1303_v36 = vor.u32 %v1302_v31, %v1299_v30  ;;  %v1306_v51 = vshll.u32 %v14650_v24, 16  ;;  %v1310_v3 = vshrl.u32 %v14650_v24, 16  ;;  %v888_v37 = vsel %vm14248_vm11, %v711_v32, %v887_v27  ;;  %v14061_v31 = vld [vmem:[#allocation2] sm:$0xf] }
  0x98   : > { %v1316_v38 = vshll.u32 %v14653_v59, 16  ;;  %v720_v39 = vsel %vm14254_vm12, %v712_v8, %v719_v53  ;;  %889 = vst [vmem:[#allocation2 + $0xb4] sm:$0xf] %v888_v37  ;;  %v891_v40 = vld [vmem:[#allocation2 + $0xbc] sm:$0x1] }
  0x99   : > { %v1304_v41 = vrot.slane %v1303_v36, 4  ;;  %v1308_v50 = vrot.slane %v1306_v51, 5  ;;  %v1312_v60 = vrot.slane %v1310_v3, 4  ;;  %890 = vst.msk [vmem:[#allocation2 + $0xb8] sm:$0xf] %vm226_vm0, %v720_v39  ;;  %v892_v46 = vsel %vm14184_vm4, %v721_v34, %v891_v40  ;;  %v13924_v39 = vld [vmem:[%s17765_s1 + $0x48] sm:$0xff]  }
  0x9a   : > { %v1318_v48 = vrot.slane %v1316_v38, 5  ;;  %893 = vst [vmem:[#allocation2 + $0xbc] sm:$0x1] %v892_v46  ;;  %v14685_v32 = vld [vmem:[#allocation2 + $0x4] sm:$0xf] }
  0x9b   : > { %v1313_v47 = vor.u32 %v1312_v60, %v1308_v50  ;;  %v1309_v49 = vsel %vm14235_vm10, %v1304_v41, %v1308_v50  ;;  %v11384_v8 = vcombine.low %v14061_v31, %v14685_v32  ;;  %v14063_v34 = vld [vmem:[#allocation2 + $0xc] sm:$0xf]  ;;  %v14690_v36 = vld [vmem:[#allocation2 + $0x10] sm:$0xf]  ;;  %v14065_v3 = vld [vmem:[#allocation2 + $0x18] sm:$0xf] }
  0x9c   : > { %v11385_v51 = vcombine.low %v14063_v34, %v14690_v36  ;;  %v14693_v37 = vld [vmem:[#allocation2 + $0x1c] sm:$0xf]  ;;  %v14067_v40 = vld [vmem:[%s17765_s1 + $0x40] sm:$0xff]   ;;  %v13925_v41 = vld [vmem:[%s17765_s1 + $0x50] sm:$0xff]  }
  0x9d   : > { %v1314_v45 = vrot.slane %v1313_v47, 4  ;;  %v11386_v38 = vcombine.low %v14065_v3, %v14693_v37  ;;  %v14068_v50 = vld [vmem:[#allocation2 + $0x24] sm:$0xf]  ;;  %v14707_v60 = vld [vmem:[#allocation2 + $0x28] sm:$0xf] }
  0x9e   : > { %v11387_v46 = vcombine.low %v14068_v50, %v14707_v60  ;;  %v14710_v47 = vld [vmem:[#allocation2 + $0x34] sm:$0xf]  ;;  %v1948_v34 = vld [vmem:[#allocation2] sm:$0xe] }
  0x9f   : > { %v1319_v52 = vsel %vm14235_vm10, %v1314_v45, %v1318_v48  ;;  %v14669_v54 = vld [vmem:[#allocation2 + $0xb4] sm:$0xf]  ;;  %v14070_v48 = vld [vmem:[#allocation2 + $0x30] sm:$0xf]  ;;  %v13926_v45 = vld [vmem:[%s17765_s1 + $0x58] sm:$0xff]   ;;  %v11420_v50 = vrot.slane %v1948_v34, 9 }
  0xa0   : > { %v11362_v55 = vcombine.low %v1309_v49, %v1319_v52  ;;  %v14671_v56 = vld [vmem:[#allocation2 + $0xb8] sm:$0xf]  ;;  %v1321_v1 = vshrl.u32 %v14669_v54, 16  ;;  %v1324_v9 = vshll.u32 %v14669_v54, 16  ;;  %v11388_v49 = vcombine.low %v14070_v48, %v14710_v47  ;;  %v14721_v52 = vld [vmem:[%s17765_s1 + $0x60] sm:$0xff]  }
  0xa1   : > { %v14675_v11 = vld [vmem:[#allocation2 + $0xbc] sm:$0x1]  ;;  %v1330_v13 = vshll.u32 %v14671_v56, 16  ;;  %v1334_v14 = vshrl.u32 %v14671_v56, 16 }
  0xa2   : > { %12710 = vmatprep.mubr.msk.bf16.mxu0 %vm1425_vm8, %v11362_v55  ;;  %v1323_v16 = vrot.slane %v1321_v1, 4  ;;  %v1326_v12 = vrot.slane %v1324_v9, 5  ;;  %v1340_v17 = vshll.u32 %v14675_v11, 16  ;;  %v14072_v55 = vld [vmem:[#allocation2 + $0x3c] sm:$0xf] }
  0xa3   : > { %v1332_v20 = vrot.slane %v1330_v13, 5  ;;  %v1336_v21 = vrot.slane %v1334_v14, 4  ;;  %v14723_v1 = vld [vmem:[#allocation2 + $0x40] sm:$0xf]  ;;  %v14726_v13 = vld [vmem:[#allocation2 + $0x4c] sm:$0xf] }
  0xa4   : > { %v1327_v23 = vor.u32 %v1326_v12, %v1323_v16  ;;  %v1342_v7 = vrot.slane %v1340_v17, 5  ;;  %v11389_v9 = vcombine.low %v14072_v55, %v14723_v1  ;;  %v14075_v14 = vld [vmem:[#allocation2 + $0x48] sm:$0xf]  ;;  %v14732_v12 = vld [vmem:[#allocation2 + $0x58] sm:$0xf] }
  0xa5   : > { %v1337_v25 = vor.u32 %v1336_v21, %v1332_v20  ;;  %v11390_v16 = vcombine.low %v14075_v14, %v14726_v13  ;;  %v14077_v17 = vld [vmem:[#allocation2 + $0x54] sm:$0xf]  ;;  %v11392_v21 = vcombine.low %v14463_v42, %v14465_v44  ;;  %v11396_v42 = vcombine.low %v14590_v58, %v14595_v61  ;;  %v1950_v14 = vld [vmem:[#allocation2 + $0x18] sm:$0xe] }
  0xa6   : > { %v1328_v26 = vrot.slane %v1327_v23, 4  ;;  %v11393_v23 = vcombine.low %v14489_v33, %v14494_v57 }
  0xa7   : > { %v1338_v27 = vrot.slane %v1337_v25, 4  ;;  %v11394_v25 = vcombine.low %v14513_v0, %v14515_v10 }
  0xa8   : > { %v1333_v29 = vsel %vm14235_vm10, %v1328_v26, %v1332_v20  ;;  %v11391_v20 = vcombine.low %v14077_v17, %v14732_v12  ;;  %v284_v26 = vld [vmem:[#allocation2 + $0xc0] sm:$0x1]  ;;  %v14079_v17 = vld [vmem:[#allocation2 + $0x14] sm:$0x1] }
  0xa9   : > { %v1343_v30 = vsel %vm14235_vm10, %v1338_v27, %v1342_v7  ;;  %v11395_v7 = vcombine.low %v14566_v15, %v14560_v18  ;;  %v285_v44 = vsel %vm14184_vm4, 0, %v284_v26  ;;  %v367_v27 = vld [vmem:[%s14221_s8 + $0xf0] sm:$0xff]  ;;  %v2001_v15 = vrot.slane %v14685_v32, 5 }
  0xaa   : > { %v11363_v53 = vcombine.low %v1333_v29, %v1343_v30  ;;  %v368_v29 = vld [vmem:[%s14221_s8 + $0xf8] sm:$0xff]  ;;  %286 = vst [vmem:[#allocation2 + $0xc0] sm:$0x1] %v285_v44  ;;  %v12280_v33 = vpack.c.bf16 %v367_v27, %v367_v27  ;;  %v11398_v32 = vcombine.low %v14641_v19, %v14650_v24  ;;  %v2008_v19 = vrot.slane %v14690_v36, 5 }
  0xab   : > { %v12281_v57 = vpack.c.bf16 %v368_v29, %v368_v29  ;;  %v11422_v26 = vrot.slane %v1950_v14, 9  ;;  %v2022_v29 = vrot.slane %v14707_v60, 5 }
  0xac   : > { %12711 = vmatmul.mubr.msk.bf16.gmra.mrb[28].mxu0 %vm1425_vm8, %v11363_v53  ;;  %v723_v0 = vshrl.u32 %v12280_v33, 16  ;;  %v726_v31 = vshll.u32 %v12280_v33, 16  ;;  %v11397_v53 = vcombine.low %v14612_v2, %v14617_v22 }
  0xad   : > { %12722 = vmatprep.mubr.msk.bf16.mxu0 %vm1425_vm8, %v11384_v8  ;;  %v731_v10 = vshrl.u32 %v12281_v57, 16  ;;  %v734_v58 = vshll.u32 %v12281_v57, 16  ;;  %v1951_v57 = vld [vmem:[#allocation2 + $0x24] sm:$0xe] }
  0xae   : > { %v725_v30 = vrot.slane %v723_v0, 7  ;;  %v2029_v0 = vrot.slane %v14710_v47, 5 }
  0xaf   : > { %v14756_v8 = vrot.slane %v731_v10, 7  ;;  %v1952_v10 = vld [vmem:[#allocation2 + $0x30] sm:$0xe] }
  0xb0   : > { %v729_v3 = vrot.slane %v725_v30, 4 }
  0xb4   : > { %12723 = vmatmul.mubr.msk.bf16.vlgmr.msra.gmra.mrb[0].mxu0 %vm1425_vm8, %v11385_v51  ;;  %v728_v51 = vor.u32 %v726_v31, %v725_v30  ;;  %v11423_v31 = vrot.slane %v1951_v57, 9 }
  0xb5   : > { %12755 = vmatpush3.bf16.msra.mxu0 %v14067_v40  ;;  %12726 = vmatprep.mubr.msk.bf16.mxu0 %vm1425_vm8, %v11386_v38  ;;  %v736_v38 = vor.u32 %v734_v58, %v14756_v8  ;;  %v2024_v58 = vrot.slane %v2022_v29, 4 }
  0xb6   : > { %12756 = vmatprep.subr.bf16.mxu0 %v13924_v39  ;;  %v2023_v47 = vsel %vm14767_vm15, %v11423_v31, %v2022_v29  ;;  %v1956_v29 = vld [vmem:[#allocation2 + $0x60] sm:$0xe]  ;;  %v14087_v31 = vld [vmem:[#allocation2 + $0x68] sm:$0x1] }
  0xb7   : > { %v737_v48 = vsel %vm14254_vm12, %v729_v3, %v736_v38  ;;  %v2031_v3 = vrot.slane %v2029_v0, 4  ;;  %v14082_v38 = vld [vmem:[#allocation2 + $0x38] sm:$0x1] }
  0xb8   : > { %897 = vst.msk [vmem:[#allocation2 + $0xc4] sm:$0xf] %vm226_vm0, %v737_v48  ;;  %v2032_v60 = vrot.slane %v14082_v38, 5  ;;  %v13930_v48 = vld [vmem:[%s17765_s1 + $0x70] sm:$0xff]  }
  0xb9   : > { %12757 = vmatpush3.bf16.msra.mxu0 %v13924_v39  ;;  %v14078_v39 = vld [vmem:[#allocation2 + $0x8] sm:$0x1] }
  0xba   : > { %12758 = vmatprep.subr.bf16.mxu0 %v13925_v41  ;;  %v2004_v40 = vrot.slane %v14078_v39, 5  ;;  %v13929_v39 = vld [vmem:[%s17765_s1 + $0x68] sm:$0xff]  }
  0xbc   : > { %12727 = vmatmul.mubr.msk.bf16.gmra.mrb[4].mxu0 %vm1425_vm8, %v11387_v46  ;;  %v2003_v46 = vrot.slane %v2001_v15, 4 }
  0xbd   : > { %12730 = vmatprep.mubr.msk.bf16.mxu0 %vm1425_vm8, %v11388_v49  ;;  %12759 = vmatpush3.bf16.msra.mxu0 %v13925_v41  ;;  %v894_v41 = vld [vmem:[#allocation2 + $0xc0] sm:$0xf] }
  0xbe   : > { %12760 = vmatprep.subr.bf16.mxu0 %v13926_v45  ;;  %v895_v2 = vsel %vm14248_vm11, %v728_v51, %v894_v41  ;;  %v2005_v55 = vsel %vm14767_vm15, %v2003_v46, %v2004_v40  ;;  %v11424_v51 = vrot.slane %v1952_v10, 9  ;;  %v1953_v46 = vld [vmem:[#allocation2 + $0x3c] sm:$0xe] }
  0xbf   : > { %896 = vst [vmem:[#allocation2 + $0xc0] sm:$0xf] %v895_v2  ;;  %v1954_v2 = vld [vmem:[#allocation2 + $0x48] sm:$0xe] }
  0xc0   : > { %v2030_v41 = vsel %vm14767_vm15, %v11424_v51, %v2029_v0  ;;  %v14086_v0 = vld [vmem:[#allocation2 + $0x5c] sm:$0x1]  ;;  %v14088_v51 = vld [vmem:[#allocation2 + $0x70] sm:$0xf] }
  0xc1   : > { %12761 = vmatpush3.bf16.msra.mxu0 %v13926_v45  ;;  %v2002_v45 = vsel %vm14767_vm15, %v11420_v50, %v2001_v15  ;;  %v2033_v50 = vsel %vm14767_vm15, %v2031_v3, %v2032_v60  ;;  %v2053_v10 = vrot.slane %v14086_v0, 5  ;;  %v2064_v3 = vrot.slane %v14088_v51, 5 }
  0xc2   : > { %12794 = vmatprep.subr.bf16.mxu0 %v14721_v52  ;;  %v2106_v51 = vrot.slane %v14671_v56, 5 }
  0xc4   : > { %12731 = vmatmul.mubr.msk.bf16.gmra.mrb[8].mxu0 %vm1425_vm8, %v11389_v9  ;;  %v1949_v9 = vld [vmem:[#allocation2 + $0xc] sm:$0xe] }
  0xc5   : > { %12734 = vmatprep.mubr.msk.bf16.mxu0 %vm1425_vm8, %v11390_v16  ;;  %v2015_v16 = vrot.slane %v14693_v37, 5 }
  0xc7   : > { %v2017_v36 = vrot.slane %v2015_v16, 4 }
  0xcc   : > { %12735 = vmatmul.mubr.msk.bf16.gmra.mrb[12].mxu0 %vm1425_vm8, %v11391_v20  ;;  %v2011_v20 = vrot.slane %v14079_v17, 5 }
  0xcd   : > { %12738 = vmatprep.mubr.msk.bf16.mxu0 %vm1425_vm8, %v11392_v21  ;;  %v11399_v21 = vcombine.low %v14669_v54, %v14671_v56  ;;  %v2016_v54 = vsel %vm14767_vm15, %v11422_v26, %v2015_v16  ;;  %v11426_v16 = vrot.slane %v1954_v2, 9 }
  0xd4   : > { %12739 = vmatmul.mubr.msk.bf16.gmra.mrb[16].mxu0 %vm1425_vm8, %v11393_v23  ;;  %v11444_v23 = vcombine.low %v2002_v45, %v2005_v55  ;;  %v11448_v45 = vcombine.low %v2030_v41, %v2033_v50  ;;  %v11425_v55 = vrot.slane %v1953_v46, 9 }
  0xd5   : > { %12742 = vmatprep.mubr.msk.bf16.mxu0 %vm1425_vm8, %v11394_v25  ;;  %v11421_v25 = vrot.slane %v1949_v9, 9 }
  0xd7   : > { %v2009_v27 = vsel %vm14767_vm15, %v11421_v25, %v2008_v19 }
  0xdc   : > { %12743 = vmatmul.mubr.msk.bf16.gmra.mrb[20].mxu0 %vm1425_vm8, %v11395_v7  ;;  %v2010_v7 = vrot.slane %v2008_v19, 4 }
  0xdd   : > { %12746 = vmatprep.mubr.msk.bf16.mxu0 %vm1425_vm8, %v11396_v42  ;;  %v14080_v42 = vld [vmem:[#allocation2 + $0x20] sm:$0x1] }
  0xde   : > { %v2018_v44 = vrot.slane %v14080_v42, 5  ;;  %v2012_v37 = vsel %vm14767_vm15, %v2010_v7, %v2011_v20  ;;  %v14084_v20 = vld [vmem:[#allocation2 + $0x50] sm:$0x1]  ;;  %v2050_v7 = vrot.slane %v14732_v12, 5  ;;  %v1955_v42 = vld [vmem:[#allocation2 + $0x54] sm:$0xe] }
  0xdf   : > { %v11445_v15 = vcombine.low %v2009_v27, %v2012_v37  ;;  %v14830_v37 = vld [vmem:[%s17765_s1 + $0x80] sm:$0xff]   ;;  %v11427_v12 = vrot.slane %v1955_v42, 9  ;;  %v2081_v42 = vrot.slane %v14573_v28, 5 }
  0xe0   : > { %v2019_v33 = vsel %vm14767_vm15, %v2017_v36, %v2018_v44  ;;  %v14085_v44 = vld [vmem:[#allocation2 + $0x64] sm:$0xf]  ;;  %v2052_v57 = vrot.slane %v2050_v7, 4 }
  0xe1   : > { %v11446_v30 = vcombine.low %v2016_v54, %v2019_v33  ;;  %v2057_v27 = vrot.slane %v14085_v44, 5 }
  0xe4   : > { %12747 = vmatmul.mubr.msk.bf16.gmra.mrb[24].mxu0 %vm1425_vm8, %v11397_v53  ;;  %v14081_v53 = vld [vmem:[#allocation2 + $0x2c] sm:$0x1] }
  0xe5   : > { %12750 = vmatprep.mubr.msk.bf16.mxu0 %vm1425_vm8, %v11398_v32  ;;  %v2025_v34 = vrot.slane %v14081_v53, 5  ;;  %v2036_v32 = vrot.slane %v14723_v1, 5  ;;  %v14083_v1 = vld [vmem:[#allocation2 + $0x44] sm:$0x1]  ;;  %v2051_v53 = vsel %vm14767_vm15, %v11427_v12, %v2050_v7  ;;  %v1961_v12 = vld [vmem:[#allocation2 + $0x9c] sm:$0xe] }
  0xe6   : > { %v2039_v14 = vrot.slane %v14083_v1, 5 }
  0xe7   : > { %v2026_v40 = vsel %vm14767_vm15, %v2024_v58, %v2025_v34  ;;  %v2038_v9 = vrot.slane %v2036_v32, 4  ;;  %v2060_v58 = vrot.slane %v14087_v31, 5  ;;  %v2054_v34 = vsel %vm14767_vm15, %v2052_v57, %v2053_v10  ;;  %v1962_v57 = vld [vmem:[#allocation2 + $0xa8] sm:$0xe] }
  0xe8   : > { %v11447_v19 = vcombine.low %v2023_v47, %v2026_v40  ;;  %v14089_v47 = vld [vmem:[#allocation2 + $0x7c] sm:$0xf]  ;;  %v11451_v41 = vcombine.low %v2051_v53, %v2054_v34  ;;  %v2095_v31 = vrot.slane %v14621_v35, 5 }
  0xe9   : > { %v2040_v25 = vsel %vm14767_vm15, %v2038_v9, %v2039_v14  ;;  %v2071_v40 = vrot.slane %v14089_v47, 5  ;;  %v2108_v47 = vrot.slane %v2106_v51, 4 }
  0xec   : > { %12751 = vmatmul.mubr.msk.bf16.gmra.mrb[28].mxu0 %vm1425_vm8, %v11399_v21  ;;  %v2046_v21 = vrot.slane %v14084_v20, 5 }
  0xed   : > { %12762 = vmatprep.mubr.msk.bf16.mxu0 %vm1425_vm8, %v11444_v23  ;;  %v2037_v23 = vsel %vm14767_vm15, %v11425_v55, %v2036_v32  ;;  %v1958_v32 = vld [vmem:[#allocation2 + $0x78] sm:$0xe]  ;;  %v14091_v55 = vld [vmem:[#allocation2 + $0x80] sm:$0x1] }
  0xee   : > { %v11449_v54 = vcombine.low %v2037_v23, %v2040_v25  ;;  %v2074_v9 = vrot.slane %v14091_v55, 5  ;;  %v1960_v23 = vld [vmem:[#allocation2 + $0x90] sm:$0xe] }
  0xef   : > { %v11432_v44 = vrot.slane %v1960_v23, 9  ;;  %v13936_v55 = vld [vmem:[#allocation2 + $0x30] sm:$0xff]   ;;  %v13944_v23 = vld [vmem:[#allocation2 + $0x78] sm:$0xff]  }
  0xf4   : > { %12763 = vmatmul.mubr.msk.bf16.vlgmr.msra.gmra.mrb[0].mxu0 %vm1425_vm8, %v11445_v15  ;;  %v11428_v15 = vrot.slane %v1956_v29, 9 }
  0xf5   : > { %12795 = vmatpush3.bf16.msra.mxu0 %v14721_v52  ;;  %12766 = vmatprep.mubr.msk.bf16.mxu0 %vm1425_vm8, %v11446_v30  ;;  %v2043_v52 = vrot.slane %v14726_v13, 5  ;;  %v13931_v13 = vld [vmem:[%s17765_s1 + $0x78] sm:$0xff]   ;;  %v2059_v30 = vrot.slane %v2057_v27, 4 }
  0xf6   : > { %12796 = vmatprep.subr.bf16.mxu0 %v13929_v39  ;;  %v2058_v38 = vsel %vm14767_vm15, %v11428_v15, %v2057_v27  ;;  %v11433_v15 = vrot.slane %v1961_v12, 9 }
  0xf7   : > { %v2045_v17 = vrot.slane %v2043_v52, 4  ;;  %v2044_v26 = vsel %vm14767_vm15, %v11426_v16, %v2043_v52  ;;  %v2061_v60 = vsel %vm14767_vm15, %v2059_v30, %v2060_v58  ;;  %v2066_v52 = vrot.slane %v2064_v3, 4 }
  0xf8   : > { %v11452_v50 = vcombine.low %v2058_v38, %v2061_v60  ;;  %v2078_v16 = vrot.slane %v14560_v18, 5  ;;  %v2088_v18 = vrot.slane %v14597_v62, 5  ;;  %v2099_v62 = vrot.slane %v14650_v24, 5  ;;  %v1963_v38 = vld [vmem:[#allocation2 + $0xb4] sm:$0xe] }
  0xf9   : > { %12797 = vmatpush3.bf16.msra.mxu0 %v13929_v39  ;;  %v2047_v36 = vsel %vm14767_vm15, %v2045_v17, %v2046_v21  ;;  %v1957_v39 = vld [vmem:[#allocation2 + $0x6c] sm:$0xe]  ;;  %v1959_v21 = vld [vmem:[#allocation2 + $0x84] sm:$0xe]  ;;  %v11434_v58 = vrot.slane %v1962_v57, 9 }
  0xfa   : > { %12798 = vmatprep.subr.bf16.mxu0 %v13930_v48  ;;  %v11450_v33 = vcombine.low %v2044_v26, %v2047_v36  ;;  %v11429_v46 = vrot.slane %v1957_v39, 9  ;;  %v11431_v26 = vrot.slane %v1959_v21, 9  ;;  %v2080_v36 = vrot.slane %v2078_v16, 4  ;;  %v2819_v21 = vld [vmem:[#allocation2 + $0xc] sm:$0xf] }
  0xfb   : > { %v2101_v53 = vrot.slane %v2099_v62, 4  ;;  %v11435_v39 = vrot.slane %v1963_v38, 9  ;;  %v14932_v57 = vld [vmem:[#allocation2 + $0x14] sm:$0x1] }
  0xfc   : > { %12767 = vmatmul.mubr.msk.bf16.gmra.mrb[4].mxu0 %vm1425_vm8, %v11447_v19  ;;  %v11430_v19 = vrot.slane %v1958_v32, 9  ;;  %v2065_v1 = vsel %vm14767_vm15, %v11429_v46, %v2064_v3  ;;  %v2079_v29 = vsel %vm14767_vm15, %v11431_v26, %v2078_v16  ;;  %v2100_v3 = vsel %vm14767_vm15, %v11434_v58, %v2099_v62  ;;  %v334_v32 = vld [vmem:[#allocation2 + $0xc8] sm:$0x1]  ;;  %v13940_v16 = vld [vmem:[#allocation2 + $0x54] sm:$0xff]  }
  0xfd   : > { %12770 = vmatprep.mubr.msk.bf16.mxu0 %vm1425_vm8, %v11448_v45  ;;  %12799 = vmatpush3.bf16.msra.mxu0 %v13930_v48  ;;  %v14090_v48 = vld [vmem:[#allocation2 + $0x74] sm:$0x1]  ;;  %v2073_v45 = vrot.slane %v2071_v40, 4  ;;  %v2107_v56 = vsel %vm14767_vm15, %v11435_v39, %v2106_v51  ;;  %v2871_v26 = vshll.u32 %v2819_v21, 16 }
  0xfe   : > { %12800 = vmatprep.subr.bf16.mxu0 %v13931_v13  ;;  %v2067_v2 = vrot.slane %v14090_v48, 5  ;;  %v2072_v17 = vsel %vm14767_vm15, %v11430_v19, %v2071_v40  ;;  %v2109_v40 = vrot.slane %v14675_v11, 5  ;;  %v738_v11 = vrot.slane %v14756_v8, 4  ;;  %v13943_v8 = vld [vmem:[%s17765_s1 + $0x90] sm:$0xff]  }
  0xff   : > { %v2075_v20 = vsel %vm14767_vm15, %v2073_v45, %v2074_v9  ;;  %v13935_v45 = vld [vmem:[#allocation2 + $0x24] sm:$0xff]   ;;  %v13937_v9 = vld [vmem:[#allocation2 + $0x3c] sm:$0xff]  }
 0x100   : > { %v2068_v14 = vsel %vm14767_vm15, %v2066_v52, %v2067_v2  ;;  %v11454_v7 = vcombine.low %v2072_v17, %v2075_v20  ;;  %v13932_v52 = vld [vmem:[#allocation2 + $0xc] sm:$0xff]   ;;  %v13934_v2 = vld [vmem:[#allocation2 + $0x18] sm:$0xff]   ;;  %v13941_v17 = vld [vmem:[#allocation2 + $0x60] sm:$0xff]  }
 0x101   : > { %12801 = vmatpush3.bf16.msra.mxu0 %v13931_v13  ;;  %v2085_v13 = vrot.slane %v14595_v61, 5  ;;  %v11453_v25 = vcombine.low %v2065_v1, %v2068_v14  ;;  %v2082_v61 = vsel %vm14767_vm15, %v2080_v36, %v2081_v42  ;;  %v13948_v1 = vld [vmem:[%s17765_s1 + $0x98] sm:$0xff]   ;;  %v13939_v14 = vld [vmem:[#allocation2 + $0x48] sm:$0xff]  }
 0x102   : > { %12834 = vmatprep.subr.bf16.mxu0 %v14830_v37  ;;  %v11455_v0 = vcombine.low %v2079_v29, %v2082_v61  ;;  %v13942_v20 = vld [vmem:[#allocation2 + $0x6c] sm:$0xff]  }
 0x103   : > { %v2087_v27 = vrot.slane %v2085_v13, 4 }
 0x104   : > { %12771 = vmatmul.mubr.msk.bf16.gmra.mrb[8].mxu0 %vm1425_vm8, %v11449_v54  ;;  %v2092_v54 = vrot.slane %v14617_v22, 5  ;;  %v2102_v22 = vrot.slane %v14653_v59, 5 }
 0x105   : > { %12774 = vmatprep.mubr.msk.bf16.mxu0 %vm1425_vm8, %v11450_v33  ;;  %v2086_v33 = vsel %vm14767_vm15, %v11432_v44, %v2085_v13  ;;  %v2089_v28 = vsel %vm14767_vm15, %v2087_v27, %v2088_v18  ;;  %v14920_v13 = vld [vmem:[#allocation2 + $0x10] sm:$0xf]  ;;  %v2822_v44 = vld [vmem:[#allocation2 + $0x18] sm:$0xf]  ;;  %v14925_v27 = vld [vmem:[#allocation2 + $0x1c] sm:$0xf] }
 0x106   : > { %v11456_v10 = vcombine.low %v2086_v33, %v2089_v28  ;;  %v2094_v30 = vrot.slane %v2092_v54, 4  ;;  %v2093_v34 = vsel %vm14767_vm15, %v11433_v15, %v2092_v54  ;;  %v2103_v35 = vsel %vm14767_vm15, %v2101_v53, %v2102_v22  ;;  %v2825_v18 = vld [vmem:[#allocation2 + $0x24] sm:$0xf]  ;;  %v14928_v54 = vld [vmem:[#allocation2 + $0x28] sm:$0xf]  ;;  %v13947_v22 = vld [vmem:[#allocation2 + $0x9c] sm:$0xff]  }
 0x107   : > { %v11458_v60 = vcombine.low %v2100_v3, %v2103_v35  ;;  %v2877_v36 = vshll.u32 %v14920_v13, 16  ;;  %v2881_v42 = vshrl.u32 %v14920_v13, 16  ;;  %v2892_v29 = vshrl.u32 %v2822_v44, 16 }
 0x108   : > { %v2096_v24 = vsel %vm14767_vm15, %v2094_v30, %v2095_v31  ;;  %v2895_v61 = vshll.u32 %v2822_v44, 16  ;;  %v2873_v28 = vrot.slane %v2871_v26, 5  ;;  %v2916_v15 = vshrl.u32 %v2825_v18, 16  ;;  %v13946_v31 = vld [vmem:[#allocation2 + $0x90] sm:$0xff]  }
 0x109   : > { %v11457_v59 = vcombine.low %v2093_v34, %v2096_v24  ;;  %v14930_v12 = vrot.slane %v2877_v36, 5  ;;  %v2883_v62 = vrot.slane %v2881_v42, 4  ;;  %v2919_v30 = vshll.u32 %v2825_v18, 16  ;;  %v2828_v24 = vld [vmem:[#allocation2 + $0x30] sm:$0xf] }
 0x10a   : > { %v2925_v58 = vshll.u32 %v14928_v54, 16  ;;  %v2929_v53 = vshrl.u32 %v14928_v54, 16  ;;  %v2894_v34 = vrot.slane %v2892_v29, 4  ;;  %v2887_v35 = vshll.u32 %v14932_v57, 16 }
 0x10b   : > { %v2884_v3 = vor.u32 %v2883_v62, %v14930_v12  ;;  %v2897_v38 = vrot.slane %v2895_v61, 5 }
 0x10c   : > { %12775 = vmatmul.mubr.msk.bf16.gmra.mrb[12].mxu0 %vm1425_vm8, %v11451_v41  ;;  %v2110_v41 = vsel %vm14767_vm15, %v2108_v47, %v2109_v40  ;;  %v2918_v40 = vrot.slane %v2916_v15, 4 }
 0x10d   : > { %12778 = vmatprep.mubr.msk.bf16.mxu0 %vm1425_vm8, %v11452_v50  ;;  %v335_v50 = vsel %vm14189_vm6, 0, %v334_v32  ;;  %v11459_v46 = vcombine.low %v2107_v56, %v2110_v41  ;;  %v2921_v32 = vrot.slane %v2919_v30, 5  ;;  %v14947_v56 = vld [vmem:[#allocation2 + $0x2c] sm:$0x1]  ;;  %v14949_v41 = vrot.slane %v2925_v58, 5 }
 0x10e   : > { %336 = vst [vmem:[#allocation2 + $0xc8] sm:$0x1] %v335_v50  ;;  %v2931_v50 = vrot.slane %v2929_v53, 4 }
 0x114   : > { %12779 = vmatmul.mubr.msk.bf16.gmra.mrb[16].mxu0 %vm1425_vm8, %v11453_v25  ;;  %v13945_v25 = vld [vmem:[#allocation2 + $0x84] sm:$0xff]  }
 0x115   : > { %12782 = vmatprep.mubr.msk.bf16.mxu0 %vm1425_vm8, %v11454_v7  ;;  %v898_v48 = vld [vmem:[#allocation2 + $0xc8] sm:$0x1]  ;;  %v2868_v7 = vshrl.u32 %v2819_v21, 16  ;;  %v2932_v21 = vor.u32 %v2931_v50, %v14949_v41 }
 0x116   : > { %v899_v19 = vsel %vm14184_vm4, %v738_v11, %v898_v48 }
 0x117   : > { %900 = vst [vmem:[#allocation2 + $0xc8] sm:$0x1] %v899_v19  ;;  %v2870_v33 = vrot.slane %v2868_v7, 4  ;;  %v2898_v19 = vor.u32 %v2897_v38, %v2894_v34  ;;  %v14960_v7 = vld [vmem:[#allocation2 + $0x38] sm:$0x1]  ;;  %v2933_v30 = vrot.slane %v2932_v21, 4 }
 0x118   : > { %v2959_v58 = vshll.u32 %v14960_v7, 16 }
 0x119   : > { %v2874_v51 = vor.u32 %v2873_v28, %v2870_v33  ;;  %v2899_v62 = vrot.slane %v2898_v19, 4  ;;  %v2837_v19 = vld [vmem:[#allocation2 + $0x54] sm:$0xf] }
 0x11a   : > { %v3015_v21 = vshll.u32 %v2837_v19, 16 }
 0x11c   : > { %12783 = vmatmul.mubr.msk.bf16.gmra.mrb[20].mxu0 %vm1425_vm8, %v11455_v0  ;;  %v2901_v0 = vshll.u32 %v14925_v27, 16 }
 0x11d   : > { %12786 = vmatprep.mubr.msk.bf16.mxu0 %vm1425_vm8, %v11456_v10  ;;  %v2905_v10 = vshrl.u32 %v14925_v27, 16 }
 0x11e   : > { %v14944_v39 = vrot.slane %v2901_v0, 5 }
 0x11f   : > { %v2907_v47 = vrot.slane %v2905_v10, 4  ;;  %v2834_v10 = vld [vmem:[#allocation2 + $0x48] sm:$0xf] }
 0x120   : > { %v2988_v38 = vshrl.u32 %v2834_v10, 16  ;;  %v2904_v50 = vsel %vm14235_vm10, %v2899_v62, %v14944_v39  ;;  %v2840_v62 = vld [vmem:[#allocation2 + $0x60] sm:$0xf] }
 0x124   : > { %12787 = vmatmul.mubr.msk.bf16.gmra.mrb[24].mxu0 %vm1425_vm8, %v11457_v59  ;;  %v14940_v59 = vld [vmem:[#allocation2 + $0x34] sm:$0xf] }
 0x125   : > { %12790 = vmatprep.mubr.msk.bf16.mxu0 %vm1425_vm8, %v11458_v60  ;;  %v14942_v60 = vld [vmem:[#allocation2 + $0x20] sm:$0x1]  ;;  %v2949_v11 = vshll.u32 %v14940_v59, 16  ;;  %v2953_v48 = vshrl.u32 %v14940_v59, 16 }
 0x127   : > { %v14962_v26 = vrot.slane %v2949_v11, 5  ;;  %v2955_v36 = vrot.slane %v2953_v48, 4 }
 0x12c   : > { %12791 = vmatmul.mubr.msk.bf16.gmra.mrb[28].mxu0 %vm1425_vm8, %v11459_v46  ;;  %v2940_v46 = vshrl.u32 %v2828_v24, 16 }
 0x12d   : > { %12802 = vmatprep.mubr.msk.bf16.mxu0 %vm1425_vm8, %v13932_v52  ;;  %v2943_v52 = vshll.u32 %v2828_v24, 16  ;;  %v14975_v24 = vld [vmem:[#allocation2 + $0x4c] sm:$0xf] }
 0x12e   : > { %v2997_v48 = vshll.u32 %v14975_v24, 16 }
 0x134   : > { %12803 = vmatmul.mubr.msk.bf16.vlgmr.msra.gmra.mrb[0].mxu0 %vm1425_vm8, %v13934_v2  ;;  %v2889_v2 = vrot.slane %v2887_v35, 5 }
 0x135   : > { %12835 = vmatpush3.bf16.msra.mxu0 %v14830_v37  ;;  %12806 = vmatprep.mubr.msk.bf16.mxu0 %vm1425_vm8, %v13935_v45  ;;  %v14913_v37 = vld [vmem:[%s17765_s1 + $0xa0] sm:$0xff]   ;;  %v2911_v45 = vshll.u32 %v14942_v60, 16 }
 0x136   : > { %12836 = vmatprep.subr.bf16.mxu0 %v13938_v5 }
 0x137   : > { %v2913_v18 = vrot.slane %v2911_v45, 5  ;;  %v14993_v45 = vld [vmem:[#allocation2 + $0x58] sm:$0xf] }
 0x139   : > { %12837 = vmatpush3.bf16.msra.mxu0 %v13938_v5  ;;  %v2831_v5 = vld [vmem:[#allocation2 + $0x3c] sm:$0xf] }
 0x13a   : > { %12838 = vmatprep.subr.bf16.mxu0 %v13943_v8  ;;  %v2964_v42 = vshrl.u32 %v2831_v5, 16  ;;  %v2967_v44 = vshll.u32 %v2831_v5, 16 }
 0x13c   : > { %12807 = vmatmul.mubr.msk.bf16.gmra.mrb[4].mxu0 %vm1425_vm8, %v13936_v55  ;;  %v2885_v55 = vrot.slane %v2884_v3, 4  ;;  %v2966_v34 = vrot.slane %v2964_v42, 4  ;;  %v15008_v42 = vrot.slane %v2997_v48, 5  ;;  %v13953_v48 = vld [vmem:[%s17765_s1 + $0xa8] sm:$0xff]  }
 0x13d   : > { %12810 = vmatprep.mubr.msk.bf16.mxu0 %vm1425_vm8, %v13937_v9  ;;  %12839 = vmatpush3.bf16.msra.mxu0 %v13943_v8  ;;  %v2875_v8 = vrot.slane %v2874_v51, 4  ;;  %v2908_v9 = vor.u32 %v2907_v47, %v14944_v39  ;;  %v14977_v51 = vld [vmem:[#allocation2 + $0x44] sm:$0x1]  ;;  %v2991_v47 = vshll.u32 %v2834_v10, 16  ;;  %v14997_v39 = vrot.slane %v2959_v58, 5 }
 0x13e   : > { %12840 = vmatprep.subr.bf16.mxu0 %v13948_v1  ;;  %v2890_v28 = vsel %vm14235_vm10, %v2885_v55, %v2889_v2  ;;  %v3001_v2 = vshrl.u32 %v14975_v24, 16  ;;  %v2983_v55 = vshll.u32 %v14977_v51, 16  ;;  %v2843_v58 = vld [vmem:[#allocation2 + $0x6c] sm:$0xf] }
 0x13f   : > { %v2880_v33 = vsel %vm14235_vm10, %v2875_v8, %v14930_v12  ;;  %v2909_v0 = vrot.slane %v2908_v9, 4  ;;  %v2969_v12 = vrot.slane %v2967_v44, 5 }
 0x140   : > { %v3003_v44 = vrot.slane %v3001_v2, 4 }
 0x141   : > { %12841 = vmatpush3.bf16.msra.mxu0 %v13948_v1  ;;  %v2935_v1 = vshll.u32 %v14947_v56, 16  ;;  %v2970_v8 = vor.u32 %v2969_v12, %v2966_v34  ;;  %v15026_v12 = vld [vmem:[#allocation2 + $0x70] sm:$0xf] }
 0x142   : > { %12874 = vmatprep.subr.bf16.mxu0 %v14913_v37 }
 0x144   : > { %12811 = vmatmul.mubr.msk.bf16.gmra.mrb[8].mxu0 %vm1425_vm8, %v13939_v14  ;;  %v14957_v14 = vld [vmem:[#allocation2 + $0x40] sm:$0xf] }
 0x145   : > { %12814 = vmatprep.mubr.msk.bf16.mxu0 %vm1425_vm8, %v13940_v16  ;;  %v13949_v16 = vld [vmem:[#allocation2 + $0xa8] sm:$0xff]   ;;  %v2973_v29 = vshll.u32 %v14957_v14, 16  ;;  %v2977_v61 = vshrl.u32 %v14957_v14, 16 }
 0x147   : > { %v14979_v3 = vrot.slane %v2973_v29, 5  ;;  %v2979_v35 = vrot.slane %v2977_v61, 4  ;;  %v2971_v61 = vrot.slane %v2970_v8, 4 }
 0x14c   : > { %12815 = vmatmul.mubr.msk.bf16.gmra.mrb[12].mxu0 %vm1425_vm8, %v13941_v17  ;;  %v13950_v17 = vld [vmem:[#allocation2 + $0xb4] sm:$0xff]  }
 0x14d   : > { %12818 = vmatprep.mubr.msk.bf16.mxu0 %vm1425_vm8, %v13942_v20  ;;  %v2922_v20 = vor.u32 %v2921_v32, %v2918_v40  ;;  %v13951_v40 = vld [vmem:[#allocation2 + $0xc0] sm:$0xff]   ;;  %v11532_v32 = vcombine.low %v2880_v33, %v2890_v28  ;;  %v2985_v33 = vrot.slane %v2983_v55, 5  ;;  %v15015_v28 = vld [vmem:[#allocation2 + $0x5c] sm:$0x1] }
 0x14f   : > { %v2923_v15 = vrot.slane %v2922_v20, 4  ;;  %v3012_v20 = vshrl.u32 %v2837_v19, 16  ;;  %v3069_v19 = vshll.u32 %v15026_v12, 16 }
 0x154   : > { %12819 = vmatmul.mubr.msk.bf16.gmra.mrb[16].mxu0 %vm1425_vm8, %v13944_v23  ;;  %v2942_v23 = vrot.slane %v2940_v46, 4  ;;  %v2914_v46 = vsel %vm14235_vm10, %v2909_v0, %v2913_v18 }
 0x155   : > { %12822 = vmatprep.mubr.msk.bf16.mxu0 %vm1425_vm8, %v13945_v25  ;;  %v2945_v25 = vrot.slane %v2943_v52, 5  ;;  %v2928_v52 = vsel %vm14235_vm10, %v2923_v15, %v14949_v41  ;;  %v2980_v41 = vor.u32 %v2979_v35, %v14979_v3  ;;  %v3004_v35 = vor.u32 %v3003_v44, %v15008_v42 }
 0x157   : > { %v2946_v53 = vor.u32 %v2945_v25, %v2942_v23  ;;  %v3021_v23 = vshll.u32 %v14993_v45, 16  ;;  %v3025_v25 = vshrl.u32 %v14993_v45, 16  ;;  %v2981_v10 = vrot.slane %v2980_v41, 4  ;;  %v2846_v41 = vld [vmem:[#allocation2 + $0x78] sm:$0xf] }
 0x159   : > { %v14995_v5 = vrot.slane %v2946_v53, 4  ;;  %v3014_v53 = vrot.slane %v3012_v20, 4  ;;  %v3027_v34 = vrot.slane %v3025_v25, 4 }
 0x15b   : > { %v2952_v29 = vsel %vm14235_vm10, %v14995_v5, %v14962_v26  ;;  %v3073_v5 = vshrl.u32 %v15026_v12, 16 }
 0x15c   : > { %12823 = vmatmul.mubr.msk.bf16.gmra.mrb[20].mxu0 %vm1425_vm8, %v13946_v31  ;;  %v2937_v31 = vrot.slane %v2935_v1, 5  ;;  %v2990_v1 = vrot.slane %v2988_v38, 4  ;;  %v3031_v38 = vshll.u32 %v15015_v28, 16 }
 0x15d   : > { %12826 = vmatprep.mubr.msk.bf16.mxu0 %vm1425_vm8, %v13947_v22  ;;  %v2956_v22 = vor.u32 %v2955_v36, %v14962_v26  ;;  %v11533_v36 = vcombine.low %v2904_v50, %v2914_v46  ;;  %v15024_v26 = vrot.slane %v3021_v23, 5  ;;  %v3060_v46 = vshrl.u32 %v2843_v58, 16  ;;  %v15056_v23 = vld [vmem:[#allocation2 + $0x68] sm:$0x1] }
 0x15e   : > { %v2938_v11 = vsel %vm14235_vm10, %v2933_v30, %v2937_v31  ;;  %v15022_v31 = vld [vmem:[#allocation2 + $0x64] sm:$0xf] }
 0x15f   : > { %v15000_v9 = vrot.slane %v2956_v22, 4  ;;  %v11534_v18 = vcombine.low %v2928_v52, %v2938_v11  ;;  %v3017_v22 = vrot.slane %v3015_v21, 5  ;;  %v3049_v50 = vshrl.u32 %v15022_v31, 16  ;;  %v15052_v21 = vld [vmem:[#allocation2 + $0x7c] sm:$0xf] }
 0x160   : > { %v3063_v52 = vshll.u32 %v2843_v58, 16  ;;  %v2976_v11 = vsel %vm14235_vm10, %v2971_v61, %v14979_v3  ;;  %v15048_v3 = vrot.slane %v3004_v35, 4  ;;  %v3062_v61 = vrot.slane %v3060_v46, 4 }
 0x161   : > { %v2962_v0 = vsel %vm14235_vm10, %v15000_v9, %v14997_v39  ;;  %v2986_v39 = vsel %vm14235_vm10, %v2981_v10, %v2985_v33  ;;  %v3018_v55 = vor.u32 %v3017_v22, %v3014_v53  ;;  %v3028_v9 = vor.u32 %v3027_v34, %v15024_v26  ;;  %v13954_v10 = vld [vmem:[%s17765_s1 + $0xb0] sm:$0xff]  }
 0x162   : > { %v3051_v44 = vrot.slane %v3049_v50, 4  ;;  %v3065_v33 = vrot.slane %v3063_v52, 5  ;;  %v3093_v53 = vshll.u32 %v15052_v21, 16  ;;  %v3097_v22 = vshrl.u32 %v15052_v21, 16  ;;  %v2849_v52 = vld [vmem:[#allocation2 + $0x84] sm:$0xf] }
 0x163   : > { %v3029_v58 = vrot.slane %v3028_v9, 4  ;;  %v11535_v34 = vcombine.low %v2952_v29, %v2962_v0  ;;  %v11536_v35 = vcombine.low %v2976_v11, %v2986_v39  ;;  %v3055_v50 = vshll.u32 %v15056_v23, 16  ;;  %v15079_v29 = vld [vmem:[#allocation2 + $0x88] sm:$0xf]  ;;  %v15092_v39 = vld [vmem:[#allocation2 + $0x80] sm:$0x1] }
 0x164   : > { %12827 = vmatmul.mubr.msk.bf16.gmra.mrb[24].mxu0 %vm1425_vm8, %v13949_v16  ;;  %v2993_v16 = vrot.slane %v2991_v47, 5  ;;  %v3036_v47 = vshrl.u32 %v2840_v62, 16  ;;  %v3066_v46 = vor.u32 %v3065_v33, %v3062_v61  ;;  %v3108_v9 = vshrl.u32 %v2849_v52, 16 }
 0x165   : > { %12830 = vmatprep.mubr.msk.bf16.mxu0 %vm1425_vm8, %v13950_v17  ;;  %v15003_v17 = vld [vmem:[#allocation2 + $0x50] sm:$0x1] }
 0x166   : > { %v2994_v15 = vor.u32 %v2993_v16, %v2990_v1  ;;  %v3007_v30 = vshll.u32 %v15003_v17, 16  ;;  %v15050_v1 = vrot.slane %v3031_v38, 5  ;;  %v3038_v16 = vrot.slane %v3036_v47, 4 }
 0x167   : > { %v3067_v61 = vrot.slane %v3066_v46, 4 }
 0x168   : > { %v15038_v2 = vrot.slane %v2994_v15, 4  ;;  %v15044_v8 = vrot.slane %v3007_v30, 5  ;;  %v3084_v15 = vshrl.u32 %v2846_v41, 16  ;;  %v3087_v30 = vshll.u32 %v2846_v41, 16 }
 0x169   : > { %v3111_v41 = vshll.u32 %v2849_v52, 16 }
 0x16a   : > { %v3000_v38 = vsel %vm14235_vm10, %v15038_v2, %v15008_v42  ;;  %v3010_v47 = vsel %vm14235_vm10, %v15048_v3, %v15044_v8  ;;  %v3086_v42 = vrot.slane %v3084_v15, 4  ;;  %v3089_v2 = vrot.slane %v3087_v30, 5  ;;  %v2852_v30 = vld [vmem:[#allocation2 + $0x90] sm:$0xf] }
 0x16b   : > { %v15094_v8 = vrot.slane %v3093_v53, 5  ;;  %v3117_v3 = vshll.u32 %v15079_v29, 16  ;;  %v3103_v15 = vshll.u32 %v15092_v39, 16 }
 0x16c   : > { %12831 = vmatmul.mubr.msk.bf16.gmra.mrb[28].mxu0 %vm1425_vm8, %v13951_v40  ;;  %v3039_v40 = vshll.u32 %v2840_v62, 16  ;;  %v3075_v62 = vrot.slane %v3073_v5, 4  ;;  %v3034_v5 = vsel %vm14235_vm10, %v3029_v58, %v15050_v1  ;;  %v11537_v58 = vcombine.low %v3000_v38, %v3010_v47 }
 0x16d   : > { %12842 = vmatprep.mubr.msk.bf16.mxu0 %vm1425_vm8, %v11532_v32  ;;  %v3045_v32 = vshll.u32 %v15022_v31, 16  ;;  %v3132_v38 = vshrl.u32 %v2852_v30, 16  ;;  %v3135_v47 = vshll.u32 %v2852_v30, 16 }
 0x16e   : > { %v3041_v20 = vrot.slane %v3039_v40, 5 }
 0x16f   : > { %v15058_v25 = vrot.slane %v3045_v32, 5 }
 0x170   : > { %v3042_v40 = vor.u32 %v3041_v20, %v3038_v16  ;;  %v3121_v16 = vshrl.u32 %v15079_v29, 16 }
 0x171   : > { %v3052_v32 = vor.u32 %v3051_v44, %v15058_v25  ;;  %v3057_v44 = vrot.slane %v3055_v50, 5 }
 0x172   : > { %v3123_v50 = vrot.slane %v3121_v16, 4 }
 0x173   : > { %v3053_v20 = vrot.slane %v3052_v32, 4  ;;  %v15111_v32 = vrot.slane %v3117_v3, 5 }
 0x174   : > { %12843 = vmatmul.mubr.msk.bf16.vlgmr.msra.gmra.mrb[0].mxu0 %vm1425_vm8, %v11533_v36  ;;  %v15060_v36 = vrot.slane %v3069_v19, 5 }
 0x175   : > { %12875 = vmatpush3.bf16.msra.mxu0 %v14913_v37  ;;  %12846 = vmatprep.mubr.msk.bf16.mxu0 %vm1425_vm8, %v11534_v18  ;;  %v3019_v37 = vrot.slane %v3018_v55, 4  ;;  %v15065_v18 = vld [vmem:[#allocation2 + $0x74] sm:$0x1]  ;;  %v3099_v55 = vrot.slane %v3097_v22, 4  ;;  %v3058_v52 = vsel %vm14235_vm10, %v3053_v20, %v3057_v44  ;;  %v3124_v20 = vor.u32 %v3123_v50, %v15111_v32 }
 0x176   : > { %12876 = vmatprep.subr.bf16.mxu0 %v13953_v48  ;;  %v3076_v0 = vor.u32 %v3075_v62, %v15060_v36  ;;  %v3079_v11 = vshll.u32 %v15065_v18, 16  ;;  %v3090_v62 = vor.u32 %v3089_v2, %v3086_v42  ;;  %v3072_v42 = vsel %vm14235_vm10, %v3067_v61, %v15060_v36 }
 0x177   : > { %v3024_v19 = vsel %vm14235_vm10, %v3019_v37, %v15024_v26  ;;  %v3043_v26 = vrot.slane %v3042_v40, 4  ;;  %v15104_v37 = vld [vmem:[%s17765_s1 + $0xc0] sm:$0xff]   ;;  %v3100_v22 = vor.u32 %v3099_v55, %v15094_v8  ;;  %v3113_v40 = vrot.slane %v3111_v41, 5 }
 0x178   : > { %v3077_v1 = vrot.slane %v3076_v0, 4  ;;  %v3081_v33 = vrot.slane %v3079_v11, 5  ;;  %v11538_v53 = vcombine.low %v3024_v19, %v3034_v5  ;;  %v2855_v0 = vld [vmem:[#allocation2 + $0x9c] sm:$0xf]  ;;  %v15118_v11 = vld [vmem:[#allocation2 + $0xa0] sm:$0xf] }
 0x179   : > { %12877 = vmatpush3.bf16.msra.mxu0 %v13953_v48  ;;  %v13955_v48 = vld [vmem:[%s17765_s1 + $0xb8] sm:$0xff]   ;;  %v3048_v46 = vsel %vm14235_vm10, %v3043_v26, %v15058_v25  ;;  %v3091_v19 = vrot.slane %v3090_v62, 4  ;;  %v3105_v5 = vrot.slane %v3103_v15, 5  ;;  %v3101_v25 = vrot.slane %v3100_v22, 4 }
 0x17a   : > { %12878 = vmatprep.subr.bf16.mxu0 %v13954_v10  ;;  %v3082_v2 = vsel %vm14235_vm10, %v3077_v1, %v3081_v33  ;;  %v3159_v3 = vshll.u32 %v2855_v0, 16  ;;  %v3165_v36 = vshll.u32 %v15118_v11, 16  ;;  %v3169_v16 = vshrl.u32 %v15118_v11, 16  ;;  %v15137_v15 = vld [vmem:[#allocation2 + $0x98] sm:$0x1] }
 0x17b   : > { %v3134_v44 = vrot.slane %v3132_v38, 4  ;;  %v3137_v61 = vrot.slane %v3135_v47, 5  ;;  %v11539_v1 = vcombine.low %v3048_v46, %v3058_v52  ;;  %v11540_v33 = vcombine.low %v3072_v42, %v3082_v2  ;;  %v2858_v52 = vld [vmem:[#allocation2 + $0xa8] sm:$0xf]  ;;  %v15148_v2 = vld [vmem:[#allocation2 + $0xac] sm:$0xf] }
 0x17c   : > { %12847 = vmatmul.mubr.msk.bf16.gmra.mrb[4].mxu0 %vm1425_vm8, %v11535_v34  ;;  %v15107_v34 = vld [vmem:[#allocation2 + $0x94] sm:$0xf]  ;;  %v3096_v62 = vsel %vm14235_vm10, %v3091_v19, %v15094_v8  ;;  %v3106_v30 = vsel %vm14235_vm10, %v3101_v25, %v3105_v5  ;;  %v3161_v50 = vrot.slane %v3159_v3, 5  ;;  %v15145_v38 = vrot.slane %v3165_v36, 5  ;;  %17874 = vst [vmem:[#allocation7_spill] sm:$0xff] %v15148_v2 }
 0x17d   : > { %12850 = vmatprep.mubr.msk.bf16.mxu0 %vm1425_vm8, %v11536_v35  ;;  %12879 = vmatpush3.bf16.msra.mxu0 %v13954_v10  ;;  %v15109_v35 = vld [vmem:[#allocation2 + $0x8c] sm:$0x1]  ;;  %v3110_v10 = vrot.slane %v3108_v9, 4  ;;  %v3141_v9 = vshll.u32 %v15107_v34, 16  ;;  %v3145_v41 = vshrl.u32 %v15107_v34, 16  ;;  %v3171_v46 = vrot.slane %v3169_v16, 4 }
 0x17e   : > { %12880 = vmatprep.subr.bf16.mxu0 %v13955_v48  ;;  %v3127_v55 = vshll.u32 %v15109_v35, 16  ;;  %v3138_v8 = vor.u32 %v3137_v61, %v3134_v44  ;;  %v3151_v42 = vshll.u32 %v15137_v15, 16  ;;  %v11541_v5 = vcombine.low %v3096_v62, %v3106_v30 }
 0x17f   : > { %v3114_v26 = vor.u32 %v3113_v40, %v3110_v10  ;;  %v15141_v22 = vrot.slane %v3141_v9, 5  ;;  %v15143_v10 = vld [vmem:[#allocation2 + $0xa4] sm:$0x1]  ;;  %v3183_v9 = vshll.u32 %v2858_v52, 16  ;;  %v3172_v36 = vor.u32 %v3171_v46, %v15145_v38 }
 0x180   : > { %17873 = vst [vmem:[#allocation6_spill] sm:$0xff] %v15143_v10  ;;  %v3175_v19 = vshll.u32 %v15143_v10, 16  ;;  %v3189_v16 = vshll.u32 %v15148_v2, 16  ;;  %v3139_v61 = vrot.slane %v3138_v8, 4  ;;  %v3153_v62 = vrot.slane %v3151_v42, 5 }
 0x181   : > { %12881 = vmatpush3.bf16.msra.mxu0 %v13955_v48  ;;  %v3156_v48 = vshrl.u32 %v2855_v0, 16  ;;  %v3115_v47 = vrot.slane %v3114_v26, 4  ;;  %v3125_v0 = vrot.slane %v3124_v20, 4  ;;  %v3193_v26 = vshrl.u32 %v15148_v2, 16  ;;  %v15168_v10 = vld [vmem:[#allocation2 + $0xc4] sm:$0xf] }
 0x182   : > { %12914 = vmatprep.subr.bf16.mxu0 %v15104_v37  ;;  %v3177_v46 = vrot.slane %v3175_v19, 5  ;;  %v3185_v4 = vrot.slane %v3183_v9, 5  ;;  %v3173_v6 = vrot.slane %v3172_v36, 4  ;;  %v3191_v63 = vrot.slane %v3189_v16, 5  ;;  %v15175_v9 = vld [vmem:[#allocation2 + $0xbc] sm:$0x1] }
 0x183   : > { %v3158_v40 = vrot.slane %v3156_v48, 4  ;;  %v15152_v48 = vld [vmem:[#allocation2 + $0xb8] sm:$0xf]  ;;  %v3120_v20 = vsel %vm14235_vm10, %v3115_v47, %v15111_v32  ;;  %v3195_v2 = vrot.slane %v3193_v26, 4  ;;  %v15166_v47 = vld [vmem:[#allocation2 + $0xb0] sm:$0x1]  ;;  %v3144_v19 = vsel %vm14235_vm10, %v3139_v61, %v15141_v22 }
 0x184   : > { %12851 = vmatmul.mubr.msk.bf16.gmra.mrb[8].mxu0 %vm1425_vm8, %v11537_v58  ;;  %v3129_v58 = vrot.slane %v3127_v55, 5  ;;  %v3180_v55 = vshrl.u32 %v2858_v52, 16  ;;  %v3178_v36 = vsel %vm14235_vm10, %v3173_v6, %v3177_v46  ;;  %v3199_v26 = vshll.u32 %v15166_v47, 16 }
 0x185   : > { %12854 = vmatprep.mubr.msk.bf16.mxu0 %vm1425_vm8, %v11538_v53  ;;  %v3147_v53 = vrot.slane %v3145_v41, 4  ;;  %v2861_v41 = vld [vmem:[#allocation2 + $0xb4] sm:$0xf]  ;;  %v3162_v3 = vor.u32 %v3161_v50, %v3158_v40  ;;  %v3217_v40 = vshrl.u32 %v15152_v48, 16  ;;  %v3196_v16 = vor.u32 %v3195_v2, %v3191_v63 }
 0x186   : > { %v3130_v44 = vsel %vm14235_vm10, %v3125_v0, %v3129_v58  ;;  %v3204_v30 = vshrl.u32 %v2861_v41, 16  ;;  %v3182_v52 = vrot.slane %v3180_v55, 4  ;;  %v2864_v58 = vld [vmem:[#allocation2 + $0xc0] sm:$0xf]  ;;  %v3201_v6 = vrot.slane %v3199_v26, 5 }
 0x187   : > { %v3148_v25 = vor.u32 %v3147_v53, %v15141_v22  ;;  %v3213_v53 = vshll.u32 %v15152_v48, 16  ;;  %v11542_v32 = vcombine.low %v3120_v20, %v3130_v44  ;;  %v3228_v22 = vshrl.u32 %v2864_v58, 16 }
 0x188   : > { %v3206_v0 = vrot.slane %v3204_v30, 4  ;;  %v3186_v55 = vor.u32 %v3185_v4, %v3182_v52  ;;  %v3231_v20 = vshll.u32 %v2864_v58, 16  ;;  %v3237_v4 = vshll.u32 %v15168_v10, 16  ;;  %v15188_v58 = vld [vmem:[#allocation2 + $0xc8] sm:$0x1] }
 0x189   : > { %v3149_v50 = vrot.slane %v3148_v25, 4  ;;  %v3215_v42 = vrot.slane %v3213_v53, 5  ;;  %v3241_v44 = vshrl.u32 %v15168_v10, 16  ;;  %v3197_v53 = vrot.slane %v3196_v16, 4  ;;  %v3573_v16 = vld [vmem:[#allocation2 + $0xc] sm:$0xe] }
 0x18a   : > { %v3230_v2 = vrot.slane %v3228_v22, 4 }
 0x18b   : > { %v3154_v25 = vsel %vm14235_vm10, %v3149_v50, %v3153_v62  ;;  %v3223_v62 = vshll.u32 %v15175_v9, 16  ;;  %v3239_v50 = vrot.slane %v3237_v4, 5  ;;  %v3243_v46 = vrot.slane %v3241_v44, 4 }
 0x18c   : > { %12855 = vmatmul.mubr.msk.bf16.gmra.mrb[12].mxu0 %vm1425_vm8, %v11539_v1  ;;  %v3207_v1 = vshll.u32 %v2861_v41, 16  ;;  %v3219_v41 = vrot.slane %v3217_v40, 4  ;;  %v11543_v30 = vcombine.low %v3144_v19, %v3154_v25  ;;  %v3233_v40 = vrot.slane %v3231_v20, 5 }
 0x18d   : > { %12858 = vmatprep.mubr.msk.bf16.mxu0 %vm1425_vm8, %v11540_v33  ;;  %v3163_v33 = vrot.slane %v3162_v3, 4  ;;  %v3244_v19 = vor.u32 %v3243_v46, %v3239_v50  ;;  %v3247_v25 = vshll.u32 %v15188_v58, 16  ;;  %v11568_v44 = vrot.slane %v3573_v16, 9 }
 0x18e   : > { %v3209_v8 = vrot.slane %v3207_v1, 5  ;;  %v3187_v1 = vrot.slane %v3186_v55, 4  ;;  %v3663_v16 = vrot.slane %v14960_v7, 5 }
 0x18f   : > { %v3168_v3 = vsel %vm14235_vm10, %v3163_v33, %v15145_v38  ;;  %v3245_v20 = vrot.slane %v3244_v19, 4  ;;  %v3249_v4 = vrot.slane %v3247_v25, 5  ;;  %v3577_v19 = vld [vmem:[#allocation2 + $0x3c] sm:$0xe] }
 0x190   : > { %v3210_v61 = vor.u32 %v3209_v8, %v3206_v0  ;;  %v11544_v38 = vcombine.low %v3168_v3, %v3178_v36  ;;  %v3192_v0 = vsel %vm14235_vm10, %v3187_v1, %v3191_v63  ;;  %v3202_v8 = vsel %vm14235_vm10, %v3197_v53, %v3201_v6  ;;  %v3574_v1 = vld [vmem:[#allocation2 + $0x18] sm:$0xe]  ;;  %v3575_v53 = vld [vmem:[#allocation2 + $0x24] sm:$0xe] }
 0x191   : > { %v3639_v36 = vrot.slane %v14920_v13, 5  ;;  %v11545_v26 = vcombine.low %v3192_v0, %v3202_v8  ;;  %v3250_v13 = vsel %vm14235_vm10, %v3245_v20, %v3249_v4  ;;  %v3660_v0 = vrot.slane %v14940_v59, 5 }
 0x192   : > { %v3211_v52 = vrot.slane %v3210_v61, 4  ;;  %v3670_v59 = vrot.slane %v14977_v51, 5  ;;  %v3674_v20 = vrot.slane %v14975_v24, 5  ;;  %v3677_v24 = vrot.slane %v15003_v17, 5 }
 0x193   : > { %v3641_v61 = vrot.slane %v3639_v36, 4 }
 0x194   : > { %12859 = vmatmul.mubr.msk.bf16.gmra.mrb[16].mxu0 %vm1425_vm8, %v11541_v5  ;;  %v3220_v5 = vor.u32 %v3219_v41, %v3215_v42  ;;  %v3234_v41 = vor.u32 %v3233_v40, %v3230_v2  ;;  %v3216_v55 = vsel %vm14235_vm10, %v3211_v52, %v3215_v42  ;;  %v11569_v40 = vrot.slane %v3574_v1, 9 }
 0x195   : > { %12862 = vmatprep.mubr.msk.bf16.mxu0 %vm1425_vm8, %v11542_v32  ;;  %v3225_v32 = vrot.slane %v3223_v62, 5  ;;  %v3646_v62 = vrot.slane %v14925_v27, 5  ;;  %v11570_v52 = vrot.slane %v3575_v53, 9  ;;  %v3656_v27 = vrot.slane %v14947_v56, 5 }
 0x196   : > { %v3221_v33 = vrot.slane %v3220_v5, 4  ;;  %v3235_v22 = vrot.slane %v3234_v41, 4  ;;  %v3642_v5 = vrot.slane %v14932_v57, 5  ;;  %v3653_v57 = vrot.slane %v14928_v54, 5  ;;  %v3576_v41 = vld [vmem:[#allocation2 + $0x30] sm:$0xe] }
 0x197   : > { %v3648_v46 = vrot.slane %v3646_v62, 4  ;;  %v3667_v56 = vrot.slane %v14957_v14, 5 }
 0x198   : > { %v3226_v3 = vsel %vm14235_vm10, %v3221_v33, %v3225_v32  ;;  %v3240_v42 = vsel %vm14235_vm10, %v3235_v22, %v3239_v50  ;;  %v3649_v50 = vrot.slane %v14942_v60, 5  ;;  %v3655_v33 = vrot.slane %v3653_v57, 4  ;;  %v13957_v22 = vld [vmem:[%s17765_s1 + $0xc8] sm:$0xff]  }
 0x199   : > { %v11546_v63 = vcombine.low %v3216_v55, %v3226_v3  ;;  %v11547_v6 = vcombine.low %v3240_v42, %v3250_v13  ;;  %v3647_v32 = vsel %vm14767_vm15, %v11569_v40, %v3646_v62  ;;  %v3654_v8 = vsel %vm14767_vm15, %v11570_v52, %v3653_v57  ;;  %v3580_v40 = vld [vmem:[#allocation2 + $0x60] sm:$0xe]  ;;  %v3581_v52 = vld [vmem:[#allocation2 + $0x6c] sm:$0xe] }
 0x19a   : > { %v3650_v54 = vsel %vm14767_vm15, %v3648_v46, %v3649_v50  ;;  %v3657_v60 = vsel %vm14767_vm15, %v3655_v33, %v3656_v27  ;;  %v11571_v3 = vrot.slane %v3576_v41, 9  ;;  %v3684_v57 = vrot.slane %v15015_v28, 5  ;;  %v15270_v50 = vld [vmem:[%s17765_s1 + $0xe0] sm:$0xff]  }
 0x19b   : > { %v11593_v25 = vcombine.low %v3647_v32, %v3650_v54  ;;  %v11594_v55 = vcombine.low %v3654_v8, %v3657_v60  ;;  %v3695_v46 = vrot.slane %v15026_v12, 5  ;;  %v3691_v54 = vrot.slane %v15056_v23, 5 }
 0x19c   : > { %12863 = vmatmul.mubr.msk.bf16.gmra.mrb[20].mxu0 %vm1425_vm8, %v11543_v30  ;;  %v3640_v30 = vsel %vm14767_vm15, %v11568_v44, %v3639_v36  ;;  %v3662_v36 = vrot.slane %v3660_v0, 4  ;;  %v3661_v14 = vsel %vm14767_vm15, %v11571_v3, %v3660_v0  ;;  %v3578_v44 = vld [vmem:[#allocation2 + $0x48] sm:$0xe]  ;;  %v11576_v0 = vrot.slane %v3581_v52, 9 }
 0x19d   : > { %12866 = vmatprep.mubr.msk.bf16.mxu0 %vm1425_vm8, %v11544_v38  ;;  %v3643_v38 = vsel %vm14767_vm15, %v3641_v61, %v3642_v5  ;;  %v13958_v61 = vld [vmem:[%s17765_s1 + $0xd0] sm:$0xff]   ;;  %v11573_v62 = vrot.slane %v3578_v44, 9  ;;  %v3697_v8 = vrot.slane %v3695_v46, 4  ;;  %v3698_v60 = vrot.slane %v15065_v18, 5 }
 0x19e   : > { %v11592_v2 = vcombine.low %v3640_v30, %v3643_v38  ;;  %v3664_v7 = vsel %vm14767_vm15, %v3662_v36, %v3663_v16  ;;  %v3579_v5 = vld [vmem:[#allocation2 + $0x54] sm:$0xe]  ;;  %v3676_v30 = vrot.slane %v3674_v20, 4  ;;  %v3696_v23 = vsel %vm14767_vm15, %v11576_v0, %v3695_v46  ;;  %v3588_v0 = vld [vmem:[#allocation2 + $0xc0] sm:$0xe] }
 0x19f   : > { %v11595_v42 = vcombine.low %v3661_v14, %v3664_v7  ;;  %v11574_v38 = vrot.slane %v3579_v5, 9  ;;  %v3675_v53 = vsel %vm14767_vm15, %v11573_v62, %v3674_v20  ;;  %v3699_v18 = vsel %vm14767_vm15, %v3697_v8, %v3698_v60 }
 0x1a0   : > { %v3678_v17 = vsel %vm14767_vm15, %v3676_v30, %v3677_v24  ;;  %v11600_v36 = vcombine.low %v3696_v23, %v3699_v18  ;;  %v3716_v7 = vrot.slane %v15107_v34, 5  ;;  %v17875_v30 = vld [vmem:[#allocation6_spill] sm:$0xff]  ;;  %v3733_v46 = vrot.slane %v15166_v47, 5  ;;  %v13960_v18 = vld [vmem:[#allocation2 + $0x18] sm:$0xff]  }
 0x1a1   : > { %v11597_v33 = vcombine.low %v3675_v53, %v3678_v17  ;;  %v3726_v34 = vrot.slane %v17875_v30, 5  ;;  %v3737_v53 = vrot.slane %v15152_v48, 5  ;;  %v3587_v17 = vld [vmem:[#allocation2 + $0xb4] sm:$0xe]  ;;  %v11583_v60 = vrot.slane %v3588_v0, 9 }
 0x1a2   : > { %v3718_v5 = vrot.slane %v3716_v7, 4  ;;  %v11582_v52 = vrot.slane %v3587_v17, 9  ;;  %v13974_v17 = vld [vmem:[#allocation2 + $0x9c] sm:$0xff]  }
 0x1a4   : > { %12867 = vmatmul.mubr.msk.bf16.gmra.mrb[24].mxu0 %vm1425_vm8, %v11545_v26  ;;  %v11572_v26 = vrot.slane %v3577_v19, 9  ;;  %v3582_v19 = vld [vmem:[#allocation2 + $0x78] sm:$0xe] }
 0x1a5   : > { %12870 = vmatprep.mubr.msk.bf16.mxu0 %vm1425_vm8, %v11546_v63  ;;  %v3669_v63 = vrot.slane %v3667_v56, 4  ;;  %v11577_v16 = vrot.slane %v3582_v19, 9  ;;  %v13962_v19 = vld [vmem:[#allocation2 + $0x24] sm:$0xff]  }
 0x1a6   : > { %v3668_v51 = vsel %vm14767_vm15, %v11572_v26, %v3667_v56  ;;  %v3702_v56 = vrot.slane %v15052_v21, 5  ;;  %v3712_v21 = vrot.slane %v15109_v35, 5  ;;  %v3723_v35 = vrot.slane %v15118_v11, 5 }
 0x1a7   : > { %v3671_v4 = vsel %vm14767_vm15, %v3669_v63, %v3670_v59  ;;  %v3705_v63 = vrot.slane %v15092_v39, 5 }
 0x1a8   : > { %v11596_v13 = vcombine.low %v3668_v51, %v3671_v4  ;;  %v3704_v26 = vrot.slane %v3702_v56, 4  ;;  %v3703_v14 = vsel %vm14767_vm15, %v11577_v16, %v3702_v56  ;;  %v3584_v51 = vld [vmem:[#allocation2 + $0x90] sm:$0xe]  ;;  %v3585_v4 = vld [vmem:[#allocation2 + $0x9c] sm:$0xe]  ;;  %v3725_v62 = vrot.slane %v3723_v35, 4 }
 0x1a9   : > { %v13976_v16 = vld [vmem:[%s17765_s1 + $0xf8] sm:$0xff]  }
 0x1ac   : > { %12871 = vmatmul.mubr.msk.bf16.gmra.mrb[28].mxu0 %vm1425_vm8, %v11547_v6  ;;  %v3688_v6 = vrot.slane %v15022_v31, 5  ;;  %v11575_v31 = vrot.slane %v3580_v40, 9 }
 0x1ad   : > { %12882 = vmatprep.mubr.msk.bf16.mxu0 %vm1425_vm8, %v11592_v2 }
 0x1ae   : > { %v3690_v32 = vrot.slane %v3688_v6, 4  ;;  %v3689_v12 = vsel %vm14767_vm15, %v11575_v31, %v3688_v6 }
 0x1b0   : > { %v3692_v41 = vsel %vm14767_vm15, %v3690_v32, %v3691_v54  ;;  %v3744_v32 = vrot.slane %v15168_v10, 5  ;;  %v3738_v54 = vsel %vm14767_vm15, %v11582_v52, %v3737_v53  ;;  %v13975_v52 = vld [vmem:[#allocation2 + $0xa8] sm:$0xff]  }
 0x1b1   : > { %v11599_v3 = vcombine.low %v3689_v12, %v3692_v41  ;;  %v3747_v41 = vrot.slane %v15188_v58, 5  ;;  %v13966_v58 = vld [vmem:[%s17765_s1 + $0xe8] sm:$0xff]  }
 0x1b2   : > { %v3746_v12 = vrot.slane %v3744_v32, 4  ;;  %v3745_v10 = vsel %vm14767_vm15, %v11583_v60, %v3744_v32 }
 0x1b4   : > { %12883 = vmatmul.mubr.msk.bf16.vlgmr.msra.gmra.mrb[0].mxu0 %vm1425_vm8, %v11593_v25  ;;  %v3709_v25 = vrot.slane %v15079_v29, 5  ;;  %v3706_v29 = vsel %vm14767_vm15, %v3704_v26, %v3705_v63  ;;  %v3748_v56 = vsel %vm14767_vm15, %v3746_v12, %v3747_v41  ;;  %v13967_v26 = vld [vmem:[#allocation2 + $0x54] sm:$0xff]   ;;  %v13968_v63 = vld [vmem:[#allocation2 + $0x60] sm:$0xff]  }
 0x1b5   : > { %12915 = vmatpush3.bf16.msra.mxu0 %v15104_v37  ;;  %12886 = vmatprep.mubr.msk.bf16.mxu0 %vm1425_vm8, %v11594_v55  ;;  %v3681_v37 = vrot.slane %v14993_v45, 5  ;;  %v13959_v45 = vld [vmem:[%s17765_s1 + $0xd8] sm:$0xff]   ;;  %v3583_v55 = vld [vmem:[#allocation2 + $0x84] sm:$0xe]  ;;  %v11601_v44 = vcombine.low %v3703_v14, %v3706_v29  ;;  %v11607_v23 = vcombine.low %v3745_v10, %v3748_v56  ;;  %v4470_v10 = vld [vmem:[#allocation2 + $0x48] sm:$0xf] }
 0x1b6   : > { %12916 = vmatprep.subr.bf16.mxu0 %v13957_v22  ;;  %v11578_v59 = vrot.slane %v3583_v55, 9  ;;  %v13971_v55 = vld [vmem:[%s17765_s1 + $0xf0] sm:$0xff]   ;;  %v15361_v14 = vld [vmem:[#allocation2 + $0x1c] sm:$0xf]  ;;  %v15392_v56 = vld [vmem:[#allocation2 + $0x4c] sm:$0xf] }
 0x1b7   : > { %v3683_v1 = vrot.slane %v3681_v37, 4  ;;  %v3682_v28 = vsel %vm14767_vm15, %v11574_v38, %v3681_v37  ;;  %v17876_v38 = vld [vmem:[#allocation7_spill] sm:$0xff] }
 0x1b8   : > { %v3710_v20 = vsel %vm14767_vm15, %v11578_v59, %v3709_v25  ;;  %v13969_v59 = vld [vmem:[#allocation2 + $0x6c] sm:$0xff]  }
 0x1b9   : > { %12917 = vmatpush3.bf16.msra.mxu0 %v13957_v22  ;;  %v3685_v2 = vsel %vm14767_vm15, %v3683_v1, %v3684_v57  ;;  %v3711_v22 = vrot.slane %v3709_v25, 4  ;;  %v3730_v1 = vrot.slane %v17876_v38, 5  ;;  %v13963_v25 = vld [vmem:[#allocation2 + $0x30] sm:$0xff]  }
 0x1ba   : > { %12918 = vmatprep.subr.bf16.mxu0 %v13958_v61  ;;  %v11598_v27 = vcombine.low %v3682_v28, %v3685_v2  ;;  %v15375_v38 = vld [vmem:[#allocation2 + $0x34] sm:$0xf] }
 0x1bb   : > { %v3713_v39 = vsel %vm14767_vm15, %v3711_v22, %v3712_v21  ;;  %v3732_v40 = vrot.slane %v3730_v1, 4  ;;  %v13970_v22 = vld [vmem:[#allocation2 + $0x78] sm:$0xff]   ;;  %v4568_v32 = vshrl.u32 %v15375_v38, 16 }
 0x1bc   : > { %12887 = vmatmul.mubr.msk.bf16.gmra.mrb[4].mxu0 %vm1425_vm8, %v11595_v42  ;;  %v11602_v37 = vcombine.low %v3710_v20, %v3713_v39  ;;  %v3719_v42 = vrot.slane %v15137_v15, 5  ;;  %v3727_v15 = vsel %vm14767_vm15, %v3725_v62, %v3726_v34  ;;  %v4458_v21 = vld [vmem:[#allocation2 + $0x18] sm:$0xf]  ;;  %v13972_v20 = vld [vmem:[#allocation2 + $0x84] sm:$0xff]   ;;  %v4516_v39 = vshll.u32 %v15361_v14, 16 }
 0x1bd   : > { %12890 = vmatprep.mubr.msk.bf16.mxu0 %vm1425_vm8, %v11596_v13  ;;  %12919 = vmatpush3.bf16.msra.mxu0 %v13958_v61  ;;  %v11579_v61 = vrot.slane %v3584_v51, 9  ;;  %v11580_v13 = vrot.slane %v3585_v4, 9  ;;  %v3734_v48 = vsel %vm14767_vm15, %v3732_v40, %v3733_v46  ;;  %v4507_v29 = vshrl.u32 %v4458_v21, 16  ;;  %v13973_v4 = vld [vmem:[#allocation2 + $0x90] sm:$0xff]  }
 0x1be   : > { %12920 = vmatprep.subr.bf16.mxu0 %v13959_v45  ;;  %v3720_v11 = vsel %vm14767_vm15, %v3718_v5, %v3719_v42  ;;  %v4520_v51 = vshrl.u32 %v15361_v14, 16  ;;  %v15368_v62 = vrot.slane %v4516_v39, 5  ;;  %v4616_v39 = vshrl.u32 %v15392_v56, 16 }
 0x1bf   : > { %v3717_v24 = vsel %vm14767_vm15, %v11579_v61, %v3716_v7  ;;  %v3724_v57 = vsel %vm14767_vm15, %v11580_v13, %v3723_v35  ;;  %v4510_v7 = vshll.u32 %v4458_v21, 16  ;;  %v4461_v35 = vld [vmem:[#allocation2 + $0x24] sm:$0xf]  ;;  %v4464_v13 = vld [vmem:[#allocation2 + $0x30] sm:$0xf] }
 0x1c0   : > { %v11603_v6 = vcombine.low %v3717_v24, %v3720_v11  ;;  %v11604_v28 = vcombine.low %v3724_v57, %v3727_v15  ;;  %v4531_v5 = vshrl.u32 %v4461_v35, 16  ;;  %v4534_v42 = vshll.u32 %v4461_v35, 16  ;;  %v15373_v11 = vld [vmem:[#allocation2 + $0x20] sm:$0x1] }
 0x1c1   : > { %12921 = vmatpush3.bf16.msra.mxu0 %v13959_v45  ;;  %v3586_v45 = vld [vmem:[#allocation2 + $0xa8] sm:$0xe]  ;;  %v4512_v61 = vrot.slane %v4510_v7, 5  ;;  %v4522_v30 = vrot.slane %v4520_v51, 4  ;;  %v4558_v57 = vshll.u32 %v4464_v13, 16  ;;  %v13978_v21 = vld [vmem:[#allocation2 + $0xc0] sm:$0xff]  }
 0x1c2   : > { %12954 = vmatprep.subr.bf16.mxu0 %v15270_v50  ;;  %v11581_v2 = vrot.slane %v3586_v45, 9  ;;  %v4533_v45 = vrot.slane %v4531_v5, 4  ;;  %v4473_v51 = vld [vmem:[#allocation2 + $0x54] sm:$0xf] }
 0x1c4   : > { %12891 = vmatmul.mubr.msk.bf16.gmra.mrb[8].mxu0 %vm1425_vm8, %v11597_v33  ;;  %v3739_v33 = vrot.slane %v3737_v53, 4  ;;  %v3731_v31 = vsel %vm14767_vm15, %v11581_v2, %v3730_v1  ;;  %v4555_v1 = vshrl.u32 %v4464_v13, 16  ;;  %v4536_v53 = vrot.slane %v4534_v42, 5  ;;  %v15379_v2 = vld [vmem:[#allocation2 + $0x2c] sm:$0x1] }
 0x1c5   : > { %12894 = vmatprep.mubr.msk.bf16.mxu0 %vm1425_vm8, %v11598_v27  ;;  %v3740_v27 = vrot.slane %v15175_v9, 5  ;;  %v11605_v9 = vcombine.low %v3731_v31, %v3734_v48  ;;  %v4560_v48 = vrot.slane %v4558_v57, 5 }
 0x1c6   : > { %v4557_v31 = vrot.slane %v4555_v1, 4  ;;  %v4537_v0 = vor.u32 %v4536_v53, %v4533_v45  ;;  %v4627_v45 = vshrl.u32 %v4473_v51, 16 }
 0x1c7   : > { %v3741_v47 = vsel %vm14767_vm15, %v3739_v33, %v3740_v27  ;;  %v4564_v33 = vshll.u32 %v15375_v38, 16  ;;  %v4467_v27 = vld [vmem:[#allocation2 + $0x3c] sm:$0xf] }
 0x1c8   : > { %v11606_v8 = vcombine.low %v3738_v54, %v3741_v47  ;;  %v15385_v54 = vld [vmem:[#allocation2 + $0x40] sm:$0xf] }
 0x1cc   : > { %12895 = vmatmul.mubr.msk.bf16.gmra.mrb[12].mxu0 %vm1425_vm8, %v11599_v3  ;;  %v13964_v3 = vld [vmem:[#allocation2 + $0x3c] sm:$0xff]  }
 0x1cd   : > { %12898 = vmatprep.mubr.msk.bf16.mxu0 %vm1425_vm8, %v11600_v36  ;;  %v13965_v36 = vld [vmem:[#allocation2 + $0x48] sm:$0xff]  }
 0x1d4   : > { %12899 = vmatmul.mubr.msk.bf16.gmra.mrb[16].mxu0 %vm1425_vm8, %v11601_v44  ;;  %v15365_v44 = vld [vmem:[#allocation2 + $0x28] sm:$0xf] }
 0x1d5   : > { %12902 = vmatprep.mubr.msk.bf16.mxu0 %vm1425_vm8, %v11602_v37  ;;  %v4509_v37 = vrot.slane %v4507_v29, 4  ;;  %v4540_v34 = vshll.u32 %v15365_v44, 16  ;;  %v4544_v24 = vshrl.u32 %v15365_v44, 16 }
 0x1d7   : > { %v4513_v15 = vor.u32 %v4512_v61, %v4509_v37  ;;  %v15381_v40 = vrot.slane %v4540_v34, 5  ;;  %v4546_v46 = vrot.slane %v4544_v24, 4  ;;  %v15422_v34 = vld [vmem:[#allocation2 + $0x58] sm:$0xf]  ;;  %v15424_v24 = vld [vmem:[#allocation2 + $0x50] sm:$0x1] }
 0x1d9   : > { %v4514_v47 = vrot.slane %v4513_v15, 4  ;;  %v4547_v41 = vor.u32 %v4546_v46, %v15381_v40  ;;  %v15433_v46 = vld [vmem:[#allocation2 + $0xd0] sm:$0xf] }
 0x1db   : > { %v4519_v29 = vsel %vm14235_vm10, %v4514_v47, %v15368_v62  ;;  %v15411_v35 = vrot.slane %v4547_v41, 4  ;;  %v4622_v41 = vshll.u32 %v15424_v24, 16 }
 0x1dc   : > { %12903 = vmatmul.mubr.msk.bf16.gmra.mrb[20].mxu0 %vm1425_vm8, %v11603_v6  ;;  %v4523_v6 = vor.u32 %v4522_v30, %v15368_v62 }
 0x1dd   : > { %12906 = vmatprep.mubr.msk.bf16.mxu0 %vm1425_vm8, %v11604_v28  ;;  %v4526_v28 = vshll.u32 %v15373_v11, 16 }
 0x1de   : > { %v4524_v60 = vrot.slane %v4523_v6, 4  ;;  %v4618_v6 = vrot.slane %v4616_v39, 4  ;;  %v4497_v39 = vld [vmem:[#allocation2 + $0xb4] sm:$0xf] }
 0x1df   : > { %v4528_v12 = vrot.slane %v4526_v28, 5  ;;  %v4630_v28 = vshll.u32 %v4473_v51, 16 }
 0x1e1   : > { %v4529_v7 = vsel %vm14235_vm10, %v4524_v60, %v4528_v12 }
 0x1e2   : > { %v11680_v53 = vcombine.low %v4519_v29, %v4529_v7 }
 0x1e4   : > { %12907 = vmatmul.mubr.msk.bf16.gmra.mrb[24].mxu0 %vm1425_vm8, %v11605_v9  ;;  %v4550_v9 = vshll.u32 %v15379_v2, 16 }
 0x1e5   : > { %12910 = vmatprep.mubr.msk.bf16.mxu0 %vm1425_vm8, %v11606_v8  ;;  %v15388_v8 = vld [vmem:[#allocation2 + $0x38] sm:$0x1] }
 0x1ec   : > { %12911 = vmatmul.mubr.msk.bf16.gmra.mrb[28].mxu0 %vm1425_vm8, %v11607_v23  ;;  %v15395_v23 = vrot.slane %v4564_v33, 5 }
 0x1ed   : > { %12922 = vmatprep.mubr.msk.bf16.mxu0 %vm1425_vm8, %v13960_v18  ;;  %v4579_v18 = vshrl.u32 %v4467_v27, 16 }
 0x1ef   : > { %v4581_v37 = vrot.slane %v4579_v18, 4  ;;  %v15445_v18 = vld [vmem:[#allocation2 + $0x64] sm:$0xf] }
 0x1f0   : > { %v4660_v29 = vshll.u32 %v15445_v18, 16  ;;  %v4664_v7 = vshrl.u32 %v15445_v18, 16 }
 0x1f4   : > { %12923 = vmatmul.mubr.msk.bf16.vlgmr.msra.gmra.mrb[0].mxu0 %vm1425_vm8, %v13962_v19  ;;  %v4582_v19 = vshll.u32 %v4467_v27, 16  ;;  %v4636_v27 = vshll.u32 %v15422_v34, 16 }
 0x1f5   : > { %12955 = vmatpush3.bf16.msra.mxu0 %v15270_v50  ;;  %12926 = vmatprep.mubr.msk.bf16.mxu0 %vm1425_vm8, %v13963_v25  ;;  %v15354_v50 = vld [vmem:[%s17765_s1 + $0x100] sm:$0xff]   ;;  %v4588_v25 = vshll.u32 %v15385_v54, 16 }
 0x1f6   : > { %12956 = vmatprep.subr.bf16.mxu0 %v13966_v58  ;;  %v4584_v61 = vrot.slane %v4582_v19, 5 }
 0x1f7   : > { %v15415_v5 = vrot.slane %v4588_v25, 5  ;;  %v13979_v25 = vld [vmem:[#allocation2 + $0xcc] sm:$0xff]  }
 0x1f9   : > { %12957 = vmatpush3.bf16.msra.mxu0 %v13966_v58  ;;  %v4561_v58 = vor.u32 %v4560_v48, %v4557_v31  ;;  %v5227_v31 = vld [vmem:[#allocation2 + $0xcc] sm:$0xe]  ;;  %v5383_v48 = vrot.slane %v15433_v46, 5 }
 0x1fa   : > { %12958 = vmatprep.subr.bf16.mxu0 %v13971_v55  ;;  %v11731_v60 = vrot.slane %v5227_v31, 9  ;;  %v15489_v31 = vld [vmem:[#allocation2 + $0x68] sm:$0x1] }
 0x1fb   : > { %v15417_v42 = vrot.slane %v4561_v58, 4  ;;  %v5385_v19 = vrot.slane %v5383_v48, 4 }
 0x1fc   : > { %12927 = vmatmul.mubr.msk.bf16.gmra.mrb[4].mxu0 %vm1425_vm8, %v13964_v3  ;;  %v4574_v3 = vshll.u32 %v15388_v8, 16 }
 0x1fd   : > { %12930 = vmatprep.mubr.msk.bf16.mxu0 %vm1425_vm8, %v13965_v36  ;;  %12959 = vmatpush3.bf16.msra.mxu0 %v13971_v55  ;;  %v4570_v55 = vrot.slane %v4568_v32, 4  ;;  %v4592_v36 = vshrl.u32 %v15385_v54, 16 }
 0x1fe   : > { %12960 = vmatprep.subr.bf16.mxu0 %v13976_v16  ;;  %v15420_v62 = vrot.slane %v4574_v3, 5  ;;  %v4632_v3 = vrot.slane %v4630_v28, 5  ;;  %v15486_v28 = vld [vmem:[#allocation2 + $0x70] sm:$0xf] }
 0x1ff   : > { %v4571_v13 = vor.u32 %v4570_v55, %v15395_v23  ;;  %v4594_v30 = vrot.slane %v4592_v36, 4  ;;  %v15450_v36 = vsel %vm14767_vm15, %v11731_v60, %v5383_v48  ;;  %v4666_v48 = vrot.slane %v4664_v7, 4 }
 0x200   : > { %17877 = vst [vmem:[#allocation6_spill] sm:$0xff] %v15450_v36  ;;  %v4684_v60 = vshll.u32 %v15486_v28, 16  ;;  %v15635_v36 = vld [vmem:[#allocation2 + $0xbc] sm:$0x1] }
 0x201   : > { %12961 = vmatpush3.bf16.msra.mxu0 %v13976_v16  ;;  %v15400_v16 = vrot.slane %v4537_v0, 4  ;;  %v4572_v47 = vrot.slane %v4571_v13, 4  ;;  %v4585_v0 = vor.u32 %v4584_v61, %v4581_v37  ;;  %v4595_v12 = vor.u32 %v4594_v30, %v15415_v5 }
 0x202   : > { %12994 = vmatprep.subr.bf16.mxu0 %v15354_v50  ;;  %v4567_v37 = vsel %vm14235_vm10, %v15417_v42, %v15395_v23 }
 0x203   : > { %v15472_v61 = vrot.slane %v4585_v0, 4  ;;  %v4577_v30 = vsel %vm14235_vm10, %v4572_v47, %v15420_v62  ;;  %v15491_v62 = vrot.slane %v4660_v29, 5 }
 0x204   : > { %12931 = vmatmul.mubr.msk.bf16.gmra.mrb[8].mxu0 %vm1425_vm8, %v13967_v26  ;;  %v4603_v26 = vshrl.u32 %v4470_v10, 16  ;;  %v11682_v47 = vcombine.low %v4567_v37, %v4577_v30 }
 0x205   : > { %12934 = vmatprep.mubr.msk.bf16.mxu0 %vm1425_vm8, %v13968_v63  ;;  %v4606_v63 = vshll.u32 %v4470_v10, 16  ;;  %v4629_v10 = vrot.slane %v4627_v45, 4 }
 0x206   : > { %v4605_v1 = vrot.slane %v4603_v26, 4 }
 0x207   : > { %v4608_v57 = vrot.slane %v4606_v63, 5 }
 0x209   : > { %v4609_v58 = vor.u32 %v4608_v57, %v4605_v1  ;;  %v15480_v1 = vrot.slane %v4595_v12, 4  ;;  %v4688_v12 = vshrl.u32 %v15486_v28, 16 }
 0x20b   : > { %v15482_v57 = vrot.slane %v4609_v58, 4  ;;  %v4670_v58 = vshll.u32 %v15489_v31, 16 }
 0x20c   : > { %12935 = vmatmul.mubr.msk.bf16.gmra.mrb[12].mxu0 %vm1425_vm8, %v13969_v59  ;;  %v4612_v59 = vshll.u32 %v15392_v56, 16 }
 0x20d   : > { %12938 = vmatprep.mubr.msk.bf16.mxu0 %vm1425_vm8, %v13970_v22  ;;  %v13977_v22 = vld [vmem:[#allocation2 + $0xb4] sm:$0xff]  }
 0x20e   : > { %v15426_v15 = vrot.slane %v4612_v59, 5 }
 0x210   : > { %v4619_v55 = vor.u32 %v4618_v6, %v15426_v15 }
 0x212   : > { %v4620_v45 = vrot.slane %v4619_v55, 4 }
 0x214   : > { %12939 = vmatmul.mubr.msk.bf16.gmra.mrb[16].mxu0 %vm1425_vm8, %v13972_v20  ;;  %v15408_v20 = vrot.slane %v4550_v9, 5  ;;  %v4476_v9 = vld [vmem:[#allocation2 + $0x60] sm:$0xf] }
 0x215   : > { %12942 = vmatprep.mubr.msk.bf16.mxu0 %vm1425_vm8, %v13973_v4  ;;  %v15413_v4 = vld [vmem:[#allocation2 + $0x44] sm:$0x1]  ;;  %v4651_v26 = vshrl.u32 %v4476_v9, 16  ;;  %v4654_v63 = vshll.u32 %v4476_v9, 16 }
 0x216   : > { %v4598_v33 = vshll.u32 %v15413_v4, 16  ;;  %v4553_v51 = vsel %vm14235_vm10, %v15411_v35, %v15408_v20  ;;  %v4624_v20 = vrot.slane %v4622_v41, 5  ;;  %v4479_v35 = vld [vmem:[#allocation2 + $0x6c] sm:$0xf]  ;;  %v4482_v41 = vld [vmem:[#allocation2 + $0x78] sm:$0xf] }
 0x217   : > { %v4653_v42 = vrot.slane %v4651_v26, 4  ;;  %v4656_v6 = vrot.slane %v4654_v63, 5  ;;  %v4675_v0 = vshrl.u32 %v4479_v35, 16  ;;  %v4667_v63 = vor.u32 %v4666_v48, %v15491_v62 }
 0x218   : > { %v15474_v13 = vrot.slane %v4598_v33, 5  ;;  %v4633_v33 = vor.u32 %v4632_v3, %v4629_v10  ;;  %v15503_v10 = vld [vmem:[#allocation2 + $0x7c] sm:$0xf]  ;;  %v4625_v55 = vsel %vm14235_vm10, %v4620_v45, %v4624_v20  ;;  %v4699_v29 = vshrl.u32 %v4482_v41, 16 }
 0x219   : > { %v4702_v7 = vshll.u32 %v4482_v41, 16  ;;  %v4712_v37 = vshrl.u32 %v15503_v10, 16 }
 0x21a   : > { %v4601_v9 = vsel %vm14235_vm10, %v15480_v1, %v15474_v13  ;;  %v15517_v3 = vrot.slane %v4633_v33, 4  ;;  %v4677_v13 = vrot.slane %v4675_v0, 4  ;;  %v15529_v1 = vrot.slane %v4684_v60, 5 }
 0x21c   : > { %12943 = vmatmul.mubr.msk.bf16.gmra.mrb[20].mxu0 %vm1425_vm8, %v13974_v17  ;;  %v4543_v17 = vsel %vm14235_vm10, %v15400_v16, %v15381_v40  ;;  %v4640_v40 = vshrl.u32 %v15422_v34, 16  ;;  %v15452_v16 = vrot.slane %v4636_v27, 5 }
 0x21d   : > { %12946 = vmatprep.mubr.msk.bf16.mxu0 %vm1425_vm8, %v13975_v52  ;;  %v15435_v52 = vld [vmem:[#allocation2 + $0xd4] sm:$0x1] }
 0x21e   : > { %v5386_v32 = vrot.slane %v15435_v52, 5 }
 0x220   : > { %v15456_v59 = vsel %vm14767_vm15, %v5385_v19, %v5386_v32  ;;  %v11681_v32 = vcombine.low %v4543_v17, %v4553_v51  ;;  %v4615_v17 = vsel %vm14235_vm10, %v15482_v57, %v15426_v15  ;;  %v4485_v15 = vld [vmem:[#allocation2 + $0x84] sm:$0xf]  ;;  %v4708_v51 = vshll.u32 %v15503_v10, 16 }
 0x221   : > { %17878 = vst [vmem:[#allocation7_spill] sm:$0xff] %v15456_v59  ;;  %v4690_v57 = vrot.slane %v4688_v12, 4  ;;  %v4726_v33 = vshll.u32 %v4485_v15, 16  ;;  %v11684_v60 = vcombine.low %v4615_v17, %v4625_v55 }
 0x222   : > { %v15539_v0 = vrot.slane %v4708_v51, 5 }
 0x223   : > { %v4691_v41 = vor.u32 %v4690_v57, %v15529_v1  ;;  %v4728_v55 = vrot.slane %v4726_v33, 5 }
 0x224   : > { %12947 = vmatmul.mubr.msk.bf16.gmra.mrb[24].mxu0 %vm1425_vm8, %v13977_v22  ;;  %v15458_v22 = vld [vmem:[#allocation2 + $0x5c] sm:$0x1] }
 0x225   : > { %12950 = vmatprep.mubr.msk.bf16.mxu0 %vm1425_vm8, %v13978_v21  ;;  %v4642_v21 = vrot.slane %v4640_v40, 4  ;;  %v4646_v23 = vshll.u32 %v15458_v22, 16  ;;  %v4678_v40 = vshll.u32 %v4479_v35, 16  ;;  %v4672_v35 = vrot.slane %v4670_v58, 5 }
 0x226   : > { %v4639_v58 = vsel %vm14235_vm10, %v15517_v3, %v15452_v16 }
 0x227   : > { %v4643_v27 = vor.u32 %v4642_v21, %v15452_v16  ;;  %v15512_v19 = vrot.slane %v4646_v23, 5  ;;  %v15522_v21 = vld [vmem:[#allocation2 + $0x74] sm:$0x1]  ;;  %v4680_v30 = vrot.slane %v4678_v40, 5  ;;  %v4723_v23 = vshrl.u32 %v4485_v15, 16 }
 0x228   : > { %v4694_v45 = vshll.u32 %v15522_v21, 16  ;;  %v15559_v16 = vld [vmem:[#allocation2 + $0x94] sm:$0xf] }
 0x229   : > { %v15519_v26 = vrot.slane %v4643_v27, 4  ;;  %v4681_v12 = vor.u32 %v4680_v30, %v4677_v13  ;;  %v4692_v13 = vrot.slane %v4691_v41, 4 }
 0x22a   : > { %v15552_v15 = vrot.slane %v4694_v45, 5 }
 0x22c   : > { %12951 = vmatmul.mubr.msk.bf16.gmra.mrb[28].mxu0 %vm1425_vm8, %v13979_v25  ;;  %v4657_v25 = vor.u32 %v4656_v6, %v4653_v42  ;;  %v4668_v42 = vrot.slane %v4667_v63, 4  ;;  %v13982_v6 = vld [vmem:[%s17765_s1 + $0x110] sm:$0xff]   ;;  %v4649_v63 = vsel %vm14235_vm10, %v15519_v26, %v15512_v19  ;;  %v13983_v19 = vld [vmem:[%s17765_s1 + $0x118] sm:$0xff]  }
 0x22d   : > { %12962 = vmatprep.mubr.msk.bf16.mxu0 %vm1425_vm8, %v11680_v53  ;;  %v4591_v53 = vsel %vm14235_vm10, %v15472_v61, %v15415_v5  ;;  %v13981_v5 = vld [vmem:[%s17765_s1 + $0x108] sm:$0xff]   ;;  %v11685_v45 = vcombine.low %v4639_v58, %v4649_v63  ;;  %v15584_v58 = vld [vmem:[#allocation2 + $0xa0] sm:$0xf] }
 0x22e   : > { %v15526_v61 = vld [vmem:[#allocation2 + $0x88] sm:$0xf]  ;;  %v4658_v20 = vrot.slane %v4657_v25, 4  ;;  %v11683_v40 = vcombine.low %v4591_v53, %v4601_v9  ;;  %v15542_v25 = vld [vmem:[#allocation2 + $0x80] sm:$0x1]  ;;  %v4725_v53 = vrot.slane %v4723_v23, 4 }
 0x22f   : > { %v4732_v27 = vshll.u32 %v15526_v61, 16  ;;  %v4736_v48 = vshrl.u32 %v15526_v61, 16  ;;  %v4488_v9 = vld [vmem:[#allocation2 + $0x90] sm:$0xf]  ;;  %v4718_v51 = vshll.u32 %v15542_v25, 16 }
 0x230   : > { %v4663_v17 = vsel %vm14235_vm10, %v4658_v20, %v15491_v62  ;;  %v15568_v62 = vld [vmem:[#allocation2 + $0x8c] sm:$0x1]  ;;  %v4747_v30 = vshrl.u32 %v4488_v9, 16  ;;  %v4750_v57 = vshll.u32 %v4488_v9, 16  ;;  %v4756_v20 = vshll.u32 %v15559_v16, 16 }
 0x231   : > { %v4729_v23 = vor.u32 %v4728_v55, %v4725_v53  ;;  %v4742_v33 = vshll.u32 %v15568_v62, 16  ;;  %v4494_v63 = vld [vmem:[#allocation2 + $0xa8] sm:$0xf] }
 0x232   : > { %v4752_v41 = vrot.slane %v4750_v57, 5  ;;  %v15586_v53 = vrot.slane %v4756_v20, 5 }
 0x234   : > { %12963 = vmatmul.mubr.msk.bf16.vlgmr.msra.gmra.mrb[0].mxu0 %vm1425_vm8, %v11681_v32  ;;  %v4701_v32 = vrot.slane %v4699_v29, 4  ;;  %v15557_v29 = vrot.slane %v4732_v27, 5  ;;  %v4491_v27 = vld [vmem:[#allocation2 + $0x9c] sm:$0xf] }
 0x235   : > { %12995 = vmatpush3.bf16.msra.mxu0 %v15354_v50  ;;  %12966 = vmatprep.mubr.msk.bf16.mxu0 %vm1425_vm8, %v11682_v47  ;;  %v4704_v50 = vrot.slane %v4702_v7, 5  ;;  %v4714_v47 = vrot.slane %v4712_v37, 4  ;;  %v4738_v7 = vrot.slane %v4736_v48, 4  ;;  %v4682_v37 = vrot.slane %v4681_v12, 4 }
 0x236   : > { %12996 = vmatprep.subr.bf16.mxu0 %v13981_v5  ;;  %v4749_v12 = vrot.slane %v4747_v30, 4  ;;  %v4774_v55 = vshll.u32 %v4491_v27, 16 }
 0x237   : > { %v4705_v3 = vor.u32 %v4704_v50, %v4701_v32  ;;  %v4715_v26 = vor.u32 %v4714_v47, %v15539_v0  ;;  %v4720_v47 = vrot.slane %v4718_v51, 5  ;;  %v4784_v51 = vshrl.u32 %v15584_v58, 16 }
 0x239   : > { %12997 = vmatpush3.bf16.msra.mxu0 %v13981_v5  ;;  %v4673_v5 = vsel %vm14235_vm10, %v4668_v42, %v4672_v35  ;;  %v4760_v35 = vshrl.u32 %v15559_v16, 16  ;;  %v4739_v42 = vor.u32 %v4738_v7, %v15557_v29  ;;  %v4706_v32 = vrot.slane %v4705_v3, 4  ;;  %v15588_v7 = vld [vmem:[#allocation2 + $0xac] sm:$0xf] }
 0x23a   : > { %12998 = vmatprep.subr.bf16.mxu0 %v13982_v6  ;;  %v11686_v48 = vcombine.low %v4663_v17, %v4673_v5  ;;  %v4716_v50 = vrot.slane %v4715_v26, 4  ;;  %v4771_v17 = vshrl.u32 %v4491_v27, 16  ;;  %v4730_v5 = vrot.slane %v4729_v23, 4 }
 0x23b   : > { %v4762_v9 = vrot.slane %v4760_v35, 4  ;;  %v4740_v3 = vrot.slane %v4739_v42, 4  ;;  %v4711_v30 = vsel %vm14235_vm10, %v4706_v32, %v15539_v0  ;;  %v4804_v57 = vshll.u32 %v15588_v7, 16  ;;  %v15608_v32 = vld [vmem:[#allocation2 + $0xa4] sm:$0x1] }
 0x23c   : > { %12967 = vmatmul.mubr.msk.bf16.gmra.mrb[4].mxu0 %vm1425_vm8, %v11683_v40  ;;  %v15576_v40 = vld [vmem:[#allocation2 + $0x98] sm:$0x1]  ;;  %v4808_v20 = vshrl.u32 %v15588_v7, 16  ;;  %v4753_v35 = vor.u32 %v4752_v41, %v4749_v12  ;;  %v4773_v42 = vrot.slane %v4771_v17, 4 }
 0x23d   : > { %12970 = vmatprep.mubr.msk.bf16.mxu0 %vm1425_vm8, %v11684_v60  ;;  %12999 = vmatpush3.bf16.msra.mxu0 %v13982_v6  ;;  %v4687_v6 = vsel %vm14235_vm10, %v4682_v37, %v15529_v1  ;;  %v4697_v60 = vsel %vm14235_vm10, %v4692_v13, %v15552_v15  ;;  %v4744_v1 = vrot.slane %v4742_v33, 5  ;;  %v4766_v26 = vshll.u32 %v15576_v40, 16 }
 0x23e   : > { %13000 = vmatprep.subr.bf16.mxu0 %v13983_v19  ;;  %v4780_v15 = vshll.u32 %v15584_v58, 16  ;;  %v4795_v37 = vshrl.u32 %v4494_v63, 16  ;;  %v4798_v13 = vshll.u32 %v4494_v63, 16  ;;  %v4763_v23 = vor.u32 %v4762_v9, %v15586_v53  ;;  %v15612_v9 = vld [vmem:[#allocation2 + $0xb0] sm:$0x1] }
 0x23f   : > { %v4776_v33 = vrot.slane %v4774_v55, 5  ;;  %v4745_v0 = vsel %vm14235_vm10, %v4740_v3, %v4744_v1  ;;  %v4768_v27 = vrot.slane %v4766_v26, 5  ;;  %v11687_v12 = vcombine.low %v4687_v6, %v4697_v60  ;;  %17879 = vst [vmem:[#allocation8_spill] sm:$0xff] %v15612_v9  ;;  %v15617_v1 = vld [vmem:[#allocation2 + $0xb8] sm:$0xf] }
 0x240   : > { %v4797_v63 = vrot.slane %v4795_v37, 4  ;;  %v15614_v17 = vrot.slane %v4804_v57, 5  ;;  %v4810_v55 = vrot.slane %v4808_v20, 4  ;;  %v4790_v3 = vshll.u32 %v15608_v32, 16  ;;  %17880 = vst [vmem:[#allocation9_spill] sm:$0xff] %v15617_v1 }
 0x241   : > { %13001 = vmatpush3.bf16.msra.mxu0 %v13983_v19  ;;  %v4721_v19 = vsel %vm14235_vm10, %v4716_v50, %v4720_v47  ;;  %v15610_v50 = vrot.slane %v4780_v15, 5  ;;  %v4786_v47 = vrot.slane %v4784_v51, 4  ;;  %v4777_v59 = vor.u32 %v4776_v33, %v4773_v42  ;;  %v4500_v37 = vld [vmem:[#allocation2 + $0xc0] sm:$0xf] }
 0x242   : > { %v11688_v41 = vcombine.low %v4711_v30, %v4721_v19  ;;  %v4814_v6 = vshll.u32 %v15612_v9, 16  ;;  %v4819_v60 = vshrl.u32 %v4497_v39, 16  ;;  %v4811_v30 = vor.u32 %v4810_v55, %v15614_v17 }
 0x243   : > { %v4787_v15 = vor.u32 %v4786_v47, %v15610_v50  ;;  %v4822_v19 = vshll.u32 %v4497_v39, 16  ;;  %v4828_v57 = vshll.u32 %v15617_v1, 16  ;;  %v4832_v20 = vshrl.u32 %v15617_v1, 16 }
 0x244   : > { %12971 = vmatmul.mubr.msk.bf16.gmra.mrb[8].mxu0 %vm1425_vm8, %v11685_v45  ;;  %v4735_v45 = vsel %vm14235_vm10, %v4730_v5, %v15557_v29  ;;  %v4754_v29 = vrot.slane %v4753_v35, 4  ;;  %v4764_v5 = vrot.slane %v4763_v23, 4  ;;  %v4778_v42 = vrot.slane %v4777_v59, 4 }
 0x245   : > { %12974 = vmatprep.mubr.msk.bf16.mxu0 %vm1425_vm8, %v11686_v48  ;;  %v4800_v48 = vrot.slane %v4798_v13, 5  ;;  %v11689_v26 = vcombine.low %v4735_v45, %v4745_v0  ;;  %v15621_v13 = vld [vmem:[#allocation2 + $0xc4] sm:$0xf]  ;;  %v4792_v33 = vrot.slane %v4790_v3, 5  ;;  %v4843_v45 = vshrl.u32 %v4500_v37, 16 }
 0x246   : > { %17881 = vst [vmem:[#allocation10_spill] sm:$0xff] %v15621_v13  ;;  %v4759_v35 = vsel %vm14235_vm10, %v4754_v29, %v15586_v53  ;;  %v4769_v23 = vsel %vm14235_vm10, %v4764_v5, %v4768_v27  ;;  %v4846_v0 = vshll.u32 %v4500_v37, 16  ;;  %v4852_v47 = vshll.u32 %v15621_v13, 16  ;;  %v4503_v37 = vld [vmem:[#allocation2 + $0xcc] sm:$0xf] }
 0x247   : > { %v4801_v51 = vor.u32 %v4800_v48, %v4797_v63  ;;  %v4856_v39 = vshrl.u32 %v15621_v13, 16  ;;  %v4788_v63 = vrot.slane %v4787_v15, 4  ;;  %v4821_v55 = vrot.slane %v4819_v60, 4 }
 0x248   : > { %v4824_v1 = vrot.slane %v4822_v19, 5  ;;  %v4830_v53 = vrot.slane %v4828_v57, 5  ;;  %v4834_v29 = vrot.slane %v4832_v20, 4  ;;  %v11690_v9 = vcombine.low %v4759_v35, %v4769_v23 }
 0x249   : > { %v4802_v48 = vrot.slane %v4801_v51, 4  ;;  %v4845_v27 = vrot.slane %v4843_v45, 4  ;;  %v4848_v59 = vrot.slane %v4846_v0, 5  ;;  %v4854_v5 = vrot.slane %v4852_v47, 5 }
 0x24a   : > { %v4858_v3 = vrot.slane %v4856_v39, 4  ;;  %v4783_v13 = vsel %vm14235_vm10, %v4778_v42, %v15610_v50  ;;  %v4793_v15 = vsel %vm14235_vm10, %v4788_v63, %v4792_v33  ;;  %v4838_v51 = vshll.u32 %v15635_v36, 16 }
 0x24b   : > { %v4807_v60 = vsel %vm14235_vm10, %v4802_v48, %v15614_v17  ;;  %v4825_v19 = vor.u32 %v4824_v1, %v4821_v55  ;;  %v4835_v57 = vor.u32 %v4834_v29, %v4830_v53  ;;  %v4867_v50 = vshrl.u32 %v4503_v37, 16 }
 0x24c   : > { %12975 = vmatmul.mubr.msk.bf16.gmra.mrb[12].mxu0 %vm1425_vm8, %v11687_v12  ;;  %v4816_v12 = vrot.slane %v4814_v6, 5  ;;  %v15643_v6 = vld [vmem:[#allocation2 + $0xc8] sm:$0x1]  ;;  %v4870_v20 = vshll.u32 %v4503_v37, 16  ;;  %v4876_v35 = vshll.u32 %v15433_v46, 16  ;;  %v4880_v23 = vshrl.u32 %v15433_v46, 16 }
 0x24d   : > { %12978 = vmatprep.mubr.msk.bf16.mxu0 %vm1425_vm8, %v11688_v41  ;;  %v4812_v41 = vrot.slane %v4811_v30, 4  ;;  %v4849_v42 = vor.u32 %v4848_v59, %v4845_v27  ;;  %v4859_v33 = vor.u32 %v4858_v3, %v4854_v5  ;;  %v11691_v45 = vcombine.low %v4783_v13, %v4793_v15 }
 0x24e   : > { %v4826_v17 = vrot.slane %v4825_v19, 4  ;;  %v4836_v47 = vrot.slane %v4835_v57, 4  ;;  %v4840_v39 = vrot.slane %v4838_v51, 5  ;;  %v4869_v63 = vrot.slane %v4867_v50, 4  ;;  %v5212_v51 = vld [vmem:[#allocation2 + $0x18] sm:$0xe] }
 0x24f   : > { %v4817_v30 = vsel %vm14235_vm10, %v4812_v41, %v4816_v12  ;;  %v4872_v1 = vrot.slane %v4870_v20, 5  ;;  %v4878_v48 = vrot.slane %v4876_v35, 5  ;;  %v4882_v12 = vrot.slane %v4880_v23, 4 }
 0x250   : > { %v11692_v0 = vcombine.low %v4807_v60, %v4817_v30  ;;  %v4860_v55 = vrot.slane %v4859_v33, 4  ;;  %v4831_v46 = vsel %vm14235_vm10, %v4826_v17, %v4830_v53  ;;  %v4841_v13 = vsel %vm14235_vm10, %v4836_v47, %v4840_v39  ;;  %v5213_v33 = vld [vmem:[#allocation2 + $0x24] sm:$0xe] }
 0x251   : > { %v4873_v29 = vor.u32 %v4872_v1, %v4869_v63  ;;  %v4883_v27 = vor.u32 %v4882_v12, %v4878_v48  ;;  %v4886_v59 = vshll.u32 %v15435_v52, 16  ;;  %v5278_v15 = vrot.slane %v15361_v14, 5 }
 0x252   : > { %v11693_v60 = vcombine.low %v4831_v46, %v4841_v13  ;;  %v11716_v50 = vrot.slane %v5212_v51, 9  ;;  %v5281_v35 = vrot.slane %v15373_v11, 5  ;;  %v5292_v11 = vrot.slane %v15375_v38, 5 }
 0x253   : > { %v4874_v30 = vrot.slane %v4873_v29, 4  ;;  %v4884_v19 = vrot.slane %v4883_v27, 4  ;;  %v4888_v57 = vrot.slane %v4886_v59, 5  ;;  %v5280_v20 = vrot.slane %v5278_v15, 4 }
 0x254   : > { %12979 = vmatmul.mubr.msk.bf16.gmra.mrb[16].mxu0 %vm1425_vm8, %v11689_v26  ;;  %v4862_v26 = vshll.u32 %v15643_v6, 16  ;;  %v5279_v23 = vsel %vm14767_vm15, %v11716_v50, %v5278_v15  ;;  %v11717_v17 = vrot.slane %v5213_v33, 9  ;;  %v5288_v39 = vrot.slane %v15379_v2, 5  ;;  %v5219_v33 = vld [vmem:[#allocation2 + $0x6c] sm:$0xe] }
 0x255   : > { %12982 = vmatprep.mubr.msk.bf16.mxu0 %vm1425_vm8, %v11690_v9  ;;  %v4850_v9 = vrot.slane %v4849_v42, 4  ;;  %v4879_v52 = vsel %vm14235_vm10, %v4874_v30, %v4878_v48  ;;  %v4889_v14 = vsel %vm14235_vm10, %v4884_v19, %v4888_v57  ;;  %v5282_v42 = vsel %vm14767_vm15, %v5280_v20, %v5281_v35  ;;  %v5218_v30 = vld [vmem:[#allocation2 + $0x60] sm:$0xe] }
 0x256   : > { %v4864_v41 = vrot.slane %v4862_v26, 5  ;;  %v5214_v26 = vld [vmem:[#allocation2 + $0x30] sm:$0xe]  ;;  %v5294_v1 = vrot.slane %v5292_v11, 4  ;;  %v5299_v12 = vrot.slane %v15385_v54, 5  ;;  %v5302_v59 = vrot.slane %v15413_v4, 5 }
 0x257   : > { %v4855_v3 = vsel %vm14235_vm10, %v4850_v9, %v4854_v5  ;;  %v5285_v5 = vrot.slane %v15365_v44, 5  ;;  %v11718_v63 = vrot.slane %v5214_v26, 9  ;;  %v5295_v44 = vrot.slane %v15388_v8, 5 }
 0x258   : > { %v4865_v37 = vsel %vm14235_vm10, %v4860_v55, %v4864_v41  ;;  %v5215_v55 = vld [vmem:[#allocation2 + $0x3c] sm:$0xe]  ;;  %v5306_v8 = vrot.slane %v15392_v56, 5  ;;  %v5216_v41 = vld [vmem:[#allocation2 + $0x48] sm:$0xe]  ;;  %v5301_v27 = vrot.slane %v5299_v12, 4 }
 0x259   : > { %v11694_v53 = vcombine.low %v4855_v3, %v4865_v37  ;;  %v5287_v47 = vrot.slane %v5285_v5, 4  ;;  %v5286_v48 = vsel %vm14767_vm15, %v11717_v17, %v5285_v5  ;;  %v5293_v9 = vsel %vm14767_vm15, %v11718_v63, %v5292_v11  ;;  %v5220_v11 = vld [vmem:[#allocation2 + $0x78] sm:$0xe] }
 0x25a   : > { %v5296_v2 = vsel %vm14767_vm15, %v5294_v1, %v5295_v44  ;;  %v11719_v29 = vrot.slane %v5215_v55, 9  ;;  %v11720_v3 = vrot.slane %v5216_v41, 9  ;;  %v5308_v37 = vrot.slane %v5306_v8, 4 }
 0x25b   : > { %v5289_v38 = vsel %vm14767_vm15, %v5287_v47, %v5288_v39  ;;  %v11742_v13 = vcombine.low %v5293_v9, %v5296_v2  ;;  %v5309_v54 = vrot.slane %v15424_v24, 5  ;;  %v5303_v56 = vsel %vm14767_vm15, %v5301_v27, %v5302_v59 }
 0x25c   : > { %12983 = vmatmul.mubr.msk.bf16.gmra.mrb[20].mxu0 %vm1425_vm8, %v11691_v45  ;;  %v11695_v45 = vcombine.low %v4879_v52, %v4889_v14  ;;  %v11741_v46 = vcombine.low %v5286_v48, %v5289_v38  ;;  %v5300_v15 = vsel %vm14767_vm15, %v11719_v29, %v5299_v12  ;;  %v5313_v51 = vrot.slane %v15422_v34, 5  ;;  %v5221_v38 = vld [vmem:[#allocation2 + $0x84] sm:$0xe]  ;;  %v5222_v12 = vld [vmem:[#allocation2 + $0x90] sm:$0xe] }
 0x25d   : > { %12986 = vmatprep.mubr.msk.bf16.mxu0 %vm1425_vm8, %v11692_v0  ;;  %v11740_v0 = vcombine.low %v5279_v23, %v5282_v42  ;;  %v5310_v4 = vsel %vm14767_vm15, %v5308_v37, %v5309_v54  ;;  %v5320_v24 = vrot.slane %v15445_v18, 5  ;;  %v11743_v19 = vcombine.low %v5300_v15, %v5303_v56  ;;  %v5224_v37 = vld [vmem:[#allocation2 + $0xa8] sm:$0xe] }
 0x25e   : > { %v5315_v20 = vrot.slane %v5313_v51, 4  ;;  %v5316_v35 = vrot.slane %v15458_v22, 5  ;;  %v11722_v52 = vrot.slane %v5218_v30, 9  ;;  %v5323_v34 = vrot.slane %v15489_v31, 5 }
 0x25f   : > { %v5322_v14 = vrot.slane %v5320_v24, 4  ;;  %v5327_v23 = vrot.slane %v15486_v28, 5  ;;  %v5334_v31 = vrot.slane %v15503_v10, 5  ;;  %v5330_v47 = vrot.slane %v15522_v21, 5 }
 0x260   : > { %v5317_v18 = vsel %vm14767_vm15, %v5315_v20, %v5316_v35  ;;  %v5321_v42 = vsel %vm14767_vm15, %v11722_v52, %v5320_v24  ;;  %v11724_v39 = vrot.slane %v5220_v11, 9  ;;  %v5337_v28 = vrot.slane %v15542_v25, 5  ;;  %v17882_v24 = vld [vmem:[#allocation8_spill] sm:$0xff]  ;;  %v5225_v20 = vld [vmem:[#allocation2 + $0xb4] sm:$0xe] }
 0x261   : > { %v5324_v22 = vsel %vm14767_vm15, %v5322_v14, %v5323_v34  ;;  %v5329_v17 = vrot.slane %v5327_v23, 4  ;;  %v5336_v63 = vrot.slane %v5334_v31, 4  ;;  %v5341_v44 = vrot.slane %v15526_v61, 5  ;;  %v17884_v35 = vld [vmem:[#allocation10_spill] sm:$0xff]  ;;  %v5226_v14 = vld [vmem:[#allocation2 + $0xc0] sm:$0xe] }
 0x262   : > { %v5335_v48 = vsel %vm14767_vm15, %v11724_v39, %v5334_v31  ;;  %v5348_v25 = vrot.slane %v15559_v16, 5  ;;  %v11725_v55 = vrot.slane %v5221_v38, 9  ;;  %v5344_v41 = vrot.slane %v15568_v62, 5 }
 0x263   : > { %v5331_v10 = vsel %vm14767_vm15, %v5329_v17, %v5330_v47  ;;  %v5338_v21 = vsel %vm14767_vm15, %v5336_v63, %v5337_v28  ;;  %v5351_v61 = vrot.slane %v15576_v40, 5  ;;  %v5355_v27 = vrot.slane %v15584_v58, 5  ;;  %v17886_v47 = vld [vmem:[#allocation7_spill] sm:$0xff]  ;;  %v13984_v63 = vld [vmem:[%s17767_s3 + $0x20] sm:$0xff]   ;;  %v13985_v28 = vld [vmem:[%s17767_s3 + $0x28] sm:$0xff]  }
 0x264   : > { %12987 = vmatmul.mubr.msk.bf16.gmra.mrb[24].mxu0 %vm1425_vm8, %v11693_v60  ;;  %v5307_v60 = vsel %vm14767_vm15, %v11720_v3, %v5306_v8  ;;  %v11748_v2 = vcombine.low %v5335_v48, %v5338_v21  ;;  %v5343_v8 = vrot.slane %v5341_v44, 4  ;;  %v5342_v29 = vsel %vm14767_vm15, %v11725_v55, %v5341_v44  ;;  %v5223_v3 = vld [vmem:[#allocation2 + $0x9c] sm:$0xe]  ;;  %13034 = vmatprep.subr.bf16.mxu1 %v13984_v63  ;;  %v6309_v44 = vld [vmem:[#allocation2 + $0x4] sm:$0xf] }
 0x265   : > { %12990 = vmatprep.mubr.msk.bf16.mxu0 %vm1425_vm8, %v11694_v53  ;;  %v5217_v53 = vld [vmem:[#allocation2 + $0x54] sm:$0xe]  ;;  %v11744_v57 = vcombine.low %v5307_v60, %v5310_v4  ;;  %v5362_v40 = vrot.slane %v15588_v7, 5  ;;  %v11727_v56 = vrot.slane %v5223_v3, 9  ;;  %v5358_v60 = vrot.slane %v15608_v32, 5  ;;  %13035 = vmatpush3.bf16.msra.mxu1 %v13984_v63 }
 0x266   : > { %v11721_v50 = vrot.slane %v5217_v53, 9  ;;  %v5345_v16 = vsel %vm14767_vm15, %v5343_v8, %v5344_v41  ;;  %v11728_v4 = vrot.slane %v5224_v37, 9  ;;  %v5365_v58 = vrot.slane %v17882_v24, 5  ;;  %13036 = vmatprep.subr.bf16.mxu1 %v13985_v28  ;;  %v6348_v8 = vld [vmem:[#allocation2 + $0x8] sm:$0x1] }
 0x267   : > { %v11749_v54 = vcombine.low %v5342_v29, %v5345_v16  ;;  %v5364_v53 = vrot.slane %v5362_v40, 4  ;;  %v5356_v30 = vsel %vm14767_vm15, %v11727_v56, %v5355_v27  ;;  %v5376_v52 = vrot.slane %v17884_v35, 5  ;;  %v15808_v37 = vld [vmem:[%s17766_s2] ss:$0 sm:$0xff] }
 0x268   : > { %v5314_v5 = vsel %vm14767_vm15, %v11721_v50, %v5313_v51  ;;  %v5357_v51 = vrot.slane %v5355_v27, 4  ;;  %v5363_v50 = vsel %vm14767_vm15, %v11728_v4, %v5362_v40  ;;  %v5379_v31 = vrot.slane %v15643_v6, 5  ;;  %v17885_v6 = vld [vmem:[#allocation6_spill] sm:$0xff]  ;;  %v15802_v40 = vld [vmem:[%s17767_s3] sm:$0xff]  }
 0x269   : > { %v11745_v26 = vcombine.low %v5314_v5, %v5317_v18  ;;  %v5366_v32 = vsel %vm14767_vm15, %v5364_v53, %v5365_v58  ;;  %v11729_v18 = vrot.slane %v5225_v20, 9  ;;  %v17887_v39 = vcombine.low %v17885_v6, %v17886_v47  ;;  %13037 = vmatpush3.bf16.msra.mxu1 %v13985_v28 }
 0x26a   : > { %v5359_v7 = vsel %vm14767_vm15, %v5357_v51, %v5358_v60  ;;  %v11752_v5 = vcombine.low %v5363_v50, %v5366_v32  ;;  %v6374_v38 = vshll.u32 %v6309_v44, 16 }
 0x26b   : > { %v11751_v34 = vcombine.low %v5356_v30, %v5359_v7 }
 0x26c   : > { %12991 = vmatmul.mubr.msk.bf16.gmra.mrb[28].mxu0 %vm1425_vm8, %v11695_v45  ;;  %v11746_v45 = vcombine.low %v5321_v42, %v5324_v22  ;;  %v5372_v42 = vrot.slane %v15635_v36, 5  ;;  %v11730_v22 = vrot.slane %v5226_v14, 9  ;;  %v6376_v55 = vrot.slane %v6374_v38, 5 }
 0x26d   : > { %13002 = vmatprep.mubr.msk.bf16.mxu0 %vm1425_vm8, %v11740_v0  ;;  %v11723_v0 = vrot.slane %v5219_v33, 9  ;;  %v5378_v33 = vrot.slane %v5376_v52, 4 }
 0x26f   : > { %v5328_v1 = vsel %vm14767_vm15, %v11723_v0, %v5327_v23  ;;  %v5380_v36 = vsel %vm14767_vm15, %v5378_v33, %v5379_v31  ;;  %v6203_v31 = vld [vmem:[#allocation2 + $0x18] sm:$0xf] }
 0x270   : > { %v11747_v9 = vcombine.low %v5328_v1, %v5331_v10  ;;  %v13986_v1 = vld [vmem:[%s17767_s3 + $0x30] sm:$0xff]   ;;  %v6308_v10 = vld [vmem:[#allocation2] sm:$0xf] }
 0x271   : > { %13038 = vmatprep.subr.bf16.mxu1 %v13986_v1  ;;  %v6365_v48 = vshrl.u32 %v6308_v10, 16  ;;  %v6368_v21 = vshll.u32 %v6308_v10, 16  ;;  %v6207_v10 = vld [vmem:[#allocation2 + $0x20] sm:$0x1] }
 0x272   : > { %13039 = vmatpush3.bf16.msra.mxu1 %v13986_v1 }
 0x274   : > { %13003 = vmatmul.mubr.msk.bf16.vlgmr.msra.gmra.mrb[0].mxu0 %vm1425_vm8, %v11741_v46  ;;  %v11726_v46 = vrot.slane %v5222_v12, 9  ;;  %v13987_v12 = vld [vmem:[%s17767_s3 + $0x38] sm:$0xff]  }
 0x275   : > { %13006 = vmatprep.mubr.msk.bf16.mxu0 %vm1425_vm8, %v11742_v13  ;;  %v5350_v13 = vrot.slane %v5348_v25, 4  ;;  %13040 = vmatprep.subr.bf16.mxu1 %v13987_v12 }
 0x276   : > { %v5349_v59 = vsel %vm14767_vm15, %v11726_v46, %v5348_v25  ;;  %v6378_v25 = vshrl.u32 %v6309_v44, 16  ;;  %13041 = vmatpush3.bf16.msra.mxu1 %v13987_v12 }
 0x277   : > { %v5352_v62 = vsel %vm14767_vm15, %v5350_v13, %v5351_v61  ;;  %v6384_v13 = vshll.u32 %v6348_v8, 16  ;;  %13074 = vmatprep.subr.bf16.mxu1 %v15802_v40 }
 0x278   : > { %v11750_v15 = vcombine.low %v5349_v59, %v5352_v62  ;;  %v6380_v41 = vrot.slane %v6378_v25, 4 }
 0x279   : > { %v6386_v16 = vrot.slane %v6384_v13, 5 }
 0x27a   : > { %v6381_v61 = vor.u32 %v6380_v41, %v6376_v55 }
 0x27c   : > { %13007 = vmatmul.mubr.msk.bf16.gmra.mrb[4].mxu0 %vm1425_vm8, %v11743_v19  ;;  %v17883_v19 = vld [vmem:[#allocation9_spill] sm:$0xff]  ;;  %v6382_v27 = vrot.slane %v6381_v61, 4 }
 0x27d   : > { %13010 = vmatprep.mubr.msk.bf16.mxu0 %vm1425_vm8, %v11744_v57  ;;  %v5369_v57 = vrot.slane %v17883_v19, 5 }
 0x27e   : > { %v6387_v62 = vsel %vm14235_vm10, %v6382_v27, %v6386_v16 }
 0x27f   : > { %v5371_v23 = vrot.slane %v5369_v57, 4  ;;  %v5370_v11 = vsel %vm14767_vm15, %v11729_v18, %v5369_v57 }
 0x284   : > { %13011 = vmatmul.mubr.msk.bf16.gmra.mrb[8].mxu0 %vm1425_vm8, %v11745_v26  ;;  %v5373_v26 = vsel %vm14767_vm15, %v5371_v23, %v5372_v42 }
 0x285   : > { %13014 = vmatprep.mubr.msk.bf16.mxu0 %vm1425_vm8, %v11746_v45  ;;  %v5377_v45 = vsel %vm14767_vm15, %v11730_v22, %v5376_v52  ;;  %v11753_v0 = vcombine.low %v5370_v11, %v5373_v26 }
 0x286   : > { %v11754_v17 = vcombine.low %v5377_v45, %v5380_v36 }
 0x28c   : > { %13015 = vmatmul.mubr.msk.bf16.gmra.mrb[12].mxu0 %vm1425_vm8, %v11747_v9  ;;  %v6367_v9 = vrot.slane %v6365_v48, 4 }
 0x28d   : > { %13018 = vmatprep.mubr.msk.bf16.mxu0 %vm1425_vm8, %v11748_v2  ;;  %v6370_v2 = vrot.slane %v6368_v21, 5 }
 0x28f   : > { %v6371_v46 = vor.u32 %v6370_v2, %v6367_v9  ;;  %v6200_v9 = vld [vmem:[#allocation2 + $0x14] sm:$0x1] }
 0x291   : > { %v6372_v29 = vrot.slane %v6371_v46, 4 }
 0x293   : > { %v6377_v59 = vsel %vm14235_vm10, %v6372_v29, %v6376_v55  ;;  %v14092_v55 = vld [vmem:[#allocation2 + $0xc] sm:$0xf] }
 0x294   : > { %13019 = vmatmul.mubr.msk.bf16.gmra.mrb[16].mxu0 %vm1425_vm8, %v11749_v54  ;;  %v11817_v3 = vcombine.low %v6377_v59, %v6387_v62 }
 0x295   : > { %13022 = vmatprep.mubr.msk.bf16.mxu0 %vm1425_vm8, %v11750_v15 }
 0x296   : > { %13042 = vmatprep.mubr.msk.bf16.mxu1 %vm1425_vm8, %v11817_v3 }
 0x29c   : > { %13023 = vmatmul.mubr.msk.bf16.gmra.mrb[20].mxu0 %vm1425_vm8, %v11751_v34 }
 0x29d   : > { %13026 = vmatprep.mubr.msk.bf16.mxu0 %vm1425_vm8, %v11752_v5 }
 0x2a4   : > { %13027 = vmatmul.mubr.msk.bf16.gmra.mrb[24].mxu0 %vm1425_vm8, %v11753_v0 }
 0x2a5   : > { %13030 = vmatprep.mubr.msk.bf16.mxu0 %vm1425_vm8, %v11754_v17 }
 0x2ac   : > { %13031 = vmatmul.mubr.msk.bf16.gmra.mrb[28].mxu0 %vm1425_vm8, %v17887_v39 }
 0x347   : > { %v13004_v54 = vpop.f32.mrb[0].mxu0 }
 0x348   : > { %v5719_v15 = vadd.f32 %v13004_v54, %v15808_v37  ;;  %v5551_v56 = vpop.f32.mrb[1].mxu0 }
 0x349   : > { %v5717_v51 = vadd.f32 %v15808_v37, %v5551_v56  ;;  %v13005_v60 = vpop.f32.mrb[2].mxu0 }
 0x34a   : > { %v5751_v4 = vmax.f32 %v5719_v15, 0.0  ;;  %v5720_v53 = vadd.f32 %v13005_v60, %v15808_v37  ;;  %v5554_v24 = vpop.f32.mrb[3].mxu0 }
 0x34b   : > { %v5749_v58 = vmax.f32 %v5717_v51, 0.0  ;;  %v5718_v30 = vadd.f32 %v15808_v37, %v5554_v24 }
 0x34c   : > { %v12284_v7 = vpack.c.bf16 %v5751_v4, %v5751_v4  ;;  %v5752_v19 = vmax.f32 %v5720_v53, 0.0 }
 0x34d   : > { %v12282_v57 = vpack.c.bf16 %v5749_v58, %v5749_v58  ;;  %v5750_v50 = vmax.f32 %v5718_v30, 0.0  ;;  %v6217_v58 = vld [vmem:[#allocation2 + $0x30] sm:$0xf] }
 0x34e   : > { %v5895_v32 = vshrl.u32 %v12284_v7, 16  ;;  %v12285_v20 = vpack.c.bf16 %v5752_v19, %v5752_v19  ;;  %v5898_v35 = vshll.u32 %v12284_v7, 16 }
 0x34f   : > { %v5878_v52 = vshrl.u32 %v12282_v57, 16  ;;  %v5881_v14 = vshll.u32 %v12282_v57, 16  ;;  %v12283_v34 = vpack.c.bf16 %v5750_v50, %v5750_v50  ;;  %v13008_v5 = vpop.f32.mrb[4].mxu0 }
 0x350   : > { %v5897_v18 = vrot.slane %v5895_v32, 7  ;;  %v5903_v23 = vshrl.u32 %v12285_v20, 16  ;;  %v5906_v42 = vshll.u32 %v12285_v20, 16  ;;  %v5723_v22 = vadd.f32 %v13008_v5, %v15808_v37  ;;  %v5567_v33 = vpop.f32.mrb[5].mxu0  ;;  %v6210_v20 = vld [vmem:[#allocation2 + $0x24] sm:$0xf] }
 0x351   : > { %v5880_v11 = vrot.slane %v5878_v52, 7  ;;  %v5886_v26 = vshrl.u32 %v12283_v34, 16  ;;  %v5889_v45 = vshll.u32 %v12283_v34, 16  ;;  %v5721_v36 = vadd.f32 %v15808_v37, %v5567_v33  ;;  %v13009_v0 = vpop.f32.mrb[6].mxu0 }
 0x352   : > { %v5900_v17 = vor.u32 %v5898_v35, %v5897_v18  ;;  %v5901_v6 = vrot.slane %v5897_v18, 4  ;;  %v5905_v47 = vrot.slane %v5903_v23, 7  ;;  %v5755_v39 = vmax.f32 %v5723_v22, 0.0  ;;  %v5570_v63 = vpop.f32.mrb[7].mxu0 }
 0x353   : > { %v5883_v28 = vor.u32 %v5881_v14, %v5880_v11  ;;  %v5884_v1 = vrot.slane %v5880_v11, 4  ;;  %v5888_v44 = vrot.slane %v5886_v26, 7  ;;  %v5753_v48 = vmax.f32 %v5721_v36, 0.0 }
 0x354   : > { %v6204_v38 = vsel %vm14248_vm11, %v5900_v17, %v6203_v31  ;;  %v5908_v25 = vor.u32 %v5906_v42, %v5905_v47  ;;  %v5910_v12 = vrot.slane %v5905_v47, 4  ;;  %v12288_v2 = vpack.c.bf16 %v5755_v39, %v5755_v39  ;;  %v6221_v39 = vld [vmem:[#allocation2 + $0x38] sm:$0x1] }
 0x355   : > { %6205 = vst [vmem:[#allocation2 + $0x18] sm:$0xf] %v6204_v38  ;;  %v6197_v8 = vsel %vm14248_vm11, %v5883_v28, %v14092_v55  ;;  %v5891_v41 = vor.u32 %v5889_v45, %v5888_v44  ;;  %v5893_v46 = vrot.slane %v5888_v44, 4  ;;  %v12286_v13 = vpack.c.bf16 %v5753_v48, %v5753_v48 }
 0x356   : > { %6198 = vst [vmem:[#allocation2 + $0xc] sm:$0xf] %v6197_v8  ;;  %v5909_v29 = vsel %vm14254_vm12, %v5901_v6, %v5908_v25  ;;  %v6208_v27 = vsel %vm14184_vm4, %v5910_v12, %v6207_v10  ;;  %v5929_v59 = vshrl.u32 %v12288_v2, 16  ;;  %v5932_v54 = vshll.u32 %v12288_v2, 16  ;;  %v6231_v8 = vld [vmem:[#allocation2 + $0x48] sm:$0xf] }
 0x357   : > { %6206 = vst.msk [vmem:[#allocation2 + $0x1c] sm:$0xf] %vm226_vm0, %v5909_v29  ;;  %6209 = vst [vmem:[#allocation2 + $0x20] sm:$0x1] %v6208_v27  ;;  %v5892_v62 = vsel %vm14254_vm12, %v5884_v1, %v5891_v41  ;;  %v6201_v3 = vsel %vm14184_vm4, %v5893_v46, %v6200_v9  ;;  %v5912_v15 = vshrl.u32 %v12286_v13, 16  ;;  %v13012_v56 = vpop.f32.mrb[8].mxu0  ;;  %v5724_v60 = vadd.f32 %v13009_v0, %v15808_v37 }
 0x358   : > { %6199 = vst.msk [vmem:[#allocation2 + $0x10] sm:$0xf] %vm226_vm0, %v5892_v62  ;;  %6202 = vst [vmem:[#allocation2 + $0x14] sm:$0x1] %v6201_v3  ;;  %v15830_v51 = vrot.slane %v5929_v59, 7  ;;  %v5722_v4 = vadd.f32 %v15808_v37, %v5570_v63  ;;  %v5727_v53 = vadd.f32 %v13012_v56, %v15808_v37  ;;  %v5583_v24 = vpop.f32.mrb[9].mxu0 }
 0x359   : > { %v5914_v30 = vrot.slane %v5912_v15, 7  ;;  %v5915_v7 = vshll.u32 %v12286_v13, 16  ;;  %v5725_v19 = vadd.f32 %v15808_v37, %v5583_v24  ;;  %v13013_v57 = vpop.f32.mrb[10].mxu0  ;;  %v5756_v35 = vmax.f32 %v5724_v60, 0.0  ;;  %v6214_v63 = vld [vmem:[#allocation2 + $0x2c] sm:$0x1] }
 0x35a   : > { %v5934_v50 = vor.u32 %v5932_v54, %v15830_v51  ;;  %v5935_v32 = vrot.slane %v15830_v51, 4  ;;  %v5754_v52 = vmax.f32 %v5722_v4, 0.0  ;;  %v5586_v14 = vpop.f32.mrb[11].mxu0  ;;  %v5759_v18 = vmax.f32 %v5727_v53, 0.0  ;;  %v6224_v54 = vld [vmem:[#allocation2 + $0x3c] sm:$0xf] }
 0x35b   : > { %v5917_v34 = vor.u32 %v5915_v7, %v5914_v30  ;;  %v5918_v5 = vrot.slane %v5914_v30, 4  ;;  %v5757_v23 = vmax.f32 %v5725_v19, 0.0  ;;  %v12289_v22 = vpack.c.bf16 %v5756_v35, %v5756_v35 }
 0x35c   : > { %v6218_v42 = vsel %vm14248_vm11, %v5934_v50, %v6217_v58  ;;  %v12287_v33 = vpack.c.bf16 %v5754_v52, %v5754_v52  ;;  %v5728_v31 = vadd.f32 %v13013_v57, %v15808_v37  ;;  %v12292_v26 = vpack.c.bf16 %v5759_v18, %v5759_v18 }
 0x35d   : > { %6219 = vst [vmem:[#allocation2 + $0x30] sm:$0xf] %v6218_v42  ;;  %v6211_v11 = vsel %vm14248_vm11, %v5917_v34, %v6210_v20  ;;  %v12290_v45 = vpack.c.bf16 %v5757_v23, %v5757_v23  ;;  %v5726_v36 = vadd.f32 %v15808_v37, %v5586_v14  ;;  %v5937_v0 = vshrl.u32 %v12289_v22, 16  ;;  %v6235_v42 = vld [vmem:[#allocation2 + $0x50] sm:$0x1] }
 0x35e   : > { %6212 = vst [vmem:[#allocation2 + $0x24] sm:$0xf] %v6211_v11  ;;  %v5940_v17 = vshll.u32 %v12289_v22, 16  ;;  %v5920_v6 = vshrl.u32 %v12287_v33, 16  ;;  %v5923_v47 = vshll.u32 %v12287_v33, 16  ;;  %v5963_v28 = vshrl.u32 %v12292_v26, 16 }
 0x35f   : > { %v5966_v1 = vshll.u32 %v12292_v26, 16  ;;  %v5946_v10 = vshrl.u32 %v12290_v45, 16  ;;  %v5949_v44 = vshll.u32 %v12290_v45, 16  ;;  %v13016_v48 = vpop.f32.mrb[12].mxu0  ;;  %v5939_v38 = vrot.slane %v5937_v0, 7 }
 0x360   : > { %v5922_v25 = vrot.slane %v5920_v6, 7  ;;  %v5760_v12 = vmax.f32 %v5728_v31, 0.0  ;;  %v5758_v9 = vmax.f32 %v5726_v36, 0.0  ;;  %v5599_v2 = vpop.f32.mrb[13].mxu0  ;;  %v15844_v55 = vrot.slane %v5963_v28, 7 }
 0x361   : > { %v15846_v41 = vrot.slane %v5946_v10, 7  ;;  %v5731_v46 = vadd.f32 %v13016_v48, %v15808_v37  ;;  %v5729_v13 = vadd.f32 %v15808_v37, %v5599_v2  ;;  %v13017_v29 = vpop.f32.mrb[14].mxu0  ;;  %v5942_v27 = vor.u32 %v5940_v17, %v5939_v38  ;;  %v6228_v0 = vld [vmem:[#allocation2 + $0x44] sm:$0x1] }
 0x362   : > { %v5944_v59 = vrot.slane %v5939_v38, 4  ;;  %v5925_v62 = vor.u32 %v5923_v47, %v5922_v25  ;;  %v5927_v3 = vrot.slane %v5922_v25, 4  ;;  %v5602_v15 = vpop.f32.mrb[15].mxu0  ;;  %v5968_v56 = vor.u32 %v5966_v1, %v15844_v55 }
 0x363   : > { %v5969_v51 = vrot.slane %v15844_v55, 4  ;;  %v5951_v60 = vor.u32 %v5949_v44, %v15846_v41  ;;  %v5952_v4 = vrot.slane %v15846_v41, 4  ;;  %v5943_v53 = vsel %vm14254_vm12, %v5935_v32, %v5942_v27  ;;  %v6238_v27 = vld [vmem:[#allocation2 + $0x54] sm:$0xf] }
 0x364   : > { %v6222_v24 = vsel %vm14184_vm4, %v5944_v59, %v6221_v39  ;;  %v5926_v58 = vsel %vm14254_vm12, %v5918_v5, %v5925_v62  ;;  %v6215_v30 = vsel %vm14184_vm4, %v5927_v3, %v6214_v63  ;;  %6220 = vst.msk [vmem:[#allocation2 + $0x34] sm:$0xf] %vm226_vm0, %v5943_v53  ;;  %v6232_v7 = vsel %vm14248_vm11, %v5968_v56, %v6231_v8 }
 0x365   : > { %6223 = vst [vmem:[#allocation2 + $0x38] sm:$0x1] %v6222_v24  ;;  %6213 = vst.msk [vmem:[#allocation2 + $0x28] sm:$0xf] %vm226_vm0, %v5926_v58  ;;  %v6225_v19 = vsel %vm14248_vm11, %v5951_v60, %v6224_v54  ;;  %v12293_v57 = vpack.c.bf16 %v5760_v12, %v5760_v12  ;;  %v12291_v50 = vpack.c.bf16 %v5758_v9, %v5758_v9  ;;  %v5763_v32 = vmax.f32 %v5731_v46, 0.0 }
 0x366   : > { %6216 = vst [vmem:[#allocation2 + $0x2c] sm:$0x1] %v6215_v30  ;;  %6233 = vst [vmem:[#allocation2 + $0x48] sm:$0xf] %v6232_v7  ;;  %v5761_v20 = vmax.f32 %v5729_v13, 0.0  ;;  %v5732_v35 = vadd.f32 %v13017_v29, %v15808_v37  ;;  %v5730_v52 = vadd.f32 %v15808_v37, %v5602_v15 }
 0x367   : > { %6226 = vst [vmem:[#allocation2 + $0x3c] sm:$0xf] %v6225_v19  ;;  %v5971_v14 = vshrl.u32 %v12293_v57, 16  ;;  %v5974_v34 = vshll.u32 %v12293_v57, 16  ;;  %v5954_v5 = vshrl.u32 %v12291_v50, 16  ;;  %v5957_v18 = vshll.u32 %v12291_v50, 16 }
 0x368   : > { %v13020_v23 = vpop.f32.mrb[16].mxu0  ;;  %v12296_v22 = vpack.c.bf16 %v5763_v32, %v5763_v32  ;;  %v12294_v33 = vpack.c.bf16 %v5761_v20, %v5761_v20  ;;  %v5764_v31 = vmax.f32 %v5732_v35, 0.0  ;;  %v5762_v11 = vmax.f32 %v5730_v52, 0.0  ;;  %v6245_v29 = vld [vmem:[#allocation2 + $0x60] sm:$0xf] }
 0x369   : > { %v5615_v26 = vpop.f32.mrb[17].mxu0  ;;  %v5973_v45 = vrot.slane %v5971_v14, 7  ;;  %v5956_v36 = vrot.slane %v5954_v5, 7  ;;  %v5735_v17 = vadd.f32 %v13020_v23, %v15808_v37  ;;  %v6310_v15 = vld [vmem:[#allocation2 + $0xc] sm:$0xf] }
 0x36a   : > { %v5733_v6 = vadd.f32 %v15808_v37, %v5615_v26  ;;  %v13021_v47 = vpop.f32.mrb[18].mxu0  ;;  %v5997_v39 = vshrl.u32 %v12296_v22, 16  ;;  %v6000_v63 = vshll.u32 %v12296_v22, 16  ;;  %v5980_v28 = vshrl.u32 %v12294_v33, 16  ;;  %v6249_v30 = vld [vmem:[#allocation2 + $0x68] sm:$0x1] }
 0x36b   : > { %v5983_v1 = vshll.u32 %v12294_v33, 16  ;;  %v5618_v10 = vpop.f32.mrb[19].mxu0  ;;  %v5976_v44 = vor.u32 %v5974_v34, %v5973_v45  ;;  %v5978_v48 = vrot.slane %v5973_v45, 4  ;;  %v5959_v38 = vor.u32 %v5957_v18, %v5956_v36  ;;  %v6242_v7 = vld [vmem:[#allocation2 + $0x5c] sm:$0x1] }
 0x36c   : > { %v5961_v25 = vrot.slane %v5956_v36, 4  ;;  %v5999_v12 = vrot.slane %v5997_v39, 7  ;;  %v5982_v9 = vrot.slane %v5980_v28, 7  ;;  %v12297_v2 = vpack.c.bf16 %v5764_v31, %v5764_v31  ;;  %v6311_v18 = vld [vmem:[#allocation2 + $0x10] sm:$0xf] }
 0x36d   : > { %v12295_v55 = vpack.c.bf16 %v5762_v11, %v5762_v11  ;;  %v5977_v8 = vsel %vm14254_vm12, %v5969_v51, %v5976_v44  ;;  %v6236_v41 = vsel %vm14184_vm4, %v5978_v48, %v6235_v42  ;;  %v5960_v46 = vsel %vm14254_vm12, %v5952_v4, %v5959_v38  ;;  %v6259_v28 = vld [vmem:[#allocation2 + $0x78] sm:$0xf] }
 0x36e   : > { %v6229_v13 = vsel %vm14184_vm4, %v5961_v25, %v6228_v0  ;;  %6234 = vst.msk [vmem:[#allocation2 + $0x4c] sm:$0xf] %vm226_vm0, %v5977_v8  ;;  %6237 = vst [vmem:[#allocation2 + $0x50] sm:$0x1] %v6236_v41  ;;  %v6002_v59 = vor.u32 %v6000_v63, %v5999_v12  ;;  %v6003_v62 = vrot.slane %v5999_v12, 4  ;;  %v5985_v3 = vor.u32 %v5983_v1, %v5982_v9 }
 0x36f   : > { %6227 = vst.msk [vmem:[#allocation2 + $0x40] sm:$0xf] %vm226_vm0, %v5960_v46  ;;  %6230 = vst [vmem:[#allocation2 + $0x44] sm:$0x1] %v6229_v13  ;;  %v5986_v54 = vrot.slane %v5982_v9, 4  ;;  %v6005_v56 = vshrl.u32 %v12297_v2, 16  ;;  %v5736_v35 = vadd.f32 %v13021_v47, %v15808_v37  ;;  %v5734_v52 = vadd.f32 %v15808_v37, %v5618_v10 }
 0x370   : > { %v6008_v51 = vshll.u32 %v12297_v2, 16  ;;  %v5988_v60 = vshrl.u32 %v12295_v55, 16  ;;  %v5991_v4 = vshll.u32 %v12295_v55, 16  ;;  %v15882_v53 = vpop.f32.mrb[20].mxu0  ;;  %v6246_v24 = vsel %vm14248_vm11, %v6002_v59, %v6245_v29  ;;  %v6252_v1 = vld [vmem:[#allocation2 + $0x6c] sm:$0xf] }
 0x371   : > { %v6239_v58 = vsel %vm14248_vm11, %v5985_v3, %v6238_v27  ;;  %v5767_v19 = vmax.f32 %v5735_v17, 0.0  ;;  %v5765_v57 = vmax.f32 %v5733_v6, 0.0  ;;  %v15888_v50 = vpop.f32.mrb[21].mxu0  ;;  %6247 = vst [vmem:[#allocation2 + $0x60] sm:$0xf] %v6246_v24  ;;  %v6007_v32 = vrot.slane %v6005_v56, 7 }
 0x372   : > { %6240 = vst [vmem:[#allocation2 + $0x54] sm:$0xf] %v6239_v58  ;;  %v5990_v20 = vrot.slane %v5988_v60, 7  ;;  %v15892_v14 = vpop.f32.mrb[22].mxu0  ;;  %v6389_v23 = vshrl.u32 %v6310_v15, 16  ;;  %v6392_v42 = vshll.u32 %v6310_v15, 16 }
 0x373   : > { %v12300_v34 = vpack.c.bf16 %v5767_v19, %v5767_v19  ;;  %v12298_v5 = vpack.c.bf16 %v5765_v57, %v5765_v57  ;;  %v15894_v22 = vpop.f32.mrb[23].mxu0  ;;  %v6010_v33 = vor.u32 %v6008_v51, %v6007_v32  ;;  %v6012_v31 = vrot.slane %v6007_v32, 4  ;;  %v6349_v25 = vld [vmem:[#allocation2 + $0x14] sm:$0x1]  ;;  %v6312_v3 = vld [vmem:[#allocation2 + $0x18] sm:$0xf] }
 0x374   : > { %v5993_v11 = vor.u32 %v5991_v4, %v5990_v20  ;;  %v5995_v26 = vrot.slane %v5990_v20, 4  ;;  %v5768_v48 = vmax.f32 %v5736_v35, 0.0  ;;  %v5766_v38 = vmax.f32 %v5734_v52, 0.0  ;;  %v6313_v4 = vld [vmem:[#allocation2 + $0x1c] sm:$0xf] }
 0x375   : > { %v6031_v45 = vshrl.u32 %v12300_v34, 16  ;;  %v6034_v36 = vshll.u32 %v12300_v34, 16  ;;  %v6014_v0 = vshrl.u32 %v12298_v5, 16  ;;  %v6017_v17 = vshll.u32 %v12298_v5, 16  ;;  %v6263_v34 = vld [vmem:[#allocation2 + $0x80] sm:$0x1] }
 0x376   : > { %v6011_v6 = vsel %vm14254_vm12, %v6003_v62, %v6010_v33  ;;  %v6250_v47 = vsel %vm14184_vm4, %v6012_v31, %v6249_v30  ;;  %v5994_v39 = vsel %vm14254_vm12, %v5986_v54, %v5993_v11  ;;  %v6243_v63 = vsel %vm14184_vm4, %v5995_v26, %v6242_v7 }
 0x377   : > { %6248 = vst.msk [vmem:[#allocation2 + $0x64] sm:$0xf] %vm226_vm0, %v6011_v6  ;;  %6251 = vst [vmem:[#allocation2 + $0x68] sm:$0x1] %v6250_v47  ;;  %v6033_v10 = vrot.slane %v6031_v45, 7  ;;  %v6016_v44 = vrot.slane %v6014_v0, 7  ;;  %v12301_v29 = vpack.c.bf16 %v5768_v48, %v5768_v48  ;;  %v12299_v27 = vpack.c.bf16 %v5766_v38, %v5766_v38 }
 0x378   : > { %6241 = vst.msk [vmem:[#allocation2 + $0x58] sm:$0xf] %vm226_vm0, %v5994_v39  ;;  %6244 = vst [vmem:[#allocation2 + $0x5c] sm:$0x1] %v6243_v63  ;;  %v6391_v12 = vrot.slane %v6389_v23, 4  ;;  %v6394_v9 = vrot.slane %v6392_v42, 5 }
 0x379   : > { %v6398_v2 = vshll.u32 %v6311_v18, 16  ;;  %v6402_v55 = vshrl.u32 %v6311_v18, 16  ;;  %v15906_v8 = vpop.f32.mrb[24].mxu0  ;;  %v6036_v41 = vor.u32 %v6034_v36, %v6033_v10  ;;  %v6019_v46 = vor.u32 %v6017_v17, %v6016_v44  ;;  %v6256_v42 = vld [vmem:[#allocation2 + $0x74] sm:$0x1] }
 0x37a   : > { %v15908_v13 = vpop.f32.mrb[25].mxu0  ;;  %v6395_v59 = vor.u32 %v6394_v9, %v6391_v12  ;;  %v6408_v60 = vshll.u32 %v6349_v25, 16  ;;  %v6037_v58 = vrot.slane %v6033_v10, 4  ;;  %v6020_v30 = vrot.slane %v6016_v44, 4  ;;  %v6350_v6 = vld [vmem:[#allocation2 + $0x20] sm:$0x1] }
 0x37b   : > { %v6400_v62 = vrot.slane %v6398_v2, 5  ;;  %v15910_v54 = vpop.f32.mrb[26].mxu0  ;;  %v6260_v15 = vsel %vm14248_vm11, %v6036_v41, %v6259_v28  ;;  %v6253_v56 = vsel %vm14248_vm11, %v6019_v46, %v6252_v1  ;;  %v6404_v51 = vrot.slane %v6402_v55, 4  ;;  %v6314_v10 = vld [vmem:[#allocation2 + $0x24] sm:$0xf] }
 0x37c   : > { %v15916_v24 = vpop.f32.mrb[27].mxu0  ;;  %6261 = vst [vmem:[#allocation2 + $0x78] sm:$0xf] %v6260_v15  ;;  %6254 = vst [vmem:[#allocation2 + $0x6c] sm:$0xf] %v6253_v56  ;;  %v6039_v7 = vshrl.u32 %v12301_v29, 16  ;;  %v5738_v15 = vadd.f32 %v15808_v37, %v15894_v22 }
 0x37d   : > { %v6022_v19 = vshrl.u32 %v12299_v27, 16  ;;  %v6042_v57 = vshll.u32 %v12301_v29, 16  ;;  %v6025_v32 = vshll.u32 %v12299_v27, 16  ;;  %v6396_v20 = vrot.slane %v6395_v59, 4  ;;  %v13989_v29 = vld [vmem:[%s17767_s3 + $0x8] sm:$0xff]  }
 0x37e   : > { %v6405_v35 = vor.u32 %v6404_v51, %v6400_v62  ;;  %v6041_v52 = vrot.slane %v6039_v7, 7  ;;  %v6410_v18 = vrot.slane %v6408_v60, 5  ;;  %v6413_v23 = vshrl.u32 %v6312_v3, 16  ;;  %v15951_v56 = vld [vmem:[#allocation2 + $0x28] sm:$0xf] }
 0x37f   : > { %v6024_v5 = vrot.slane %v6022_v19, 7  ;;  %v6401_v33 = vsel %vm14235_vm10, %v6396_v20, %v6400_v62  ;;  %v6416_v11 = vshll.u32 %v6312_v3, 16  ;;  %v6422_v26 = vshll.u32 %v6313_v4, 16  ;;  %v15920_v47 = vpop.f32.mrb[28].mxu0 }
 0x380   : > { %v6406_v31 = vrot.slane %v6405_v35, 4  ;;  %v6044_v45 = vor.u32 %v6042_v57, %v6041_v52  ;;  %v6046_v36 = vrot.slane %v6041_v52, 4  ;;  %v6415_v63 = vrot.slane %v6413_v23, 4  ;;  %v15924_v44 = vpop.f32.mrb[29].mxu0 }
 0x381   : > { %v6027_v0 = vor.u32 %v6025_v32, %v6024_v5  ;;  %v6029_v17 = vrot.slane %v6024_v5, 4  ;;  %v6418_v28 = vrot.slane %v6416_v11, 5  ;;  %v6424_v1 = vrot.slane %v6422_v26, 5  ;;  %v15934_v9 = vpop.f32.mrb[30].mxu0 }
 0x382   : > { %v6411_v39 = vsel %vm14235_vm10, %v6406_v31, %v6410_v18  ;;  %v6045_v48 = vsel %vm14254_vm12, %v6037_v58, %v6044_v45  ;;  %v6264_v38 = vsel %vm14184_vm4, %v6046_v36, %v6263_v34  ;;  %v6426_v41 = vshrl.u32 %v6313_v4, 16  ;;  %v15941_v27 = vpop.f32.mrb[31].mxu0  ;;  %v6273_v45 = vld [vmem:[#allocation2 + $0x90] sm:$0xf]  ;;  %v6266_v36 = vld [vmem:[#allocation2 + $0x84] sm:$0xf] }
 0x383   : > { %v6028_v25 = vsel %vm14254_vm12, %v6020_v30, %v6027_v0  ;;  %v6257_v12 = vsel %vm14184_vm4, %v6029_v17, %v6256_v42  ;;  %6262 = vst.msk [vmem:[#allocation2 + $0x7c] sm:$0xf] %vm226_vm0, %v6045_v48  ;;  %6265 = vst [vmem:[#allocation2 + $0x80] sm:$0x1] %v6264_v38  ;;  %v11818_v2 = vcombine.low %v6401_v33, %v6411_v39  ;;  %v6432_v46 = vshll.u32 %v6350_v6, 16  ;;  %v13991_v39 = vld [vmem:[%s17767_s3 + $0x18] sm:$0xff]  }
 0x384   : > { %6255 = vst.msk [vmem:[#allocation2 + $0x70] sm:$0xf] %vm226_vm0, %v6028_v25  ;;  %6258 = vst [vmem:[#allocation2 + $0x74] sm:$0x1] %v6257_v12  ;;  %v6419_v55 = vor.u32 %v6418_v28, %v6415_v63  ;;  %v5739_v59 = vadd.f32 %v15882_v53, %v15808_v37  ;;  %v5737_v62 = vadd.f32 %v15808_v37, %v15888_v50  ;;  %v6428_v60 = vrot.slane %v6426_v41, 4  ;;  %v13990_v53 = vld [vmem:[%s17767_s3 + $0x10] sm:$0xff]  }
 0x385   : > { %v5740_v3 = vadd.f32 %v15892_v14, %v15808_v37  ;;  %13043 = vmatmul.mubr.msk.bf16.vlgmr.msra.gmra.mrb[0].mxu1 %vm1425_vm8, %v11818_v2  ;;  %v6434_v4 = vrot.slane %v6432_v46, 5  ;;  %v6437_v58 = vshrl.u32 %v6314_v10, 16  ;;  %v5770_v7 = vmax.f32 %v5738_v15, 0.0  ;;  %v6270_v12 = vld [vmem:[#allocation2 + $0x8c] sm:$0x1]  ;;  %v15970_v41 = vld [vmem:[%s17767_s3 + $0x40] sm:$0xff]  }
 0x386   : > { %v6420_v51 = vrot.slane %v6419_v55, 4  ;;  %13075 = vmatpush3.bf16.msra.mxu1 %v15802_v40  ;;  %v5771_v50 = vmax.f32 %v5739_v59, 0.0  ;;  %v5769_v30 = vmax.f32 %v5737_v62, 0.0  ;;  %v6429_v19 = vor.u32 %v6428_v60, %v6424_v1  ;;  %v16095_v21 = vld [vmem:[#allocation2 + $0x6c] sm:$0xf] }
 0x387   : > { %v5772_v14 = vmax.f32 %v5740_v3, 0.0  ;;  %v6439_v57 = vrot.slane %v6437_v58, 4  ;;  %v6440_v32 = vshll.u32 %v6314_v10, 16  ;;  %13076 = vmatprep.subr.bf16.mxu1 %v13989_v29  ;;  %v12303_v34 = vpack.c.bf16 %v5770_v7, %v5770_v7  ;;  %v6277_v10 = vld [vmem:[#allocation2 + $0x98] sm:$0x1] }
 0x388   : > { %v6425_v22 = vsel %vm14235_vm10, %v6420_v51, %v6424_v1  ;;  %v12304_v20 = vpack.c.bf16 %v5771_v50, %v5771_v50  ;;  %v12302_v35 = vpack.c.bf16 %v5769_v30, %v5769_v30  ;;  %v6430_v5 = vrot.slane %v6429_v19, 4  ;;  %v15973_v58 = vld [vmem:[#allocation2 + $0x30] sm:$0xf]  ;;  %v6352_v19 = vld [vmem:[#allocation2 + $0x38] sm:$0x1] }
 0x389   : > { %v12305_v52 = vpack.c.bf16 %v5772_v14, %v5772_v14  ;;  %v6442_v18 = vrot.slane %v6440_v32, 5  ;;  %v6446_v23 = vshll.u32 %v15951_v56, 16  ;;  %v6450_v40 = vshrl.u32 %v15951_v56, 16 }
 0x38a   : > { %v6065_v42 = vshrl.u32 %v12304_v20, 16  ;;  %v6068_v33 = vshll.u32 %v12304_v20, 16  ;;  %v6048_v31 = vshrl.u32 %v12302_v35, 16  ;;  %v6051_v11 = vshll.u32 %v12302_v35, 16  ;;  %13077 = vmatpush3.bf16.msra.mxu1 %v13989_v29 }
 0x38b   : > { %v6435_v26 = vsel %vm14235_vm10, %v6430_v5, %v6434_v4  ;;  %v6073_v0 = vshrl.u32 %v12305_v52, 16  ;;  %v6076_v17 = vshll.u32 %v12305_v52, 16  ;;  %v6056_v6 = vshrl.u32 %v12303_v34, 16  ;;  %13078 = vmatprep.subr.bf16.mxu1 %v13990_v53  ;;  %v6351_v4 = vld [vmem:[#allocation2 + $0x2c] sm:$0x1] }
 0x38c   : > { %v11819_v63 = vcombine.low %v6425_v22, %v6435_v26  ;;  %v6067_v28 = vrot.slane %v6065_v42, 7  ;;  %v6050_v1 = vrot.slane %v6048_v31, 7  ;;  %v6059_v48 = vshll.u32 %v12303_v34, 16  ;;  %v15979_v22 = vld [vmem:[#allocation2 + $0x34] sm:$0xf] }
 0x38d   : > { %v6075_v38 = vrot.slane %v6073_v0, 7  ;;  %v6058_v25 = vrot.slane %v6056_v6, 7  ;;  %v6443_v2 = vor.u32 %v6442_v18, %v6439_v57  ;;  %v6448_v55 = vrot.slane %v6446_v23, 5  ;;  %v16000_v6 = vld [vmem:[#allocation2 + $0x3c] sm:$0xf] }
 0x38e   : > { %13046 = vmatprep.mubr.msk.bf16.mxu1 %vm1425_vm8, %v11819_v63  ;;  %v6070_v46 = vor.u32 %v6068_v33, %v6067_v28  ;;  %v6071_v29 = vrot.slane %v6067_v28, 4  ;;  %v6053_v59 = vor.u32 %v6051_v11, %v6050_v1  ;;  %v6054_v62 = vrot.slane %v6050_v1, 4  ;;  %13079 = vmatpush3.bf16.msra.mxu1 %v13990_v53 }
 0x38f   : > { %v6078_v3 = vor.u32 %v6076_v17, %v6075_v38  ;;  %v6080_v15 = vrot.slane %v6075_v38, 4  ;;  %v6061_v51 = vor.u32 %v6059_v48, %v6058_v25  ;;  %v6063_v60 = vrot.slane %v6058_v25, 4  ;;  %13080 = vmatprep.subr.bf16.mxu1 %v13991_v39 }
 0x390   : > { %v6274_v50 = vsel %vm14248_vm11, %v6070_v46, %v6273_v45  ;;  %v6267_v30 = vsel %vm14248_vm11, %v6053_v59, %v6266_v36  ;;  %v6444_v14 = vrot.slane %v6443_v2, 4  ;;  %v6452_v7 = vrot.slane %v6450_v40, 4 }
 0x391   : > { %6275 = vst [vmem:[#allocation2 + $0x90] sm:$0xf] %v6274_v50  ;;  %6268 = vst [vmem:[#allocation2 + $0x84] sm:$0xf] %v6267_v30  ;;  %v6079_v53 = vsel %vm14254_vm12, %v6071_v29, %v6078_v3  ;;  %v6278_v57 = vsel %vm14184_vm4, %v6080_v15, %v6277_v10  ;;  %v6062_v32 = vsel %vm14254_vm12, %v6054_v62, %v6061_v51  ;;  %v6456_v34 = vshll.u32 %v6351_v4, 16 }
 0x392   : > { %v6271_v20 = vsel %vm14184_vm4, %v6063_v60, %v6270_v12  ;;  %6276 = vst.msk [vmem:[#allocation2 + $0x94] sm:$0xf] %vm226_vm0, %v6079_v53  ;;  %6279 = vst [vmem:[#allocation2 + $0x98] sm:$0x1] %v6278_v57  ;;  %v6449_v35 = vsel %vm14235_vm10, %v6444_v14, %v6448_v55  ;;  %v6453_v52 = vor.u32 %v6452_v7, %v6448_v55  ;;  %v6461_v5 = vshrl.u32 %v15973_v58, 16 }
 0x393   : > { %6269 = vst.msk [vmem:[#allocation2 + $0x88] sm:$0xf] %vm226_vm0, %v6062_v32  ;;  %6272 = vst [vmem:[#allocation2 + $0x8c] sm:$0x1] %v6271_v20  ;;  %13081 = vmatpush3.bf16.msra.mxu1 %v13991_v39  ;;  %v6464_v18 = vshll.u32 %v15973_v58, 16  ;;  %v6470_v23 = vshll.u32 %v15979_v22, 16  ;;  %v5743_v26 = vadd.f32 %v15906_v8, %v15808_v37  ;;  %v5741_v28 = vadd.f32 %v15808_v37, %v15908_v13 }
 0x394   : > { %v6474_v40 = vshrl.u32 %v15979_v22, 16  ;;  %v6480_v42 = vshll.u32 %v6352_v19, 16  ;;  %13114 = vmatprep.subr.bf16.mxu1 %v15970_v41  ;;  %v6454_v33 = vrot.slane %v6453_v52, 4  ;;  %v6458_v31 = vrot.slane %v6456_v34, 5  ;;  %v16017_v19 = vld [vmem:[#allocation2 + $0x40] sm:$0xf] }
 0x395   : > { %v6463_v11 = vrot.slane %v6461_v5, 4  ;;  %v6466_v45 = vrot.slane %v6464_v18, 5  ;;  %v6472_v36 = vrot.slane %v6470_v23, 5  ;;  %v5775_v63 = vmax.f32 %v5743_v26, 0.0  ;;  %v6280_v53 = vld [vmem:[#allocation2 + $0x9c] sm:$0xf] }
 0x396   : > { %v6476_v0 = vrot.slane %v6474_v40, 4  ;;  %v6482_v17 = vrot.slane %v6480_v42, 5  ;;  %v6459_v39 = vsel %vm14235_vm10, %v6454_v33, %v6458_v31  ;;  %v5744_v1 = vadd.f32 %v15910_v54, %v15808_v37  ;;  %v6291_v18 = vld [vmem:[#allocation2 + $0xb0] sm:$0x1]  ;;  %v6284_v23 = vld [vmem:[#allocation2 + $0xa4] sm:$0x1] }
 0x397   : > { %v11820_v10 = vcombine.low %v6449_v35, %v6459_v39  ;;  %v6467_v48 = vor.u32 %v6466_v45, %v6463_v11  ;;  %v5742_v8 = vadd.f32 %v15808_v37, %v15916_v24  ;;  %v12308_v25 = vpack.c.bf16 %v5775_v63, %v5775_v63  ;;  %v6287_v24 = vld [vmem:[#allocation2 + $0xa8] sm:$0xf] }
 0x398   : > { %v6477_v38 = vor.u32 %v6476_v0, %v6472_v36  ;;  %v5773_v12 = vmax.f32 %v5741_v28, 0.0  ;;  %v5776_v2 = vmax.f32 %v5744_v1, 0.0  ;;  %v6485_v55 = vshrl.u32 %v16000_v6, 16  ;;  %v16022_v26 = vld [vmem:[#allocation2 + $0x48] sm:$0xf] }
 0x399   : > { %13047 = vmatmul.mubr.msk.bf16.gmra.mrb[4].mxu1 %vm1425_vm8, %v11820_v10  ;;  %v6468_v46 = vrot.slane %v6467_v48, 4  ;;  %v5774_v59 = vmax.f32 %v5742_v8, 0.0  ;;  %v6488_v13 = vshll.u32 %v16000_v6, 16  ;;  %v6099_v62 = vshrl.u32 %v12308_v25, 16  ;;  %v16028_v48 = vld [vmem:[#allocation2 + $0x4c] sm:$0xf] }
 0x39a   : > { %v6478_v29 = vrot.slane %v6477_v38, 4  ;;  %v6102_v54 = vshll.u32 %v12308_v25, 16  ;;  %v12306_v3 = vpack.c.bf16 %v5773_v12, %v5773_v12  ;;  %v12309_v15 = vpack.c.bf16 %v5776_v2, %v5776_v2  ;;  %v16032_v2 = vld [vmem:[#allocation2 + $0x50] sm:$0x1] }
 0x39b   : > { %v6473_v51 = vsel %vm14235_vm10, %v6468_v46, %v6472_v36  ;;  %v12307_v60 = vpack.c.bf16 %v5774_v59, %v5774_v59  ;;  %v6487_v4 = vrot.slane %v6485_v55, 4  ;;  %v6101_v30 = vrot.slane %v6099_v62, 7 }
 0x39c   : > { %v6483_v37 = vsel %vm14235_vm10, %v6478_v29, %v6482_v17  ;;  %v6082_v14 = vshrl.u32 %v12306_v3, 16  ;;  %v6085_v7 = vshll.u32 %v12306_v3, 16  ;;  %v6107_v57 = vshrl.u32 %v12309_v15, 16  ;;  %v16026_v17 = vld [vmem:[#allocation2 + $0x44] sm:$0x1] }
 0x39d   : > { %v11821_v50 = vcombine.low %v6473_v51, %v6483_v37  ;;  %v6110_v32 = vshll.u32 %v12309_v15, 16  ;;  %v6090_v20 = vshrl.u32 %v12307_v60, 16  ;;  %v6093_v35 = vshll.u32 %v12307_v60, 16 }
 0x39e   : > { %v6104_v52 = vor.u32 %v6102_v54, %v6101_v30  ;;  %v6105_v34 = vrot.slane %v6101_v30, 4  ;;  %v6084_v5 = vrot.slane %v6082_v14, 7  ;;  %v6490_v40 = vrot.slane %v6488_v13, 5  ;;  %v14093_v30 = vld [vmem:[%s17766_s2] ss:$0 sm:$0xff] }
 0x39f   : > { %13050 = vmatprep.mubr.msk.bf16.mxu1 %vm1425_vm8, %v11821_v50  ;;  %v6109_v42 = vrot.slane %v6107_v57, 7  ;;  %v6092_v33 = vrot.slane %v6090_v20, 7  ;;  %v6494_v31 = vshll.u32 %v16017_v19, 16  ;;  %v6498_v11 = vshrl.u32 %v16017_v19, 16  ;;  %v16056_v20 = vld [vmem:[#allocation2 + $0x54] sm:$0xf] }
 0x3a0   : > { %v6288_v45 = vsel %vm14248_vm11, %v6104_v52, %v6287_v24  ;;  %v6087_v36 = vor.u32 %v6085_v7, %v6084_v5  ;;  %v6088_v0 = vrot.slane %v6084_v5, 4  ;;  %v6491_v39 = vor.u32 %v6490_v40, %v6487_v4 }
 0x3a1   : > { %6289 = vst [vmem:[#allocation2 + $0xa8] sm:$0xf] %v6288_v45  ;;  %v6112_v63 = vor.u32 %v6110_v32, %v6109_v42  ;;  %v6114_v28 = vrot.slane %v6109_v42, 4  ;;  %v6095_v1 = vor.u32 %v6093_v35, %v6092_v33  ;;  %v6097_v10 = vrot.slane %v6092_v33, 4 }
 0x3a2   : > { %v6281_v38 = vsel %vm14248_vm11, %v6087_v36, %v6280_v53  ;;  %v6492_v8 = vrot.slane %v6491_v39, 4  ;;  %v6496_v25 = vrot.slane %v6494_v31, 5  ;;  %v6500_v12 = vrot.slane %v6498_v11, 4 }
 0x3a3   : > { %6282 = vst [vmem:[#allocation2 + $0x9c] sm:$0xf] %v6281_v38  ;;  %v6113_v55 = vsel %vm14254_vm12, %v6105_v34, %v6112_v63  ;;  %v6292_v46 = vsel %vm14184_vm4, %v6114_v28, %v6291_v18  ;;  %v6096_v29 = vsel %vm14254_vm12, %v6088_v0, %v6095_v1  ;;  %v6285_v59 = vsel %vm14184_vm4, %v6097_v10, %v6284_v23  ;;  %v6301_v10 = vld [vmem:[#allocation2 + $0xc0] sm:$0xf] }
 0x3a4   : > { %6290 = vst.msk [vmem:[#allocation2 + $0xac] sm:$0xf] %vm226_vm0, %v6113_v55  ;;  %6293 = vst [vmem:[#allocation2 + $0xb0] sm:$0x1] %v6292_v46  ;;  %v6497_v13 = vsel %vm14235_vm10, %v6492_v8, %v6496_v25  ;;  %v6501_v62 = vor.u32 %v6500_v12, %v6496_v25  ;;  %v6504_v54 = vshll.u32 %v16026_v17, 16  ;;  %v6509_v3 = vshrl.u32 %v16022_v26, 16 }
 0x3a5   : > { %6283 = vst.msk [vmem:[#allocation2 + $0xa0] sm:$0xf] %vm226_vm0, %v6096_v29  ;;  %6286 = vst [vmem:[#allocation2 + $0xa4] sm:$0x1] %v6285_v59  ;;  %v6512_v15 = vshll.u32 %v16022_v26, 16  ;;  %v6518_v51 = vshll.u32 %v16028_v48, 16  ;;  %v5747_v14 = vadd.f32 %v14093_v30, %v15920_v47  ;;  %v5745_v34 = vadd.f32 %v14093_v30, %v15924_v44 }
 0x3a6   : > { %v6522_v37 = vshrl.u32 %v16028_v48, 16  ;;  %v6528_v24 = vshll.u32 %v16032_v2, 16  ;;  %v6502_v60 = vrot.slane %v6501_v62, 4  ;;  %v6506_v4 = vrot.slane %v6504_v54, 5  ;;  %v16070_v8 = vld [vmem:[#allocation2 + $0x58] sm:$0xf] }
 0x3a7   : > { %v6511_v50 = vrot.slane %v6509_v3, 4  ;;  %v6514_v7 = vrot.slane %v6512_v15, 5  ;;  %v6520_v53 = vrot.slane %v6518_v51, 5  ;;  %v5779_v52 = vmax.f32 %v5747_v14, 0.0  ;;  %v6294_v59 = vld [vmem:[#allocation2 + $0xb4] sm:$0xf] }
 0x3a8   : > { %v6524_v57 = vrot.slane %v6522_v37, 4  ;;  %v6530_v32 = vrot.slane %v6528_v24, 5  ;;  %v6507_v35 = vsel %vm14235_vm10, %v6502_v60, %v6506_v4  ;;  %v5748_v5 = vadd.f32 %v14093_v30, %v15934_v9  ;;  %v6305_v4 = vld [vmem:[#allocation2 + $0xc8] sm:$0x1] }
 0x3a9   : > { %v11822_v18 = vcombine.low %v6497_v13, %v6507_v35  ;;  %v6515_v23 = vor.u32 %v6514_v7, %v6511_v50  ;;  %v5746_v42 = vadd.f32 %v14093_v30, %v15941_v27  ;;  %v12312_v47 = vpack.c.bf16 %v5779_v52, %v5779_v52  ;;  %v16077_v52 = vld [vmem:[#allocation2 + $0x60] sm:$0xf] }
 0x3aa   : > { %v6525_v40 = vor.u32 %v6524_v57, %v6520_v53  ;;  %v5777_v33 = vmax.f32 %v5745_v34, 0.0  ;;  %v5780_v31 = vmax.f32 %v5748_v5, 0.0  ;;  %v6533_v11 = vshrl.u32 %v16056_v20, 16 }
 0x3ab   : > { %13051 = vmatmul.mubr.msk.bf16.gmra.mrb[8].mxu1 %vm1425_vm8, %v11822_v18  ;;  %v6516_v45 = vrot.slane %v6515_v23, 4  ;;  %v5778_v0 = vmax.f32 %v5746_v42, 0.0  ;;  %v6536_v39 = vshll.u32 %v16056_v20, 16  ;;  %v6133_v44 = vshrl.u32 %v12312_v47, 16  ;;  %v16081_v42 = vld [vmem:[#allocation2 + $0x64] sm:$0xf] }
 0x3ac   : > { %v6526_v36 = vrot.slane %v6525_v40, 4  ;;  %v6136_v63 = vshll.u32 %v12312_v47, 16  ;;  %v12310_v9 = vpack.c.bf16 %v5777_v33, %v5777_v33  ;;  %v12313_v28 = vpack.c.bf16 %v5780_v31, %v5780_v31  ;;  %v16079_v40 = vld [vmem:[#allocation2 + $0x5c] sm:$0x1] }
 0x3ad   : > { %v6521_v1 = vsel %vm14235_vm10, %v6516_v45, %v6520_v53  ;;  %v12311_v38 = vpack.c.bf16 %v5778_v0, %v5778_v0  ;;  %v6535_v25 = vrot.slane %v6533_v11, 4  ;;  %v6135_v55 = vrot.slane %v6133_v44, 7  ;;  %v16085_v45 = vld [vmem:[#allocation2 + $0x68] sm:$0x1] }
 0x3ae   : > { %v6531_v27 = vsel %vm14235_vm10, %v6526_v36, %v6530_v32  ;;  %v6116_v46 = vshrl.u32 %v12310_v9, 16  ;;  %v6119_v29 = vshll.u32 %v12310_v9, 16  ;;  %v6141_v13 = vshrl.u32 %v12313_v28, 16  ;;  %v6298_v32 = vld [vmem:[#allocation2 + $0xbc] sm:$0x1] }
 0x3af   : > { %v11823_v12 = vcombine.low %v6521_v1, %v6531_v27  ;;  %v6144_v62 = vshll.u32 %v12313_v28, 16  ;;  %v6124_v54 = vshrl.u32 %v12311_v38, 16  ;;  %v6127_v3 = vshll.u32 %v12311_v38, 16  ;;  %v16103_v1 = vld [vmem:[#allocation2 + $0x70] sm:$0xf] }
 0x3b0   : > { %v6138_v15 = vor.u32 %v6136_v63, %v6135_v55  ;;  %v6139_v51 = vrot.slane %v6135_v55, 4  ;;  %v6118_v37 = vrot.slane %v6116_v46, 7  ;;  %v6538_v24 = vrot.slane %v6536_v39, 5 }
 0x3b1   : > { %13054 = vmatprep.mubr.msk.bf16.mxu1 %vm1425_vm8, %v11823_v12  ;;  %v6143_v60 = vrot.slane %v6141_v13, 7  ;;  %v6126_v50 = vrot.slane %v6124_v54, 7  ;;  %v6542_v30 = vshll.u32 %v16070_v8, 16  ;;  %v6546_v14 = vshrl.u32 %v16070_v8, 16 }
 0x3b2   : > { %v6302_v7 = vsel %vm14248_vm11, %v6138_v15, %v6301_v10  ;;  %v6121_v53 = vor.u32 %v6119_v29, %v6118_v37  ;;  %v6122_v57 = vrot.slane %v6118_v37, 4  ;;  %v6539_v35 = vor.u32 %v6538_v24, %v6535_v25  ;;  %v16109_v25 = vld [vmem:[#allocation2 + $0x78] sm:$0xf]  ;;  %v16111_v29 = vld [vmem:[#allocation2 + $0x74] sm:$0x1] }
 0x3b3   : > { %6303 = vst [vmem:[#allocation2 + $0xc0] sm:$0xf] %v6302_v7  ;;  %v6146_v34 = vor.u32 %v6144_v62, %v6143_v60  ;;  %v6148_v5 = vrot.slane %v6143_v60, 4  ;;  %v6129_v18 = vor.u32 %v6127_v3, %v6126_v50  ;;  %v6131_v23 = vrot.slane %v6126_v50, 4 }
 0x3b4   : > { %v6295_v47 = vsel %vm14248_vm11, %v6121_v53, %v6294_v59  ;;  %v6540_v33 = vrot.slane %v6539_v35, 4  ;;  %v6544_v31 = vrot.slane %v6542_v30, 5  ;;  %v6548_v11 = vrot.slane %v6546_v14, 4  ;;  %v16119_v14 = vld [vmem:[#allocation2 + $0x7c] sm:$0xf] }
 0x3b5   : > { %6296 = vst [vmem:[#allocation2 + $0xb4] sm:$0xf] %v6295_v47  ;;  %v6147_v36 = vsel %vm14254_vm12, %v6139_v51, %v6146_v34  ;;  %v6306_v0 = vsel %vm14184_vm4, %v6148_v5, %v6305_v4  ;;  %v6130_v39 = vsel %vm14254_vm12, %v6122_v57, %v6129_v18  ;;  %v6299_v44 = vsel %vm14184_vm4, %v6131_v23, %v6298_v32  ;;  %v16124_v18 = vld [vmem:[#allocation2 + $0x80] sm:$0x1] }
 0x3b6   : > { %6304 = vst.msk [vmem:[#allocation2 + $0xc4] sm:$0xf] %vm226_vm0, %v6147_v36  ;;  %6307 = vst [vmem:[#allocation2 + $0xc8] sm:$0x1] %v6306_v0  ;;  %v6545_v63 = vsel %vm14235_vm10, %v6540_v33, %v6544_v31  ;;  %v6549_v9 = vor.u32 %v6548_v11, %v6544_v31  ;;  %v6552_v28 = vshll.u32 %v16079_v40, 16  ;;  %v6557_v61 = vshrl.u32 %v16077_v52, 16 }
 0x3b7   : > { %6297 = vst.msk [vmem:[#allocation2 + $0xb8] sm:$0xf] %vm226_vm0, %v6130_v39  ;;  %6300 = vst [vmem:[#allocation2 + $0xbc] sm:$0x1] %v6299_v44  ;;  %v6560_v16 = vshll.u32 %v16077_v52, 16  ;;  %v6566_v27 = vshll.u32 %v16081_v42, 16 }
 0x3b8   : > { %v6570_v10 = vshrl.u32 %v16081_v42, 16  ;;  %v6576_v38 = vshll.u32 %v16085_v45, 16  ;;  %v6550_v12 = vrot.slane %v6549_v9, 4  ;;  %v6554_v55 = vrot.slane %v6552_v28, 5  ;;  %v16128_v36 = vld [vmem:[#allocation2 + $0x84] sm:$0xf] }
 0x3b9   : > { %v6559_v46 = vrot.slane %v6557_v61, 4  ;;  %v6581_v59 = vshrl.u32 %v16095_v21, 16  ;;  %v6562_v13 = vrot.slane %v6560_v16, 5  ;;  %v6568_v62 = vrot.slane %v6566_v27, 5  ;;  %v16134_v9 = vld [vmem:[#allocation2 + $0x88] sm:$0xf] }
 0x3ba   : > { %v6572_v54 = vrot.slane %v6570_v10, 4  ;;  %v6578_v3 = vrot.slane %v6576_v38, 5  ;;  %v6555_v15 = vsel %vm14235_vm10, %v6550_v12, %v6554_v55  ;;  %v6584_v37 = vshll.u32 %v16095_v21, 16  ;;  %v16137_v10 = vld [vmem:[#allocation2 + $0x8c] sm:$0x1] }
 0x3bb   : > { %v6583_v51 = vrot.slane %v6581_v59, 4  ;;  %v6590_v24 = vshll.u32 %v16103_v1, 16  ;;  %v11824_v60 = vcombine.low %v6545_v63, %v6555_v15  ;;  %v6563_v4 = vor.u32 %v6562_v13, %v6559_v46 }
 0x3bc   : > { %v6573_v50 = vor.u32 %v6572_v54, %v6568_v62  ;;  %v6594_v30 = vshrl.u32 %v16103_v1, 16  ;;  %v6586_v7 = vrot.slane %v6584_v37, 5  ;;  %v6600_v57 = vshll.u32 %v16111_v29, 16 }
 0x3bd   : > { %v6592_v53 = vrot.slane %v6590_v24, 5  ;;  %v6605_v32 = vshrl.u32 %v16109_v25, 16  ;;  %13055 = vmatmul.mubr.msk.bf16.gmra.mrb[12].mxu1 %vm1425_vm8, %v11824_v60  ;;  %v6564_v35 = vrot.slane %v6563_v4, 4  ;;  %v6608_v23 = vshll.u32 %v16109_v25, 16  ;;  %v16150_v60 = vld [vmem:[#allocation2 + $0x94] sm:$0xf] }
 0x3be   : > { %v6574_v34 = vrot.slane %v6573_v50, 4  ;;  %v6596_v5 = vrot.slane %v6594_v30, 4  ;;  %v6587_v47 = vor.u32 %v6586_v7, %v6583_v51  ;;  %v6602_v33 = vrot.slane %v6600_v57, 5 }
 0x3bf   : > { %v6607_v31 = vrot.slane %v6605_v32, 4  ;;  %v6614_v11 = vshll.u32 %v16119_v14, 16  ;;  %v6569_v0 = vsel %vm14235_vm10, %v6564_v35, %v6568_v62  ;;  %v6610_v63 = vrot.slane %v6608_v23, 5  ;;  %v16156_v35 = vld [vmem:[#allocation2 + $0x98] sm:$0x1] }
 0x3c0   : > { %v6579_v39 = vsel %vm14235_vm10, %v6574_v34, %v6578_v3  ;;  %v6597_v44 = vor.u32 %v6596_v5, %v6592_v53  ;;  %v6588_v61 = vrot.slane %v6587_v47, 4  ;;  %v6618_v27 = vshrl.u32 %v16119_v14, 16  ;;  %v16146_v3 = vld [vmem:[#allocation2 + $0x90] sm:$0xf] }
 0x3c1   : > { %v11825_v28 = vcombine.low %v6569_v0, %v6579_v39  ;;  %v6616_v16 = vrot.slane %v6614_v11, 5  ;;  %v6611_v12 = vor.u32 %v6610_v63, %v6607_v31  ;;  %v6624_v55 = vshll.u32 %v16124_v18, 16  ;;  %v16162_v31 = vld [vmem:[#allocation2 + $0x9c] sm:$0xf]  ;;  %v16165_v63 = vld [vmem:[#allocation2 + $0xa0] sm:$0xf] }
 0x3c2   : > { %v6598_v38 = vrot.slane %v6597_v44, 4  ;;  %v6629_v46 = vshrl.u32 %v16128_v36, 16  ;;  %v6593_v59 = vsel %vm14235_vm10, %v6588_v61, %v6592_v53  ;;  %v6620_v13 = vrot.slane %v6618_v27, 4 }
 0x3c3   : > { %13058 = vmatprep.mubr.msk.bf16.mxu1 %vm1425_vm8, %v11825_v28  ;;  %v6632_v62 = vshll.u32 %v16128_v36, 16  ;;  %v6638_v54 = vshll.u32 %v16134_v9, 16  ;;  %v6612_v51 = vrot.slane %v6611_v12, 4  ;;  %v6626_v37 = vrot.slane %v6624_v55, 5 }
 0x3c4   : > { %v6603_v15 = vsel %vm14235_vm10, %v6598_v38, %v6602_v33  ;;  %v6631_v24 = vrot.slane %v6629_v46, 4  ;;  %v6621_v50 = vor.u32 %v6620_v13, %v6616_v16  ;;  %v6642_v57 = vshrl.u32 %v16134_v9, 16 }
 0x3c5   : > { %v11826_v4 = vcombine.low %v6593_v59, %v6603_v15  ;;  %v6634_v30 = vrot.slane %v6632_v62, 5  ;;  %v6640_v7 = vrot.slane %v6638_v54, 5  ;;  %v6617_v53 = vsel %vm14235_vm10, %v6612_v51, %v6616_v16  ;;  %v16172_v62 = vld [vmem:[#allocation2 + $0xa4] sm:$0x1] }
 0x3c6   : > { %v6648_v32 = vshll.u32 %v16137_v10, 16  ;;  %v6653_v34 = vshrl.u32 %v16146_v3, 16  ;;  %v6622_v5 = vrot.slane %v6621_v50, 4  ;;  %v6656_v47 = vshll.u32 %v16146_v3, 16  ;;  %v16178_v50 = vld [vmem:[#allocation2 + $0xa8] sm:$0xf] }
 0x3c7   : > { %13059 = vmatmul.mubr.msk.bf16.gmra.mrb[16].mxu1 %vm1425_vm8, %v11826_v4  ;;  %v6635_v23 = vor.u32 %v6634_v30, %v6631_v24  ;;  %v6662_v33 = vshll.u32 %v16150_v60, 16  ;;  %v6644_v11 = vrot.slane %v6642_v57, 4  ;;  %v6666_v44 = vshrl.u32 %v16150_v60, 16 }
 0x3c8   : > { %v6650_v0 = vrot.slane %v6648_v32, 5  ;;  %v6655_v39 = vrot.slane %v6653_v34, 4  ;;  %v6627_v28 = vsel %vm14235_vm10, %v6622_v5, %v6626_v37  ;;  %v6658_v16 = vrot.slane %v6656_v47, 5  ;;  %v16181_v32 = vld [vmem:[#allocation2 + $0xac] sm:$0xf] }
 0x3c9   : > { %v6636_v61 = vrot.slane %v6635_v23, 4  ;;  %v6664_v27 = vrot.slane %v6662_v33, 5  ;;  %v11827_v38 = vcombine.low %v6617_v53, %v6627_v28  ;;  %v6645_v12 = vor.u32 %v6644_v11, %v6640_v7  ;;  %v16186_v33 = vld [vmem:[#allocation2 + $0xb0] sm:$0x1] }
 0x3ca   : > { %v6668_v55 = vrot.slane %v6666_v44, 4  ;;  %v6672_v46 = vshll.u32 %v16156_v35, 16  ;;  %v6659_v13 = vor.u32 %v6658_v16, %v6655_v39  ;;  %v6677_v54 = vshrl.u32 %v16162_v31, 16 }
 0x3cb   : > { %v6641_v59 = vsel %vm14235_vm10, %v6636_v61, %v6640_v7  ;;  %v6680_v15 = vshll.u32 %v16162_v31, 16  ;;  %13062 = vmatprep.mubr.msk.bf16.mxu1 %vm1425_vm8, %v11827_v38  ;;  %v6646_v51 = vrot.slane %v6645_v12, 4  ;;  %v6686_v4 = vshll.u32 %v16165_v63, 16 }
 0x3cc   : > { %v6669_v37 = vor.u32 %v6668_v55, %v6664_v27  ;;  %v6674_v24 = vrot.slane %v6672_v46, 5  ;;  %v6660_v30 = vrot.slane %v6659_v13, 4  ;;  %v6679_v53 = vrot.slane %v6677_v54, 4 }
 0x3cd   : > { %v6682_v57 = vrot.slane %v6680_v15, 5  ;;  %v6690_v7 = vshrl.u32 %v16165_v63, 16  ;;  %v6651_v34 = vsel %vm14235_vm10, %v6646_v51, %v6650_v0  ;;  %v6688_v23 = vrot.slane %v6686_v4, 5  ;;  %v16194_v0 = vld [vmem:[#allocation2 + $0xb4] sm:$0xf] }
 0x3ce   : > { %v6670_v5 = vrot.slane %v6669_v37, 4  ;;  %v6696_v47 = vshll.u32 %v16172_v62, 16  ;;  %v11828_v11 = vcombine.low %v6641_v59, %v6651_v34  ;;  %v6665_v28 = vsel %vm14235_vm10, %v6660_v30, %v6664_v27  ;;  %v16199_v51 = vld [vmem:[#allocation2 + $0xb8] sm:$0xf]  ;;  %v16206_v34 = vld [vmem:[#allocation2 + $0xbc] sm:$0x1] }
 0x3cf   : > { %v6683_v39 = vor.u32 %v6682_v57, %v6679_v53  ;;  %v6692_v44 = vrot.slane %v6690_v7, 4  ;;  %v6701_v16 = vshrl.u32 %v16178_v50, 16  ;;  %v6704_v38 = vshll.u32 %v16178_v50, 16 }
 0x3d0   : > { %v6675_v61 = vsel %vm14235_vm10, %v6670_v5, %v6674_v24  ;;  %13063 = vmatmul.mubr.msk.bf16.gmra.mrb[20].mxu1 %vm1425_vm8, %v11828_v11  ;;  %v6710_v59 = vshll.u32 %v16181_v32, 16  ;;  %v6698_v13 = vrot.slane %v6696_v47, 5  ;;  %v6714_v27 = vshrl.u32 %v16181_v32, 16 }
 0x3d1   : > { %v11829_v12 = vcombine.low %v6665_v28, %v6675_v61  ;;  %v6684_v55 = vrot.slane %v6683_v39, 4  ;;  %v6693_v46 = vor.u32 %v6692_v44, %v6688_v23  ;;  %v6703_v54 = vrot.slane %v6701_v16, 4 }
 0x3d2   : > { %v6706_v15 = vrot.slane %v6704_v38, 5  ;;  %v6712_v24 = vrot.slane %v6710_v59, 5  ;;  %v6720_v4 = vshll.u32 %v16186_v33, 16  ;;  %v6725_v30 = vshrl.u32 %v16194_v0, 16 }
 0x3d3   : > { %13066 = vmatprep.mubr.msk.bf16.mxu1 %vm1425_vm8, %v11829_v12  ;;  %v6694_v37 = vrot.slane %v6693_v46, 4  ;;  %v6689_v53 = vsel %vm14235_vm10, %v6684_v55, %v6688_v23  ;;  %v6716_v7 = vrot.slane %v6714_v27, 4  ;;  %v6728_v5 = vshll.u32 %v16194_v0, 16 }
 0x3d4   : > { %v6707_v57 = vor.u32 %v6706_v15, %v6703_v54  ;;  %v6727_v11 = vrot.slane %v6725_v30, 4  ;;  %v6734_v39 = vshll.u32 %v16199_v51, 16  ;;  %v6738_v44 = vshrl.u32 %v16199_v51, 16 }
 0x3d5   : > { %v6699_v47 = vsel %vm14235_vm10, %v6694_v37, %v6698_v13  ;;  %v6717_v16 = vor.u32 %v6716_v7, %v6712_v24  ;;  %v6730_v38 = vrot.slane %v6728_v5, 5  ;;  %v6744_v55 = vshll.u32 %v16206_v34, 16 }
 0x3d6   : > { %v11830_v28 = vcombine.low %v6689_v53, %v6699_v47  ;;  %v6708_v61 = vrot.slane %v6707_v57, 4  ;;  %v6736_v12 = vrot.slane %v6734_v39, 5  ;;  %v6740_v23 = vrot.slane %v6738_v44, 4  ;;  %v7363_v39 = vld [vmem:[#allocation2 + $0x90] sm:$0xe] }
 0x3d7   : > { %v6718_v46 = vrot.slane %v6717_v16, 4  ;;  %v6722_v59 = vrot.slane %v6720_v4, 5  ;;  %v6731_v54 = vor.u32 %v6730_v38, %v6727_v11  ;;  %v6746_v57 = vrot.slane %v6744_v55, 5  ;;  %v14094_v16 = vld [vmem:[#allocation2] sm:$0xf] }
 0x3d8   : > { %13067 = vmatmul.mubr.msk.bf16.gmra.mrb[24].mxu1 %vm1425_vm8, %v11830_v28  ;;  %v6741_v15 = vor.u32 %v6740_v23, %v6736_v12  ;;  %v6713_v13 = vsel %vm14235_vm10, %v6708_v61, %v6712_v24  ;;  %v11860_v7 = vcombine.low %v16056_v20, %v16070_v8  ;;  %v11861_v5 = vcombine.low %v16077_v52, %v16081_v42  ;;  %v16238_v38 = vld [vmem:[#allocation2 + $0x4] sm:$0xf]  ;;  %v7364_v24 = vld [vmem:[#allocation2 + $0x9c] sm:$0xe] }
 0x3d9   : > { %v6723_v27 = vsel %vm14235_vm10, %v6718_v46, %v6722_v59  ;;  %v6732_v37 = vrot.slane %v6731_v54, 4  ;;  %v11862_v47 = vcombine.low %v16095_v21, %v16103_v1  ;;  %v14096_v46 = vld [vmem:[#allocation2 + $0xc] sm:$0xf]  ;;  %v16247_v59 = vld [vmem:[#allocation2 + $0x10] sm:$0xf]  ;;  %v11858_v55 = vcombine.low %v16000_v6, %v16017_v19 }
 0x3da   : > { %v11831_v30 = vcombine.low %v6713_v13, %v6723_v27  ;;  %v6742_v53 = vrot.slane %v6741_v15, 4  ;;  %v11854_v54 = vcombine.low %v14096_v46, %v16247_v59  ;;  %v13993_v15 = vld [vmem:[%s17767_s3 + $0x48] sm:$0xff]   ;;  %v7358_v13 = vld [vmem:[#allocation2 + $0x54] sm:$0xe]  ;;  %v14098_v27 = vld [vmem:[#allocation2 + $0x18] sm:$0xf]  ;;  %v17892_v20 = vcombine.low %v16128_v36, %v16134_v9 }
 0x3db   : > { %v6737_v4 = vsel %vm14235_vm10, %v6732_v37, %v6736_v12  ;;  %v11853_v12 = vcombine.low %v14094_v16, %v16238_v38  ;;  %v16253_v37 = vld [vmem:[#allocation2 + $0x1c] sm:$0xf]  ;;  %v11896_v16 = vrot.slane %v7358_v13, 9  ;;  %v7453_v46 = vrot.slane %v16079_v40, 5  ;;  %v7361_v13 = vld [vmem:[#allocation2 + $0x78] sm:$0xe] }
 0x3dc   : > { %13070 = vmatprep.mubr.msk.bf16.mxu1 %vm1425_vm8, %v11831_v30  ;;  %v6747_v11 = vsel %vm14235_vm10, %v6742_v53, %v6746_v57  ;;  %v11855_v30 = vcombine.low %v14098_v27, %v16253_v37  ;;  %v7450_v53 = vrot.slane %v16070_v8, 5  ;;  %v7359_v57 = vld [vmem:[#allocation2 + $0x60] sm:$0xe]  ;;  %v11857_v27 = vcombine.low %v15973_v58, %v15979_v22  ;;  %v14101_v21 = vld [vmem:[#allocation2 + $0x8] sm:$0x1] }
 0x3dd   : > { %v11832_v61 = vcombine.low %v6737_v4, %v6747_v11  ;;  %v7360_v4 = vld [vmem:[#allocation2 + $0x6c] sm:$0xe]  ;;  %v14100_v11 = vld [vmem:[#allocation2 + $0x24] sm:$0xf]  ;;  %v7464_v22 = vrot.slane %v16103_v1, 5  ;;  %v7460_v28 = vrot.slane %v16085_v45, 5  ;;  %v17893_v8 = vcombine.low %v16146_v3, %v16150_v60 }
 0x3de   : > { %v11898_v58 = vrot.slane %v7360_v4, 9  ;;  %v11899_v45 = vrot.slane %v7361_v13, 9  ;;  %v7481_v13 = vrot.slane %v16137_v10, 5  ;;  %v16330_v10 = vld [vmem:[%s17767_s3 + $0x60] sm:$0xff]   ;;  %v7401_v52 = vrot.slane %v16238_v38, 5 }
 0x3df   : > { %v7466_v4 = vrot.slane %v7464_v22, 4  ;;  %v7404_v1 = vrot.slane %v14101_v21, 5  ;;  %v7408_v3 = vrot.slane %v16247_v59, 5 }
 0x3e0   : > { %13071 = vmatmul.mubr.msk.bf16.gmra.mrb[28].mxu1 %vm1425_vm8, %v11832_v61  ;;  %v11856_v61 = vcombine.low %v14100_v11, %v15951_v56  ;;  %v16272_v56 = vsel %vm14767_vm15, %v11896_v16, %v7450_v53  ;;  %v16288_v16 = vsel %vm14767_vm15, %v11898_v58, %v7464_v22  ;;  %v7478_v58 = vrot.slane %v16134_v9, 5 }
 0x3e1   : > { %13082 = vmatprep.mubr.msk.bf16.mxu1 %vm1425_vm8, %v11853_v12  ;;  %v7452_v12 = vrot.slane %v7450_v53, 4  ;;  %v7362_v53 = vld [vmem:[#allocation2 + $0x84] sm:$0xe]  ;;  %v7495_v22 = vrot.slane %v16172_v62, 5  ;;  %v7410_v38 = vrot.slane %v7408_v3, 4 }
 0x3e2   : > { %v11900_v44 = vrot.slane %v7362_v53, 9  ;;  %v7485_v53 = vrot.slane %v16150_v60, 5  ;;  %v7415_v60 = vrot.slane %v16253_v37, 5  ;;  %v14104_v37 = vld [vmem:[#allocation2 + $0x28] sm:$0xf] }
 0x3e3   : > { %v16276_v40 = vsel %vm14767_vm15, %v7452_v12, %v7453_v46  ;;  %v7467_v12 = vrot.slane %v16111_v29, 5  ;;  %v7471_v46 = vrot.slane %v16119_v14, 5 }
 0x3e5   : > { %v16305_v29 = vsel %vm14767_vm15, %v7466_v4, %v7467_v12  ;;  %v7473_v11 = vrot.slane %v7471_v46, 4  ;;  %v16316_v4 = vsel %vm14767_vm15, %v11899_v45, %v7471_v46  ;;  %v7492_v12 = vrot.slane %v16165_v63, 5 }
 0x3e6   : > { %v7487_v45 = vrot.slane %v7485_v53, 4 }
 0x3e8   : > { %13083 = vmatmul.mubr.msk.bf16.vlgmr.msra.gmra.mrb[0].mxu1 %vm1425_vm8, %v11854_v54  ;;  %v11897_v54 = vrot.slane %v7359_v57, 9 }
 0x3e9   : > { %13115 = vmatpush3.bf16.msra.mxu1 %v15970_v41  ;;  %13086 = vmatprep.mubr.msk.bf16.mxu1 %vm1425_vm8, %v11855_v30  ;;  %v13996_v41 = vld [vmem:[%s17767_s3 + $0x50] sm:$0xff]   ;;  %v7457_v30 = vrot.slane %v16081_v42, 5  ;;  %v7351_v42 = vld [vmem:[#allocation2] sm:$0xe] }
 0x3ea   : > { %13116 = vmatprep.subr.bf16.mxu1 %v13993_v15 }
 0x3eb   : > { %v16283_v57 = vsel %vm14767_vm15, %v11897_v54, %v7457_v30  ;;  %v7459_v23 = vrot.slane %v7457_v30, 4  ;;  %v14001_v54 = vld [vmem:[%s17767_s3 + $0x58] sm:$0xff]  }
 0x3ed   : > { %13117 = vmatpush3.bf16.msra.mxu1 %v13993_v15  ;;  %v16297_v30 = vsel %vm14767_vm15, %v7459_v23, %v7460_v28  ;;  %v7474_v15 = vrot.slane %v16124_v18, 5  ;;  %v11859_v28 = vcombine.low %v16022_v26, %v16028_v48  ;;  %v7480_v23 = vrot.slane %v7478_v58, 4 }
 0x3ee   : > { %13118 = vmatprep.subr.bf16.mxu1 %v13996_v41  ;;  %v16324_v26 = vsel %vm14767_vm15, %v11900_v44, %v7478_v58  ;;  %v7365_v44 = vld [vmem:[#allocation2 + $0xa8] sm:$0xe]  ;;  %v11902_v58 = vrot.slane %v7364_v24, 9  ;;  %v7506_v24 = vrot.slane %v16199_v51, 5 }
 0x3f0   : > { %13087 = vmatmul.mubr.msk.bf16.gmra.mrb[4].mxu1 %vm1425_vm8, %v11856_v61  ;;  %v16320_v61 = vsel %vm14767_vm15, %v7473_v11, %v7474_v15  ;;  %v11901_v11 = vrot.slane %v7363_v39, 9  ;;  %v7488_v15 = vrot.slane %v16156_v35, 5  ;;  %v7366_v39 = vld [vmem:[#allocation2 + $0xb4] sm:$0xe]  ;;  %v16354_v46 = vsel %vm14767_vm15, %v11902_v58, %v7492_v12 }
 0x3f1   : > { %13090 = vmatprep.mubr.msk.bf16.mxu1 %vm1425_vm8, %v11857_v27  ;;  %13119 = vmatpush3.bf16.msra.mxu1 %v13996_v41  ;;  %v16336_v41 = vsel %vm14767_vm15, %v7480_v23, %v7481_v13  ;;  %v7494_v27 = vrot.slane %v7492_v12, 4  ;;  %v7499_v23 = vrot.slane %v16181_v32, 5  ;;  %v11903_v35 = vrot.slane %v7365_v44, 9 }
 0x3f2   : > { %13120 = vmatprep.subr.bf16.mxu1 %v14001_v54  ;;  %v16344_v18 = vsel %vm14767_vm15, %v11901_v11, %v7485_v53  ;;  %v16350_v13 = vsel %vm14767_vm15, %v7487_v45, %v7488_v15  ;;  %v7502_v11 = vrot.slane %v16186_v33, 5  ;;  %v11904_v12 = vrot.slane %v7366_v39, 9  ;;  %v14103_v39 = vld [vmem:[#allocation2 + $0x20] sm:$0x1]  ;;  %v16636_v45 = vld [vmem:[#allocation2 + $0xac] sm:$0xf] }
 0x3f3   : > { %v16362_v53 = vsel %vm14767_vm15, %v7494_v27, %v7495_v22  ;;  %v7508_v15 = vrot.slane %v7506_v24, 4  ;;  %v7509_v44 = vrot.slane %v16206_v34, 5  ;;  %v16374_v58 = vsel %vm14767_vm15, %v11903_v35, %v7499_v23 }
 0x3f4   : > { %v16385_v34 = vsel %vm14767_vm15, %v11904_v12, %v7506_v24  ;;  %v7418_v35 = vrot.slane %v14103_v39, 5 }
 0x3f5   : > { %13121 = vmatpush3.bf16.msra.mxu1 %v14001_v54  ;;  %v7501_v54 = vrot.slane %v7499_v23, 4  ;;  %v16389_v6 = vsel %vm14767_vm15, %v7508_v15, %v7509_v44  ;;  %v7353_v23 = vld [vmem:[#allocation2 + $0x18] sm:$0xe] }
 0x3f6   : > { %13154 = vmatprep.subr.bf16.mxu1 %v16330_v10 }
 0x3f7   : > { %v16378_v22 = vsel %vm14767_vm15, %v7501_v54, %v7502_v11  ;;  %v7422_v54 = vrot.slane %v14104_v37, 5  ;;  %v11891_v11 = vrot.slane %v7353_v23, 9  ;;  %v7356_v23 = vld [vmem:[#allocation2 + $0x3c] sm:$0xe] }
 0x3f8   : > { %13091 = vmatmul.mubr.msk.bf16.gmra.mrb[8].mxu1 %vm1425_vm8, %v11858_v55  ;;  %v11894_v37 = vrot.slane %v7356_v23, 9 }
 0x3f9   : > { %13094 = vmatprep.mubr.msk.bf16.mxu1 %vm1425_vm8, %v11859_v28  ;;  %v17891_v28 = vcombine.low %v16109_v25, %v16119_v14  ;;  %v17894_v25 = vcombine.low %v16162_v31, %v16165_v63  ;;  %v17895_v14 = vcombine.low %v16178_v50, %v16181_v32  ;;  %v17896_v31 = vcombine.low %v16194_v0, %v16199_v51  ;;  %v7352_v63 = vld [vmem:[#allocation2 + $0xc] sm:$0xe]  ;;  %v14102_v32 = vld [vmem:[#allocation2 + $0x14] sm:$0x1] }
 0x3fa   : > { %v7417_v50 = vrot.slane %v7415_v60, 4  ;;  %v7411_v27 = vrot.slane %v14102_v32, 5  ;;  %v11890_v24 = vrot.slane %v7352_v63, 9  ;;  %v14105_v51 = vld [vmem:[#allocation2 + $0x34] sm:$0xf]  ;;  %v14008_v32 = vld [vmem:[%s17767_s3 + $0x78] sm:$0xff]  }
 0x3fb   : > { %v7429_v12 = vrot.slane %v14105_v51, 5 }
 0x3fc   : > { %v7412_v59 = vsel %vm14767_vm15, %v7410_v38, %v7411_v27  ;;  %v7419_v0 = vsel %vm14767_vm15, %v7417_v50, %v7418_v35  ;;  %v7409_v15 = vsel %vm14767_vm15, %v11890_v24, %v7408_v3  ;;  %v7443_v38 = vrot.slane %v16028_v48, 5  ;;  %v7357_v35 = vld [vmem:[#allocation2 + $0x48] sm:$0xe] }
 0x3fd   : > { %v11914_v44 = vcombine.low %v7409_v15, %v7412_v59  ;;  %v7431_v21 = vrot.slane %v7429_v12, 4  ;;  %v7439_v48 = vrot.slane %v16026_v17, 5  ;;  %v7446_v24 = vrot.slane %v16032_v2, 5  ;;  %v16474_v59 = vld [vmem:[%s17767_s3 + $0x80] sm:$0xff]   ;;  %v16487_v15 = vld [vmem:[#allocation2 + $0x28] sm:$0xf] }
 0x3fe   : > { %v7445_v39 = vrot.slane %v7443_v38, 4 }
 0x400   : > { %13095 = vmatmul.mubr.msk.bf16.gmra.mrb[12].mxu1 %vm1425_vm8, %v11860_v7  ;;  %v11889_v7 = vrot.slane %v7351_v42, 9  ;;  %v7354_v42 = vld [vmem:[#allocation2 + $0x24] sm:$0xe] }
 0x401   : > { %13098 = vmatprep.mubr.msk.bf16.mxu1 %vm1425_vm8, %v11861_v5  ;;  %v7403_v5 = vrot.slane %v7401_v52, 4 }
 0x402   : > { %v7402_v36 = vsel %vm14767_vm15, %v11889_v7, %v7401_v52  ;;  %v7424_v52 = vrot.slane %v7422_v54, 4 }
 0x403   : > { %v7405_v9 = vsel %vm14767_vm15, %v7403_v5, %v7404_v1  ;;  %v14106_v1 = vld [vmem:[#allocation2 + $0x2c] sm:$0x1]  ;;  %v7355_v5 = vld [vmem:[#allocation2 + $0x30] sm:$0xe] }
 0x404   : > { %v7425_v7 = vrot.slane %v14106_v1, 5  ;;  %v17897_v1 = vcombine.low %v16272_v56, %v16276_v40  ;;  %v16512_v56 = vld [vmem:[#allocation2 + $0x50] sm:$0x1] }
 0x406   : > { %v7426_v3 = vsel %vm14767_vm15, %v7424_v52, %v7425_v7  ;;  %v16493_v52 = vld [vmem:[#allocation2 + $0x38] sm:$0x1]  ;;  %v16502_v7 = vld [vmem:[#allocation2 + $0x4c] sm:$0xf] }
 0x408   : > { %13099 = vmatmul.mubr.msk.bf16.gmra.mrb[16].mxu1 %vm1425_vm8, %v11862_v47  ;;  %v11913_v47 = vcombine.low %v7402_v36, %v7405_v9  ;;  %v14007_v36 = vld [vmem:[%s17767_s3 + $0x70] sm:$0xff]   ;;  %v11892_v9 = vrot.slane %v7354_v42, 9  ;;  %v16495_v42 = vld [vmem:[#allocation2 + $0x40] sm:$0xf] }
 0x409   : > { %13102 = vmatprep.mubr.msk.bf16.mxu1 %vm1425_vm8, %v17891_v28  ;;  %v7416_v28 = vsel %vm14767_vm15, %v11891_v11, %v7415_v60  ;;  %v7436_v60 = vrot.slane %v16017_v19, 5  ;;  %v11895_v11 = vrot.slane %v7357_v35, 9  ;;  %v9074_v35 = vrot.slane %v16502_v7, 5 }
 0x40b   : > { %v7438_v27 = vrot.slane %v7436_v60, 4  ;;  %v7437_v17 = vsel %vm14767_vm15, %v11894_v37, %v7436_v60  ;;  %v7444_v2 = vsel %vm14767_vm15, %v11895_v11, %v7443_v38  ;;  %v16541_v37 = vld [vmem:[#allocation2 + $0x68] sm:$0x1] }
 0x410   : > { %13103 = vmatmul.mubr.msk.bf16.gmra.mrb[20].mxu1 %vm1425_vm8, %v17892_v20  ;;  %v14006_v20 = vld [vmem:[%s17767_s3 + $0x68] sm:$0xff]  }
 0x411   : > { %13106 = vmatprep.mubr.msk.bf16.mxu1 %vm1425_vm8, %v17893_v8  ;;  %v11915_v8 = vcombine.low %v7416_v28, %v7419_v0  ;;  %v7447_v0 = vsel %vm14767_vm15, %v7445_v39, %v7446_v24  ;;  %v8975_v28 = vld [vmem:[#allocation2 + $0x24] sm:$0xe]  ;;  %v8979_v24 = vld [vmem:[#allocation2 + $0x54] sm:$0xe] }
 0x418   : > { %13107 = vmatmul.mubr.msk.bf16.gmra.mrb[24].mxu1 %vm1425_vm8, %v17894_v25  ;;  %v14107_v25 = vld [vmem:[#allocation2 + $0x38] sm:$0x1] }
 0x419   : > { %13110 = vmatprep.mubr.msk.bf16.mxu1 %vm1425_vm8, %v17895_v14  ;;  %v7432_v14 = vrot.slane %v14107_v25, 5 }
 0x420   : > { %13111 = vmatmul.mubr.msk.bf16.gmra.mrb[28].mxu1 %vm1425_vm8, %v17896_v31  ;;  %v7423_v31 = vsel %vm14767_vm15, %v11892_v9, %v7422_v54  ;;  %v7440_v54 = vsel %vm14767_vm15, %v7438_v27, %v7439_v48  ;;  %v16532_v27 = vld [vmem:[#allocation2 + $0x64] sm:$0xf] }
 0x421   : > { %13122 = vmatprep.mubr.msk.bf16.mxu1 %vm1425_vm8, %v11913_v47  ;;  %v11893_v47 = vrot.slane %v7355_v5, 9  ;;  %v11916_v63 = vcombine.low %v7423_v31, %v7426_v3  ;;  %v11918_v51 = vcombine.low %v7437_v17, %v7440_v54  ;;  %v12039_v5 = vrot.slane %v8975_v28, 9  ;;  %v16620_v54 = vld [vmem:[#allocation2 + $0xa0] sm:$0xf] }
 0x422   : > { %v9063_v31 = vrot.slane %v16493_v52, 5  ;;  %v9076_v28 = vrot.slane %v9074_v35, 4 }
 0x423   : > { %v7430_v50 = vsel %vm14767_vm15, %v11893_v47, %v7429_v12  ;;  %v11919_v12 = vcombine.low %v7444_v2, %v7447_v0  ;;  %v8978_v47 = vld [vmem:[#allocation2 + $0x48] sm:$0xe]  ;;  %v16550_v2 = vld [vmem:[#allocation2 + $0x70] sm:$0xf] }
 0x424   : > { %v12042_v48 = vrot.slane %v8978_v47, 9 }
 0x428   : > { %13123 = vmatmul.mubr.msk.bf16.vlgmr.msra.gmra.mrb[0].mxu1 %vm1425_vm8, %v11914_v44  ;;  %v16489_v44 = vld [vmem:[#allocation2 + $0x34] sm:$0xf] }
 0x429   : > { %13155 = vmatpush3.bf16.msra.mxu1 %v16330_v10  ;;  %13126 = vmatprep.mubr.msk.bf16.mxu1 %vm1425_vm8, %v11915_v8  ;;  %v7433_v10 = vsel %vm14767_vm15, %v7431_v21, %v7432_v14  ;;  %v8976_v8 = vld [vmem:[#allocation2 + $0x30] sm:$0xe]  ;;  %v9053_v21 = vrot.slane %v16487_v15, 5  ;;  %v9060_v25 = vrot.slane %v16489_v44, 5  ;;  %v8977_v14 = vld [vmem:[#allocation2 + $0x3c] sm:$0xe] }
 0x42a   : > { %13156 = vmatprep.subr.bf16.mxu1 %v14006_v20  ;;  %v11917_v19 = vcombine.low %v7430_v50, %v7433_v10  ;;  %v12040_v60 = vrot.slane %v8976_v8, 9  ;;  %v16510_v10 = vld [vmem:[#allocation2 + $0x44] sm:$0x1]  ;;  %v9077_v8 = vrot.slane %v16512_v56, 5 }
 0x42b   : > { %v9055_v9 = vrot.slane %v9053_v21, 4  ;;  %v16516_v40 = vsel %vm14767_vm15, %v12039_v5, %v9053_v21  ;;  %v9062_v38 = vrot.slane %v9060_v25, 4  ;;  %v9070_v17 = vrot.slane %v16510_v10, 5 }
 0x42c   : > { %17899 = vst [vmem:[#allocation8_spill] sm:$0xff] %v16516_v40  ;;  %v16529_v50 = vsel %vm14767_vm15, %v12040_v60, %v9060_v25  ;;  %v12043_v5 = vrot.slane %v8979_v24, 9  ;;  %v16574_v47 = vsel %vm14767_vm15, %v9076_v28, %v9077_v8  ;;  %v9095_v8 = vrot.slane %v16550_v2, 5  ;;  %v10620_v40 = vld [vmem:[#allocation2 + $0x84] sm:$0xe] }
 0x42d   : > { %13157 = vmatpush3.bf16.msra.mxu1 %v14006_v20  ;;  %v16491_v20 = vld [vmem:[#allocation2 + $0x2c] sm:$0x1]  ;;  %17901 = vst [vmem:[#allocation10_spill] sm:$0xff] %v16529_v50  ;;  %v16538_v39 = vsel %vm14767_vm15, %v9062_v38, %v9063_v31  ;;  %17907 = vst [vmem:[#allocation3_spill] sm:$0xff] %v16574_v47  ;;  %v8986_v47 = vld [vmem:[#allocation2 + $0xa8] sm:$0xe] }
 0x42e   : > { %13158 = vmatprep.subr.bf16.mxu1 %v14007_v36  ;;  %v9056_v3 = vrot.slane %v16491_v20, 5  ;;  %17902 = vst [vmem:[#allocation6_spill] sm:$0xff] %v16538_v39 }
 0x430   : > { %13127 = vmatmul.mubr.msk.bf16.gmra.mrb[4].mxu1 %vm1425_vm8, %v11916_v63  ;;  %v16519_v63 = vld [vmem:[#allocation2 + $0x58] sm:$0xf] }
 0x431   : > { %13130 = vmatprep.mubr.msk.bf16.mxu1 %vm1425_vm8, %v11917_v19  ;;  %13159 = vmatpush3.bf16.msra.mxu1 %v14007_v36  ;;  %v17898_v36 = vcombine.low %v16283_v57, %v16297_v30  ;;  %v16521_v57 = vld [vmem:[#allocation2 + $0x5c] sm:$0x1]  ;;  %v16525_v30 = vsel %vm14767_vm15, %v9055_v9, %v9056_v3  ;;  %v9067_v19 = vrot.slane %v16495_v42, 5  ;;  %v9081_v21 = vrot.slane %v16519_v63, 5 }
 0x432   : > { %13160 = vmatprep.subr.bf16.mxu1 %v14008_v32  ;;  %17900 = vst [vmem:[#allocation9_spill] sm:$0xff] %v16525_v30  ;;  %v9084_v25 = vrot.slane %v16521_v57, 5  ;;  %v17906_v9 = vcombine.low %v16288_v16, %v16305_v29  ;;  %v16568_v3 = vld [vmem:[#allocation2 + $0x7c] sm:$0xf]  ;;  %v16580_v16 = vld [vmem:[#allocation2 + $0x74] sm:$0x1] }
 0x433   : > { %v9069_v0 = vrot.slane %v9067_v19, 4  ;;  %v9083_v38 = vrot.slane %v9081_v21, 4  ;;  %v16582_v29 = vld [vmem:[#allocation2 + $0x80] sm:$0x1]  ;;  %v9098_v60 = vrot.slane %v16580_v16, 5 }
 0x434   : > { %v14028_v30 = vld [vmem:[#allocation2 + $0xc0] sm:$0xff]  }
 0x435   : > { %13161 = vmatpush3.bf16.msra.mxu1 %v14008_v32  ;;  %v12041_v32 = vrot.slane %v8977_v14, 9  ;;  %v9088_v14 = vrot.slane %v16532_v27, 5 }
 0x436   : > { %13194 = vmatprep.subr.bf16.mxu1 %v16474_v59 }
 0x437   : > { %v16547_v11 = vsel %vm14767_vm15, %v12041_v32, %v9067_v19  ;;  %v8982_v32 = vld [vmem:[#allocation2 + $0x78] sm:$0xe]  ;;  %v17908_v19 = vcombine.low %v16316_v4, %v16320_v61  ;;  %v9090_v24 = vrot.slane %v9088_v14, 4  ;;  %v16597_v4 = vsel %vm14767_vm15, %v9083_v38, %v9084_v25  ;;  %v8983_v38 = vld [vmem:[#allocation2 + $0x84] sm:$0xe] }
 0x438   : > { %13131 = vmatmul.mubr.msk.bf16.gmra.mrb[8].mxu1 %vm1425_vm8, %v11918_v51  ;;  %17903 = vst [vmem:[#allocation7_spill] sm:$0xff] %v16547_v11  ;;  %v8980_v51 = vld [vmem:[#allocation2 + $0x60] sm:$0xe]  ;;  %17910 = vst [vmem:[#allocation12_spill] sm:$0xff] %v16597_v4  ;;  %v9102_v25 = vrot.slane %v16568_v3, 5 }
 0x439   : > { %13134 = vmatprep.mubr.msk.bf16.mxu1 %vm1425_vm8, %v11919_v12  ;;  %v16554_v12 = vsel %vm14767_vm15, %v12042_v48, %v9074_v35  ;;  %v12044_v31 = vrot.slane %v8980_v51, 9  ;;  %v16588_v35 = vsel %vm14767_vm15, %v12043_v5, %v9081_v21  ;;  %v16593_v51 = vld [vmem:[#allocation2 + $0x8c] sm:$0x1]  ;;  %v16604_v21 = vld [vmem:[#allocation2 + $0x94] sm:$0xf] }
 0x43a   : > { %17904 = vst [vmem:[#allocation4_spill] sm:$0xff] %v16554_v12  ;;  %17909 = vst [vmem:[#allocation11_spill] sm:$0xff] %v16588_v35  ;;  %v8254_v48 = vld [vmem:[#allocation2 + $0x98] sm:$0x1]  ;;  %v8984_v5 = vld [vmem:[#allocation2 + $0x90] sm:$0xe] }
 0x43b   : > { %v16601_v61 = vsel %vm14767_vm15, %v12044_v31, %v9088_v14  ;;  %v9097_v31 = vrot.slane %v9095_v8, 4  ;;  %v16628_v14 = vld [vmem:[#allocation2 + $0xa4] sm:$0x1]  ;;  %v9112_v55 = vrot.slane %v16593_v51, 5  ;;  %v9116_v33 = vrot.slane %v16604_v21, 5 }
 0x43c   : > { %17911 = vst [vmem:[#allocation13_spill] sm:$0xff] %v16601_v61  ;;  %v8985_v61 = vld [vmem:[#allocation2 + $0x9c] sm:$0xe]  ;;  %v9119_v35 = vrot.slane %v8254_v48, 5 }
 0x43d   : > { %v9118_v4 = vrot.slane %v9116_v33, 4 }
 0x440   : > { %13135 = vmatmul.mubr.msk.bf16.gmra.mrb[12].mxu1 %vm1425_vm8, %v17897_v1  ;;  %v16560_v1 = vsel %vm14767_vm15, %v9069_v0, %v9070_v17  ;;  %v9091_v0 = vrot.slane %v16541_v37, 5  ;;  %v16591_v17 = vld [vmem:[#allocation2 + $0x88] sm:$0xf] }
 0x441   : > { %13138 = vmatprep.mubr.msk.bf16.mxu1 %vm1425_vm8, %v17898_v36  ;;  %17905 = vst [vmem:[#allocation5_spill] sm:$0xff] %v16560_v1  ;;  %v8981_v36 = vld [vmem:[#allocation2 + $0x6c] sm:$0xe]  ;;  %v9109_v23 = vrot.slane %v16591_v17, 5 }
 0x442   : > { %v12045_v28 = vrot.slane %v8981_v36, 9 }
 0x443   : > { %v9111_v62 = vrot.slane %v9109_v23, 4 }
 0x444   : > { %v16617_v36 = vsel %vm14767_vm15, %v12045_v28, %v9095_v8  ;;  %v16632_v28 = vsel %vm14767_vm15, %v9097_v31, %v9098_v60  ;;  %v12047_v8 = vrot.slane %v8983_v38, 9  ;;  %v17917_v60 = vcombine.low %v16324_v26, %v16336_v41  ;;  %v8260_v38 = vld [vmem:[#allocation2 + $0xb0] sm:$0x1] }
 0x445   : > { %17913 = vst [vmem:[#allocation15_spill] sm:$0xff] %v16617_v36  ;;  %17915 = vst [vmem:[#allocation17_spill] sm:$0xff] %v16632_v28  ;;  %v16662_v41 = vsel %vm14767_vm15, %v9111_v62, %v9112_v55  ;;  %v8987_v62 = vld [vmem:[#allocation2 + $0xb4] sm:$0xe]  ;;  %v8266_v55 = vld [vmem:[#allocation2 + $0xc8] sm:$0x1] }
 0x446   : > { %v16658_v26 = vsel %vm14767_vm15, %v12047_v8, %v9109_v23  ;;  %17920 = vst [vmem:[#allocation20_spill] sm:$0xff] %v16662_v41  ;;  %v12049_v23 = vrot.slane %v8985_v61, 9  ;;  %v9130_v8 = vrot.slane %v16636_v45, 5  ;;  %v12050_v31 = vrot.slane %v8986_v47, 9  ;;  %v14019_v28 = vld [vmem:[#allocation2 + $0x6c] sm:$0xff]  }
 0x447   : > { %17919 = vst [vmem:[#allocation19_spill] sm:$0xff] %v16658_v26  ;;  %v9133_v41 = vrot.slane %v8260_v38, 5  ;;  %v8353_v36 = vshrl.u32 %v16489_v44, 16 }
 0x448   : > { %13139 = vmatmul.mubr.msk.bf16.gmra.mrb[16].mxu1 %vm1425_vm8, %v17906_v9  ;;  %v16610_v9 = vsel %vm14767_vm15, %v9090_v24, %v9091_v0  ;;  %v9104_v24 = vrot.slane %v9102_v25, 4  ;;  %v9105_v0 = vrot.slane %v16582_v29, 5 }
 0x449   : > { %13142 = vmatprep.mubr.msk.bf16.mxu1 %vm1425_vm8, %v17908_v19  ;;  %17912 = vst [vmem:[#allocation14_spill] sm:$0xff] %v16610_v9  ;;  %v12046_v19 = vrot.slane %v8982_v32, 9  ;;  %v12048_v9 = vrot.slane %v8984_v5, 9  ;;  %v8263_v5 = vld [vmem:[#allocation2 + $0xbc] sm:$0x1] }
 0x44b   : > { %v16624_v32 = vsel %vm14767_vm15, %v12046_v19, %v9102_v25  ;;  %v16642_v25 = vsel %vm14767_vm15, %v9104_v24, %v9105_v0  ;;  %v17918_v19 = vcombine.low %v16344_v18, %v16350_v13  ;;  %v16654_v24 = vld [vmem:[#allocation2 + $0xb8] sm:$0xf]  ;;  %v16666_v48 = vsel %vm14767_vm15, %v12048_v9, %v9116_v33  ;;  %v16669_v18 = vld [vmem:[#allocation2 + $0xc4] sm:$0xf] }
 0x44c   : > { %17914 = vst [vmem:[#allocation16_spill] sm:$0xff] %v16624_v32  ;;  %17916 = vst [vmem:[#allocation18_spill] sm:$0xff] %v16642_v25  ;;  %v9123_v0 = vrot.slane %v16620_v54, 5  ;;  %v9132_v13 = vrot.slane %v9130_v8, 4  ;;  %v16692_v33 = vsel %vm14767_vm15, %v12050_v31, %v9130_v8  ;;  %v9144_v47 = vrot.slane %v16669_v18, 5 }
 0x44d   : > { %17921 = vst [vmem:[#allocation21_spill] sm:$0xff] %v16666_v48  ;;  %17925 = vst [vmem:[#allocation25_spill] sm:$0xff] %v16692_v33  ;;  %v9140_v48 = vrot.slane %v8263_v5, 5  ;;  %v9147_v32 = vrot.slane %v8266_v55, 5  ;;  %v17927_v31 = vcombine.low %v16354_v46, %v16362_v53  ;;  %v17930_v5 = vcombine.low %v16374_v58, %v16378_v22  ;;  %v14011_v22 = vld [vmem:[#allocation2 + $0x18] sm:$0xff]   ;;  %v14012_v55 = vld [vmem:[#allocation2 + $0x24] sm:$0xff]  }
 0x44e   : > { %v9125_v9 = vrot.slane %v9123_v0, 4  ;;  %v16683_v25 = vsel %vm14767_vm15, %v12049_v23, %v9123_v0  ;;  %v16699_v38 = vsel %vm14767_vm15, %v9132_v13, %v9133_v41  ;;  %v9146_v26 = vrot.slane %v9144_v47, 4  ;;  %v14016_v0 = vld [vmem:[#allocation2 + $0x48] sm:$0xff]  }
 0x44f   : > { %17923 = vst [vmem:[#allocation23_spill] sm:$0xff] %v16683_v25  ;;  %17926 = vst [vmem:[#allocation26_spill] sm:$0xff] %v16699_v38  ;;  %v17933_v58 = vcombine.low %v16385_v34, %v16389_v6  ;;  %v14020_v34 = vld [vmem:[%s17767_s3 + $0x90] sm:$0xff]  }
 0x450   : > { %13143 = vmatmul.mubr.msk.bf16.gmra.mrb[20].mxu1 %vm1425_vm8, %v17917_v60  ;;  %v9126_v60 = vrot.slane %v16628_v14, 5  ;;  %v16727_v53 = vsel %vm14767_vm15, %v9146_v26, %v9147_v32  ;;  %v8219_v32 = vld [vmem:[#allocation2 + $0xc] sm:$0xf]  ;;  %v16745_v6 = vld [vmem:[#allocation2 + $0x10] sm:$0xf] }
 0x451   : > { %13146 = vmatprep.mubr.msk.bf16.mxu1 %vm1425_vm8, %v17918_v19  ;;  %v16675_v19 = vsel %vm14767_vm15, %v9118_v4, %v9119_v35  ;;  %v9137_v35 = vrot.slane %v16654_v24, 5  ;;  %v8988_v4 = vld [vmem:[#allocation2 + $0xc0] sm:$0xe]  ;;  %17932 = vst [vmem:[#allocation30_spill] sm:$0xff] %v16727_v53  ;;  %v8268_v26 = vshrl.u32 %v8219_v32, 16 }
 0x452   : > { %17922 = vst [vmem:[#allocation22_spill] sm:$0xff] %v16675_v19  ;;  %v16688_v61 = vsel %vm14767_vm15, %v9125_v9, %v9126_v60  ;;  %v12051_v19 = vrot.slane %v8987_v62, 9  ;;  %v12052_v60 = vrot.slane %v8988_v4, 9  ;;  %v14015_v62 = vld [vmem:[%s17767_s3 + $0x88] sm:$0xff]   ;;  %v8277_v4 = vshll.u32 %v16745_v6, 16  ;;  %v16761_v9 = vld [vmem:[%s17767_s3 + $0xa0] sm:$0xff]  }
 0x453   : > { %17924 = vst [vmem:[#allocation24_spill] sm:$0xff] %v16688_v61  ;;  %v9139_v23 = vrot.slane %v9137_v35, 4  ;;  %v16768_v53 = vld [vmem:[#allocation2 + $0x20] sm:$0x1]  ;;  %v8228_v25 = vld [vmem:[#allocation2 + $0x30] sm:$0xf] }
 0x454   : > { %v16709_v8 = vsel %vm14767_vm15, %v12051_v19, %v9137_v35  ;;  %v16723_v46 = vsel %vm14767_vm15, %v12052_v60, %v9144_v47  ;;  %v14009_v19 = vld [vmem:[#allocation2 + $0xc] sm:$0xff]   ;;  %v8271_v35 = vshll.u32 %v8219_v32, 16  ;;  %v8281_v47 = vshrl.u32 %v16745_v6, 16 }
 0x455   : > { %17928 = vst [vmem:[#allocation27_spill] sm:$0xff] %v16709_v8  ;;  %v16713_v41 = vsel %vm14767_vm15, %v9139_v23, %v9140_v48  ;;  %17931 = vst [vmem:[#allocation29_spill] sm:$0xff] %v16723_v46  ;;  %v8222_v23 = vld [vmem:[#allocation2 + $0x18] sm:$0xf]  ;;  %v14013_v60 = vld [vmem:[#allocation2 + $0x30] sm:$0xff]  }
 0x456   : > { %17929 = vst [vmem:[#allocation28_spill] sm:$0xff] %v16713_v41  ;;  %v8283_v32 = vrot.slane %v8281_v47, 4  ;;  %v14017_v8 = vld [vmem:[#allocation2 + $0x54] sm:$0xff]  }
 0x458   : > { %13147 = vmatmul.mubr.msk.bf16.gmra.mrb[24].mxu1 %vm1425_vm8, %v17927_v31  ;;  %v16752_v31 = vld [vmem:[#allocation2 + $0x1c] sm:$0xf] }
 0x459   : > { %13150 = vmatprep.mubr.msk.bf16.mxu1 %vm1425_vm8, %v17930_v5  ;;  %v14014_v5 = vld [vmem:[#allocation2 + $0x3c] sm:$0xff]   ;;  %v8301_v48 = vshll.u32 %v16752_v31, 16  ;;  %v8305_v13 = vshrl.u32 %v16752_v31, 16 }
 0x45b   : > { %v8307_v47 = vrot.slane %v8305_v13, 4  ;;  %v8311_v13 = vshll.u32 %v16768_v53, 16 }
 0x460   : > { %13151 = vmatmul.mubr.msk.bf16.gmra.mrb[28].mxu1 %vm1425_vm8, %v17933_v58  ;;  %v8273_v58 = vrot.slane %v8271_v35, 5 }
 0x461   : > { %13162 = vmatprep.mubr.msk.bf16.mxu1 %vm1425_vm8, %v14009_v19  ;;  %v8270_v19 = vrot.slane %v8268_v26, 4  ;;  %v16763_v26 = vld [vmem:[#allocation2 + $0x14] sm:$0x1] }
 0x462   : > { %v8287_v38 = vshll.u32 %v16763_v26, 16 }
 0x464   : > { %v8289_v33 = vrot.slane %v8287_v38, 5  ;;  %v8343_v38 = vshll.u32 %v8228_v25, 16 }
 0x468   : > { %13163 = vmatmul.mubr.msk.bf16.vlgmr.msra.gmra.mrb[0].mxu1 %vm1425_vm8, %v14011_v22  ;;  %v8292_v22 = vshrl.u32 %v8222_v23, 16 }
 0x469   : > { %13195 = vmatpush3.bf16.msra.mxu1 %v16474_v59  ;;  %13166 = vmatprep.mubr.msk.bf16.mxu1 %vm1425_vm8, %v14012_v55  ;;  %v14025_v59 = vld [vmem:[%s17767_s3 + $0x98] sm:$0xff]   ;;  %v8279_v55 = vrot.slane %v8277_v4, 5  ;;  %v16765_v4 = vrot.slane %v8301_v48, 5 }
 0x46a   : > { %13196 = vmatprep.subr.bf16.mxu1 %v14015_v62  ;;  %v8294_v35 = vrot.slane %v8292_v22, 4 }
 0x46b   : > { %v8308_v48 = vor.u32 %v8307_v47, %v16765_v4 }
 0x46d   : > { %13197 = vmatpush3.bf16.msra.mxu1 %v14015_v62  ;;  %v8295_v62 = vshll.u32 %v8222_v23, 16 }
 0x46e   : > { %13198 = vmatprep.subr.bf16.mxu1 %v14020_v34 }
 0x46f   : > { %v8297_v23 = vrot.slane %v8295_v62, 5 }
 0x470   : > { %13167 = vmatmul.mubr.msk.bf16.gmra.mrb[4].mxu1 %vm1425_vm8, %v14013_v60  ;;  %v8225_v60 = vld [vmem:[#allocation2 + $0x24] sm:$0xf] }
 0x471   : > { %13170 = vmatprep.mubr.msk.bf16.mxu1 %vm1425_vm8, %v14014_v5  ;;  %13199 = vmatpush3.bf16.msra.mxu1 %v14020_v34  ;;  %v8274_v5 = vor.u32 %v8273_v58, %v8270_v19  ;;  %v8284_v34 = vor.u32 %v8283_v32, %v8279_v55  ;;  %v8316_v46 = vshrl.u32 %v8225_v60, 16  ;;  %v8319_v41 = vshll.u32 %v8225_v60, 16 }
 0x472   : > { %13200 = vmatprep.subr.bf16.mxu1 %v14025_v59  ;;  %v8298_v22 = vor.u32 %v8297_v23, %v8294_v35  ;;  %v8325_v32 = vshll.u32 %v16487_v15, 16  ;;  %v8329_v60 = vshrl.u32 %v16487_v15, 16  ;;  %v8309_v35 = vrot.slane %v8308_v48, 4  ;;  %v8234_v48 = vld [vmem:[#allocation2 + $0x48] sm:$0xf] }
 0x473   : > { %v8285_v19 = vrot.slane %v8284_v34, 4  ;;  %v8318_v58 = vrot.slane %v8316_v46, 4  ;;  %v8321_v62 = vrot.slane %v8319_v41, 5  ;;  %v8335_v23 = vshll.u32 %v16491_v20, 16 }
 0x474   : > { %v8299_v61 = vrot.slane %v8298_v22, 4  ;;  %v16782_v41 = vrot.slane %v8325_v32, 5  ;;  %v8331_v47 = vrot.slane %v8329_v60, 4  ;;  %v8340_v15 = vshrl.u32 %v8228_v25, 16 }
 0x475   : > { %13201 = vmatpush3.bf16.msra.mxu1 %v14025_v59  ;;  %v8275_v59 = vrot.slane %v8274_v5, 4  ;;  %v14018_v5 = vld [vmem:[#allocation2 + $0x60] sm:$0xff]   ;;  %v8322_v46 = vor.u32 %v8321_v62, %v8318_v58  ;;  %v8349_v22 = vshll.u32 %v16489_v44, 16  ;;  %v8373_v25 = vshll.u32 %v16495_v42, 16 }
 0x476   : > { %13234 = vmatprep.subr.bf16.mxu1 %v16761_v9  ;;  %v8304_v20 = vsel %vm14235_vm10, %v8299_v61, %v16765_v4  ;;  %v8377_v44 = vshrl.u32 %v16495_v42, 16  ;;  %v8332_v58 = vor.u32 %v8331_v47, %v16782_v41  ;;  %v8397_v62 = vshll.u32 %v16502_v7, 16  ;;  %v8237_v4 = vld [vmem:[#allocation2 + $0x54] sm:$0xf]  ;;  %v14021_v47 = vld [vmem:[#allocation2 + $0x78] sm:$0xff]  }
 0x477   : > { %v8280_v34 = vsel %vm14235_vm10, %v8275_v59, %v8279_v55  ;;  %v8231_v55 = vld [vmem:[#allocation2 + $0x3c] sm:$0xf]  ;;  %v8401_v61 = vshrl.u32 %v16502_v7, 16  ;;  %v8342_v32 = vrot.slane %v8340_v15, 4  ;;  %v16802_v60 = vrot.slane %v8349_v22, 5 }
 0x478   : > { %13171 = vmatmul.mubr.msk.bf16.gmra.mrb[8].mxu1 %vm1425_vm8, %v14016_v0  ;;  %v8290_v0 = vsel %vm14235_vm10, %v8285_v19, %v8289_v33  ;;  %v16795_v19 = vrot.slane %v8335_v23, 5  ;;  %v8388_v23 = vshrl.u32 %v8234_v48, 16  ;;  %v8379_v42 = vrot.slane %v8377_v44, 4 }
 0x479   : > { %13174 = vmatprep.mubr.msk.bf16.mxu1 %vm1425_vm8, %v14017_v8  ;;  %v8313_v8 = vrot.slane %v8311_v13, 5  ;;  %v16787_v33 = vcombine.low %v8280_v34, %v8290_v0  ;;  %v8323_v13 = vrot.slane %v8322_v46, 4  ;;  %v8355_v0 = vrot.slane %v8353_v36, 4 }
 0x47a   : > { %v16804_v34 = vrot.slane %v8373_v25, 5  ;;  %v8412_v46 = vshrl.u32 %v8237_v4, 16  ;;  %v8415_v12 = vshll.u32 %v8237_v4, 16  ;;  %v16806_v1 = vrot.slane %v8397_v62, 5 }
 0x47b   : > { %v8314_v59 = vsel %vm14235_vm10, %v8309_v35, %v8313_v8  ;;  %v8364_v35 = vshrl.u32 %v8231_v55, 16  ;;  %v8367_v8 = vshll.u32 %v8231_v55, 16  ;;  %v8403_v11 = vrot.slane %v8401_v61, 4 }
 0x47c   : > { %v8421_v7 = vshll.u32 %v16519_v63, 16  ;;  %v8425_v15 = vshrl.u32 %v16519_v63, 16  ;;  %v8333_v22 = vrot.slane %v8332_v58, 4  ;;  %v8356_v55 = vor.u32 %v8355_v0, %v16802_v60  ;;  %v8240_v0 = vld [vmem:[#allocation2 + $0x60] sm:$0xf] }
 0x47d   : > { %v8366_v25 = vrot.slane %v8364_v35, 4  ;;  %v8369_v44 = vrot.slane %v8367_v8, 5  ;;  %v8390_v4 = vrot.slane %v8388_v23, 4  ;;  %v16814_v62 = vcombine.low %v8304_v20, %v8314_v59 }
 0x47e   : > { %v8380_v61 = vor.u32 %v8379_v42, %v16804_v34  ;;  %v8414_v63 = vrot.slane %v8412_v46, 4  ;;  %v8417_v50 = vrot.slane %v8415_v12, 5  ;;  %v8328_v58 = vsel %vm14235_vm10, %v8323_v13, %v16782_v41 }
 0x47f   : > { %v8338_v35 = vsel %vm14235_vm10, %v8333_v22, %v16795_v19  ;;  %v8357_v59 = vrot.slane %v8356_v55, 4  ;;  %v8383_v8 = vshll.u32 %v16510_v10, 16  ;;  %v8370_v12 = vor.u32 %v8369_v44, %v8366_v25  ;;  %v14024_v22 = vld [vmem:[#allocation2 + $0x9c] sm:$0xff]   ;;  %v8243_v44 = vld [vmem:[#allocation2 + $0x6c] sm:$0xf] }
 0x480   : > { %13175 = vmatmul.mubr.msk.bf16.gmra.mrb[12].mxu1 %vm1425_vm8, %v14018_v5  ;;  %v8391_v5 = vshll.u32 %v8234_v48, 16  ;;  %v8359_v48 = vshll.u32 %v16493_v52, 16  ;;  %v8404_v52 = vor.u32 %v8403_v11, %v16806_v1  ;;  %v8407_v42 = vshll.u32 %v16512_v56, 16 }
 0x481   : > { %13178 = vmatprep.mubr.msk.bf16.mxu1 %vm1425_vm8, %v14019_v28  ;;  %v8345_v28 = vrot.slane %v8343_v38, 5  ;;  %v14022_v38 = vld [vmem:[#allocation2 + $0x84] sm:$0xff]   ;;  %v8381_v41 = vrot.slane %v8380_v61, 4  ;;  %v8418_v13 = vor.u32 %v8417_v50, %v8414_v63  ;;  %v8436_v11 = vshrl.u32 %v8240_v0, 16 }
 0x482   : > { %v8393_v39 = vrot.slane %v8391_v5, 5  ;;  %v8361_v23 = vrot.slane %v8359_v48, 5  ;;  %v8439_v46 = vshll.u32 %v8240_v0, 16  ;;  %v8449_v19 = vshrl.u32 %v16532_v27, 16 }
 0x483   : > { %v8346_v36 = vor.u32 %v8345_v28, %v8342_v32  ;;  %v16821_v32 = vrot.slane %v8421_v7, 5  ;;  %v8427_v28 = vrot.slane %v8425_v15, 4  ;;  %v8405_v7 = vrot.slane %v8404_v52, 4 }
 0x484   : > { %v8394_v5 = vor.u32 %v8393_v39, %v8390_v4  ;;  %v8362_v56 = vsel %vm14235_vm10, %v8357_v59, %v8361_v23  ;;  %v8385_v50 = vrot.slane %v8383_v8, 5  ;;  %v8371_v39 = vrot.slane %v8370_v12, 4  ;;  %v16859_v59 = vld [vmem:[#allocation2 + $0x1c] sm:$0xf]  ;;  %v14026_v8 = vld [vmem:[#allocation2 + $0xa8] sm:$0xff]  }
 0x485   : > { %v8347_v20 = vrot.slane %v8346_v36, 4  ;;  %v8428_v15 = vor.u32 %v8427_v28, %v16821_v32  ;;  %v16831_v36 = vcombine.low %v8328_v58, %v8338_v35  ;;  %v8409_v48 = vrot.slane %v8407_v42, 5  ;;  %17934 = vst [vmem:[#allocation31_spill] sm:$0xff] %v16859_v59 }
 0x486   : > { %v8395_v55 = vrot.slane %v8394_v5, 4  ;;  %v8431_v25 = vshll.u32 %v16521_v57, 16  ;;  %v16843_v4 = vrot.slane %v8418_v13, 4  ;;  %v16847_v61 = vrot.slane %v8439_v46, 5  ;;  %v14027_v13 = vld [vmem:[#allocation2 + $0xb4] sm:$0xff]  }
 0x487   : > { %v8352_v10 = vsel %vm14235_vm10, %v8347_v20, %v16802_v60  ;;  %v16845_v60 = vrot.slane %v8436_v11, 4  ;;  %v8410_v63 = vsel %vm14235_vm10, %v8405_v7, %v8409_v48  ;;  %v16851_v58 = vrot.slane %v8428_v15, 4  ;;  %v10611_v7 = vld [vmem:[#allocation2 + $0x18] sm:$0xe]  ;;  %v16918_v46 = vld [vmem:[#allocation2 + $0x4c] sm:$0xf] }
 0x488   : > { %13179 = vmatmul.mubr.msk.bf16.gmra.mrb[16].mxu1 %vm1425_vm8, %v14021_v47  ;;  %v14023_v47 = vld [vmem:[#allocation2 + $0x90] sm:$0xff]   ;;  %v16855_v57 = vrot.slane %v8449_v19, 4  ;;  %v8460_v28 = vshrl.u32 %v8243_v44, 16  ;;  %v8463_v0 = vshll.u32 %v8243_v44, 16  ;;  %v8469_v35 = vshll.u32 %v16550_v2, 16  ;;  %17941 = vst [vmem:[#allocation38_spill] sm:$0xff] %v16918_v46 }
 0x489   : > { %13182 = vmatprep.mubr.msk.bf16.mxu1 %vm1425_vm8, %v14022_v38  ;;  %v8445_v38 = vshll.u32 %v16532_v27, 16  ;;  %v8386_v27 = vsel %vm14235_vm10, %v8381_v41, %v8385_v50  ;;  %v8473_v20 = vshrl.u32 %v16550_v2, 16  ;;  %v16861_v23 = vcombine.low %v8352_v10, %v8362_v56  ;;  %v16871_v41 = vld [vmem:[#allocation2 + $0x78] sm:$0xf]  ;;  %v10612_v56 = vld [vmem:[#allocation2 + $0x24] sm:$0xe] }
 0x48a   : > { %v8376_v12 = vsel %vm14235_vm10, %v8371_v39, %v16804_v34  ;;  %v8400_v5 = vsel %vm14235_vm10, %v8395_v55, %v16806_v1  ;;  %v16869_v42 = vrot.slane %v8431_v25, 5  ;;  %v16885_v1 = vld [vmem:[#allocation2 + $0x28] sm:$0xf]  ;;  %v10677_v10 = vrot.slane %v16859_v59, 5  ;;  %v16905_v25 = vld [vmem:[#allocation2 + $0x2c] sm:$0x1] }
 0x48b   : > { %v16853_v52 = vrot.slane %v8445_v38, 5  ;;  %v16873_v11 = vcombine.low %v8376_v12, %v8386_v27  ;;  %v16875_v2 = vcombine.low %v8400_v5, %v8410_v63  ;;  %17936 = vst [vmem:[#allocation33_spill] sm:$0xff] %v16885_v1  ;;  %v16897_v50 = vrot.slane %v8460_v28, 4  ;;  %17938 = vst [vmem:[#allocation35_spill] sm:$0xff] %v16905_v25  ;;  %v16908_v44 = vld [vmem:[#allocation2 + $0x38] sm:$0x1] }
 0x48c   : > { %v16899_v39 = vrot.slane %v8463_v0, 5  ;;  %v16901_v55 = vrot.slane %v8469_v35, 5  ;;  %v16903_v48 = vrot.slane %v8473_v20, 4  ;;  %17939 = vst [vmem:[#allocation36_spill] sm:$0xff] %v16908_v44  ;;  %v16910_v27 = vld [vmem:[#allocation2 + $0x40] sm:$0xf] }
 0x48d   : > { %17940 = vst [vmem:[#allocation37_spill] sm:$0xff] %v16910_v27  ;;  %v12185_v63 = vrot.slane %v10611_v7, 9  ;;  %v10679_v12 = vrot.slane %v10677_v10, 4  ;;  %v10684_v28 = vrot.slane %v16885_v1, 5  ;;  %v8493_v20 = vshll.u32 %v16568_v3, 16 }
 0x48e   : > { %v12186_v19 = vrot.slane %v10612_v56, 9  ;;  %v10614_v0 = vld [vmem:[#allocation2 + $0x3c] sm:$0xe]  ;;  %v16933_v34 = vld [vmem:[#allocation2 + $0x44] sm:$0x1] }
 0x48f   : > { %v16922_v7 = vsel %vm14767_vm15, %v12185_v63, %v10677_v10  ;;  %v10686_v38 = vrot.slane %v10684_v28, 4  ;;  %17944 = vst [vmem:[#allocation41_spill] sm:$0xff] %v16933_v34  ;;  %v10615_v1 = vld [vmem:[#allocation2 + $0x48] sm:$0xe]  ;;  %v16951_v59 = vld [vmem:[#allocation2 + $0x5c] sm:$0x1] }
 0x490   : > { %13183 = vmatmul.mubr.msk.bf16.gmra.mrb[20].mxu1 %vm1425_vm8, %v14023_v47  ;;  %v16883_v47 = vld [vmem:[#allocation2 + $0x20] sm:$0x1]  ;;  %17942 = vst [vmem:[#allocation39_spill] sm:$0xff] %v16922_v7  ;;  %17949 = vst [vmem:[#allocation46_spill] sm:$0xff] %v16951_v59  ;;  %v10694_v7 = vrot.slane %v16908_v44, 5 }
 0x491   : > { %13186 = vmatprep.mubr.msk.bf16.mxu1 %vm1425_vm8, %v14024_v22  ;;  %17935 = vst [vmem:[#allocation32_spill] sm:$0xff] %v16883_v47  ;;  %v16894_v22 = vld [vmem:[#allocation2 + $0x34] sm:$0xf]  ;;  %v10680_v5 = vrot.slane %v16883_v47, 5  ;;  %v16935_v47 = vld [vmem:[#allocation2 + $0x50] sm:$0x1] }
 0x492   : > { %17937 = vst [vmem:[#allocation34_spill] sm:$0xff] %v16894_v22  ;;  %17945 = vst [vmem:[#allocation42_spill] sm:$0xff] %v16935_v47  ;;  %v10691_v63 = vrot.slane %v16894_v22, 5  ;;  %v12188_v22 = vrot.slane %v10614_v0, 9 }
 0x493   : > { %v16926_v15 = vsel %vm14767_vm15, %v10679_v12, %v10680_v5  ;;  %v16940_v12 = vld [vmem:[#allocation2 + $0x58] sm:$0xf]  ;;  %v16944_v5 = vsel %vm14767_vm15, %v12186_v19, %v10684_v28  ;;  %v16956_v19 = vrot.slane %v8493_v20, 5  ;;  %v12189_v20 = vrot.slane %v10615_v1, 9 }
 0x494   : > { %17943 = vst [vmem:[#allocation40_spill] sm:$0xff] %v16926_v15  ;;  %17946 = vst [vmem:[#allocation43_spill] sm:$0xff] %v16940_v12  ;;  %v10693_v15 = vrot.slane %v10691_v63, 4  ;;  %v10712_v1 = vrot.slane %v16940_v12, 5  ;;  %v9883_v12 = vld [vmem:[#allocation2 + $0x80] sm:$0x1] }
 0x495   : > { %17947 = vst [vmem:[#allocation44_spill] sm:$0xff] %v16944_v5  ;;  %v10617_v5 = vld [vmem:[#allocation2 + $0x60] sm:$0xe] }
 0x496   : > { %v16967_v10 = vsel %vm14767_vm15, %v10693_v15, %v10694_v7 }
 0x497   : > { %17952 = vst [vmem:[#allocation49_spill] sm:$0xff] %v16967_v10  ;;  %v10618_v10 = vld [vmem:[#allocation2 + $0x6c] sm:$0xe] }
 0x498   : > { %13187 = vmatmul.mubr.msk.bf16.gmra.mrb[24].mxu1 %vm1425_vm8, %v14026_v8  ;;  %v10613_v8 = vld [vmem:[#allocation2 + $0x30] sm:$0xe] }
 0x499   : > { %13190 = vmatprep.mubr.msk.bf16.mxu1 %vm1425_vm8, %v14027_v13  ;;  %v10687_v13 = vrot.slane %v16905_v25, 5  ;;  %v12187_v56 = vrot.slane %v10613_v8, 9  ;;  %v10698_v25 = vrot.slane %v16910_v27, 5  ;;  %v10701_v8 = vrot.slane %v16933_v34, 5  ;;  %v16963_v27 = vld [vmem:[#allocation2 + $0x64] sm:$0xf] }
 0x49a   : > { %17951 = vst [vmem:[#allocation48_spill] sm:$0xff] %v16963_v27  ;;  %v10715_v34 = vrot.slane %v16951_v59, 5  ;;  %v12192_v59 = vrot.slane %v10618_v10, 9 }
 0x49b   : > { %v16948_v35 = vsel %vm14767_vm15, %v10686_v38, %v10687_v13  ;;  %v16960_v38 = vsel %vm14767_vm15, %v12187_v56, %v10691_v63  ;;  %v10700_v28 = vrot.slane %v10698_v25, 4  ;;  %v10616_v13 = vld [vmem:[#allocation2 + $0x54] sm:$0xe]  ;;  %v16971_v0 = vsel %vm14767_vm15, %v12188_v22, %v10698_v25  ;;  %v16975_v56 = vld [vmem:[#allocation2 + $0x68] sm:$0x1] }
 0x49c   : > { %17948 = vst [vmem:[#allocation45_spill] sm:$0xff] %v16948_v35  ;;  %17950 = vst [vmem:[#allocation47_spill] sm:$0xff] %v16960_v38  ;;  %v10705_v35 = vrot.slane %v16918_v46, 5  ;;  %v16977_v63 = vld [vmem:[#allocation2 + $0x70] sm:$0xf]  ;;  %v10708_v22 = vrot.slane %v16935_v47, 5 }
 0x49d   : > { %17953 = vst [vmem:[#allocation50_spill] sm:$0xff] %v16971_v0  ;;  %17954 = vst [vmem:[#allocation51_spill] sm:$0xff] %v16975_v56  ;;  %v16983_v15 = vsel %vm14767_vm15, %v10700_v28, %v10701_v8  ;;  %v16989_v25 = vld [vmem:[#allocation2 + $0x7c] sm:$0xf]  ;;  %v12190_v46 = vrot.slane %v10616_v13, 9  ;;  %v10714_v8 = vrot.slane %v10712_v1, 4 }
 0x49e   : > { %17955 = vst [vmem:[#allocation52_spill] sm:$0xff] %v16977_v63  ;;  %17956 = vst [vmem:[#allocation53_spill] sm:$0xff] %v16983_v15  ;;  %v10707_v7 = vrot.slane %v10705_v35, 4  ;;  %v16994_v38 = vld [vmem:[#allocation2 + $0x74] sm:$0x1]  ;;  %v16998_v28 = vsel %vm14767_vm15, %v12189_v20, %v10705_v35  ;;  %v12191_v47 = vrot.slane %v10617_v5, 9 }
 0x49f   : > { %17957 = vst [vmem:[#allocation54_spill] sm:$0xff] %v16989_v25  ;;  %17958 = vst [vmem:[#allocation55_spill] sm:$0xff] %v16994_v38  ;;  %v17007_v13 = vsel %vm14767_vm15, %v12190_v46, %v10712_v1  ;;  %v10726_v15 = vrot.slane %v16977_v63, 5  ;;  %v10619_v0 = vld [vmem:[#allocation2 + $0x78] sm:$0xe]  ;;  %v14030_v5 = vld [vmem:[%s17767_s3 + $0xa8] sm:$0xff]  }
 0x4a0   : > { %13191 = vmatmul.mubr.msk.bf16.gmra.mrb[28].mxu1 %vm1425_vm8, %v14028_v30  ;;  %17959 = vst [vmem:[#allocation56_spill] sm:$0xff] %v16998_v28  ;;  %v17003_v44 = vsel %vm14767_vm15, %v10707_v7, %v10708_v22  ;;  %17961 = vst [vmem:[#allocation58_spill] sm:$0xff] %v17007_v13  ;;  %v10722_v30 = vrot.slane %v16975_v56, 5  ;;  %v17011_v35 = vld [vmem:[#allocation2 + $0x88] sm:$0xf]  ;;  %v17019_v22 = vsel %vm14767_vm15, %v10714_v8, %v10715_v34  ;;  %v12193_v8 = vrot.slane %v10619_v0, 9 }
 0x4a1   : > { %13202 = vmatprep.mubr.msk.bf16.mxu1 %vm1425_vm8, %v16787_v33  ;;  %v10719_v33 = vrot.slane %v16963_v27, 5  ;;  %17960 = vst [vmem:[#allocation57_spill] sm:$0xff] %v17003_v44  ;;  %v17013_v20 = vld [vmem:[#allocation2 + $0x94] sm:$0xf]  ;;  %17963 = vst [vmem:[#allocation60_spill] sm:$0xff] %v17019_v22  ;;  %v10728_v63 = vrot.slane %v10726_v15, 4  ;;  %v17037_v10 = vsel %vm14767_vm15, %v12192_v59, %v10726_v15 }
 0x4a2   : > { %17962 = vst [vmem:[#allocation59_spill] sm:$0xff] %v17013_v20  ;;  %v9886_v46 = vld [vmem:[#allocation2 + $0x8c] sm:$0x1]  ;;  %v10729_v27 = vrot.slane %v16994_v38, 5  ;;  %17966 = vst [vmem:[#allocation63_spill] sm:$0xff] %v17037_v10  ;;  %v10736_v28 = vrot.slane %v9883_v12, 5 }
 0x4a3   : > { %v10721_v7 = vrot.slane %v10719_v33, 4  ;;  %v17025_v56 = vsel %vm14767_vm15, %v12191_v47, %v10719_v33  ;;  %v10733_v47 = vrot.slane %v16989_v25, 5  ;;  %v10621_v33 = vld [vmem:[#allocation2 + $0x90] sm:$0xe]  ;;  %v9889_v1 = vld [vmem:[#allocation2 + $0x98] sm:$0x1] }
 0x4a4   : > { %17964 = vst [vmem:[#allocation61_spill] sm:$0xff] %v17025_v56  ;;  %v9891_v22 = vld [vmem:[#allocation2 + $0xa0] sm:$0xf]  ;;  %v17044_v44 = vsel %vm14767_vm15, %v10728_v63, %v10729_v27  ;;  %v9894_v59 = vld [vmem:[#allocation2 + $0xac] sm:$0xf]  ;;  %v10743_v38 = vrot.slane %v9886_v46, 5 }
 0x4a5   : > { %v17033_v34 = vsel %vm14767_vm15, %v10721_v7, %v10722_v30  ;;  %17967 = vst [vmem:[#allocation64_spill] sm:$0xff] %v17044_v44  ;;  %v10740_v30 = vrot.slane %v17011_v35, 5  ;;  %v10735_v15 = vrot.slane %v10733_v47, 4  ;;  %v12194_v7 = vrot.slane %v10620_v40, 9  ;;  %v10622_v25 = vld [vmem:[#allocation2 + $0x9c] sm:$0xe] }
 0x4a6   : > { %17965 = vst [vmem:[#allocation62_spill] sm:$0xff] %v17033_v34  ;;  %v9892_v27 = vld [vmem:[#allocation2 + $0xa4] sm:$0x1]  ;;  %v17056_v12 = vsel %vm14767_vm15, %v12193_v8, %v10733_v47  ;;  %v10747_v13 = vrot.slane %v17013_v20, 5  ;;  %v14031_v40 = vld [vmem:[%s17767_s3 + $0xb0] sm:$0xff]   ;;  %v10750_v8 = vrot.slane %v9889_v1, 5 }
 0x4a7   : > { %v10742_v63 = vrot.slane %v10740_v30, 4  ;;  %v9895_v46 = vld [vmem:[#allocation2 + $0xb0] sm:$0x1]  ;;  %v10754_v47 = vrot.slane %v9891_v22, 5  ;;  %v9897_v0 = vld [vmem:[#allocation2 + $0xb8] sm:$0xf] }
 0x4a8   : > { %13203 = vmatmul.mubr.msk.bf16.vlgmr.msra.gmra.mrb[0].mxu1 %vm1425_vm8, %v16814_v62  ;;  %v12195_v62 = vrot.slane %v10621_v33, 9  ;;  %v10749_v10 = vrot.slane %v10747_v13, 4  ;;  %v12196_v34 = vrot.slane %v10622_v25, 9  ;;  %v10623_v56 = vld [vmem:[#allocation2 + $0xa8] sm:$0xe]  ;;  %v10761_v25 = vrot.slane %v9894_v59, 5 }
 0x4a9   : > { %13235 = vmatpush3.bf16.msra.mxu1 %v16761_v9  ;;  %13206 = vmatprep.mubr.msk.bf16.mxu1 %vm1425_vm8, %v16831_v36  ;;  %v17064_v9 = vsel %vm14767_vm15, %v10735_v15, %v10736_v28  ;;  %v17068_v36 = vsel %vm14767_vm15, %v12194_v7, %v10740_v30  ;;  %v17074_v44 = vsel %vm14767_vm15, %v10742_v63, %v10743_v38  ;;  %v8497_v28 = vshrl.u32 %v16568_v3, 16  ;;  %v10624_v1 = vld [vmem:[#allocation2 + $0xb4] sm:$0xe]  ;;  %v9898_v22 = vld [vmem:[#allocation2 + $0xbc] sm:$0x1] }
 0x4aa   : > { %13236 = vmatprep.subr.bf16.mxu1 %v14030_v5  ;;  %17968 = vst [vmem:[#allocation65_spill] sm:$0xff] %v17068_v36  ;;  %17969 = vst [vmem:[#allocation66_spill] sm:$0xff] %v17074_v44  ;;  %v10756_v30 = vrot.slane %v10754_v47, 4  ;;  %v10757_v7 = vrot.slane %v9892_v27, 5  ;;  %v9900_v20 = vld [vmem:[#allocation2 + $0xc4] sm:$0xf]  ;;  %v17081_v33 = vsel %vm14767_vm15, %v12195_v62, %v10747_v13  ;;  %v17085_v38 = vsel %vm14767_vm15, %v10749_v10, %v10750_v8 }
 0x4ab   : > { %17970 = vst [vmem:[#allocation67_spill] sm:$0xff] %v17085_v38  ;;  %v17089_v3 = vsel %vm14767_vm15, %v12196_v34, %v10754_v47  ;;  %v12197_v63 = vrot.slane %v10623_v56, 9  ;;  %v10768_v10 = vrot.slane %v9897_v0, 5  ;;  %v10625_v62 = vld [vmem:[#allocation2 + $0xc0] sm:$0xe]  ;;  %v10763_v59 = vrot.slane %v10761_v25, 4 }
 0x4ac   : > { %v17098_v13 = vsel %vm14767_vm15, %v10756_v30, %v10757_v7  ;;  %v9901_v8 = vld [vmem:[#allocation2 + $0xc8] sm:$0x1]  ;;  %v10764_v47 = vrot.slane %v9895_v46, 5  ;;  %v12198_v15 = vrot.slane %v10624_v1, 9  ;;  %v8499_v44 = vrot.slane %v8497_v28, 4  ;;  %v18049_v43 = vld [vmem:[#allocation50_spill] sm:$0xff] }
 0x4ad   : > { %13237 = vmatpush3.bf16.msra.mxu1 %v14030_v5  ;;  %v14032_v5 = vld [vmem:[%s17767_s3 + $0xb8] sm:$0xff]   ;;  %v12220_v34 = vcombine.low %v17089_v3, %v17098_v13  ;;  %v10770_v36 = vrot.slane %v10768_v10, 4  ;;  %v10771_v27 = vrot.slane %v9898_v22, 5  ;;  %v10775_v38 = vrot.slane %v9900_v20, 5  ;;  %v8249_v28 = vld [vmem:[#allocation2 + $0x84] sm:$0xf] }
 0x4ae   : > { %13238 = vmatprep.subr.bf16.mxu1 %v14031_v40  ;;  %v17108_v56 = vsel %vm14767_vm15, %v12197_v63, %v10761_v25  ;;  %v17112_v0 = vsel %vm14767_vm15, %v10763_v59, %v10764_v47  ;;  %v17116_v46 = vsel %vm14767_vm15, %v12198_v15, %v10768_v10  ;;  %v10778_v7 = vrot.slane %v9901_v8, 5 }
 0x4af   : > { %v12221_v20 = vcombine.low %v17108_v56, %v17112_v0  ;;  %v10777_v30 = vrot.slane %v10775_v38, 4  ;;  %v17971_v15 = vor.u32 %v16847_v61, %v16845_v60  ;;  %v8479_v22 = vshll.u32 %v16580_v16, 16 }
 0x4b0   : > { %13207 = vmatmul.mubr.msk.bf16.gmra.mrb[4].mxu1 %vm1425_vm8, %v16861_v23  ;;  %v12199_v23 = vrot.slane %v10625_v62, 9  ;;  %v17972_v25 = vshrl.u32 %v16871_v41, 16  ;;  %v8517_v62 = vshll.u32 %v16591_v17, 16  ;;  %v8521_v59 = vshrl.u32 %v16591_v17, 16 }
 0x4b1   : > { %13210 = vmatprep.mubr.msk.bf16.mxu1 %vm1425_vm8, %v16873_v11  ;;  %13239 = vmatpush3.bf16.msra.mxu1 %v14031_v40  ;;  %v17121_v11 = vld [vmem:[%s17767_s3 + $0xc0] sm:$0xff]   ;;  %v17127_v40 = vsel %vm14767_vm15, %v10770_v36, %v10771_v27  ;;  %v8443_v1 = vrot.slane %v17971_v15, 4  ;;  %v17145_v60 = vsel %vm14767_vm15, %v10777_v30, %v10778_v7  ;;  %v17973_v16 = vshll.u32 %v16871_v41, 16 }
 0x4b2   : > { %13240 = vmatprep.subr.bf16.mxu1 %v14032_v5  ;;  %v8486_v63 = vrot.slane %v17972_v25, 4  ;;  %v12222_v10 = vcombine.low %v17116_v46, %v17127_v40  ;;  %v17141_v36 = vsel %vm14767_vm15, %v12199_v23, %v10775_v38  ;;  %v8508_v27 = vshrl.u32 %v8249_v28, 16  ;;  %v11151_v46 = vld [vmem:[%s14221_s8 + $0x18] sm:$0xff] }
 0x4b3   : > { %v8489_v61 = vrot.slane %v17973_v16, 5  ;;  %v8511_v8 = vshll.u32 %v8249_v28, 16  ;;  %v12223_v47 = vcombine.low %v17141_v36, %v17145_v60  ;;  %v17974_v17 = vor.u32 %v16855_v57, %v16853_v52  ;;  %v11149_v36 = vld [vmem:[%s14221_s8 + $0x8] sm:$0xff] }
 0x4b4   : > { %v17975_v38 = vor.u32 %v16899_v39, %v16897_v50  ;;  %v17976_v30 = vor.u32 %v16903_v48, %v16901_v55  ;;  %v8500_v41 = vor.u32 %v8499_v44, %v16956_v19  ;;  %v17978_v57 = vsel %vm14235_vm10, %v16843_v4, %v16821_v32 }
 0x4b5   : > { %13241 = vmatpush3.bf16.msra.mxu1 %v14032_v5  ;;  %v8453_v15 = vrot.slane %v17974_v17, 4  ;;  %v17977_v5 = vsel %vm14235_vm10, %v16851_v58, %v16869_v42  ;;  %v17979_v39 = vshll.u32 %v16541_v37, 16  ;;  %v8481_v48 = vrot.slane %v8479_v22, 5  ;;  %v8252_v17 = vld [vmem:[#allocation2 + $0x90] sm:$0xf] }
 0x4b6   : > { %v8467_v23 = vrot.slane %v17975_v38, 4  ;;  %v8477_v7 = vrot.slane %v17976_v30, 4  ;;  %13274 = vmatprep.subr.bf16.mxu1 %v17121_v11  ;;  %v12007_v50 = vcombine.low %v17978_v57, %v17977_v5  ;;  %v8503_v44 = vshll.u32 %v16582_v29, 16 }
 0x4b7   : > { %v8457_v28 = vrot.slane %v17979_v39, 5  ;;  %v17177_v25 = vrot.slane %v8517_v62, 5  ;;  %v8523_v16 = vrot.slane %v8521_v59, 4  ;;  %v8448_v32 = vsel %vm14235_vm10, %v8443_v1, %v16853_v52  ;;  %v8255_v1 = vld [vmem:[#allocation2 + $0x9c] sm:$0xf] }
 0x4b8   : > { %13211 = vmatmul.mubr.msk.bf16.gmra.mrb[8].mxu1 %vm1425_vm8, %v16875_v2  ;;  %v8490_v4 = vor.u32 %v8489_v61, %v8486_v63  ;;  %v8510_v58 = vrot.slane %v8508_v27, 4  ;;  %v8513_v37 = vrot.slane %v8511_v8, 5  ;;  %v8472_v29 = vsel %vm14235_vm10, %v8467_v23, %v16901_v55 }
 0x4b9   : > { %13214 = vmatprep.mubr.msk.bf16.mxu1 %vm1425_vm8, %v12007_v50  ;;  %v8458_v42 = vsel %vm14235_vm10, %v8453_v15, %v8457_v28  ;;  %v8482_v2 = vsel %vm14235_vm10, %v8477_v7, %v8481_v48  ;;  %v8501_v22 = vrot.slane %v8500_v41, 4  ;;  %v8532_v62 = vshrl.u32 %v8252_v17, 16 }
 0x4ba   : > { %v8535_v59 = vshll.u32 %v8252_v17, 16  ;;  %v8541_v38 = vshll.u32 %v16604_v21, 16  ;;  %v8545_v52 = vshrl.u32 %v16604_v21, 16  ;;  %v8505_v63 = vrot.slane %v8503_v44, 5 }
 0x4bb   : > { %v8524_v61 = vor.u32 %v8523_v16, %v17177_v25  ;;  %v8565_v27 = vshll.u32 %v16620_v54, 16  ;;  %v8569_v8 = vshrl.u32 %v16620_v54, 16  ;;  %v12008_v15 = vcombine.low %v8448_v32, %v8458_v42 }
 0x4bc   : > { %v12009_v55 = vcombine.low %v8472_v29, %v8482_v2  ;;  %v8491_v23 = vrot.slane %v8490_v4, 4  ;;  %v8514_v30 = vor.u32 %v8513_v37, %v8510_v58  ;;  %v8506_v7 = vsel %vm14235_vm10, %v8501_v22, %v8505_v63  ;;  %v8258_v37 = vld [vmem:[#allocation2 + $0xa8] sm:$0xf]  ;;  %v14108_v63 = vld [vmem:[#allocation2 + $0x98] sm:$0x1] }
 0x4bd   : > { %v8527_v41 = vshll.u32 %v16593_v51, 16  ;;  %v8556_v5 = vshrl.u32 %v8255_v1, 16  ;;  %v8559_v57 = vshll.u32 %v8255_v1, 16  ;;  %v8534_v21 = vrot.slane %v8532_v62, 4  ;;  %v8261_v62 = vld [vmem:[#allocation2 + $0xb4] sm:$0xf] }
 0x4be   : > { %v8537_v50 = vrot.slane %v8535_v59, 5  ;;  %v17198_v39 = vrot.slane %v8541_v38, 5  ;;  %v8547_v28 = vrot.slane %v8545_v52, 4  ;;  %v8525_v48 = vrot.slane %v8524_v61, 4 }
 0x4bf   : > { %v17201_v54 = vrot.slane %v8565_v27, 5  ;;  %v8571_v44 = vrot.slane %v8569_v8, 4  ;;  %v8496_v16 = vsel %vm14235_vm10, %v8491_v23, %v16956_v19  ;;  %v8515_v51 = vrot.slane %v8514_v30, 4 }
 0x4c0   : > { %13215 = vmatmul.mubr.msk.bf16.gmra.mrb[12].mxu1 %vm1425_vm8, %v12008_v15  ;;  %v12010_v17 = vcombine.low %v8496_v16, %v8506_v7  ;;  %v8529_v32 = vrot.slane %v8527_v41, 5  ;;  %v8558_v4 = vrot.slane %v8556_v5, 4  ;;  %v8561_v58 = vrot.slane %v8559_v57, 5 }
 0x4c1   : > { %13218 = vmatprep.mubr.msk.bf16.mxu1 %vm1425_vm8, %v12009_v55  ;;  %v8538_v42 = vor.u32 %v8537_v50, %v8534_v21  ;;  %v8548_v29 = vor.u32 %v8547_v28, %v17198_v39  ;;  %v8589_v2 = vshll.u32 %v16636_v45, 16  ;;  %v8593_v22 = vshrl.u32 %v16636_v45, 16 }
 0x4c2   : > { %v8530_v59 = vsel %vm14235_vm10, %v8525_v48, %v8529_v32  ;;  %v8572_v38 = vor.u32 %v8571_v44, %v17201_v54  ;;  %v8613_v19 = vshll.u32 %v16654_v24, 16  ;;  %v8617_v52 = vshrl.u32 %v16654_v24, 16  ;;  %v8264_v32 = vld [vmem:[#allocation2 + $0xc0] sm:$0xf] }
 0x4c3   : > { %v8520_v1 = vsel %vm14235_vm10, %v8515_v51, %v17177_v25  ;;  %v8551_v61 = vshll.u32 %v14108_v63, 16  ;;  %v8580_v27 = vshrl.u32 %v8258_v37, 16  ;;  %v8583_v8 = vshll.u32 %v8258_v37, 16 }
 0x4c4   : > { %v8562_v15 = vor.u32 %v8561_v58, %v8558_v4  ;;  %v8575_v45 = vshll.u32 %v16628_v14, 16  ;;  %v8604_v55 = vshrl.u32 %v8261_v62, 16  ;;  %v8607_v23 = vshll.u32 %v8261_v62, 16  ;;  %v14109_v62 = vld [vmem:[#allocation2 + $0xb0] sm:$0x1] }
 0x4c5   : > { %v12011_v30 = vcombine.low %v8520_v1, %v8530_v59  ;;  %v8549_v7 = vrot.slane %v8548_v29, 4  ;;  %v8591_v41 = vrot.slane %v8589_v2, 5  ;;  %v8595_v5 = vrot.slane %v8593_v22, 4 }
 0x4c6   : > { %v8539_v24 = vrot.slane %v8538_v42, 4  ;;  %v8573_v57 = vrot.slane %v8572_v38, 4  ;;  %v8615_v21 = vrot.slane %v8613_v19, 5  ;;  %v8619_v50 = vrot.slane %v8617_v52, 4 }
 0x4c7   : > { %v8553_v25 = vrot.slane %v8551_v61, 5  ;;  %v8582_v28 = vrot.slane %v8580_v27, 4  ;;  %v8585_v48 = vrot.slane %v8583_v8, 5  ;;  %v8563_v44 = vrot.slane %v8562_v15, 4 }
 0x4c8   : > { %13219 = vmatmul.mubr.msk.bf16.gmra.mrb[16].mxu1 %vm1425_vm8, %v12010_v17  ;;  %v8577_v16 = vrot.slane %v8575_v45, 5  ;;  %v8606_v14 = vrot.slane %v8604_v55, 4  ;;  %v8609_v51 = vrot.slane %v8607_v23, 5  ;;  %v8596_v58 = vor.u32 %v8595_v5, %v8591_v41 }
 0x4c9   : > { %13222 = vmatprep.mubr.msk.bf16.mxu1 %vm1425_vm8, %v12011_v30  ;;  %v8554_v4 = vsel %vm14235_vm10, %v8549_v7, %v8553_v25  ;;  %v8637_v17 = vshll.u32 %v16669_v18, 16  ;;  %v8641_v37 = vshrl.u32 %v16669_v18, 16  ;;  %v8544_v42 = vsel %vm14235_vm10, %v8539_v24, %v17198_v39  ;;  %v14110_v18 = vld [vmem:[#allocation2 + $0xbc] sm:$0x1] }
 0x4ca   : > { %v8578_v29 = vsel %vm14235_vm10, %v8573_v57, %v8577_v16  ;;  %v8620_v2 = vor.u32 %v8619_v50, %v8615_v21  ;;  %v8586_v22 = vor.u32 %v8585_v48, %v8582_v28  ;;  %v8599_v59 = vshll.u32 %v14109_v62, 16 }
 0x4cb   : > { %v8628_v38 = vshrl.u32 %v8264_v32, 16  ;;  %v8631_v19 = vshll.u32 %v8264_v32, 16  ;;  %v12012_v52 = vcombine.low %v8544_v42, %v8554_v4  ;;  %v8568_v1 = vsel %vm14235_vm10, %v8563_v44, %v17201_v54  ;;  %v14111_v44 = vld [vmem:[#allocation2 + $0xc8] sm:$0x1] }
 0x4cc   : > { %v8610_v63 = vor.u32 %v8609_v51, %v8606_v14  ;;  %v8623_v61 = vshll.u32 %v14110_v18, 16  ;;  %v12013_v27 = vcombine.low %v8568_v1, %v8578_v29  ;;  %v8597_v8 = vrot.slane %v8596_v58, 4 }
 0x4cd   : > { %v8639_v39 = vrot.slane %v8637_v17, 5  ;;  %v8643_v15 = vrot.slane %v8641_v37, 4  ;;  %v8621_v45 = vrot.slane %v8620_v2, 4  ;;  %v8587_v55 = vrot.slane %v8586_v22, 4 }
 0x4ce   : > { %v8601_v23 = vrot.slane %v8599_v59, 5  ;;  %v8630_v30 = vrot.slane %v8628_v38, 4  ;;  %v8633_v7 = vrot.slane %v8631_v19, 5  ;;  %v8611_v5 = vrot.slane %v8610_v63, 4 }
 0x4cf   : > { %v8625_v24 = vrot.slane %v8623_v61, 5  ;;  %v8644_v57 = vor.u32 %v8643_v15, %v8639_v39  ;;  %v9039_v25 = vrot.slane %v16745_v6, 5  ;;  %v8592_v28 = vsel %vm14235_vm10, %v8587_v55, %v8591_v41  ;;  %v8973_v6 = vld [vmem:[#allocation2 + $0xc] sm:$0xe]  ;;  %v14036_v15 = vld [vmem:[%s17767_s3 + $0xd8] sm:$0xff]   ;;  %v17984_v55 = vld [vmem:[#allocation6_spill] sm:$0xff] }
 0x4d0   : > { %13223 = vmatmul.mubr.msk.bf16.gmra.mrb[20].mxu1 %vm1425_vm8, %v12012_v52  ;;  %v8602_v54 = vsel %vm14235_vm10, %v8597_v8, %v8601_v23  ;;  %v8634_v48 = vor.u32 %v8633_v7, %v8630_v30  ;;  %v8647_v16 = vshll.u32 %v14111_v44, 16  ;;  %v8616_v51 = vsel %vm14235_vm10, %v8611_v5, %v8615_v21  ;;  %v14034_v61 = vld [vmem:[%s17767_s3 + $0xc8] sm:$0xff]   ;;  %v14038_v5 = vld [vmem:[%s17767_s3 + $0xe0] sm:$0xff]   ;;  %v17996_v44 = vld [vmem:[#allocation14_spill] sm:$0xff] }
 0x4d1   : > { %13226 = vmatprep.mubr.msk.bf16.mxu1 %vm1425_vm8, %v12013_v27  ;;  %v8626_v50 = vsel %vm14235_vm10, %v8621_v45, %v8625_v24  ;;  %v12014_v14 = vcombine.low %v8592_v28, %v8602_v54  ;;  %v8645_v4 = vrot.slane %v8644_v57, 4  ;;  %v9041_v58 = vrot.slane %v9039_v25, 4  ;;  %v17980_v27 = vld [vmem:[#allocation8_spill] sm:$0xff]  ;;  %v17981_v8 = vld [vmem:[#allocation9_spill] sm:$0xff]  ;;  %v17983_v45 = vld [vmem:[#allocation10_spill] sm:$0xff] }
 0x4d2   : > { %v12015_v32 = vcombine.low %v8616_v51, %v8626_v50  ;;  %v8635_v17 = vrot.slane %v8634_v48, 4  ;;  %v8649_v37 = vrot.slane %v8647_v16, 5  ;;  %v9042_v42 = vrot.slane %v16763_v26, 5  ;;  %v8974_v26 = vld [vmem:[#allocation2 + $0x18] sm:$0xe]  ;;  %v17987_v30 = vld [vmem:[#allocation5_spill] sm:$0xff] }
 0x4d3   : > { %v9046_v29 = vrot.slane %v16752_v31, 5  ;;  %v12037_v2 = vrot.slane %v8973_v6, 9  ;;  %v9049_v31 = vrot.slane %v16768_v53, 5  ;;  %v12038_v52 = vrot.slane %v8974_v26, 9  ;;  %v14035_v53 = vld [vmem:[%s17767_s3 + $0xd0] sm:$0xff]   ;;  %v17989_v24 = vld [vmem:[#allocation4_spill] sm:$0xff] }
 0x4d4   : > { %v8650_v41 = vsel %vm14235_vm10, %v8645_v4, %v8649_v37  ;;  %v9043_v21 = vsel %vm14767_vm15, %v9041_v58, %v9042_v42  ;;  %v8640_v22 = vsel %vm14235_vm10, %v8635_v17, %v8639_v39  ;;  %v17982_v39 = vcombine.low %v17980_v27, %v17981_v8  ;;  %v17990_v54 = vld [vmem:[#allocation3_spill] sm:$0xff]  ;;  %v17995_v48 = vld [vmem:[#allocation13_spill] sm:$0xff]  ;;  %v18001_v4 = vld [vmem:[#allocation16_spill] sm:$0xff] }
 0x4d5   : > { %v12016_v62 = vcombine.low %v8640_v22, %v8650_v41  ;;  %v9040_v59 = vsel %vm14767_vm15, %v12037_v2, %v9039_v25  ;;  %v9048_v19 = vrot.slane %v9046_v29, 4  ;;  %v9047_v63 = vsel %vm14767_vm15, %v12038_v52, %v9046_v29  ;;  %v17992_v50 = vld [vmem:[#allocation11_spill] sm:$0xff]  ;;  %v17993_v25 = vld [vmem:[#allocation12_spill] sm:$0xff]  ;;  %v17999_v51 = vld [vmem:[#allocation17_spill] sm:$0xff] }
 0x4d6   : > { %v12061_v38 = vcombine.low %v9040_v59, %v9043_v21  ;;  %v17985_v23 = vcombine.low %v17983_v45, %v17984_v55  ;;  %v17991_v57 = vcombine.low %v17989_v24, %v17990_v54  ;;  %v17994_v28 = vcombine.low %v17992_v50, %v17993_v25  ;;  %v18002_v58 = vld [vmem:[#allocation18_spill] sm:$0xff]  ;;  %v18004_v37 = vld [vmem:[#allocation19_spill] sm:$0xff]  ;;  %v18005_v6 = vld [vmem:[#allocation20_spill] sm:$0xff] }
 0x4d7   : > { %v9050_v1 = vsel %vm14767_vm15, %v9048_v19, %v9049_v31  ;;  %v17997_v16 = vcombine.low %v17995_v48, %v17996_v44  ;;  %v18003_v17 = vcombine.low %v18001_v4, %v18002_v58  ;;  %v18006_v42 = vcombine.low %v18004_v37, %v18005_v6  ;;  %v18007_v41 = vld [vmem:[#allocation21_spill] sm:$0xff]  ;;  %v18008_v29 = vld [vmem:[#allocation22_spill] sm:$0xff]  ;;  %v18010_v21 = vld [vmem:[#allocation23_spill] sm:$0xff] }
 0x4d8   : > { %13227 = vmatmul.mubr.msk.bf16.gmra.mrb[24].mxu1 %vm1425_vm8, %v12014_v14  ;;  %v12062_v18 = vcombine.low %v9047_v63, %v9050_v1  ;;  %v17998_v14 = vld [vmem:[#allocation15_spill] sm:$0xff]  ;;  %v18009_v2 = vcombine.low %v18007_v41, %v18008_v29  ;;  %v18011_v22 = vld [vmem:[#allocation24_spill] sm:$0xff]  ;;  %v18013_v59 = vld [vmem:[#allocation25_spill] sm:$0xff] }
 0x4d9   : > { %13230 = vmatprep.mubr.msk.bf16.mxu1 %vm1425_vm8, %v12015_v32  ;;  %v18000_v32 = vcombine.low %v17998_v14, %v17999_v51  ;;  %v18016_v26 = vld [vmem:[#allocation27_spill] sm:$0xff]  ;;  %v18017_v31 = vld [vmem:[#allocation28_spill] sm:$0xff]  ;;  %v18019_v63 = vld [vmem:[#allocation29_spill] sm:$0xff] }
 0x4da   : > { %v18018_v52 = vcombine.low %v18016_v26, %v18017_v31  ;;  %v14037_v1 = vld [vmem:[#allocation2 + $0x18] sm:$0xff]   ;;  %v14039_v27 = vld [vmem:[#allocation2 + $0x24] sm:$0xff]  }
 0x4db   : > { %v14043_v8 = vld [vmem:[%s17767_s3 + $0xe8] sm:$0xff]   ;;  %v14053_v45 = vld [vmem:[%s17767_s3 + $0xf8] sm:$0xff]   ;;  %v9860_v25 = vld [vmem:[#allocation2 + $0x24] sm:$0xf] }
 0x4dc   : > { %v14042_v55 = vld [vmem:[#allocation2 + $0x48] sm:$0xff]   ;;  %v9857_v24 = vld [vmem:[#allocation2 + $0x18] sm:$0xf]  ;;  %v9933_v4 = vshll.u32 %v9860_v25, 16 }
 0x4dd   : > { %v18022_v54 = vld [vmem:[#allocation31_spill] sm:$0xff]  ;;  %v9906_v48 = vshrl.u32 %v9857_v24, 16  ;;  %v9909_v44 = vshll.u32 %v9857_v24, 16  ;;  %v18023_v37 = vld [vmem:[#allocation33_spill] sm:$0xff] }
 0x4de   : > { %v9919_v50 = vshrl.u32 %v18022_v54, 16  ;;  %v9939_v6 = vshll.u32 %v18023_v37, 16  ;;  %v9935_v29 = vrot.slane %v9933_v4, 5 }
 0x4df   : > { %v9908_v58 = vrot.slane %v9906_v48, 4  ;;  %v18027_v48 = vld [vmem:[#allocation36_spill] sm:$0xff] }
 0x4e0   : > { %13231 = vmatmul.mubr.msk.bf16.gmra.mrb[28].mxu1 %vm1425_vm8, %v12016_v62  ;;  %v18012_v62 = vcombine.low %v18010_v21, %v18011_v22  ;;  %v9921_v51 = vrot.slane %v9919_v50, 4  ;;  %v9863_v21 = vld [vmem:[#allocation2 + $0x30] sm:$0xf]  ;;  %v14051_v22 = vld [vmem:[#allocation2 + $0x9c] sm:$0xff]   ;;  %v17364_v26 = vrot.slane %v9939_v6, 5  ;;  %v14054_v50 = vld [vmem:[#allocation2 + $0xb4] sm:$0xff]  }
 0x4e1   : > { %13242 = vmatprep.mubr.msk.bf16.mxu1 %vm1425_vm8, %v12061_v38  ;;  %v18014_v38 = vld [vmem:[#allocation26_spill] sm:$0xff]  ;;  %v9954_v31 = vshrl.u32 %v9863_v21, 16  ;;  %v9869_v6 = vld [vmem:[#allocation2 + $0x48] sm:$0xf] }
 0x4e2   : > { %v18015_v19 = vcombine.low %v18013_v59, %v18014_v38  ;;  %v18024_v59 = vld [vmem:[#allocation32_spill] sm:$0xff] }
 0x4e3   : > { %v9925_v38 = vshll.u32 %v18024_v59, 16 }
 0x4e8   : > { %13243 = vmatmul.mubr.msk.bf16.vlgmr.msra.gmra.mrb[0].mxu1 %vm1425_vm8, %v12062_v18  ;;  %v18020_v18 = vld [vmem:[#allocation30_spill] sm:$0xff] }
 0x4e9   : > { %13275 = vmatpush3.bf16.msra.mxu1 %v17121_v11  ;;  %13246 = vmatprep.mubr.msk.bf16.mxu1 %vm1425_vm8, %v17982_v39  ;;  %v17986_v11 = vld [vmem:[#allocation7_spill] sm:$0xff]  ;;  %v14040_v39 = vld [vmem:[#allocation2 + $0x30] sm:$0xff]  }
 0x4ea   : > { %13276 = vmatprep.subr.bf16.mxu1 %v14034_v61  ;;  %v17988_v7 = vcombine.low %v17986_v11, %v17987_v30  ;;  %v14044_v11 = vld [vmem:[#allocation2 + $0x54] sm:$0xff]   ;;  %v14045_v30 = vld [vmem:[#allocation2 + $0x60] sm:$0xff]  }
 0x4ed   : > { %13277 = vmatpush3.bf16.msra.mxu1 %v14034_v61  ;;  %v18021_v61 = vcombine.low %v18019_v63, %v18020_v18  ;;  %v9957_v18 = vshll.u32 %v9863_v21, 16  ;;  %v17391_v21 = vld [vmem:[#allocation2 + $0xd0] sm:$0xf] }
 0x4ee   : > { %13278 = vmatprep.subr.bf16.mxu1 %v14035_v53 }
 0x4ef   : > { %v9959_v24 = vrot.slane %v9957_v18, 5 }
 0x4f0   : > { %13247 = vmatmul.mubr.msk.bf16.gmra.mrb[4].mxu1 %vm1425_vm8, %v17985_v23  ;;  %v17350_v23 = vld [vmem:[%s17767_s3 + $0x100] sm:$0xff]  }
 0x4f1   : > { %13250 = vmatprep.mubr.msk.bf16.mxu1 %vm1425_vm8, %v17988_v7  ;;  %13279 = vmatpush3.bf16.msra.mxu1 %v14035_v53  ;;  %v14048_v53 = vld [vmem:[%s17767_s3 + $0xf0] sm:$0xff]  }
 0x4f2   : > { %13280 = vmatprep.subr.bf16.mxu1 %v14036_v15  ;;  %v14046_v7 = vld [vmem:[#allocation2 + $0x6c] sm:$0xff]  }
 0x4f5   : > { %13281 = vmatpush3.bf16.msra.mxu1 %v14036_v15  ;;  %v14041_v15 = vld [vmem:[#allocation2 + $0x3c] sm:$0xff]  }
 0x4f6   : > { %13314 = vmatprep.subr.bf16.mxu1 %v14038_v5 }
 0x4f8   : > { %13251 = vmatmul.mubr.msk.bf16.gmra.mrb[8].mxu1 %vm1425_vm8, %v17991_v57  ;;  %v9915_v57 = vshll.u32 %v18022_v54, 16 }
 0x4f9   : > { %13254 = vmatprep.mubr.msk.bf16.mxu1 %vm1425_vm8, %v17994_v28  ;;  %v14049_v28 = vld [vmem:[#allocation2 + $0x84] sm:$0xff]  }
 0x4fa   : > { %v9917_v14 = vrot.slane %v9915_v57, 5 }
 0x500   : > { %13255 = vmatmul.mubr.msk.bf16.gmra.mrb[12].mxu1 %vm1425_vm8, %v17997_v16  ;;  %v14050_v16 = vld [vmem:[#allocation2 + $0x90] sm:$0xff]  }
 0x501   : > { %13258 = vmatprep.mubr.msk.bf16.mxu1 %vm1425_vm8, %v18000_v32  ;;  %v9930_v32 = vshrl.u32 %v9860_v25, 16 }
 0x503   : > { %v9932_v41 = vrot.slane %v9930_v32, 4 }
 0x508   : > { %13259 = vmatmul.mubr.msk.bf16.gmra.mrb[16].mxu1 %vm1425_vm8, %v18003_v17  ;;  %v9911_v17 = vrot.slane %v9909_v44, 5  ;;  %v9973_v44 = vshll.u32 %v18027_v48, 16 }
 0x509   : > { %13262 = vmatprep.mubr.msk.bf16.mxu1 %vm1425_vm8, %v18006_v42  ;;  %v9922_v42 = vor.u32 %v9921_v51, %v9917_v14  ;;  %v14055_v51 = vld [vmem:[#allocation2 + $0xc0] sm:$0xff]  }
 0x510   : > { %13263 = vmatmul.mubr.msk.bf16.gmra.mrb[20].mxu1 %vm1425_vm8, %v18009_v2  ;;  %v9943_v2 = vshrl.u32 %v18023_v37, 16 }
 0x511   : > { %13266 = vmatprep.mubr.msk.bf16.mxu1 %vm1425_vm8, %v18012_v62  ;;  %v9912_v62 = vor.u32 %v9911_v17, %v9908_v58  ;;  %v18028_v58 = vld [vmem:[#allocation37_spill] sm:$0xff] }
 0x512   : > { %v9945_v63 = vrot.slane %v9943_v2, 4  ;;  %v9987_v17 = vshll.u32 %v18028_v58, 16  ;;  %v9991_v37 = vshrl.u32 %v18028_v58, 16 }
 0x518   : > { %13267 = vmatmul.mubr.msk.bf16.gmra.mrb[24].mxu1 %vm1425_vm8, %v18015_v19  ;;  %v14052_v19 = vld [vmem:[#allocation2 + $0xa8] sm:$0xff]  }
 0x519   : > { %13270 = vmatprep.mubr.msk.bf16.mxu1 %vm1425_vm8, %v18018_v52  ;;  %v9923_v52 = vrot.slane %v9922_v42, 4 }
 0x520   : > { %13271 = vmatmul.mubr.msk.bf16.gmra.mrb[28].mxu1 %vm1425_vm8, %v18021_v61  ;;  %v18025_v61 = vld [vmem:[#allocation34_spill] sm:$0xff] }
 0x521   : > { %13282 = vmatprep.mubr.msk.bf16.mxu1 %vm1425_vm8, %v14037_v1  ;;  %v9936_v1 = vor.u32 %v9935_v29, %v9932_v41  ;;  %v18029_v29 = vld [vmem:[#allocation38_spill] sm:$0xff] }
 0x522   : > { %v10011_v2 = vshll.u32 %v18029_v29, 16  ;;  %v10015_v59 = vshrl.u32 %v18029_v29, 16 }
 0x528   : > { %13283 = vmatmul.mubr.msk.bf16.vlgmr.msra.gmra.mrb[0].mxu1 %vm1425_vm8, %v14039_v27  ;;  %v9963_v27 = vshll.u32 %v18025_v61, 16 }
 0x529   : > { %13315 = vmatpush3.bf16.msra.mxu1 %v14038_v5  ;;  %13286 = vmatprep.mubr.msk.bf16.mxu1 %vm1425_vm8, %v14040_v39  ;;  %v14047_v5 = vld [vmem:[#allocation2 + $0x78] sm:$0xff]   ;;  %v9913_v39 = vrot.slane %v9912_v62, 4 }
 0x52a   : > { %13316 = vmatprep.subr.bf16.mxu1 %v14043_v8  ;;  %v17376_v54 = vrot.slane %v9963_v27, 5 }
 0x52b   : > { %v9918_v25 = vsel %vm14235_vm10, %v9913_v39, %v9917_v14  ;;  %v9993_v39 = vrot.slane %v9991_v37, 4  ;;  %v18031_v37 = vld [vmem:[#allocation41_spill] sm:$0xff] }
 0x52d   : > { %13317 = vmatpush3.bf16.msra.mxu1 %v14043_v8  ;;  %v9967_v8 = vshrl.u32 %v18025_v61, 16 }
 0x52e   : > { %13318 = vmatprep.subr.bf16.mxu1 %v14048_v53 }
 0x52f   : > { %v9969_v57 = vrot.slane %v9967_v8, 4  ;;  %v17402_v8 = vrot.slane %v9987_v17, 5 }
 0x530   : > { %13287 = vmatmul.mubr.msk.bf16.gmra.mrb[4].mxu1 %vm1425_vm8, %v14041_v15  ;;  %v18026_v15 = vld [vmem:[#allocation35_spill] sm:$0xff] }
 0x531   : > { %13290 = vmatprep.mubr.msk.bf16.mxu1 %vm1425_vm8, %v14042_v55  ;;  %13319 = vmatpush3.bf16.msra.mxu1 %v14048_v53  ;;  %v9927_v53 = vrot.slane %v9925_v38, 5  ;;  %v9956_v55 = vrot.slane %v9954_v31, 4  ;;  %v9970_v62 = vor.u32 %v9969_v57, %v17376_v54  ;;  %v10626_v38 = vld [vmem:[#allocation2 + $0xcc] sm:$0xe] }
 0x532   : > { %13320 = vmatprep.subr.bf16.mxu1 %v14053_v45  ;;  %v12200_v61 = vrot.slane %v10626_v38, 9 }
 0x533   : > { %v9960_v41 = vor.u32 %v9959_v24, %v9956_v55  ;;  %v10005_v55 = vshll.u32 %v9869_v6, 16  ;;  %v9971_v17 = vrot.slane %v9970_v62, 4 }
 0x535   : > { %13321 = vmatpush3.bf16.msra.mxu1 %v14053_v45  ;;  %v9949_v45 = vshll.u32 %v18026_v15, 16  ;;  %v14056_v15 = vld [vmem:[#allocation2 + $0xcc] sm:$0xff]   ;;  %v9961_v58 = vrot.slane %v9960_v41, 4  ;;  %v18032_v41 = vld [vmem:[#allocation48_spill] sm:$0xff] }
 0x536   : > { %13354 = vmatprep.subr.bf16.mxu1 %v17350_v23  ;;  %v10059_v62 = vshll.u32 %v18032_v41, 16 }
 0x538   : > { %13291 = vmatmul.mubr.msk.bf16.gmra.mrb[8].mxu1 %vm1425_vm8, %v14044_v11  ;;  %v9866_v11 = vld [vmem:[#allocation2 + $0x3c] sm:$0xf] }
 0x539   : > { %13294 = vmatprep.mubr.msk.bf16.mxu1 %vm1425_vm8, %v14045_v30  ;;  %v9928_v30 = vsel %vm14235_vm10, %v9923_v52, %v9927_v53  ;;  %v9981_v4 = vshll.u32 %v9866_v11, 16  ;;  %v9872_v52 = vld [vmem:[#allocation2 + $0x54] sm:$0xf] }
 0x53a   : > { %v12149_v32 = vcombine.low %v9918_v25, %v9928_v30  ;;  %v10029_v24 = vshll.u32 %v9872_v52, 16 }
 0x53b   : > { %v9983_v27 = vrot.slane %v9981_v4, 5 }
 0x540   : > { %13295 = vmatmul.mubr.msk.bf16.gmra.mrb[12].mxu1 %vm1425_vm8, %v14046_v7  ;;  %v17373_v7 = vrot.slane %v9936_v1, 4  ;;  %v18030_v1 = vld [vmem:[#allocation43_spill] sm:$0xff] }
 0x541   : > { %13298 = vmatprep.mubr.msk.bf16.mxu1 %vm1425_vm8, %v14047_v5  ;;  %v9946_v5 = vor.u32 %v9945_v63, %v17364_v26  ;;  %v10035_v63 = vshll.u32 %v18030_v1, 16  ;;  %v10039_v18 = vshrl.u32 %v18030_v1, 16 }
 0x542   : > { %v9942_v14 = vsel %vm14235_vm10, %v17373_v7, %v17364_v26  ;;  %v10017_v7 = vrot.slane %v10015_v59, 4 }
 0x543   : > { %v9947_v42 = vrot.slane %v9946_v5, 4  ;;  %v10026_v5 = vshrl.u32 %v9872_v52, 16  ;;  %v17414_v25 = vrot.slane %v10035_v63, 5  ;;  %v10041_v48 = vrot.slane %v10039_v18, 4  ;;  %v18033_v63 = vld [vmem:[#allocation42_spill] sm:$0xff] }
 0x544   : > { %v10063_v52 = vshrl.u32 %v18032_v41, 16  ;;  %v10021_v18 = vshll.u32 %v18033_v63, 16 }
 0x545   : > { %v10028_v38 = vrot.slane %v10026_v5, 4 }
 0x548   : > { %13299 = vmatmul.mubr.msk.bf16.gmra.mrb[16].mxu1 %vm1425_vm8, %v14049_v28  ;;  %v17380_v28 = vrot.slane %v9949_v45, 5  ;;  %v10002_v45 = vshrl.u32 %v9869_v6, 16  ;;  %v9997_v6 = vshll.u32 %v18031_v37, 16 }
 0x549   : > { %13302 = vmatprep.mubr.msk.bf16.mxu1 %vm1425_vm8, %v14050_v16  ;;  %v9978_v16 = vshrl.u32 %v9866_v11, 16  ;;  %v17404_v11 = vrot.slane %v10011_v2, 5  ;;  %v10007_v2 = vrot.slane %v10005_v55, 5 }
 0x54a   : > { %v9952_v4 = vsel %vm14235_vm10, %v9947_v42, %v17380_v28  ;;  %v10004_v29 = vrot.slane %v10002_v45, 4  ;;  %v10042_v28 = vor.u32 %v10041_v48, %v17414_v25 }
 0x54b   : > { %v9980_v26 = vrot.slane %v9978_v16, 4  ;;  %v9875_v16 = vld [vmem:[#allocation2 + $0x60] sm:$0xf]  ;;  %v10018_v59 = vor.u32 %v10017_v7, %v17404_v11  ;;  %v12150_v1 = vcombine.low %v9942_v14, %v9952_v4  ;;  %v14058_v14 = vld [vmem:[%s17767_s3 + $0x108] sm:$0xff]  }
 0x54c   : > { %v10053_v42 = vshll.u32 %v9875_v16, 16  ;;  %v10008_v45 = vor.u32 %v10007_v2, %v10004_v29 }
 0x54d   : > { %v9984_v49 = vor.u32 %v9983_v27, %v9980_v26  ;;  %v9966_v26 = vsel %vm14235_vm10, %v9961_v58, %v17376_v54  ;;  %v10019_v55 = vrot.slane %v10018_v59, 4  ;;  %v10043_v54 = vrot.slane %v10042_v28, 4  ;;  %v9881_v59 = vld [vmem:[#allocation2 + $0x78] sm:$0xf] }
 0x54e   : > { %v10055_v48 = vrot.slane %v10053_v42, 5  ;;  %v10023_v58 = vrot.slane %v10021_v18, 5  ;;  %v10101_v63 = vshll.u32 %v9881_v59, 16 }
 0x550   : > { %13303 = vmatmul.mubr.msk.bf16.gmra.mrb[20].mxu1 %vm1425_vm8, %v14051_v22  ;;  %v17393_v22 = vld [vmem:[#allocation2 + $0xd4] sm:$0x1] }
 0x551   : > { %13306 = vmatprep.mubr.msk.bf16.mxu1 %vm1425_vm8, %v14052_v19  ;;  %v10782_v19 = vrot.slane %v17391_v21, 5  ;;  %v10785_v31 = vrot.slane %v17393_v22, 5 }
 0x553   : > { %v10784_v53 = vrot.slane %v10782_v19, 4  ;;  %v17408_v30 = vsel %vm14767_vm15, %v12200_v61, %v10782_v19  ;;  %v10031_v19 = vrot.slane %v10029_v24, 5  ;;  %v9985_v61 = vrot.slane %v9984_v49, 4  ;;  %v9878_v24 = vld [vmem:[#allocation2 + $0x6c] sm:$0xf] }
 0x554   : > { %v10074_v29 = vshrl.u32 %v9878_v24, 16  ;;  %v10077_v2 = vshll.u32 %v9878_v24, 16 }
 0x555   : > { %v17412_v57 = vsel %vm14767_vm15, %v10784_v53, %v10785_v31  ;;  %v10050_v31 = vshrl.u32 %v9875_v16, 16  ;;  %v18034_v53 = vld [vmem:[#allocation46_spill] sm:$0xff]  ;;  %v10032_v7 = vor.u32 %v10031_v19, %v10028_v38  ;;  %v17439_v16 = vrot.slane %v10059_v62, 5  ;;  %v18036_v62 = vld [vmem:[#allocation51_spill] sm:$0xff] }
 0x556   : > { %v9990_v49 = vsel %vm14235_vm10, %v9985_v61, %v17402_v8  ;;  %v10009_v19 = vrot.slane %v10008_v45, 4  ;;  %v10076_v18 = vrot.slane %v10074_v29, 4  ;;  %v10079_v61 = vrot.slane %v10077_v2, 5 }
 0x557   : > { %v10052_v5 = vrot.slane %v10050_v31, 4  ;;  %v10024_v31 = vsel %vm14235_vm10, %v10019_v55, %v10023_v58  ;;  %v10033_v28 = vrot.slane %v10032_v7, 4 }
 0x558   : > { %13307 = vmatmul.mubr.msk.bf16.gmra.mrb[24].mxu1 %vm1425_vm8, %v14054_v50  ;;  %v9975_v50 = vrot.slane %v9973_v44, 5  ;;  %v9994_v44 = vor.u32 %v9993_v39, %v17402_v8  ;;  %v9999_v39 = vrot.slane %v9997_v6, 5  ;;  %v10014_v45 = vsel %vm14235_vm10, %v10009_v19, %v17404_v11 }
 0x559   : > { %13310 = vmatprep.mubr.msk.bf16.mxu1 %vm1425_vm8, %v14055_v51  ;;  %v12224_v51 = vcombine.low %v17408_v30, %v17412_v57  ;;  %v10056_v42 = vor.u32 %v10055_v48, %v10052_v5  ;;  %v10038_v55 = vsel %vm14235_vm10, %v10033_v28, %v17414_v25  ;;  %v12153_v7 = vcombine.low %v10014_v45, %v10024_v31  ;;  %v9884_v48 = vld [vmem:[#allocation2 + $0x84] sm:$0xf]  ;;  %v18039_v28 = vld [vmem:[#allocation59_spill] sm:$0xff] }
 0x55a   : > { %v9995_v27 = vrot.slane %v9994_v44, 4  ;;  %v10103_v11 = vrot.slane %v10101_v63, 5  ;;  %v10080_v25 = vor.u32 %v10079_v61, %v10076_v18  ;;  %v10122_v29 = vshrl.u32 %v9884_v48, 16 }
 0x55b   : > { %v10057_v24 = vrot.slane %v10056_v42, 4  ;;  %v10125_v2 = vshll.u32 %v9884_v48, 16  ;;  %v10159_v42 = vshrl.u32 %v18039_v28, 16 }
 0x55c   : > { %v10000_v38 = vsel %vm14235_vm10, %v9995_v27, %v9999_v39  ;;  %v18037_v27 = vld [vmem:[#allocation54_spill] sm:$0xff]  ;;  %v10124_v61 = vrot.slane %v10122_v29, 4  ;;  %v14113_v29 = vld [vmem:[#allocation2 + $0x8c] sm:$0x1] }
 0x55d   : > { %v10107_v39 = vshll.u32 %v18037_v27, 16 }
 0x560   : > { %13311 = vmatmul.mubr.msk.bf16.gmra.mrb[28].mxu1 %vm1425_vm8, %v14056_v15  ;;  %v10045_v15 = vshll.u32 %v18034_v53, 16  ;;  %v10111_v53 = vshrl.u32 %v18037_v27, 16  ;;  %v10127_v27 = vrot.slane %v10125_v2, 5  ;;  %v10141_v2 = vshll.u32 %v14113_v29, 16  ;;  %v9899_v29 = vld [vmem:[#allocation2 + $0xc0] sm:$0xf] }
 0x561   : > { %13322 = vmatprep.mubr.msk.bf16.mxu1 %vm1425_vm8, %v12149_v32  ;;  %v9976_v32 = vsel %vm14235_vm10, %v9971_v17, %v9975_v50  ;;  %v10065_v50 = vrot.slane %v10063_v52, 4  ;;  %v18035_v17 = vld [vmem:[#allocation52_spill] sm:$0xff]  ;;  %v10069_v52 = vshll.u32 %v18036_v62, 16 }
 0x562   : > { %v12151_v4 = vcombine.low %v9966_v26, %v9976_v32  ;;  %v10083_v37 = vshll.u32 %v18035_v17, 16  ;;  %v10087_v6 = vshrl.u32 %v18035_v17, 16  ;;  %v10047_v44 = vrot.slane %v10045_v15, 5 }
 0x563   : > { %v10066_v41 = vor.u32 %v10065_v50, %v17439_v16  ;;  %v10098_v32 = vshrl.u32 %v9881_v59, 16  ;;  %v12152_v15 = vcombine.low %v9990_v49, %v10000_v38  ;;  %v14060_v50 = vld [vmem:[%s17767_s3 + $0x118] sm:$0xff]   ;;  %v17476_v49 = vrot.slane %v10107_v39, 5 }
 0x564   : > { %v10048_v8 = vsel %vm14235_vm10, %v10043_v54, %v10047_v44  ;;  %v10089_v26 = vrot.slane %v10087_v6, 4  ;;  %v10071_v54 = vrot.slane %v10069_v52, 5  ;;  %v10113_v44 = vrot.slane %v10111_v53, 4 }
 0x565   : > { %v12154_v5 = vcombine.low %v10038_v55, %v10048_v8  ;;  %v10100_v17 = vrot.slane %v10098_v32, 4  ;;  %v10131_v59 = vshll.u32 %v17011_v35, 16  ;;  %v10135_v38 = vshrl.u32 %v17011_v35, 16 }
 0x566   : > { %v10155_v8 = vshll.u32 %v18039_v28, 16  ;;  %v10081_v32 = vrot.slane %v10080_v25, 4  ;;  %v10114_v35 = vor.u32 %v10113_v44, %v17476_v49  ;;  %v10161_v55 = vrot.slane %v10159_v42, 4  ;;  %v14115_v28 = vld [vmem:[#allocation2 + $0x98] sm:$0x1] }
 0x567   : > { %v17489_v39 = vrot.slane %v10131_v59, 5  ;;  %v10137_v53 = vrot.slane %v10135_v38, 4  ;;  %v14116_v42 = vld [vmem:[#allocation2 + $0xac] sm:$0xf] }
 0x568   : > { %13323 = vmatmul.mubr.msk.bf16.vlgmr.msra.gmra.mrb[0].mxu1 %vm1425_vm8, %v12150_v1  ;;  %v17460_v1 = vrot.slane %v10083_v37, 5  ;;  %v9887_v37 = vld [vmem:[#allocation2 + $0x90] sm:$0xf] }
 0x569   : > { %13355 = vmatpush3.bf16.msra.mxu1 %v17350_v23  ;;  %13326 = vmatprep.mubr.msk.bf16.mxu1 %vm1425_vm8, %v12151_v4  ;;  %v14059_v23 = vld [vmem:[%s17767_s3 + $0x110] sm:$0xff]   ;;  %v10067_v4 = vrot.slane %v10066_v41, 4  ;;  %v10146_v19 = vshrl.u32 %v9887_v37, 16  ;;  %v10149_v31 = vshll.u32 %v9887_v37, 16  ;;  %v10062_v41 = vsel %vm14235_vm10, %v10057_v24, %v17439_v16 }
 0x56a   : > { %13356 = vmatprep.subr.bf16.mxu1 %v14058_v14  ;;  %v10090_v58 = vor.u32 %v10089_v26, %v17460_v1  ;;  %v10104_v26 = vor.u32 %v10103_v11, %v10100_v17  ;;  %v17491_v16 = vrot.slane %v10155_v8, 5  ;;  %v10138_v17 = vor.u32 %v10137_v53, %v17489_v39 }
 0x56b   : > { %v10072_v62 = vsel %vm14235_vm10, %v10067_v4, %v10071_v54  ;;  %v10151_v45 = vrot.slane %v10149_v31, 5  ;;  %v10086_v4 = vsel %vm14235_vm10, %v10081_v32, %v17460_v1  ;;  %v14114_v1 = vld [vmem:[#allocation2 + $0xa0] sm:$0xf]  ;;  %v10165_v8 = vshll.u32 %v14115_v28, 16 }
 0x56c   : > { %v10091_v52 = vrot.slane %v10090_v58, 4  ;;  %v12155_v24 = vcombine.low %v10062_v41, %v10072_v62  ;;  %v10105_v48 = vrot.slane %v10104_v26, 4  ;;  %v10115_v58 = vrot.slane %v10114_v35, 4 }
 0x56d   : > { %13357 = vmatpush3.bf16.msra.mxu1 %v14058_v14  ;;  %v18038_v14 = vld [vmem:[#allocation55_spill] sm:$0xff]  ;;  %v10162_v44 = vor.u32 %v10161_v55, %v17491_v16  ;;  %v10179_v59 = vshll.u32 %v14114_v1, 16  ;;  %v10183_v38 = vshrl.u32 %v14114_v1, 16  ;;  %v10203_v41 = vshll.u32 %v14116_v42, 16 }
 0x56e   : > { %13358 = vmatprep.subr.bf16.mxu1 %v14059_v23  ;;  %v10093_v6 = vshll.u32 %v18038_v14, 16  ;;  %v10207_v62 = vshrl.u32 %v14116_v42, 16  ;;  %v10139_v26 = vrot.slane %v10138_v17, 4 }
 0x56f   : > { %v17507_v53 = vrot.slane %v10179_v59, 5  ;;  %v17510_v55 = vrot.slane %v10203_v41, 5  ;;  %v14119_v59 = vld [vmem:[#allocation2 + $0xc4] sm:$0xf]  ;;  %v14120_v41 = vld [vmem:[#allocation2 + $0xb0] sm:$0x1] }
 0x570   : > { %13327 = vmatmul.mubr.msk.bf16.gmra.mrb[4].mxu1 %vm1425_vm8, %v12152_v15  ;;  %v10095_v63 = vrot.slane %v10093_v6, 5  ;;  %v10148_v15 = vrot.slane %v10146_v19, 4  ;;  %v9893_v19 = vld [vmem:[#allocation2 + $0xa8] sm:$0xf] }
 0x571   : > { %13330 = vmatprep.mubr.msk.bf16.mxu1 %vm1425_vm8, %v12153_v7  ;;  %13359 = vmatpush3.bf16.msra.mxu1 %v14059_v23  ;;  %v14112_v23 = vld [vmem:[#allocation2 + $0x80] sm:$0x1]  ;;  %v9890_v7 = vld [vmem:[#allocation2 + $0x9c] sm:$0xf] }
 0x572   : > { %13360 = vmatprep.subr.bf16.mxu1 %v14060_v50  ;;  %v10117_v18 = vshll.u32 %v14112_v23, 16  ;;  %v10096_v54 = vsel %vm14235_vm10, %v10091_v52, %v10095_v63  ;;  %v10170_v11 = vshrl.u32 %v9890_v7, 16  ;;  %v10173_v37 = vshll.u32 %v9890_v7, 16 }
 0x573   : > { %v12156_v25 = vcombine.low %v10086_v4, %v10096_v54  ;;  %v10152_v6 = vor.u32 %v10151_v45, %v10148_v15  ;;  %v10194_v23 = vshrl.u32 %v9893_v19, 16  ;;  %v10185_v15 = vrot.slane %v10183_v38, 4 }
 0x574   : > { %v10119_v14 = vrot.slane %v10117_v18, 5  ;;  %v10172_v32 = vrot.slane %v10170_v11, 4  ;;  %v10175_v63 = vrot.slane %v10173_v37, 5  ;;  %v10197_v18 = vshll.u32 %v9893_v19, 16 }
 0x575   : > { %13361 = vmatpush3.bf16.msra.mxu1 %v14060_v50  ;;  %v10128_v50 = vor.u32 %v10127_v27, %v10124_v61  ;;  %v10153_v35 = vrot.slane %v10152_v6, 4  ;;  %v10143_v27 = vrot.slane %v10141_v2, 5  ;;  %v10167_v45 = vrot.slane %v10165_v8, 5 }
 0x576   : > { %v10120_v31 = vsel %vm14235_vm10, %v10115_v58, %v10119_v14  ;;  %v10209_v7 = vrot.slane %v10207_v62, 4  ;;  %v10176_v4 = vor.u32 %v10175_v63, %v10172_v32  ;;  %v14117_v58 = vld [vmem:[#allocation2 + $0xa4] sm:$0x1]  ;;  %v10196_v37 = vrot.slane %v10194_v23, 4  ;;  %v9902_v32 = vld [vmem:[#allocation2 + $0xcc] sm:$0xf] }
 0x577   : > { %v10129_v52 = vrot.slane %v10128_v50, 4  ;;  %v10189_v50 = vshll.u32 %v14117_v58, 16  ;;  %v10158_v17 = vsel %vm14235_vm10, %v10153_v35, %v17491_v16  ;;  %v10186_v14 = vor.u32 %v10185_v15, %v17507_v53 }
 0x578   : > { %13331 = vmatmul.mubr.msk.bf16.gmra.mrb[8].mxu1 %vm1425_vm8, %v12154_v5  ;;  %v10110_v5 = vsel %vm14235_vm10, %v10105_v48, %v17476_v49  ;;  %v10163_v49 = vrot.slane %v10162_v44, 4  ;;  %v10144_v48 = vsel %vm14235_vm10, %v10139_v26, %v10143_v27  ;;  %v14118_v44 = vld [vmem:[#allocation2 + $0xb8] sm:$0xf]  ;;  %v10210_v2 = vor.u32 %v10209_v7, %v17510_v55 }
 0x579   : > { %13334 = vmatprep.mubr.msk.bf16.mxu1 %vm1425_vm8, %v12155_v24  ;;  %v12157_v61 = vcombine.low %v10110_v5, %v10120_v31  ;;  %v9896_v24 = vld [vmem:[#allocation2 + $0xb4] sm:$0xf]  ;;  %v10134_v54 = vsel %vm14235_vm10, %v10129_v52, %v17489_v39  ;;  %v10227_v39 = vshll.u32 %v14118_v44, 16  ;;  %v10231_v5 = vshrl.u32 %v14118_v44, 16 }
 0x57a   : > { %v10168_v11 = vsel %vm14235_vm10, %v10163_v49, %v10167_v45  ;;  %v10218_v6 = vshrl.u32 %v9896_v24, 16  ;;  %v10221_v1 = vshll.u32 %v9896_v24, 16  ;;  %v10251_v38 = vshll.u32 %v14119_v59, 16 }
 0x57b   : > { %v10255_v19 = vshrl.u32 %v14119_v59, 16  ;;  %v12158_v31 = vcombine.low %v10134_v54, %v10144_v48  ;;  %v12159_v16 = vcombine.low %v10158_v17, %v10168_v11  ;;  %v10177_v28 = vrot.slane %v10176_v4, 4 }
 0x57c   : > { %v10191_v8 = vrot.slane %v10189_v50, 5  ;;  %v10213_v62 = vshll.u32 %v14120_v41, 16  ;;  %v10242_v52 = vshrl.u32 %v9899_v29, 16  ;;  %v10245_v26 = vshll.u32 %v9899_v29, 16 }
 0x57d   : > { %v10187_v63 = vrot.slane %v10186_v14, 4  ;;  %v10220_v35 = vrot.slane %v10218_v6, 4  ;;  %v10229_v49 = vrot.slane %v10227_v39, 5  ;;  %v10233_v23 = vrot.slane %v10231_v5, 4  ;;  %v14121_v6 = vld [vmem:[#allocation2 + $0xbc] sm:$0x1] }
 0x57e   : > { %v10253_v27 = vrot.slane %v10251_v38, 5  ;;  %v10257_v15 = vrot.slane %v10255_v19, 4  ;;  %v10266_v45 = vshrl.u32 %v9902_v32, 16  ;;  %v10269_v7 = vshll.u32 %v9902_v32, 16  ;;  %v14122_v38 = vld [vmem:[#allocation2 + $0xc8] sm:$0x1] }
 0x57f   : > { %v10275_v24 = vshll.u32 %v17391_v21, 16  ;;  %v10279_v54 = vshrl.u32 %v17391_v21, 16  ;;  %v10215_v4 = vrot.slane %v10213_v62, 5  ;;  %v10244_v58 = vrot.slane %v10242_v52, 4 }
 0x580   : > { %13335 = vmatmul.mubr.msk.bf16.gmra.mrb[12].mxu1 %vm1425_vm8, %v12156_v25  ;;  %v10199_v25 = vrot.slane %v10197_v18, 5  ;;  %v10211_v18 = vrot.slane %v10210_v2, 4  ;;  %v10247_v50 = vrot.slane %v10245_v26, 5  ;;  %v10182_v17 = vsel %vm14235_vm10, %v10177_v28, %v17507_v53 }
 0x581   : > { %13338 = vmatprep.mubr.msk.bf16.mxu1 %vm1425_vm8, %v12157_v61  ;;  %v10223_v61 = vrot.slane %v10221_v1, 5  ;;  %v10192_v11 = vsel %vm14235_vm10, %v10187_v63, %v10191_v8  ;;  %v10237_v44 = vshll.u32 %v14121_v6, 16  ;;  %v10258_v39 = vor.u32 %v10257_v15, %v10253_v27  ;;  %v18052_v6 = vld [vmem:[#allocation56_spill] sm:$0xff] }
 0x582   : > { %v10200_v42 = vor.u32 %v10199_v25, %v10196_v37  ;;  %v10234_v37 = vor.u32 %v10233_v23, %v10229_v49  ;;  %v10216_v25 = vsel %vm14235_vm10, %v10211_v18, %v10215_v4  ;;  %v10268_v21 = vrot.slane %v10266_v45, 4 }
 0x583   : > { %v10224_v14 = vor.u32 %v10223_v61, %v10220_v35  ;;  %v10271_v5 = vrot.slane %v10269_v7, 5  ;;  %v10277_v29 = vrot.slane %v10275_v24, 5  ;;  %v10281_v2 = vrot.slane %v10279_v54, 4 }
 0x584   : > { %v10201_v48 = vrot.slane %v10200_v42, 4  ;;  %v12160_v1 = vcombine.low %v10182_v17, %v10192_v11  ;;  %v10248_v59 = vor.u32 %v10247_v50, %v10244_v58  ;;  %v10261_v19 = vshll.u32 %v14122_v38, 16  ;;  %v18044_v58 = vld [vmem:[#allocation45_spill] sm:$0xff]  ;;  %v18046_v17 = vld [vmem:[#allocation47_spill] sm:$0xff]  ;;  %v18062_v38 = vld [vmem:[#allocation64_spill] sm:$0xff] }
 0x585   : > { %v10239_v28 = vrot.slane %v10237_v44, 5  ;;  %v10259_v8 = vrot.slane %v10258_v39, 4  ;;  %v10225_v42 = vrot.slane %v10224_v14, 4  ;;  %v10272_v41 = vor.u32 %v10271_v5, %v10268_v21  ;;  %v18047_v11 = vld [vmem:[#allocation49_spill] sm:$0xff]  ;;  %v18055_v21 = vld [vmem:[#allocation58_spill] sm:$0xff]  ;;  %v18056_v5 = vld [vmem:[#allocation60_spill] sm:$0xff] }
 0x586   : > { %v10206_v53 = vsel %vm14235_vm10, %v10201_v48, %v17510_v55  ;;  %v10282_v62 = vor.u32 %v10281_v2, %v10277_v29  ;;  %v10285_v52 = vshll.u32 %v17393_v22, 16  ;;  %v10249_v26 = vrot.slane %v10248_v59, 4  ;;  %v18041_v48 = vld [vmem:[#allocation40_spill] sm:$0xff]  ;;  %v18053_v44 = vld [vmem:[#allocation57_spill] sm:$0xff]  ;;  %v18061_v59 = vld [vmem:[#allocation63_spill] sm:$0xff] }
 0x587   : > { %v10263_v32 = vrot.slane %v10261_v19, 5  ;;  %v10230_v35 = vsel %vm14235_vm10, %v10225_v42, %v10229_v49  ;;  %v10273_v23 = vrot.slane %v10272_v41, 4  ;;  %v18040_v49 = vld [vmem:[#allocation39_spill] sm:$0xff]  ;;  %v18054_v39 = vcombine.low %v18052_v6, %v18053_v44  ;;  %v18058_v2 = vld [vmem:[#allocation61_spill] sm:$0xff] }
 0x588   : > { %13339 = vmatmul.mubr.msk.bf16.gmra.mrb[16].mxu1 %vm1425_vm8, %v12158_v31  ;;  %v12161_v31 = vcombine.low %v10206_v53, %v10216_v25  ;;  %v10283_v18 = vrot.slane %v10282_v62, 4  ;;  %v10287_v61 = vrot.slane %v10285_v52, 5  ;;  %v10254_v45 = vsel %vm14235_vm10, %v10249_v26, %v10253_v27  ;;  %v18043_v27 = vld [vmem:[#allocation44_spill] sm:$0xff]  ;;  %v18050_v25 = vld [vmem:[#allocation53_spill] sm:$0xff]  ;;  %v18068_v42 = vld [vmem:[#allocation67_spill] sm:$0xff] }
 0x589   : > { %13342 = vmatprep.mubr.msk.bf16.mxu1 %vm1425_vm8, %v12159_v16  ;;  %v10235_v16 = vrot.slane %v10234_v37, 4  ;;  %v10264_v63 = vsel %vm14235_vm10, %v10259_v8, %v10263_v32  ;;  %v10278_v22 = vsel %vm14235_vm10, %v10273_v23, %v10277_v29  ;;  %v18042_v4 = vcombine.low %v18040_v49, %v18041_v48  ;;  %v11154_v62 = vld [vmem:[%s14221_s8 + $0x30] sm:$0xff]  ;;  %v11152_v32 = vld [vmem:[%s14221_s8 + $0x20] sm:$0xff] }
 0x58a   : > { %v12163_v7 = vcombine.low %v10254_v45, %v10264_v63  ;;  %v10288_v24 = vsel %vm14235_vm10, %v10283_v18, %v10287_v61  ;;  %v18045_v50 = vcombine.low %v18043_v27, %v18044_v58  ;;  %v18048_v37 = vcombine.low %v18046_v17, %v18047_v11  ;;  %v11158_v49 = vld [vmem:[%s14221_s8 + $0x50] sm:$0xff]  ;;  %v11156_v27 = vld [vmem:[%s14221_s8 + $0x40] sm:$0xff]  ;;  %v11159_v17 = vld [vmem:[%s14221_s8 + $0x58] sm:$0xff] }
 0x58b   : > { %v10240_v55 = vsel %vm14235_vm10, %v10235_v16, %v10239_v28  ;;  %v12164_v54 = vcombine.low %v10278_v22, %v10288_v24  ;;  %v18051_v14 = vcombine.low %v18049_v43, %v18050_v25  ;;  %v18057_v29 = vcombine.low %v18055_v21, %v18056_v5  ;;  %v18065_v16 = vld [vmem:[#allocation65_spill] sm:$0xff]  ;;  %v18066_v28 = vld [vmem:[#allocation66_spill] sm:$0xff] }
 0x58c   : > { %v12162_v15 = vcombine.low %v10230_v35, %v10240_v55  ;;  %v18063_v19 = vcombine.low %v18061_v59, %v18062_v38  ;;  %v18067_v8 = vcombine.low %v18065_v16, %v18066_v28  ;;  %v18069_v41 = vcombine.low %v17081_v33, %v18068_v42  ;;  %v11150_v33 = vld [vmem:[%s14221_s8 + $0x10] sm:$0xff]  ;;  %v11155_v35 = vld [vmem:[%s14221_s8 + $0x38] sm:$0xff]  ;;  %v11157_v25 = vld [vmem:[%s14221_s8 + $0x48] sm:$0xff] }
 0x58d   : > { %v11162_v5 = vld [vmem:[%s14221_s8 + $0x70] sm:$0xff]  ;;  %v11163_v38 = vld [vmem:[%s14221_s8 + $0x78] sm:$0xff]  ;;  %v11161_v28 = vld [vmem:[%s14221_s8 + $0x68] sm:$0xff] }
 0x590   : > { %13343 = vmatmul.mubr.msk.bf16.gmra.mrb[20].mxu1 %vm1425_vm8, %v12160_v1  ;;  %v18059_v1 = vld [vmem:[#allocation62_spill] sm:$0xff] }
 0x591   : > { %13346 = vmatprep.mubr.msk.bf16.mxu1 %vm1425_vm8, %v12161_v31  ;;  %v18060_v53 = vcombine.low %v18058_v2, %v18059_v1  ;;  %v18064_v31 = vcombine.low %v17056_v12, %v17064_v9  ;;  %v17624_v12 = vld [vmem:[%s17768_s4] ss:$0 sm:$0xff] }
 0x592   : > { %v11160_v1 = vld [vmem:[%s14221_s8 + $0x60] sm:$0xff] }
 0x598   : > { %13347 = vmatmul.mubr.msk.bf16.gmra.mrb[24].mxu1 %vm1425_vm8, %v12162_v15  ;;  %v11153_v15 = vld [vmem:[%s14221_s8 + $0x28] sm:$0xff] }
 0x599   : > { %13350 = vmatprep.mubr.msk.bf16.mxu1 %vm1425_vm8, %v12163_v7 }
 0x5a0   : > { %13351 = vmatmul.mubr.msk.bf16.gmra.mrb[28].mxu1 %vm1425_vm8, %v12164_v54 }
 0x5a1   : > { %13362 = vmatprep.mubr.msk.bf16.mxu1 %vm1425_vm8, %v18042_v4 }
 0x5a8   : > { %13363 = vmatmul.mubr.msk.bf16.vlgmr.msra.gmra.mrb[0].mxu1 %vm1425_vm8, %v18045_v50 }
 0x5a9   : > { %13366 = vmatprep.mubr.msk.bf16.mxu1 %vm1425_vm8, %v18048_v37 }
 0x5b0   : > { %13367 = vmatmul.mubr.msk.bf16.gmra.mrb[4].mxu1 %vm1425_vm8, %v18051_v14 }
 0x5b1   : > { %13370 = vmatprep.mubr.msk.bf16.mxu1 %vm1425_vm8, %v18054_v39 }
 0x5b8   : > { %13371 = vmatmul.mubr.msk.bf16.gmra.mrb[8].mxu1 %vm1425_vm8, %v18057_v29 }
 0x5b9   : > { %13374 = vmatprep.mubr.msk.bf16.mxu1 %vm1425_vm8, %v18060_v53 }
 0x5c0   : > { %13375 = vmatmul.mubr.msk.bf16.gmra.mrb[12].mxu1 %vm1425_vm8, %v18063_v19 }
 0x5c1   : > { %13378 = vmatprep.mubr.msk.bf16.mxu1 %vm1425_vm8, %v18064_v31 }
 0x5c8   : > { %13379 = vmatmul.mubr.msk.bf16.gmra.mrb[16].mxu1 %vm1425_vm8, %v18067_v8 }
 0x5c9   : > { %13382 = vmatprep.mubr.msk.bf16.mxu1 %vm1425_vm8, %v18069_v41 }
 0x5d0   : > { %13383 = vmatmul.mubr.msk.bf16.gmra.mrb[20].mxu1 %vm1425_vm8, %v12220_v34  ;;  %v11148_v34 = vld [vmem:[%s14221_s8] sm:$0xff] }
 0x5d1   : > { %13386 = vmatprep.mubr.msk.bf16.mxu1 %vm1425_vm8, %v12221_v20 }
 0x5d8   : > { %13387 = vmatmul.mubr.msk.bf16.gmra.mrb[24].mxu1 %vm1425_vm8, %v12222_v10 }
 0x5d9   : > { %13390 = vmatprep.mubr.msk.bf16.mxu1 %vm1425_vm8, %v12223_v47 }
 0x5e0   : > { %13391 = vmatmul.mubr.msk.bf16.gmra.mrb[28].mxu1 %vm1425_vm8, %v12224_v51 }
 0x67b   : > { %v13364_v9 = vpop.f32.mrb[0].mxu1 }
 0x67c   : > { %v11118_v3 = vadd.f32 %v13364_v9, %v17624_v12  ;;  %v10950_v13 = vpop.f32.mrb[1].mxu1 }
 0x67d   : > { %v11116_v56 = vadd.f32 %v17624_v12, %v10950_v13  ;;  %v13365_v0 = vpop.f32.mrb[2].mxu1 }
 0x67e   : > { %v11182_v20 = vadd.f32 %v11150_v33, %v11118_v3  ;;  %v11119_v40 = vadd.f32 %v13365_v0, %v17624_v12  ;;  %v10953_v10 = vpop.f32.mrb[3].mxu1  ;;  %v11166_v3 = vld [vmem:[%s14221_s8 + $0x90] sm:$0xff] }
 0x67f   : > { %v11180_v60 = vadd.f32 %v11148_v34, %v11116_v56  ;;  %v11117_v47 = vadd.f32 %v17624_v12, %v10953_v10  ;;  %v11164_v56 = vld [vmem:[%s14221_s8 + $0x80] sm:$0xff] }
 0x680   : > { %11214 = vst.msk [vmem:[%s17634_s29 + $0x10] sm:$0xff] %vm1425_vm8, %v11182_v20  ;;  %v11183_v30 = vadd.f32 %v11151_v46, %v11119_v40  ;;  %v11167_v20 = vld [vmem:[%s14221_s8 + $0x98] sm:$0xff] }
 0x681   : > { %11212 = vst.msk [vmem:[%s17634_s29] sm:$0xff] %vm1425_vm8, %v11180_v60  ;;  %v11181_v57 = vadd.f32 %v11149_v36, %v11117_v47  ;;  %v11165_v60 = vld [vmem:[%s14221_s8 + $0x88] sm:$0xff] }
 0x682   : > { %11215 = vst.msk [vmem:[%s17634_s29 + $0x18] sm:$0xff] %vm1425_vm8, %v11183_v30 }
 0x683   : > { %11213 = vst.msk [vmem:[%s17634_s29 + $0x8] sm:$0xff] %vm1425_vm8, %v11181_v57  ;;  %v13368_v51 = vpop.f32.mrb[4].mxu1 }
 0x684   : > { %v11122_v52 = vadd.f32 %v13368_v51, %v17624_v12  ;;  %v10966_v26 = vpop.f32.mrb[5].mxu1 }
 0x685   : > { %v11120_v55 = vadd.f32 %v17624_v12, %v10966_v26  ;;  %v13369_v63 = vpop.f32.mrb[6].mxu1 }
 0x686   : > { %v11186_v23 = vadd.f32 %v11154_v62, %v11122_v52  ;;  %v11123_v18 = vadd.f32 %v13369_v63, %v17624_v12  ;;  %v10969_v61 = vpop.f32.mrb[7].mxu1  ;;  %v11170_v52 = vld [vmem:[%s14221_s8 + $0xb0] sm:$0xff] }
 0x687   : > { %v11184_v45 = vadd.f32 %v11152_v32, %v11120_v55  ;;  %v11121_v7 = vadd.f32 %v17624_v12, %v10969_v61  ;;  %v11168_v55 = vld [vmem:[%s14221_s8 + $0xa0] sm:$0xff] }
 0x688   : > { %11218 = vst.msk [vmem:[%s17634_s29 + $0x30] sm:$0xff] %vm1425_vm8, %v11186_v23  ;;  %v11187_v22 = vadd.f32 %v11155_v35, %v11123_v18  ;;  %v11171_v23 = vld [vmem:[%s14221_s8 + $0xb8] sm:$0xff] }
 0x689   : > { %11216 = vst.msk [vmem:[%s17634_s29 + $0x20] sm:$0xff] %vm1425_vm8, %v11184_v45  ;;  %v11185_v24 = vadd.f32 %v11153_v15, %v11121_v7  ;;  %v11169_v45 = vld [vmem:[%s14221_s8 + $0xa8] sm:$0xff] }
 0x68a   : > { %11219 = vst.msk [vmem:[%s17634_s29 + $0x38] sm:$0xff] %vm1425_vm8, %v11187_v22 }
 0x68b   : > { %11217 = vst.msk [vmem:[%s17634_s29 + $0x28] sm:$0xff] %vm1425_vm8, %v11185_v24  ;;  %v13372_v54 = vpop.f32.mrb[8].mxu1 }
 0x68c   : > { %v11126_v48 = vadd.f32 %v13372_v54, %v17624_v12  ;;  %v10982_v4 = vpop.f32.mrb[9].mxu1 }
 0x68d   : > { %v11124_v58 = vadd.f32 %v17624_v12, %v10982_v4  ;;  %v13373_v50 = vpop.f32.mrb[10].mxu1 }
 0x68e   : > { %v11190_v11 = vadd.f32 %v11158_v49, %v11126_v48  ;;  %v11127_v37 = vadd.f32 %v13373_v50, %v17624_v12  ;;  %v10985_v43 = vpop.f32.mrb[11].mxu1  ;;  %v11174_v48 = vld [vmem:[%s14221_s8 + $0xd0] sm:$0xff] }
 0x68f   : > { %v11188_v14 = vadd.f32 %v11156_v27, %v11124_v58  ;;  %v11125_v6 = vadd.f32 %v17624_v12, %v10985_v43  ;;  %v11172_v58 = vld [vmem:[%s14221_s8 + $0xc0] sm:$0xff] }
 0x690   : > { %11222 = vst.msk [vmem:[%s17634_s29 + $0x50] sm:$0xff] %vm1425_vm8, %v11190_v11  ;;  %v11191_v44 = vadd.f32 %v11159_v17, %v11127_v37  ;;  %v11175_v11 = vld [vmem:[%s14221_s8 + $0xd8] sm:$0xff] }
 0x691   : > { %11220 = vst.msk [vmem:[%s17634_s29 + $0x40] sm:$0xff] %vm1425_vm8, %v11188_v14  ;;  %v11189_v39 = vadd.f32 %v11157_v25, %v11125_v6  ;;  %v11173_v14 = vld [vmem:[%s14221_s8 + $0xc8] sm:$0xff] }
 0x692   : > { %11223 = vst.msk [vmem:[%s17634_s29 + $0x58] sm:$0xff] %vm1425_vm8, %v11191_v44 }
 0x693   : > { %11221 = vst.msk [vmem:[%s17634_s29 + $0x48] sm:$0xff] %vm1425_vm8, %v11189_v39  ;;  %v13376_v21 = vpop.f32.mrb[12].mxu1 }
 0x694   : > { %v11130_v29 = vadd.f32 %v13376_v21, %v17624_v12  ;;  %v10998_v2 = vpop.f32.mrb[13].mxu1 }
 0x695   : > { %v11128_v53 = vadd.f32 %v17624_v12, %v10998_v2  ;;  %v13377_v59 = vpop.f32.mrb[14].mxu1 }
 0x696   : > { %v11194_v19 = vadd.f32 %v11162_v5, %v11130_v29  ;;  %v11131_v31 = vadd.f32 %v13377_v59, %v17624_v12  ;;  %v11001_v16 = vpop.f32.mrb[15].mxu1  ;;  %v11178_v29 = vld [vmem:[%s14221_s8 + $0xf0] sm:$0xff] }
 0x697   : > { %v11192_v8 = vadd.f32 %v11160_v1, %v11128_v53  ;;  %v11129_v42 = vadd.f32 %v17624_v12, %v11001_v16  ;;  %v11176_v53 = vld [vmem:[%s14221_s8 + $0xe0] sm:$0xff] }
 0x698   : > { %11226 = vst.msk [vmem:[%s17634_s29 + $0x70] sm:$0xff] %vm1425_vm8, %v11194_v19  ;;  %v11195_v41 = vadd.f32 %v11163_v38, %v11131_v31  ;;  %v11179_v19 = vld [vmem:[%s14221_s8 + $0xf8] sm:$0xff] }
 0x699   : > { %11224 = vst.msk [vmem:[%s17634_s29 + $0x60] sm:$0xff] %vm1425_vm8, %v11192_v8  ;;  %v11193_v9 = vadd.f32 %v11161_v28, %v11129_v42  ;;  %v11177_v8 = vld [vmem:[%s14221_s8 + $0xe8] sm:$0xff] }
 0x69a   : > { %11227 = vst.msk [vmem:[%s17634_s29 + $0x78] sm:$0xff] %vm1425_vm8, %v11195_v41 }
 0x69b   : > { %11225 = vst.msk [vmem:[%s17634_s29 + $0x68] sm:$0xff] %vm1425_vm8, %v11193_v9  ;;  %v13380_v33 = vpop.f32.mrb[16].mxu1 }
 0x69c   : > { %v11134_v13 = vadd.f32 %v13380_v33, %v17624_v12  ;;  %v11014_v34 = vpop.f32.mrb[17].mxu1 }
 0x69d   : > { %v11132_v0 = vadd.f32 %v17624_v12, %v11014_v34  ;;  %v13381_v46 = vpop.f32.mrb[18].mxu1 }
 0x69e   : > { %v11198_v40 = vadd.f32 %v11166_v3, %v11134_v13  ;;  %v11135_v10 = vadd.f32 %v13381_v46, %v17624_v12  ;;  %v11017_v36 = vpop.f32.mrb[19].mxu1 }
 0x69f   : > { %v11196_v47 = vadd.f32 %v11164_v56, %v11132_v0  ;;  %v11133_v30 = vadd.f32 %v17624_v12, %v11017_v36 }
 0x6a0   : > { %11230 = vst.msk [vmem:[%s17634_s29 + $0x90] sm:$0xff] %vm1425_vm8, %v11198_v40  ;;  %v11199_v57 = vadd.f32 %v11167_v20, %v11135_v10 }
 0x6a1   : > { %11228 = vst.msk [vmem:[%s17634_s29 + $0x80] sm:$0xff] %vm1425_vm8, %v11196_v47  ;;  %v11197_v51 = vadd.f32 %v11165_v60, %v11133_v30 }
 0x6a2   : > { %11231 = vst.msk [vmem:[%s17634_s29 + $0x98] sm:$0xff] %vm1425_vm8, %v11199_v57 }
 0x6a3   : > { %11229 = vst.msk [vmem:[%s17634_s29 + $0x88] sm:$0xff] %vm1425_vm8, %v11197_v51  ;;  %v13384_v62 = vpop.f32.mrb[20].mxu1 }
 0x6a4   : > { %v11138_v26 = vadd.f32 %v13384_v62, %v17624_v12  ;;  %v11030_v32 = vpop.f32.mrb[21].mxu1 }
 0x6a5   : > { %v11136_v63 = vadd.f32 %v17624_v12, %v11030_v32  ;;  %v13385_v35 = vpop.f32.mrb[22].mxu1 }
 0x6a6   : > { %v11202_v18 = vadd.f32 %v11170_v52, %v11138_v26  ;;  %v11139_v61 = vadd.f32 %v13385_v35, %v17624_v12  ;;  %v11033_v15 = vpop.f32.mrb[23].mxu1 }
 0x6a7   : > { %v11200_v7 = vadd.f32 %v11168_v55, %v11136_v63  ;;  %v11137_v22 = vadd.f32 %v17624_v12, %v11033_v15 }
 0x6a8   : > { %11234 = vst.msk [vmem:[%s17634_s29 + $0xb0] sm:$0xff] %vm1425_vm8, %v11202_v18  ;;  %v11203_v24 = vadd.f32 %v11171_v23, %v11139_v61 }
 0x6a9   : > { %11232 = vst.msk [vmem:[%s17634_s29 + $0xa0] sm:$0xff] %vm1425_vm8, %v11200_v7  ;;  %v11201_v54 = vadd.f32 %v11169_v45, %v11137_v22 }
 0x6aa   : > { %11235 = vst.msk [vmem:[%s17634_s29 + $0xb8] sm:$0xff] %vm1425_vm8, %v11203_v24 }
 0x6ab   : > { %11233 = vst.msk [vmem:[%s17634_s29 + $0xa8] sm:$0xff] %vm1425_vm8, %v11201_v54  ;;  %v13388_v49 = vpop.f32.mrb[24].mxu1 }
 0x6ac   : > { %v11142_v4 = vadd.f32 %v13388_v49, %v17624_v12  ;;  %v11046_v27 = vpop.f32.mrb[25].mxu1 }
 0x6ad   : > { %v11140_v50 = vadd.f32 %v17624_v12, %v11046_v27  ;;  %v13389_v17 = vpop.f32.mrb[26].mxu1 }
 0x6ae   : > { %v11206_v37 = vadd.f32 %v11174_v48, %v11142_v4  ;;  %v11143_v43 = vadd.f32 %v13389_v17, %v17624_v12  ;;  %v11049_v25 = vpop.f32.mrb[27].mxu1 }
 0x6af   : > { %v11204_v6 = vadd.f32 %v11172_v58, %v11140_v50  ;;  %v11141_v44 = vadd.f32 %v17624_v12, %v11049_v25 }
 0x6b0   : > { %11238 = vst.msk [vmem:[%s17634_s29 + $0xd0] sm:$0xff] %vm1425_vm8, %v11206_v37  ;;  %v11207_v39 = vadd.f32 %v11175_v11, %v11143_v43 }
 0x6b1   : > { %11236 = vst.msk [vmem:[%s17634_s29 + $0xc0] sm:$0xff] %vm1425_vm8, %v11204_v6  ;;  %v11205_v21 = vadd.f32 %v11173_v14, %v11141_v44 }
 0x6b2   : > { %11239 = vst.msk [vmem:[%s17634_s29 + $0xd8] sm:$0xff] %vm1425_vm8, %v11207_v39 }
 0x6b3   : > { %11237 = vst.msk [vmem:[%s17634_s29 + $0xc8] sm:$0xff] %vm1425_vm8, %v11205_v21  ;;  %v13392_v5 = vpop.f32.mrb[28].mxu1 }
 0x6b4   : > { %v11146_v2 = vadd.f32 %v13392_v5, %v17624_v12  ;;  %v11062_v1 = vpop.f32.mrb[29].mxu1 }
 0x6b5   : > { %v11144_v59 = vadd.f32 %v17624_v12, %v11062_v1  ;;  %v13393_v38 = vpop.f32.mrb[30].mxu1 }
 0x6b6   : > { %v11210_v31 = vadd.f32 %v11178_v29, %v11146_v2  ;;  %v11147_v16 = vadd.f32 %v13393_v38, %v17624_v12  ;;  %v11065_v28 = vpop.f32.mrb[31].mxu1 }
 0x6b7   : > { %v11208_v42 = vadd.f32 %v11176_v53, %v11144_v59  ;;  %v11145_v41 = vadd.f32 %v17624_v12, %v11065_v28 }
 0x6b8   : > { %11242 = vst.msk [vmem:[%s17634_s29 + $0xf0] sm:$0xff] %vm1425_vm8, %v11210_v31  ;;  %v11211_v9 = vadd.f32 %v11179_v19, %v11147_v16 }
 0x6b9   : > { %11240 = vst.msk [vmem:[%s17634_s29 + $0xe0] sm:$0xff] %vm1425_vm8, %v11208_v42  ;;  %v11209_v33 = vadd.f32 %v11177_v8, %v11145_v41 }
 0x6ba   : > { %11243 = vst.msk [vmem:[%s17634_s29 + $0xf8] sm:$0xff] %vm1425_vm8, %v11211_v9 }
 0x6bb   : > { %11241 = vst.msk [vmem:[%s17634_s29 + $0xe8] sm:$0xff] %vm1425_vm8, %v11209_v33 }
 0x6bc PF: > { %s15_s18 = sadd.s32 1, %s14129_s18  }
 0x6bd   : > { %p12_p4 = scmp.ge.s32.totalorder %s15_s18, 4  }
 0x6bf   :  { %14 = sbr.rel (!%p12_p4) target bundleno = 1 (0x1), region = 89 }

</bundles_post_ra>
